<compile_context>
chip_gen: v6e
topology: v6e:2x2x1
jax: 0.10.0
libtpu: 0.0.40
codegen_flags: <defaults>
</compile_context>

<pallas_src>
import functools
import math

import jax
import jax.numpy as jnp
from jax.experimental import pallas as pl
from jax.experimental.pallas import tpu as pltpu


# ----------------------------------------------------------------------------
# Fused conv (as matmul) + BatchNorm + optional residual + optional ReLU
# ----------------------------------------------------------------------------
def _conv_bn_act_kernel(a_ref, b_ref, g_ref, bb_ref, *rest,
                        relu, has_residual, inv_m):
    if has_residual:
        r_ref, o_ref, acc_ref = rest
    else:
        r_ref = None
        o_ref, acc_ref = rest

    k = pl.program_id(1)

    @pl.when(k == 0)
    def _():
        acc_ref[...] = jnp.zeros_like(acc_ref)

    # bf16 x bf16 -> f32 accumulation on the MXU.
    acc_ref[...] += jnp.dot(a_ref[...], b_ref[...],
                            preferred_element_type=jnp.float32)

    @pl.when(k == pl.num_programs(1) - 1)
    def _():
        x = acc_ref[...]                                   # [M, tn] f32
        # Single-pass batch statistics over the M = N*H*W axis.
        s = jnp.sum(x, axis=0, keepdims=True)
        ss = jnp.sum(x * x, axis=0, keepdims=True)
        mean = s * inv_m
        var = ss * inv_m - mean * mean                     # biased variance
        scale = jax.lax.rsqrt(var + 1e-5) * g_ref[...]     # rsqrt on the EUP
        y = (x - mean) * scale + bb_ref[...]
        if has_residual:
            y = y + r_ref[...]
        if relu:
            y = jnp.maximum(y, 0.0)
        o_ref[...] = y.astype(o_ref.dtype)


def _round_up(x, m):
    return ((x + m - 1) // m) * m


def _choose_tk(kp, cap=512):
    """Largest multiple of 128 that divides kp and is <= cap."""
    best = 128
    t = 128
    while t <= min(kp, cap):
        if kp % t == 0:
            best = t
        t += 128
    return best


def _im2col(x_nhwc, kh, kw, stride, pad):
    N, H, W, C = x_nhwc.shape
    xp = jnp.pad(x_nhwc, ((0, 0), (pad, pad), (pad, pad), (0, 0)))
    Ho = (H + 2 * pad - kh) // stride + 1
    Wo = (W + 2 * pad - kw) // stride + 1
    cols = []
    for i in range(kh):
        for j in range(kw):
            cols.append(xp[:, i:i + stride * (Ho - 1) + 1:stride,
                           j:j + stride * (Wo - 1) + 1:stride, :])
    # [N, Ho, Wo, kh*kw, C] -> [N*Ho*Wo, kh*kw*C]  (taps major, channels minor)
    pat = jnp.stack(cols, axis=3).reshape(N * Ho * Wo, kh * kw * C)
    return pat, N, Ho, Wo


def conv_bn_act(x_nhwc, w_oihw, gamma, beta, *, stride, pad, relu,
                residual=None):
    """conv2d (no bias) + BatchNorm(train-mode batch stats) [+ residual] [+ ReLU]."""
    Cout, Cin, KH, KW = w_oihw.shape
    patches, N, Ho, Wo = _im2col(x_nhwc, KH, KW, stride, pad)
    M = N * Ho * Wo
    K = KH * KW * Cin
    Kp = _round_up(K, 128)                 # lane-aligned contraction dim
    tk = _choose_tk(Kp)
    tn = Cout if Cout < 128 else 128       # lane-dense N tiles where possible

    a = jnp.pad(patches, ((0, 0), (0, Kp - K))).astype(jnp.bfloat16)
    w2d = jnp.transpose(w_oihw, (2, 3, 1, 0)).reshape(K, Cout)
    b = jnp.pad(w2d, ((0, Kp - K), (0, 0))).astype(jnp.bfloat16)
    g = gamma.reshape(1, Cout).astype(jnp.float32)
    bb = beta.reshape(1, Cout).astype(jnp.float32)

    has_res = residual is not None
    in_specs = [
        pl.BlockSpec((M, tk), lambda j, k: (0, k)),      # A: patches
        pl.BlockSpec((tk, tn), lambda j, k: (k, j)),     # B: weights
        pl.BlockSpec((1, tn), lambda j, k: (0, j)),      # gamma
        pl.BlockSpec((1, tn), lambda j, k: (0, j)),      # beta
    ]
    args = [a, b, g, bb]
    if has_res:
        in_specs.append(pl.BlockSpec((M, tn), lambda j, k: (0, j)))
        args.append(residual.reshape(M, Cout).astype(jnp.float32))

    out = pl.pallas_call(
        functools.partial(_conv_bn_act_kernel, relu=relu,
                          has_residual=has_res, inv_m=1.0 / M),
        out_shape=jax.ShapeDtypeStruct((M, Cout), jnp.float32),
        grid_spec=pltpu.PrefetchScalarGridSpec(
            num_scalar_prefetch=0,
            grid=(Cout // tn, Kp // tk),
            in_specs=in_specs,
            out_specs=pl.BlockSpec((M, tn), lambda j, k: (0, j)),
            scratch_shapes=[pltpu.VMEM((M, tn), jnp.float32)],
        ),
        compiler_params=pltpu.CompilerParams(
            dimension_semantics=("parallel", "arbitrary"),
            vmem_limit_bytes=32 * 1024 * 1024,
        ),
    )(*args)
    return out.reshape(N, Ho, Wo, Cout)


# ----------------------------------------------------------------------------
# MaxPool 3x3 / stride 2 / pad 1 (tap views fed separately, max done in-kernel)
# ----------------------------------------------------------------------------
def _max_taps_kernel(*refs):
    o_ref = refs[-1]
    acc = refs[0][...]
    for r in refs[1:-1]:
        acc = jnp.maximum(acc, r[...])
    o_ref[...] = acc


def maxpool_pallas(x_nhwc, k=3, stride=2, pad=1):
    N, H, W, C = x_nhwc.shape
    Ho = (H + 2 * pad - k) // stride + 1
    Wo = (W + 2 * pad - k) // stride + 1
    M = N * Ho * Wo
    xp = jnp.pad(x_nhwc, ((0, 0), (pad, pad), (pad, pad), (0, 0)),
                 constant_values=-jnp.inf)
    taps = []
    for i in range(k):
        for j in range(k):
            taps.append(
                xp[:, i:i + stride * (Ho - 1) + 1:stride,
                   j:j + stride * (Wo - 1) + 1:stride, :].reshape(M, C))

    tm = M
    for cand in (1024, 512, 256, 128):
        if M >= cand and M % cand == 0:
            tm = cand
            break

    out = pl.pallas_call(
        _max_taps_kernel,
        out_shape=jax.ShapeDtypeStruct((M, C), jnp.float32),
        grid=(M // tm,),
        in_specs=[pl.BlockSpec((tm, C), lambda i: (i, 0))] * len(taps),
        out_specs=pl.BlockSpec((tm, C), lambda i: (i, 0)),
        compiler_params=pltpu.CompilerParams(
            dimension_semantics=("parallel",),
            vmem_limit_bytes=32 * 1024 * 1024,
        ),
    )(*taps)
    return out.reshape(N, Ho, Wo, C)


# ----------------------------------------------------------------------------
# Parameter construction (deterministic, matching init_layer semantics)
# ----------------------------------------------------------------------------
def _conv_init(key, cout, cin, kh, kw):
    std = math.sqrt(2.0 / float(kh * kw * cout))
    return std * jax.random.normal(key, (cout, cin, kh, kw), dtype=jnp.float32)


def make_params(key, list_of_num_layers, list_of_out_dims):
    keys = iter(jax.random.split(key, 64))
    params = {
        "conv1_w": _conv_init(next(keys), 64, 3, 7, 7),
        "bn1_g": jnp.ones((64,), jnp.float32),
        "bn1_b": jnp.zeros((64,), jnp.float32),
        "blocks": [],
    }
    indim = 64
    for i in range(4):
        for j in range(list_of_num_layers[i]):
            outdim = list_of_out_dims[i]
            half_res = (i >= 1) and (j == 0)
            blk = {
                "half_res": half_res,
                "identity": indim == outdim,
                "C1_w": _conv_init(next(keys), outdim, indim, 3, 3),
                "BN1_g": jnp.ones((outdim,), jnp.float32),
                "BN1_b": jnp.zeros((outdim,), jnp.float32),
                "C2_w": _conv_init(next(keys), outdim, outdim, 3, 3),
                "BN2_g": jnp.ones((outdim,), jnp.float32),
                "BN2_b": jnp.zeros((outdim,), jnp.float32),
            }
            if indim != outdim:
                blk["SC_w"] = _conv_init(next(keys), outdim, indim, 1, 1)
                blk["BNs_g"] = jnp.ones((outdim,), jnp.float32)
                blk["BNs_b"] = jnp.zeros((outdim,), jnp.float32)
            params["blocks"].append(blk)
            indim = outdim
    return params


# ----------------------------------------------------------------------------
# Forward pass (SimpleBlock ResNet trunk, flatten=False)
# ----------------------------------------------------------------------------
def simple_block_forward(x, blk):
    stride = 2 if blk["half_res"] else 1
    # C1 + BN1 + ReLU fused.
    h = conv_bn_act(x, blk["C1_w"], blk["BN1_g"], blk["BN1_b"],
                    stride=stride, pad=1, relu=True)
    # Shortcut path.
    if blk["identity"]:
        short = x
    else:
        short = conv_bn_act(x, blk["SC_w"], blk["BNs_g"], blk["BNs_b"],
                            stride=stride, pad=0, relu=False)
    # C2 + BN2 + residual add + ReLU fused.
    return conv_bn_act(h, blk["C2_w"], blk["BN2_g"], blk["BN2_b"],
                       stride=1, pad=1, relu=True, residual=short)


def resnet_closer_forward(x_nchw, params):
    # NCHW -> NHWC for the kernels (channels on the lane axis).
    x = jnp.transpose(x_nchw.astype(jnp.float32), (0, 2, 3, 1))
    # Stem: 7x7 s2 p3 conv + BN + ReLU fused, then 3x3 s2 p1 max pool.
    x = conv_bn_act(x, params["conv1_w"], params["bn1_g"], params["bn1_b"],
                    stride=2, pad=3, relu=True)
    x = maxpool_pallas(x, k=3, stride=2, pad=1)
    for blk in params["blocks"]:
        x = simple_block_forward(x, blk)
    # flatten=False branch: return the feature map (back to NCHW), wrapped in
    # a tuple exactly like the PyTorch module's forward.
    out = jnp.transpose(x, (0, 3, 1, 2))
    return (out,)


if __name__ == "__main__":
    key = jax.random.PRNGKey(0)
    k_param, k_x = jax.random.split(key)

    list_of_num_layers = [1, 1, 1, 1]           # ResNet-10 style trunk
    list_of_out_dims = [64, 128, 256, 512]
    params = make_params(k_param, list_of_num_layers, list_of_out_dims)

    # Small input consistent with the module: NCHW, 3 input channels.
    x = jax.random.normal(k_x, (2, 3, 32, 32), dtype=jnp.float32)

    fwd = jax.jit(lambda xx: resnet_closer_forward(xx, params))
    (out,) = fwd(x)
    out = jax.block_until_ready(out)

    assert out.shape == (2, 512, 1, 1), out.shape
    assert bool(jnp.all(jnp.isfinite(out)))
    print("KERNEL_OK")
</pallas_src>

<mosaic_0001>
module attributes {stable_mosaic.version = 11 : i64} {
  func.func @_conv_bn_act_kernel(%arg0: i32, %arg1: i32, %arg2: memref<512x256xbf16, #tpu.memory_space<vmem>>, %arg3: memref<256x64xbf16, #tpu.memory_space<vmem>>, %arg4: memref<1x64xf32, #tpu.memory_space<vmem>>, %arg5: memref<1x64xf32, #tpu.memory_space<vmem>>, %arg6: memref<512x64xf32, #tpu.memory_space<vmem>>, %arg7: memref<512x64xf32, #tpu.memory_space<vmem>>) attributes {dimension_semantics = [#tpu.dimension_semantics<parallel>, #tpu.dimension_semantics<arbitrary>], iteration_bounds = array<i64: 1, 1>, scalar_prefetch = 0 : i64, scratch_operands = 1 : i64, tpu.core_type = #tpu.core_type<tc>, window_params = [{transform_indices = @transform_0, window_bounds = array<i64: 512, 256>}, {transform_indices = @transform_1, window_bounds = array<i64: 256, 64>}, {transform_indices = @transform_2, window_bounds = array<i64: 1, 64>}, {transform_indices = @transform_3, window_bounds = array<i64: 1, 64>}, {transform_indices = @transform_4, window_bounds = array<i64: 512, 64>}]} {
    %c0_i32 = arith.constant 0 : i32
    %0 = arith.cmpi eq, %arg1, %c0_i32 : i32
    %1 = arith.extui %0 : i1 to i32
    %c0_i32_0 = arith.constant 0 : i32
    %2 = arith.cmpi ne, %1, %c0_i32_0 : i32
    scf.if %2 {
      %cst_10 = arith.constant 0.000000e+00 : f32
      %12 = vector.broadcast %cst_10 : f32 to vector<512x64xf32>
      %c0_11 = arith.constant 0 : index
      %c0_12 = arith.constant 0 : index
      %13 = vector.load %arg7[%c0_11, %c0_12] : memref<512x64xf32, #tpu.memory_space<vmem>>, vector<512x64xf32>
      tpu.vector_store %arg7[%c0_11, %c0_12], %12 {strides = array<i32>} : memref<512x64xf32, #tpu.memory_space<vmem>>, vector<512x64xf32>,
    } else {
    }
    %c0 = arith.constant 0 : index
    %c0_1 = arith.constant 0 : index
    %3 = vector.load %arg7[%c0, %c0_1] : memref<512x64xf32, #tpu.memory_space<vmem>>, vector<512x64xf32>
    %c0_2 = arith.constant 0 : index
    %c0_3 = arith.constant 0 : index
    %4 = vector.load %arg2[%c0_2, %c0_3] : memref<512x256xbf16, #tpu.memory_space<vmem>>, vector<512x256xbf16>
    %c0_4 = arith.constant 0 : index
    %c0_5 = arith.constant 0 : index
    %5 = vector.load %arg3[%c0_4, %c0_5] : memref<256x64xbf16, #tpu.memory_space<vmem>>, vector<256x64xbf16>
    %cst = arith.constant dense<0.000000e+00> : vector<512x64xf32>
    %6 = tpu.matmul %4, %5, %cst {dimension_numbers = #tpu.dot_dimension_numbers<[1], [0], [0], [1], [0, 0, 1, 1], [], []>} : vector<512x256xbf16>, vector<256x64xbf16>, vector<512x64xf32> -> vector<512x64xf32>
    %7 = arith.addf %3, %6 : vector<512x64xf32>
    %c0_6 = arith.constant 0 : index
    %c0_7 = arith.constant 0 : index
    %8 = vector.load %arg7[%c0_6, %c0_7] : memref<512x64xf32, #tpu.memory_space<vmem>>, vector<512x64xf32>
    tpu.vector_store %arg7[%c0_6, %c0_7], %7 {strides = array<i32>} : memref<512x64xf32, #tpu.memory_space<vmem>>, vector<512x64xf32>,
    %c0_i32_8 = arith.constant 0 : i32
    %9 = arith.cmpi eq, %arg1, %c0_i32_8 : i32
    %10 = arith.extui %9 : i1 to i32
    %c0_i32_9 = arith.constant 0 : i32
    %11 = arith.cmpi ne, %10, %c0_i32_9 : i32
    scf.if %11 {
      %c0_10 = arith.constant 0 : index
      %c0_11 = arith.constant 0 : index
      %12 = vector.load %arg7[%c0_10, %c0_11] : memref<512x64xf32, #tpu.memory_space<vmem>>, vector<512x64xf32>
      %cst_12 = arith.constant dense<0.000000e+00> : vector<64xf32>
      %13 = vector.multi_reduction <add>, %12, %cst_12 [0] : vector<512x64xf32> to vector<64xf32>
      %14 = vector.shape_cast %13 : vector<64xf32> to vector<1x64xf32>
      %15 = arith.mulf %12, %12 : vector<512x64xf32>
      %cst_13 = arith.constant dense<0.000000e+00> : vector<64xf32>
      %16 = vector.multi_reduction <add>, %15, %cst_13 [0] : vector<512x64xf32> to vector<64xf32>
      %17 = vector.shape_cast %16 : vector<64xf32> to vector<1x64xf32>
      %cst_14 = arith.constant 0.001953125 : f32
      %18 = vector.broadcast %cst_14 : f32 to vector<1x64xf32>
      %19 = arith.mulf %14, %18 : vector<1x64xf32>
      %cst_15 = arith.constant 0.001953125 : f32
      %20 = vector.broadcast %cst_15 : f32 to vector<1x64xf32>
      %21 = arith.mulf %17, %20 : vector<1x64xf32>
      %22 = arith.mulf %19, %19 : vector<1x64xf32>
      %23 = arith.subf %21, %22 : vector<1x64xf32>
      %cst_16 = arith.constant 9.99999974E-6 : f32
      %24 = vector.broadcast %cst_16 : f32 to vector<1x64xf32>
      %25 = arith.addf %23, %24 : vector<1x64xf32>
      %26 = math.rsqrt %25 : vector<1x64xf32>
      %c0_17 = arith.constant 0 : index
      %c0_18 = arith.constant 0 : index
      %27 = vector.load %arg4[%c0_17, %c0_18] : memref<1x64xf32, #tpu.memory_space<vmem>>, vector<1x64xf32>
      %28 = arith.mulf %26, %27 : vector<1x64xf32>
      %29 = vector.broadcast %19 : vector<1x64xf32> to vector<512x64xf32>
      %30 = arith.subf %12, %29 : vector<512x64xf32>
      %31 = vector.broadcast %28 : vector<1x64xf32> to vector<512x64xf32>
      %32 = arith.mulf %30, %31 : vector<512x64xf32>
      %c0_19 = arith.constant 0 : index
      %c0_20 = arith.constant 0 : index
      %33 = vector.load %arg5[%c0_19, %c0_20] : memref<1x64xf32, #tpu.memory_space<vmem>>, vector<1x64xf32>
      %34 = vector.broadcast %33 : vector<1x64xf32> to vector<512x64xf32>
      %35 = arith.addf %32, %34 : vector<512x64xf32>
      %cst_21 = arith.constant 0.000000e+00 : f32
      %36 = vector.broadcast %cst_21 : f32 to vector<512x64xf32>
      %37 = arith.maximumf %35, %36 : vector<512x64xf32>
      %c0_22 = arith.constant 0 : index
      %c0_23 = arith.constant 0 : index
      %38 = vector.load %arg6[%c0_22, %c0_23] : memref<512x64xf32, #tpu.memory_space<vmem>>, vector<512x64xf32>
      tpu.vector_store %arg6[%c0_22, %c0_23], %37 {strides = array<i32>} : memref<512x64xf32, #tpu.memory_space<vmem>>, vector<512x64xf32>,
    } else {
    }
    return
  }
  func.func @transform_0(%arg0: i32, %arg1: i32) -> (i32, i32) {
    %c0_i32 = arith.constant 0 : i32
    %c0_i32_0 = arith.constant 0 : i32
    return %c0_i32, %arg1 : i32, i32
  }
  func.func @transform_1(%arg0: i32, %arg1: i32) -> (i32, i32) {
    %c0_i32 = arith.constant 0 : i32
    return %arg1, %arg0 : i32, i32
  }
  func.func @transform_2(%arg0: i32, %arg1: i32) -> (i32, i32) {
    %c0_i32 = arith.constant 0 : i32
    %c0_i32_0 = arith.constant 0 : i32
    return %c0_i32, %arg0 : i32, i32
  }
  func.func @transform_3(%arg0: i32, %arg1: i32) -> (i32, i32) {
    %c0_i32 = arith.constant 0 : i32
    %c0_i32_0 = arith.constant 0 : i32
    return %c0_i32, %arg0 : i32, i32
  }
  func.func @transform_4(%arg0: i32, %arg1: i32) -> (i32, i32) {
    %c0_i32 = arith.constant 0 : i32
    %c0_i32_0 = arith.constant 0 : i32
    return %c0_i32, %arg0 : i32, i32
  }
}

module attributes {stable_mosaic.version = 11 : i64} {
  func.func @_max_taps_kernel(%arg0: i32, %arg1: memref<128x64xf32, #tpu.memory_space<vmem>>, %arg2: memref<128x64xf32, #tpu.memory_space<vmem>>, %arg3: memref<128x64xf32, #tpu.memory_space<vmem>>, %arg4: memref<128x64xf32, #tpu.memory_space<vmem>>, %arg5: memref<128x64xf32, #tpu.memory_space<vmem>>, %arg6: memref<128x64xf32, #tpu.memory_space<vmem>>, %arg7: memref<128x64xf32, #tpu.memory_space<vmem>>, %arg8: memref<128x64xf32, #tpu.memory_space<vmem>>, %arg9: memref<128x64xf32, #tpu.memory_space<vmem>>, %arg10: memref<128x64xf32, #tpu.memory_space<vmem>>) attributes {dimension_semantics = [#tpu.dimension_semantics<parallel>], iteration_bounds = array<i64: 1>, scalar_prefetch = 0 : i64, scratch_operands = 0 : i64, tpu.core_type = #tpu.core_type<tc>, window_params = [{transform_indices = @transform_0, window_bounds = array<i64: 128, 64>}, {transform_indices = @transform_1, window_bounds = array<i64: 128, 64>}, {transform_indices = @transform_2, window_bounds = array<i64: 128, 64>}, {transform_indices = @transform_3, window_bounds = array<i64: 128, 64>}, {transform_indices = @transform_4, window_bounds = array<i64: 128, 64>}, {transform_indices = @transform_5, window_bounds = array<i64: 128, 64>}, {transform_indices = @transform_6, window_bounds = array<i64: 128, 64>}, {transform_indices = @transform_7, window_bounds = array<i64: 128, 64>}, {transform_indices = @transform_8, window_bounds = array<i64: 128, 64>}, {transform_indices = @transform_9, window_bounds = array<i64: 128, 64>}]} {
    %c0 = arith.constant 0 : index
    %c0_0 = arith.constant 0 : index
    %0 = vector.load %arg1[%c0, %c0_0] : memref<128x64xf32, #tpu.memory_space<vmem>>, vector<128x64xf32>
    %c0_1 = arith.constant 0 : index
    %c0_2 = arith.constant 0 : index
    %1 = vector.load %arg2[%c0_1, %c0_2] : memref<128x64xf32, #tpu.memory_space<vmem>>, vector<128x64xf32>
    %2 = arith.maximumf %0, %1 : vector<128x64xf32>
    %c0_3 = arith.constant 0 : index
    %c0_4 = arith.constant 0 : index
    %3 = vector.load %arg3[%c0_3, %c0_4] : memref<128x64xf32, #tpu.memory_space<vmem>>, vector<128x64xf32>
    %4 = arith.maximumf %2, %3 : vector<128x64xf32>
    %c0_5 = arith.constant 0 : index
    %c0_6 = arith.constant 0 : index
    %5 = vector.load %arg4[%c0_5, %c0_6] : memref<128x64xf32, #tpu.memory_space<vmem>>, vector<128x64xf32>
    %6 = arith.maximumf %4, %5 : vector<128x64xf32>
    %c0_7 = arith.constant 0 : index
    %c0_8 = arith.constant 0 : index
    %7 = vector.load %arg5[%c0_7, %c0_8] : memref<128x64xf32, #tpu.memory_space<vmem>>, vector<128x64xf32>
    %8 = arith.maximumf %6, %7 : vector<128x64xf32>
    %c0_9 = arith.constant 0 : index
    %c0_10 = arith.constant 0 : index
    %9 = vector.load %arg6[%c0_9, %c0_10] : memref<128x64xf32, #tpu.memory_space<vmem>>, vector<128x64xf32>
    %10 = arith.maximumf %8, %9 : vector<128x64xf32>
    %c0_11 = arith.constant 0 : index
    %c0_12 = arith.constant 0 : index
    %11 = vector.load %arg7[%c0_11, %c0_12] : memref<128x64xf32, #tpu.memory_space<vmem>>, vector<128x64xf32>
    %12 = arith.maximumf %10, %11 : vector<128x64xf32>
    %c0_13 = arith.constant 0 : index
    %c0_14 = arith.constant 0 : index
    %13 = vector.load %arg8[%c0_13, %c0_14] : memref<128x64xf32, #tpu.memory_space<vmem>>, vector<128x64xf32>
    %14 = arith.maximumf %12, %13 : vector<128x64xf32>
    %c0_15 = arith.constant 0 : index
    %c0_16 = arith.constant 0 : index
    %15 = vector.load %arg9[%c0_15, %c0_16] : memref<128x64xf32, #tpu.memory_space<vmem>>, vector<128x64xf32>
    %16 = arith.maximumf %14, %15 : vector<128x64xf32>
    %c0_17 = arith.constant 0 : index
    %c0_18 = arith.constant 0 : index
    %17 = vector.load %arg10[%c0_17, %c0_18] : memref<128x64xf32, #tpu.memory_space<vmem>>, vector<128x64xf32>
    tpu.vector_store %arg10[%c0_17, %c0_18], %16 {strides = array<i32>} : memref<128x64xf32, #tpu.memory_space<vmem>>, vector<128x64xf32>,
    return
  }
  func.func @transform_0(%arg0: i32) -> (i32, i32) {
    %c0_i32 = arith.constant 0 : i32
    %c0_i32_0 = arith.constant 0 : i32
    return %arg0, %c0_i32 : i32, i32
  }
  func.func @transform_1(%arg0: i32) -> (i32, i32) {
    %c0_i32 = arith.constant 0 : i32
    %c0_i32_0 = arith.constant 0 : i32
    return %arg0, %c0_i32 : i32, i32
  }
  func.func @transform_2(%arg0: i32) -> (i32, i32) {
    %c0_i32 = arith.constant 0 : i32
    %c0_i32_0 = arith.constant 0 : i32
    return %arg0, %c0_i32 : i32, i32
  }
  func.func @transform_3(%arg0: i32) -> (i32, i32) {
    %c0_i32 = arith.constant 0 : i32
    %c0_i32_0 = arith.constant 0 : i32
    return %arg0, %c0_i32 : i32, i32
  }
  func.func @transform_4(%arg0: i32) -> (i32, i32) {
    %c0_i32 = arith.constant 0 : i32
    %c0_i32_0 = arith.constant 0 : i32
    return %arg0, %c0_i32 : i32, i32
  }
  func.func @transform_5(%arg0: i32) -> (i32, i32) {
    %c0_i32 = arith.constant 0 : i32
    %c0_i32_0 = arith.constant 0 : i32
    return %arg0, %c0_i32 : i32, i32
  }
  func.func @transform_6(%arg0: i32) -> (i32, i32) {
    %c0_i32 = arith.constant 0 : i32
    %c0_i32_0 = arith.constant 0 : i32
    return %arg0, %c0_i32 : i32, i32
  }
  func.func @transform_7(%arg0: i32) -> (i32, i32) {
    %c0_i32 = arith.constant 0 : i32
    %c0_i32_0 = arith.constant 0 : i32
    return %arg0, %c0_i32 : i32, i32
  }
  func.func @transform_8(%arg0: i32) -> (i32, i32) {
    %c0_i32 = arith.constant 0 : i32
    %c0_i32_0 = arith.constant 0 : i32
    return %arg0, %c0_i32 : i32, i32
  }
  func.func @transform_9(%arg0: i32) -> (i32, i32) {
    %c0_i32 = arith.constant 0 : i32
    %c0_i32_0 = arith.constant 0 : i32
    return %arg0, %c0_i32 : i32, i32
  }
}

module attributes {stable_mosaic.version = 11 : i64} {
  func.func @_conv_bn_act_kernel(%arg0: i32, %arg1: i32, %arg2: memref<128x128xbf16, #tpu.memory_space<vmem>>, %arg3: memref<128x64xbf16, #tpu.memory_space<vmem>>, %arg4: memref<1x64xf32, #tpu.memory_space<vmem>>, %arg5: memref<1x64xf32, #tpu.memory_space<vmem>>, %arg6: memref<128x64xf32, #tpu.memory_space<vmem>>, %arg7: memref<128x64xf32, #tpu.memory_space<vmem>>) attributes {dimension_semantics = [#tpu.dimension_semantics<parallel>, #tpu.dimension_semantics<arbitrary>], iteration_bounds = array<i64: 1, 5>, scalar_prefetch = 0 : i64, scratch_operands = 1 : i64, tpu.core_type = #tpu.core_type<tc>, window_params = [{transform_indices = @transform_0, window_bounds = array<i64: 128, 128>}, {transform_indices = @transform_1, window_bounds = array<i64: 128, 64>}, {transform_indices = @transform_2, window_bounds = array<i64: 1, 64>}, {transform_indices = @transform_3, window_bounds = array<i64: 1, 64>}, {transform_indices = @transform_4, window_bounds = array<i64: 128, 64>}]} {
    %c0_i32 = arith.constant 0 : i32
    %0 = arith.cmpi eq, %arg1, %c0_i32 : i32
    %1 = arith.extui %0 : i1 to i32
    %c0_i32_0 = arith.constant 0 : i32
    %2 = arith.cmpi ne, %1, %c0_i32_0 : i32
    scf.if %2 {
      %cst_9 = arith.constant 0.000000e+00 : f32
      %12 = vector.broadcast %cst_9 : f32 to vector<128x64xf32>
      %c0_10 = arith.constant 0 : index
      %c0_11 = arith.constant 0 : index
      %13 = vector.load %arg7[%c0_10, %c0_11] : memref<128x64xf32, #tpu.memory_space<vmem>>, vector<128x64xf32>
      tpu.vector_store %arg7[%c0_10, %c0_11], %12 {strides = array<i32>} : memref<128x64xf32, #tpu.memory_space<vmem>>, vector<128x64xf32>,
    } else {
    }
    %c0 = arith.constant 0 : index
    %c0_1 = arith.constant 0 : index
    %3 = vector.load %arg7[%c0, %c0_1] : memref<128x64xf32, #tpu.memory_space<vmem>>, vector<128x64xf32>
    %c0_2 = arith.constant 0 : index
    %c0_3 = arith.constant 0 : index
    %4 = vector.load %arg2[%c0_2, %c0_3] : memref<128x128xbf16, #tpu.memory_space<vmem>>, vector<128x128xbf16>
    %c0_4 = arith.constant 0 : index
    %c0_5 = arith.constant 0 : index
    %5 = vector.load %arg3[%c0_4, %c0_5] : memref<128x64xbf16, #tpu.memory_space<vmem>>, vector<128x64xbf16>
    %cst = arith.constant dense<0.000000e+00> : vector<128x64xf32>
    %6 = tpu.matmul %4, %5, %cst {dimension_numbers = #tpu.dot_dimension_numbers<[1], [0], [0], [1], [0, 0, 1, 1], [], []>} : vector<128x128xbf16>, vector<128x64xbf16>, vector<128x64xf32> -> vector<128x64xf32>
    %7 = arith.addf %3, %6 : vector<128x64xf32>
    %c0_6 = arith.constant 0 : index
    %c0_7 = arith.constant 0 : index
    %8 = vector.load %arg7[%c0_6, %c0_7] : memref<128x64xf32, #tpu.memory_space<vmem>>, vector<128x64xf32>
    tpu.vector_store %arg7[%c0_6, %c0_7], %7 {strides = array<i32>} : memref<128x64xf32, #tpu.memory_space<vmem>>, vector<128x64xf32>,
    %c4_i32 = arith.constant 4 : i32
    %9 = arith.cmpi eq, %arg1, %c4_i32 : i32
    %10 = arith.extui %9 : i1 to i32
    %c0_i32_8 = arith.constant 0 : i32
    %11 = arith.cmpi ne, %10, %c0_i32_8 : i32
    scf.if %11 {
      %c0_9 = arith.constant 0 : index
      %c0_10 = arith.constant 0 : index
      %12 = vector.load %arg7[%c0_9, %c0_10] : memref<128x64xf32, #tpu.memory_space<vmem>>, vector<128x64xf32>
      %cst_11 = arith.constant dense<0.000000e+00> : vector<64xf32>
      %13 = vector.multi_reduction <add>, %12, %cst_11 [0] : vector<128x64xf32> to vector<64xf32>
      %14 = vector.shape_cast %13 : vector<64xf32> to vector<1x64xf32>
      %15 = arith.mulf %12, %12 : vector<128x64xf32>
      %cst_12 = arith.constant dense<0.000000e+00> : vector<64xf32>
      %16 = vector.multi_reduction <add>, %15, %cst_12 [0] : vector<128x64xf32> to vector<64xf32>
      %17 = vector.shape_cast %16 : vector<64xf32> to vector<1x64xf32>
      %cst_13 = arith.constant 7.812500e-03 : f32
      %18 = vector.broadcast %cst_13 : f32 to vector<1x64xf32>
      %19 = arith.mulf %14, %18 : vector<1x64xf32>
      %cst_14 = arith.constant 7.812500e-03 : f32
      %20 = vector.broadcast %cst_14 : f32 to vector<1x64xf32>
      %21 = arith.mulf %17, %20 : vector<1x64xf32>
      %22 = arith.mulf %19, %19 : vector<1x64xf32>
      %23 = arith.subf %21, %22 : vector<1x64xf32>
      %cst_15 = arith.constant 9.99999974E-6 : f32
      %24 = vector.broadcast %cst_15 : f32 to vector<1x64xf32>
      %25 = arith.addf %23, %24 : vector<1x64xf32>
      %26 = math.rsqrt %25 : vector<1x64xf32>
      %c0_16 = arith.constant 0 : index
      %c0_17 = arith.constant 0 : index
      %27 = vector.load %arg4[%c0_16, %c0_17] : memref<1x64xf32, #tpu.memory_space<vmem>>, vector<1x64xf32>
      %28 = arith.mulf %26, %27 : vector<1x64xf32>
      %29 = vector.broadcast %19 : vector<1x64xf32> to vector<128x64xf32>
      %30 = arith.subf %12, %29 : vector<128x64xf32>
      %31 = vector.broadcast %28 : vector<1x64xf32> to vector<128x64xf32>
      %32 = arith.mulf %30, %31 : vector<128x64xf32>
      %c0_18 = arith.constant 0 : index
      %c0_19 = arith.constant 0 : index
      %33 = vector.load %arg5[%c0_18, %c0_19] : memref<1x64xf32, #tpu.memory_space<vmem>>, vector<1x64xf32>
      %34 = vector.broadcast %33 : vector<1x64xf32> to vector<128x64xf32>
      %35 = arith.addf %32, %34 : vector<128x64xf32>
      %cst_20 = arith.constant 0.000000e+00 : f32
      %36 = vector.broadcast %cst_20 : f32 to vector<128x64xf32>
      %37 = arith.maximumf %35, %36 : vector<128x64xf32>
      %c0_21 = arith.constant 0 : index
      %c0_22 = arith.constant 0 : index
      %38 = vector.load %arg6[%c0_21, %c0_22] : memref<128x64xf32, #tpu.memory_space<vmem>>, vector<128x64xf32>
      tpu.vector_store %arg6[%c0_21, %c0_22], %37 {strides = array<i32>} : memref<128x64xf32, #tpu.memory_space<vmem>>, vector<128x64xf32>,
    } else {
    }
    return
  }
  func.func @transform_0(%arg0: i32, %arg1: i32) -> (i32, i32) {
    %c0_i32 = arith.constant 0 : i32
    %c0_i32_0 = arith.constant 0 : i32
    return %c0_i32, %arg1 : i32, i32
  }
  func.func @transform_1(%arg0: i32, %arg1: i32) -> (i32, i32) {
    %c0_i32 = arith.constant 0 : i32
    return %arg1, %arg0 : i32, i32
  }
  func.func @transform_2(%arg0: i32, %arg1: i32) -> (i32, i32) {
    %c0_i32 = arith.constant 0 : i32
    %c0_i32_0 = arith.constant 0 : i32
    return %c0_i32, %arg0 : i32, i32
  }
  func.func @transform_3(%arg0: i32, %arg1: i32) -> (i32, i32) {
    %c0_i32 = arith.constant 0 : i32
    %c0_i32_0 = arith.constant 0 : i32
    return %c0_i32, %arg0 : i32, i32
  }
  func.func @transform_4(%arg0: i32, %arg1: i32) -> (i32, i32) {
    %c0_i32 = arith.constant 0 : i32
    %c0_i32_0 = arith.constant 0 : i32
    return %c0_i32, %arg0 : i32, i32
  }
}

module attributes {stable_mosaic.version = 11 : i64} {
  func.func @_conv_bn_act_kernel(%arg0: i32, %arg1: i32, %arg2: memref<128x128xbf16, #tpu.memory_space<vmem>>, %arg3: memref<128x64xbf16, #tpu.memory_space<vmem>>, %arg4: memref<1x64xf32, #tpu.memory_space<vmem>>, %arg5: memref<1x64xf32, #tpu.memory_space<vmem>>, %arg6: memref<128x64xf32, #tpu.memory_space<vmem>>, %arg7: memref<128x64xf32, #tpu.memory_space<vmem>>, %arg8: memref<128x64xf32, #tpu.memory_space<vmem>>) attributes {dimension_semantics = [#tpu.dimension_semantics<parallel>, #tpu.dimension_semantics<arbitrary>], iteration_bounds = array<i64: 1, 5>, scalar_prefetch = 0 : i64, scratch_operands = 1 : i64, tpu.core_type = #tpu.core_type<tc>, window_params = [{transform_indices = @transform_0, window_bounds = array<i64: 128, 128>}, {transform_indices = @transform_1, window_bounds = array<i64: 128, 64>}, {transform_indices = @transform_2, window_bounds = array<i64: 1, 64>}, {transform_indices = @transform_3, window_bounds = array<i64: 1, 64>}, {transform_indices = @transform_4, window_bounds = array<i64: 128, 64>}, {transform_indices = @transform_5, window_bounds = array<i64: 128, 64>}]} {
    %c0_i32 = arith.constant 0 : i32
    %0 = arith.cmpi eq, %arg1, %c0_i32 : i32
    %1 = arith.extui %0 : i1 to i32
    %c0_i32_0 = arith.constant 0 : i32
    %2 = arith.cmpi ne, %1, %c0_i32_0 : i32
    scf.if %2 {
      %cst_9 = arith.constant 0.000000e+00 : f32
      %12 = vector.broadcast %cst_9 : f32 to vector<128x64xf32>
      %c0_10 = arith.constant 0 : index
      %c0_11 = arith.constant 0 : index
      %13 = vector.load %arg8[%c0_10, %c0_11] : memref<128x64xf32, #tpu.memory_space<vmem>>, vector<128x64xf32>
      tpu.vector_store %arg8[%c0_10, %c0_11], %12 {strides = array<i32>} : memref<128x64xf32, #tpu.memory_space<vmem>>, vector<128x64xf32>,
    } else {
    }
    %c0 = arith.constant 0 : index
    %c0_1 = arith.constant 0 : index
    %3 = vector.load %arg8[%c0, %c0_1] : memref<128x64xf32, #tpu.memory_space<vmem>>, vector<128x64xf32>
    %c0_2 = arith.constant 0 : index
    %c0_3 = arith.constant 0 : index
    %4 = vector.load %arg2[%c0_2, %c0_3] : memref<128x128xbf16, #tpu.memory_space<vmem>>, vector<128x128xbf16>
    %c0_4 = arith.constant 0 : index
    %c0_5 = arith.constant 0 : index
    %5 = vector.load %arg3[%c0_4, %c0_5] : memref<128x64xbf16, #tpu.memory_space<vmem>>, vector<128x64xbf16>
    %cst = arith.constant dense<0.000000e+00> : vector<128x64xf32>
    %6 = tpu.matmul %4, %5, %cst {dimension_numbers = #tpu.dot_dimension_numbers<[1], [0], [0], [1], [0, 0, 1, 1], [], []>} : vector<128x128xbf16>, vector<128x64xbf16>, vector<128x64xf32> -> vector<128x64xf32>
    %7 = arith.addf %3, %6 : vector<128x64xf32>
    %c0_6 = arith.constant 0 : index
    %c0_7 = arith.constant 0 : index
    %8 = vector.load %arg8[%c0_6, %c0_7] : memref<128x64xf32, #tpu.memory_space<vmem>>, vector<128x64xf32>
    tpu.vector_store %arg8[%c0_6, %c0_7], %7 {strides = array<i32>} : memref<128x64xf32, #tpu.memory_space<vmem>>, vector<128x64xf32>,
    %c4_i32 = arith.constant 4 : i32
    %9 = arith.cmpi eq, %arg1, %c4_i32 : i32
    %10 = arith.extui %9 : i1 to i32
    %c0_i32_8 = arith.constant 0 : i32
    %11 = arith.cmpi ne, %10, %c0_i32_8 : i32
    scf.if %11 {
      %c0_9 = arith.constant 0 : index
      %c0_10 = arith.constant 0 : index
      %12 = vector.load %arg8[%c0_9, %c0_10] : memref<128x64xf32, #tpu.memory_space<vmem>>, vector<128x64xf32>
      %cst_11 = arith.constant dense<0.000000e+00> : vector<64xf32>
      %13 = vector.multi_reduction <add>, %12, %cst_11 [0] : vector<128x64xf32> to vector<64xf32>
      %14 = vector.shape_cast %13 : vector<64xf32> to vector<1x64xf32>
      %15 = arith.mulf %12, %12 : vector<128x64xf32>
      %cst_12 = arith.constant dense<0.000000e+00> : vector<64xf32>
      %16 = vector.multi_reduction <add>, %15, %cst_12 [0] : vector<128x64xf32> to vector<64xf32>
      %17 = vector.shape_cast %16 : vector<64xf32> to vector<1x64xf32>
      %cst_13 = arith.constant 7.812500e-03 : f32
      %18 = vector.broadcast %cst_13 : f32 to vector<1x64xf32>
      %19 = arith.mulf %14, %18 : vector<1x64xf32>
      %cst_14 = arith.constant 7.812500e-03 : f32
      %20 = vector.broadcast %cst_14 : f32 to vector<1x64xf32>
      %21 = arith.mulf %17, %20 : vector<1x64xf32>
      %22 = arith.mulf %19, %19 : vector<1x64xf32>
      %23 = arith.subf %21, %22 : vector<1x64xf32>
      %cst_15 = arith.constant 9.99999974E-6 : f32
      %24 = vector.broadcast %cst_15 : f32 to vector<1x64xf32>
      %25 = arith.addf %23, %24 : vector<1x64xf32>
      %26 = math.rsqrt %25 : vector<1x64xf32>
      %c0_16 = arith.constant 0 : index
      %c0_17 = arith.constant 0 : index
      %27 = vector.load %arg4[%c0_16, %c0_17] : memref<1x64xf32, #tpu.memory_space<vmem>>, vector<1x64xf32>
      %28 = arith.mulf %26, %27 : vector<1x64xf32>
      %29 = vector.broadcast %19 : vector<1x64xf32> to vector<128x64xf32>
      %30 = arith.subf %12, %29 : vector<128x64xf32>
      %31 = vector.broadcast %28 : vector<1x64xf32> to vector<128x64xf32>
      %32 = arith.mulf %30, %31 : vector<128x64xf32>
      %c0_18 = arith.constant 0 : index
      %c0_19 = arith.constant 0 : index
      %33 = vector.load %arg5[%c0_18, %c0_19] : memref<1x64xf32, #tpu.memory_space<vmem>>, vector<1x64xf32>
      %34 = vector.broadcast %33 : vector<1x64xf32> to vector<128x64xf32>
      %35 = arith.addf %32, %34 : vector<128x64xf32>
      %c0_20 = arith.constant 0 : index
      %c0_21 = arith.constant 0 : index
      %36 = vector.load %arg6[%c0_20, %c0_21] : memref<128x64xf32, #tpu.memory_space<vmem>>, vector<128x64xf32>
      %37 = arith.addf %35, %36 : vector<128x64xf32>
      %cst_22 = arith.constant 0.000000e+00 : f32
      %38 = vector.broadcast %cst_22 : f32 to vector<128x64xf32>
      %39 = arith.maximumf %37, %38 : vector<128x64xf32>
      %c0_23 = arith.constant 0 : index
      %c0_24 = arith.constant 0 : index
      %40 = vector.load %arg7[%c0_23, %c0_24] : memref<128x64xf32, #tpu.memory_space<vmem>>, vector<128x64xf32>
      tpu.vector_store %arg7[%c0_23, %c0_24], %39 {strides = array<i32>} : memref<128x64xf32, #tpu.memory_space<vmem>>, vector<128x64xf32>,
    } else {
    }
    return
  }
  func.func @transform_0(%arg0: i32, %arg1: i32) -> (i32, i32) {
    %c0_i32 = arith.constant 0 : i32
    %c0_i32_0 = arith.constant 0 : i32
    return %c0_i32, %arg1 : i32, i32
  }
  func.func @transform_1(%arg0: i32, %arg1: i32) -> (i32, i32) {
    %c0_i32 = arith.constant 0 : i32
    return %arg1, %arg0 : i32, i32
  }
  func.func @transform_2(%arg0: i32, %arg1: i32) -> (i32, i32) {
    %c0_i32 = arith.constant 0 : i32
    %c0_i32_0 = arith.constant 0 : i32
    return %c0_i32, %arg0 : i32, i32
  }
  func.func @transform_3(%arg0: i32, %arg1: i32) -> (i32, i32) {
    %c0_i32 = arith.constant 0 : i32
    %c0_i32_0 = arith.constant 0 : i32
    return %c0_i32, %arg0 : i32, i32
  }
  func.func @transform_4(%arg0: i32, %arg1: i32) -> (i32, i32) {
    %c0_i32 = arith.constant 0 : i32
    %c0_i32_0 = arith.constant 0 : i32
    return %c0_i32, %arg0 : i32, i32
  }
  func.func @transform_5(%arg0: i32, %arg1: i32) -> (i32, i32) {
    %c0_i32 = arith.constant 0 : i32
    %c0_i32_0 = arith.constant 0 : i32
    return %c0_i32, %arg0 : i32, i32
  }
}

module attributes {stable_mosaic.version = 11 : i64} {
  func.func @_conv_bn_act_kernel(%arg0: i32, %arg1: i32, %arg2: memref<32x128xbf16, #tpu.memory_space<vmem>>, %arg3: memref<128x128xbf16, #tpu.memory_space<vmem>>, %arg4: memref<1x128xf32, #tpu.memory_space<vmem>>, %arg5: memref<1x128xf32, #tpu.memory_space<vmem>>, %arg6: memref<32x128xf32, #tpu.memory_space<vmem>>, %arg7: memref<32x128xf32, #tpu.memory_space<vmem>>) attributes {dimension_semantics = [#tpu.dimension_semantics<parallel>, #tpu.dimension_semantics<arbitrary>], iteration_bounds = array<i64: 1, 5>, scalar_prefetch = 0 : i64, scratch_operands = 1 : i64, tpu.core_type = #tpu.core_type<tc>, window_params = [{transform_indices = @transform_0, window_bounds = array<i64: 32, 128>}, {transform_indices = @transform_1, window_bounds = array<i64: 128, 128>}, {transform_indices = @transform_2, window_bounds = array<i64: 1, 128>}, {transform_indices = @transform_3, window_bounds = array<i64: 1, 128>}, {transform_indices = @transform_4, window_bounds = array<i64: 32, 128>}]} {
    %c0_i32 = arith.constant 0 : i32
    %0 = arith.cmpi eq, %arg1, %c0_i32 : i32
    %1 = arith.extui %0 : i1 to i32
    %c0_i32_0 = arith.constant 0 : i32
    %2 = arith.cmpi ne, %1, %c0_i32_0 : i32
    scf.if %2 {
      %cst_9 = arith.constant 0.000000e+00 : f32
      %12 = vector.broadcast %cst_9 : f32 to vector<32x128xf32>
      %c0_10 = arith.constant 0 : index
      %c0_11 = arith.constant 0 : index
      %13 = vector.load %arg7[%c0_10, %c0_11] : memref<32x128xf32, #tpu.memory_space<vmem>>, vector<32x128xf32>
      tpu.vector_store %arg7[%c0_10, %c0_11], %12 {strides = array<i32>} : memref<32x128xf32, #tpu.memory_space<vmem>>, vector<32x128xf32>,
    } else {
    }
    %c0 = arith.constant 0 : index
    %c0_1 = arith.constant 0 : index
    %3 = vector.load %arg7[%c0, %c0_1] : memref<32x128xf32, #tpu.memory_space<vmem>>, vector<32x128xf32>
    %c0_2 = arith.constant 0 : index
    %c0_3 = arith.constant 0 : index
    %4 = vector.load %arg2[%c0_2, %c0_3] : memref<32x128xbf16, #tpu.memory_space<vmem>>, vector<32x128xbf16>
    %c0_4 = arith.constant 0 : index
    %c0_5 = arith.constant 0 : index
    %5 = vector.load %arg3[%c0_4, %c0_5] : memref<128x128xbf16, #tpu.memory_space<vmem>>, vector<128x128xbf16>
    %cst = arith.constant dense<0.000000e+00> : vector<32x128xf32>
    %6 = tpu.matmul %4, %5, %cst {dimension_numbers = #tpu.dot_dimension_numbers<[1], [0], [0], [1], [0, 0, 1, 1], [], []>} : vector<32x128xbf16>, vector<128x128xbf16>, vector<32x128xf32> -> vector<32x128xf32>
    %7 = arith.addf %3, %6 : vector<32x128xf32>
    %c0_6 = arith.constant 0 : index
    %c0_7 = arith.constant 0 : index
    %8 = vector.load %arg7[%c0_6, %c0_7] : memref<32x128xf32, #tpu.memory_space<vmem>>, vector<32x128xf32>
    tpu.vector_store %arg7[%c0_6, %c0_7], %7 {strides = array<i32>} : memref<32x128xf32, #tpu.memory_space<vmem>>, vector<32x128xf32>,
    %c4_i32 = arith.constant 4 : i32
    %9 = arith.cmpi eq, %arg1, %c4_i32 : i32
    %10 = arith.extui %9 : i1 to i32
    %c0_i32_8 = arith.constant 0 : i32
    %11 = arith.cmpi ne, %10, %c0_i32_8 : i32
    scf.if %11 {
      %c0_9 = arith.constant 0 : index
      %c0_10 = arith.constant 0 : index
      %12 = vector.load %arg7[%c0_9, %c0_10] : memref<32x128xf32, #tpu.memory_space<vmem>>, vector<32x128xf32>
      %cst_11 = arith.constant dense<0.000000e+00> : vector<128xf32>
      %13 = vector.multi_reduction <add>, %12, %cst_11 [0] : vector<32x128xf32> to vector<128xf32>
      %14 = vector.shape_cast %13 : vector<128xf32> to vector<1x128xf32>
      %15 = arith.mulf %12, %12 : vector<32x128xf32>
      %cst_12 = arith.constant dense<0.000000e+00> : vector<128xf32>
      %16 = vector.multi_reduction <add>, %15, %cst_12 [0] : vector<32x128xf32> to vector<128xf32>
      %17 = vector.shape_cast %16 : vector<128xf32> to vector<1x128xf32>
      %cst_13 = arith.constant 3.125000e-02 : f32
      %18 = vector.broadcast %cst_13 : f32 to vector<1x128xf32>
      %19 = arith.mulf %14, %18 : vector<1x128xf32>
      %cst_14 = arith.constant 3.125000e-02 : f32
      %20 = vector.broadcast %cst_14 : f32 to vector<1x128xf32>
      %21 = arith.mulf %17, %20 : vector<1x128xf32>
      %22 = arith.mulf %19, %19 : vector<1x128xf32>
      %23 = arith.subf %21, %22 : vector<1x128xf32>
      %cst_15 = arith.constant 9.99999974E-6 : f32
      %24 = vector.broadcast %cst_15 : f32 to vector<1x128xf32>
      %25 = arith.addf %23, %24 : vector<1x128xf32>
      %26 = math.rsqrt %25 : vector<1x128xf32>
      %c0_16 = arith.constant 0 : index
      %c0_17 = arith.constant 0 : index
      %27 = vector.load %arg4[%c0_16, %c0_17] : memref<1x128xf32, #tpu.memory_space<vmem>>, vector<1x128xf32>
      %28 = arith.mulf %26, %27 : vector<1x128xf32>
      %29 = vector.broadcast %19 : vector<1x128xf32> to vector<32x128xf32>
      %30 = arith.subf %12, %29 : vector<32x128xf32>
      %31 = vector.broadcast %28 : vector<1x128xf32> to vector<32x128xf32>
      %32 = arith.mulf %30, %31 : vector<32x128xf32>
      %c0_18 = arith.constant 0 : index
      %c0_19 = arith.constant 0 : index
      %33 = vector.load %arg5[%c0_18, %c0_19] : memref<1x128xf32, #tpu.memory_space<vmem>>, vector<1x128xf32>
      %34 = vector.broadcast %33 : vector<1x128xf32> to vector<32x128xf32>
      %35 = arith.addf %32, %34 : vector<32x128xf32>
      %cst_20 = arith.constant 0.000000e+00 : f32
      %36 = vector.broadcast %cst_20 : f32 to vector<32x128xf32>
      %37 = arith.maximumf %35, %36 : vector<32x128xf32>
      %c0_21 = arith.constant 0 : index
      %c0_22 = arith.constant 0 : index
      %38 = vector.load %arg6[%c0_21, %c0_22] : memref<32x128xf32, #tpu.memory_space<vmem>>, vector<32x128xf32>
      tpu.vector_store %arg6[%c0_21, %c0_22], %37 {strides = array<i32>} : memref<32x128xf32, #tpu.memory_space<vmem>>, vector<32x128xf32>,
    } else {
    }
    return
  }
  func.func @transform_0(%arg0: i32, %arg1: i32) -> (i32, i32) {
    %c0_i32 = arith.constant 0 : i32
    %c0_i32_0 = arith.constant 0 : i32
    return %c0_i32, %arg1 : i32, i32
  }
  func.func @transform_1(%arg0: i32, %arg1: i32) -> (i32, i32) {
    %c0_i32 = arith.constant 0 : i32
    return %arg1, %arg0 : i32, i32
  }
  func.func @transform_2(%arg0: i32, %arg1: i32) -> (i32, i32) {
    %c0_i32 = arith.constant 0 : i32
    %c0_i32_0 = arith.constant 0 : i32
    return %c0_i32, %arg0 : i32, i32
  }
  func.func @transform_3(%arg0: i32, %arg1: i32) -> (i32, i32) {
    %c0_i32 = arith.constant 0 : i32
    %c0_i32_0 = arith.constant 0 : i32
    return %c0_i32, %arg0 : i32, i32
  }
  func.func @transform_4(%arg0: i32, %arg1: i32) -> (i32, i32) {
    %c0_i32 = arith.constant 0 : i32
    %c0_i32_0 = arith.constant 0 : i32
    return %c0_i32, %arg0 : i32, i32
  }
}

module attributes {stable_mosaic.version = 11 : i64} {
  func.func @_conv_bn_act_kernel(%arg0: i32, %arg1: i32, %arg2: memref<32x384xbf16, #tpu.memory_space<vmem>>, %arg3: memref<384x128xbf16, #tpu.memory_space<vmem>>, %arg4: memref<1x128xf32, #tpu.memory_space<vmem>>, %arg5: memref<1x128xf32, #tpu.memory_space<vmem>>, %arg6: memref<32x128xf32, #tpu.memory_space<vmem>>, %arg7: memref<32x128xf32, #tpu.memory_space<vmem>>, %arg8: memref<32x128xf32, #tpu.memory_space<vmem>>) attributes {dimension_semantics = [#tpu.dimension_semantics<parallel>, #tpu.dimension_semantics<arbitrary>], iteration_bounds = array<i64: 1, 3>, scalar_prefetch = 0 : i64, scratch_operands = 1 : i64, tpu.core_type = #tpu.core_type<tc>, window_params = [{transform_indices = @transform_0, window_bounds = array<i64: 32, 384>}, {transform_indices = @transform_1, window_bounds = array<i64: 384, 128>}, {transform_indices = @transform_2, window_bounds = array<i64: 1, 128>}, {transform_indices = @transform_3, window_bounds = array<i64: 1, 128>}, {transform_indices = @transform_4, window_bounds = array<i64: 32, 128>}, {transform_indices = @transform_5, window_bounds = array<i64: 32, 128>}]} {
    %c0_i32 = arith.constant 0 : i32
    %0 = arith.cmpi eq, %arg1, %c0_i32 : i32
    %1 = arith.extui %0 : i1 to i32
    %c0_i32_0 = arith.constant 0 : i32
    %2 = arith.cmpi ne, %1, %c0_i32_0 : i32
    scf.if %2 {
      %cst_9 = arith.constant 0.000000e+00 : f32
      %12 = vector.broadcast %cst_9 : f32 to vector<32x128xf32>
      %c0_10 = arith.constant 0 : index
      %c0_11 = arith.constant 0 : index
      %13 = vector.load %arg8[%c0_10, %c0_11] : memref<32x128xf32, #tpu.memory_space<vmem>>, vector<32x128xf32>
      tpu.vector_store %arg8[%c0_10, %c0_11], %12 {strides = array<i32>} : memref<32x128xf32, #tpu.memory_space<vmem>>, vector<32x128xf32>,
    } else {
    }
    %c0 = arith.constant 0 : index
    %c0_1 = arith.constant 0 : index
    %3 = vector.load %arg8[%c0, %c0_1] : memref<32x128xf32, #tpu.memory_space<vmem>>, vector<32x128xf32>
    %c0_2 = arith.constant 0 : index
    %c0_3 = arith.constant 0 : index
    %4 = vector.load %arg2[%c0_2, %c0_3] : memref<32x384xbf16, #tpu.memory_space<vmem>>, vector<32x384xbf16>
    %c0_4 = arith.constant 0 : index
    %c0_5 = arith.constant 0 : index
    %5 = vector.load %arg3[%c0_4, %c0_5] : memref<384x128xbf16, #tpu.memory_space<vmem>>, vector<384x128xbf16>
    %cst = arith.constant dense<0.000000e+00> : vector<32x128xf32>
    %6 = tpu.matmul %4, %5, %cst {dimension_numbers = #tpu.dot_dimension_numbers<[1], [0], [0], [1], [0, 0, 1, 1], [], []>} : vector<32x384xbf16>, vector<384x128xbf16>, vector<32x128xf32> -> vector<32x128xf32>
    %7 = arith.addf %3, %6 : vector<32x128xf32>
    %c0_6 = arith.constant 0 : index
    %c0_7 = arith.constant 0 : index
    %8 = vector.load %arg8[%c0_6, %c0_7] : memref<32x128xf32, #tpu.memory_space<vmem>>, vector<32x128xf32>
    tpu.vector_store %arg8[%c0_6, %c0_7], %7 {strides = array<i32>} : memref<32x128xf32, #tpu.memory_space<vmem>>, vector<32x128xf32>,
    %c2_i32 = arith.constant 2 : i32
    %9 = arith.cmpi eq, %arg1, %c2_i32 : i32
    %10 = arith.extui %9 : i1 to i32
    %c0_i32_8 = arith.constant 0 : i32
    %11 = arith.cmpi ne, %10, %c0_i32_8 : i32
    scf.if %11 {
      %c0_9 = arith.constant 0 : index
      %c0_10 = arith.constant 0 : index
      %12 = vector.load %arg8[%c0_9, %c0_10] : memref<32x128xf32, #tpu.memory_space<vmem>>, vector<32x128xf32>
      %cst_11 = arith.constant dense<0.000000e+00> : vector<128xf32>
      %13 = vector.multi_reduction <add>, %12, %cst_11 [0] : vector<32x128xf32> to vector<128xf32>
      %14 = vector.shape_cast %13 : vector<128xf32> to vector<1x128xf32>
      %15 = arith.mulf %12, %12 : vector<32x128xf32>
      %cst_12 = arith.constant dense<0.000000e+00> : vector<128xf32>
      %16 = vector.multi_reduction <add>, %15, %cst_12 [0] : vector<32x128xf32> to vector<128xf32>
      %17 = vector.shape_cast %16 : vector<128xf32> to vector<1x128xf32>
      %cst_13 = arith.constant 3.125000e-02 : f32
      %18 = vector.broadcast %cst_13 : f32 to vector<1x128xf32>
      %19 = arith.mulf %14, %18 : vector<1x128xf32>
      %cst_14 = arith.constant 3.125000e-02 : f32
      %20 = vector.broadcast %cst_14 : f32 to vector<1x128xf32>
      %21 = arith.mulf %17, %20 : vector<1x128xf32>
      %22 = arith.mulf %19, %19 : vector<1x128xf32>
      %23 = arith.subf %21, %22 : vector<1x128xf32>
      %cst_15 = arith.constant 9.99999974E-6 : f32
      %24 = vector.broadcast %cst_15 : f32 to vector<1x128xf32>
      %25 = arith.addf %23, %24 : vector<1x128xf32>
      %26 = math.rsqrt %25 : vector<1x128xf32>
      %c0_16 = arith.constant 0 : index
      %c0_17 = arith.constant 0 : index
      %27 = vector.load %arg4[%c0_16, %c0_17] : memref<1x128xf32, #tpu.memory_space<vmem>>, vector<1x128xf32>
      %28 = arith.mulf %26, %27 : vector<1x128xf32>
      %29 = vector.broadcast %19 : vector<1x128xf32> to vector<32x128xf32>
      %30 = arith.subf %12, %29 : vector<32x128xf32>
      %31 = vector.broadcast %28 : vector<1x128xf32> to vector<32x128xf32>
      %32 = arith.mulf %30, %31 : vector<32x128xf32>
      %c0_18 = arith.constant 0 : index
      %c0_19 = arith.constant 0 : index
      %33 = vector.load %arg5[%c0_18, %c0_19] : memref<1x128xf32, #tpu.memory_space<vmem>>, vector<1x128xf32>
      %34 = vector.broadcast %33 : vector<1x128xf32> to vector<32x128xf32>
      %35 = arith.addf %32, %34 : vector<32x128xf32>
      %c0_20 = arith.constant 0 : index
      %c0_21 = arith.constant 0 : index
      %36 = vector.load %arg6[%c0_20, %c0_21] : memref<32x128xf32, #tpu.memory_space<vmem>>, vector<32x128xf32>
      %37 = arith.addf %35, %36 : vector<32x128xf32>
      %cst_22 = arith.constant 0.000000e+00 : f32
      %38 = vector.broadcast %cst_22 : f32 to vector<32x128xf32>
      %39 = arith.maximumf %37, %38 : vector<32x128xf32>
      %c0_23 = arith.constant 0 : index
      %c0_24 = arith.constant 0 : index
      %40 = vector.load %arg7[%c0_23, %c0_24] : memref<32x128xf32, #tpu.memory_space<vmem>>, vector<32x128xf32>
      tpu.vector_store %arg7[%c0_23, %c0_24], %39 {strides = array<i32>} : memref<32x128xf32, #tpu.memory_space<vmem>>, vector<32x128xf32>,
    } else {
    }
    return
  }
  func.func @transform_0(%arg0: i32, %arg1: i32) -> (i32, i32) {
    %c0_i32 = arith.constant 0 : i32
    %c0_i32_0 = arith.constant 0 : i32
    return %c0_i32, %arg1 : i32, i32
  }
  func.func @transform_1(%arg0: i32, %arg1: i32) -> (i32, i32) {
    %c0_i32 = arith.constant 0 : i32
    return %arg1, %arg0 : i32, i32
  }
  func.func @transform_2(%arg0: i32, %arg1: i32) -> (i32, i32) {
    %c0_i32 = arith.constant 0 : i32
    %c0_i32_0 = arith.constant 0 : i32
    return %c0_i32, %arg0 : i32, i32
  }
  func.func @transform_3(%arg0: i32, %arg1: i32) -> (i32, i32) {
    %c0_i32 = arith.constant 0 : i32
    %c0_i32_0 = arith.constant 0 : i32
    return %c0_i32, %arg0 : i32, i32
  }
  func.func @transform_4(%arg0: i32, %arg1: i32) -> (i32, i32) {
    %c0_i32 = arith.constant 0 : i32
    %c0_i32_0 = arith.constant 0 : i32
    return %c0_i32, %arg0 : i32, i32
  }
  func.func @transform_5(%arg0: i32, %arg1: i32) -> (i32, i32) {
    %c0_i32 = arith.constant 0 : i32
    %c0_i32_0 = arith.constant 0 : i32
    return %c0_i32, %arg0 : i32, i32
  }
}

module attributes {stable_mosaic.version = 11 : i64} {
  func.func @_conv_bn_act_kernel(%arg0: i32, %arg1: i32, %arg2: memref<32x128xbf16, #tpu.memory_space<vmem>>, %arg3: memref<128x128xbf16, #tpu.memory_space<vmem>>, %arg4: memref<1x128xf32, #tpu.memory_space<vmem>>, %arg5: memref<1x128xf32, #tpu.memory_space<vmem>>, %arg6: memref<32x128xf32, #tpu.memory_space<vmem>>, %arg7: memref<32x128xf32, #tpu.memory_space<vmem>>) attributes {dimension_semantics = [#tpu.dimension_semantics<parallel>, #tpu.dimension_semantics<arbitrary>], iteration_bounds = array<i64: 1, 1>, scalar_prefetch = 0 : i64, scratch_operands = 1 : i64, tpu.core_type = #tpu.core_type<tc>, window_params = [{transform_indices = @transform_0, window_bounds = array<i64: 32, 128>}, {transform_indices = @transform_1, window_bounds = array<i64: 128, 128>}, {transform_indices = @transform_2, window_bounds = array<i64: 1, 128>}, {transform_indices = @transform_3, window_bounds = array<i64: 1, 128>}, {transform_indices = @transform_4, window_bounds = array<i64: 32, 128>}]} {
    %c0_i32 = arith.constant 0 : i32
    %0 = arith.cmpi eq, %arg1, %c0_i32 : i32
    %1 = arith.extui %0 : i1 to i32
    %c0_i32_0 = arith.constant 0 : i32
    %2 = arith.cmpi ne, %1, %c0_i32_0 : i32
    scf.if %2 {
      %cst_10 = arith.constant 0.000000e+00 : f32
      %12 = vector.broadcast %cst_10 : f32 to vector<32x128xf32>
      %c0_11 = arith.constant 0 : index
      %c0_12 = arith.constant 0 : index
      %13 = vector.load %arg7[%c0_11, %c0_12] : memref<32x128xf32, #tpu.memory_space<vmem>>, vector<32x128xf32>
      tpu.vector_store %arg7[%c0_11, %c0_12], %12 {strides = array<i32>} : memref<32x128xf32, #tpu.memory_space<vmem>>, vector<32x128xf32>,
    } else {
    }
    %c0 = arith.constant 0 : index
    %c0_1 = arith.constant 0 : index
    %3 = vector.load %arg7[%c0, %c0_1] : memref<32x128xf32, #tpu.memory_space<vmem>>, vector<32x128xf32>
    %c0_2 = arith.constant 0 : index
    %c0_3 = arith.constant 0 : index
    %4 = vector.load %arg2[%c0_2, %c0_3] : memref<32x128xbf16, #tpu.memory_space<vmem>>, vector<32x128xbf16>
    %c0_4 = arith.constant 0 : index
    %c0_5 = arith.constant 0 : index
    %5 = vector.load %arg3[%c0_4, %c0_5] : memref<128x128xbf16, #tpu.memory_space<vmem>>, vector<128x128xbf16>
    %cst = arith.constant dense<0.000000e+00> : vector<32x128xf32>
    %6 = tpu.matmul %4, %5, %cst {dimension_numbers = #tpu.dot_dimension_numbers<[1], [0], [0], [1], [0, 0, 1, 1], [], []>} : vector<32x128xbf16>, vector<128x128xbf16>, vector<32x128xf32> -> vector<32x128xf32>
    %7 = arith.addf %3, %6 : vector<32x128xf32>
    %c0_6 = arith.constant 0 : index
    %c0_7 = arith.constant 0 : index
    %8 = vector.load %arg7[%c0_6, %c0_7] : memref<32x128xf32, #tpu.memory_space<vmem>>, vector<32x128xf32>
    tpu.vector_store %arg7[%c0_6, %c0_7], %7 {strides = array<i32>} : memref<32x128xf32, #tpu.memory_space<vmem>>, vector<32x128xf32>,
    %c0_i32_8 = arith.constant 0 : i32
    %9 = arith.cmpi eq, %arg1, %c0_i32_8 : i32
    %10 = arith.extui %9 : i1 to i32
    %c0_i32_9 = arith.constant 0 : i32
    %11 = arith.cmpi ne, %10, %c0_i32_9 : i32
    scf.if %11 {
      %c0_10 = arith.constant 0 : index
      %c0_11 = arith.constant 0 : index
      %12 = vector.load %arg7[%c0_10, %c0_11] : memref<32x128xf32, #tpu.memory_space<vmem>>, vector<32x128xf32>
      %cst_12 = arith.constant dense<0.000000e+00> : vector<128xf32>
      %13 = vector.multi_reduction <add>, %12, %cst_12 [0] : vector<32x128xf32> to vector<128xf32>
      %14 = vector.shape_cast %13 : vector<128xf32> to vector<1x128xf32>
      %15 = arith.mulf %12, %12 : vector<32x128xf32>
      %cst_13 = arith.constant dense<0.000000e+00> : vector<128xf32>
      %16 = vector.multi_reduction <add>, %15, %cst_13 [0] : vector<32x128xf32> to vector<128xf32>
      %17 = vector.shape_cast %16 : vector<128xf32> to vector<1x128xf32>
      %cst_14 = arith.constant 3.125000e-02 : f32
      %18 = vector.broadcast %cst_14 : f32 to vector<1x128xf32>
      %19 = arith.mulf %14, %18 : vector<1x128xf32>
      %cst_15 = arith.constant 3.125000e-02 : f32
      %20 = vector.broadcast %cst_15 : f32 to vector<1x128xf32>
      %21 = arith.mulf %17, %20 : vector<1x128xf32>
      %22 = arith.mulf %19, %19 : vector<1x128xf32>
      %23 = arith.subf %21, %22 : vector<1x128xf32>
      %cst_16 = arith.constant 9.99999974E-6 : f32
      %24 = vector.broadcast %cst_16 : f32 to vector<1x128xf32>
      %25 = arith.addf %23, %24 : vector<1x128xf32>
      %26 = math.rsqrt %25 : vector<1x128xf32>
      %c0_17 = arith.constant 0 : index
      %c0_18 = arith.constant 0 : index
      %27 = vector.load %arg4[%c0_17, %c0_18] : memref<1x128xf32, #tpu.memory_space<vmem>>, vector<1x128xf32>
      %28 = arith.mulf %26, %27 : vector<1x128xf32>
      %29 = vector.broadcast %19 : vector<1x128xf32> to vector<32x128xf32>
      %30 = arith.subf %12, %29 : vector<32x128xf32>
      %31 = vector.broadcast %28 : vector<1x128xf32> to vector<32x128xf32>
      %32 = arith.mulf %30, %31 : vector<32x128xf32>
      %c0_19 = arith.constant 0 : index
      %c0_20 = arith.constant 0 : index
      %33 = vector.load %arg5[%c0_19, %c0_20] : memref<1x128xf32, #tpu.memory_space<vmem>>, vector<1x128xf32>
      %34 = vector.broadcast %33 : vector<1x128xf32> to vector<32x128xf32>
      %35 = arith.addf %32, %34 : vector<32x128xf32>
      %c0_21 = arith.constant 0 : index
      %c0_22 = arith.constant 0 : index
      %36 = vector.load %arg6[%c0_21, %c0_22] : memref<32x128xf32, #tpu.memory_space<vmem>>, vector<32x128xf32>
      tpu.vector_store %arg6[%c0_21, %c0_22], %35 {strides = array<i32>} : memref<32x128xf32, #tpu.memory_space<vmem>>, vector<32x128xf32>,
    } else {
    }
    return
  }
  func.func @transform_0(%arg0: i32, %arg1: i32) -> (i32, i32) {
    %c0_i32 = arith.constant 0 : i32
    %c0_i32_0 = arith.constant 0 : i32
    return %c0_i32, %arg1 : i32, i32
  }
  func.func @transform_1(%arg0: i32, %arg1: i32) -> (i32, i32) {
    %c0_i32 = arith.constant 0 : i32
    return %arg1, %arg0 : i32, i32
  }
  func.func @transform_2(%arg0: i32, %arg1: i32) -> (i32, i32) {
    %c0_i32 = arith.constant 0 : i32
    %c0_i32_0 = arith.constant 0 : i32
    return %c0_i32, %arg0 : i32, i32
  }
  func.func @transform_3(%arg0: i32, %arg1: i32) -> (i32, i32) {
    %c0_i32 = arith.constant 0 : i32
    %c0_i32_0 = arith.constant 0 : i32
    return %c0_i32, %arg0 : i32, i32
  }
  func.func @transform_4(%arg0: i32, %arg1: i32) -> (i32, i32) {
    %c0_i32 = arith.constant 0 : i32
    %c0_i32_0 = arith.constant 0 : i32
    return %c0_i32, %arg0 : i32, i32
  }
}

module attributes {stable_mosaic.version = 11 : i64} {
  func.func @_conv_bn_act_kernel(%arg0: i32, %arg1: i32, %arg2: memref<8x384xbf16, #tpu.memory_space<vmem>>, %arg3: memref<384x128xbf16, #tpu.memory_space<vmem>>, %arg4: memref<1x128xf32, #tpu.memory_space<vmem>>, %arg5: memref<1x128xf32, #tpu.memory_space<vmem>>, %arg6: memref<8x128xf32, #tpu.memory_space<vmem>>, %arg7: memref<8x128xf32, #tpu.memory_space<vmem>>) attributes {dimension_semantics = [#tpu.dimension_semantics<parallel>, #tpu.dimension_semantics<arbitrary>], iteration_bounds = array<i64: 2, 3>, scalar_prefetch = 0 : i64, scratch_operands = 1 : i64, tpu.core_type = #tpu.core_type<tc>, window_params = [{transform_indices = @transform_0, window_bounds = array<i64: 8, 384>}, {transform_indices = @transform_1, window_bounds = array<i64: 384, 128>}, {transform_indices = @transform_2, window_bounds = array<i64: 1, 128>}, {transform_indices = @transform_3, window_bounds = array<i64: 1, 128>}, {transform_indices = @transform_4, window_bounds = array<i64: 8, 128>}]} {
    %c0_i32 = arith.constant 0 : i32
    %0 = arith.cmpi eq, %arg1, %c0_i32 : i32
    %1 = arith.extui %0 : i1 to i32
    %c0_i32_0 = arith.constant 0 : i32
    %2 = arith.cmpi ne, %1, %c0_i32_0 : i32
    scf.if %2 {
      %cst_9 = arith.constant 0.000000e+00 : f32
      %12 = vector.broadcast %cst_9 : f32 to vector<8x128xf32>
      %c0_10 = arith.constant 0 : index
      %c0_11 = arith.constant 0 : index
      %13 = vector.load %arg7[%c0_10, %c0_11] : memref<8x128xf32, #tpu.memory_space<vmem>>, vector<8x128xf32>
      tpu.vector_store %arg7[%c0_10, %c0_11], %12 {strides = array<i32>} : memref<8x128xf32, #tpu.memory_space<vmem>>, vector<8x128xf32>,
    } else {
    }
    %c0 = arith.constant 0 : index
    %c0_1 = arith.constant 0 : index
    %3 = vector.load %arg7[%c0, %c0_1] : memref<8x128xf32, #tpu.memory_space<vmem>>, vector<8x128xf32>
    %c0_2 = arith.constant 0 : index
    %c0_3 = arith.constant 0 : index
    %4 = vector.load %arg2[%c0_2, %c0_3] : memref<8x384xbf16, #tpu.memory_space<vmem>>, vector<8x384xbf16>
    %c0_4 = arith.constant 0 : index
    %c0_5 = arith.constant 0 : index
    %5 = vector.load %arg3[%c0_4, %c0_5] : memref<384x128xbf16, #tpu.memory_space<vmem>>, vector<384x128xbf16>
    %cst = arith.constant dense<0.000000e+00> : vector<8x128xf32>
    %6 = tpu.matmul %4, %5, %cst {dimension_numbers = #tpu.dot_dimension_numbers<[1], [0], [0], [1], [0, 0, 1, 1], [], []>} : vector<8x384xbf16>, vector<384x128xbf16>, vector<8x128xf32> -> vector<8x128xf32>
    %7 = arith.addf %3, %6 : vector<8x128xf32>
    %c0_6 = arith.constant 0 : index
    %c0_7 = arith.constant 0 : index
    %8 = vector.load %arg7[%c0_6, %c0_7] : memref<8x128xf32, #tpu.memory_space<vmem>>, vector<8x128xf32>
    tpu.vector_store %arg7[%c0_6, %c0_7], %7 {strides = array<i32>} : memref<8x128xf32, #tpu.memory_space<vmem>>, vector<8x128xf32>,
    %c2_i32 = arith.constant 2 : i32
    %9 = arith.cmpi eq, %arg1, %c2_i32 : i32
    %10 = arith.extui %9 : i1 to i32
    %c0_i32_8 = arith.constant 0 : i32
    %11 = arith.cmpi ne, %10, %c0_i32_8 : i32
    scf.if %11 {
      %c0_9 = arith.constant 0 : index
      %c0_10 = arith.constant 0 : index
      %12 = vector.load %arg7[%c0_9, %c0_10] : memref<8x128xf32, #tpu.memory_space<vmem>>, vector<8x128xf32>
      %cst_11 = arith.constant dense<0.000000e+00> : vector<128xf32>
      %13 = vector.multi_reduction <add>, %12, %cst_11 [0] : vector<8x128xf32> to vector<128xf32>
      %14 = vector.shape_cast %13 : vector<128xf32> to vector<1x128xf32>
      %15 = arith.mulf %12, %12 : vector<8x128xf32>
      %cst_12 = arith.constant dense<0.000000e+00> : vector<128xf32>
      %16 = vector.multi_reduction <add>, %15, %cst_12 [0] : vector<8x128xf32> to vector<128xf32>
      %17 = vector.shape_cast %16 : vector<128xf32> to vector<1x128xf32>
      %cst_13 = arith.constant 1.250000e-01 : f32
      %18 = vector.broadcast %cst_13 : f32 to vector<1x128xf32>
      %19 = arith.mulf %14, %18 : vector<1x128xf32>
      %cst_14 = arith.constant 1.250000e-01 : f32
      %20 = vector.broadcast %cst_14 : f32 to vector<1x128xf32>
      %21 = arith.mulf %17, %20 : vector<1x128xf32>
      %22 = arith.mulf %19, %19 : vector<1x128xf32>
      %23 = arith.subf %21, %22 : vector<1x128xf32>
      %cst_15 = arith.constant 9.99999974E-6 : f32
      %24 = vector.broadcast %cst_15 : f32 to vector<1x128xf32>
      %25 = arith.addf %23, %24 : vector<1x128xf32>
      %26 = math.rsqrt %25 : vector<1x128xf32>
      %c0_16 = arith.constant 0 : index
      %c0_17 = arith.constant 0 : index
      %27 = vector.load %arg4[%c0_16, %c0_17] : memref<1x128xf32, #tpu.memory_space<vmem>>, vector<1x128xf32>
      %28 = arith.mulf %26, %27 : vector<1x128xf32>
      %29 = vector.broadcast %19 : vector<1x128xf32> to vector<8x128xf32>
      %30 = arith.subf %12, %29 : vector<8x128xf32>
      %31 = vector.broadcast %28 : vector<1x128xf32> to vector<8x128xf32>
      %32 = arith.mulf %30, %31 : vector<8x128xf32>
      %c0_18 = arith.constant 0 : index
      %c0_19 = arith.constant 0 : index
      %33 = vector.load %arg5[%c0_18, %c0_19] : memref<1x128xf32, #tpu.memory_space<vmem>>, vector<1x128xf32>
      %34 = vector.broadcast %33 : vector<1x128xf32> to vector<8x128xf32>
      %35 = arith.addf %32, %34 : vector<8x128xf32>
      %cst_20 = arith.constant 0.000000e+00 : f32
      %36 = vector.broadcast %cst_20 : f32 to vector<8x128xf32>
      %37 = arith.maximumf %35, %36 : vector<8x128xf32>
      %c0_21 = arith.constant 0 : index
      %c0_22 = arith.constant 0 : index
      %38 = vector.load %arg6[%c0_21, %c0_22] : memref<8x128xf32, #tpu.memory_space<vmem>>, vector<8x128xf32>
      tpu.vector_store %arg6[%c0_21, %c0_22], %37 {strides = array<i32>} : memref<8x128xf32, #tpu.memory_space<vmem>>, vector<8x128xf32>,
    } else {
    }
    return
  }
  func.func @transform_0(%arg0: i32, %arg1: i32) -> (i32, i32) {
    %c0_i32 = arith.constant 0 : i32
    %c0_i32_0 = arith.constant 0 : i32
    return %c0_i32, %arg1 : i32, i32
  }
  func.func @transform_1(%arg0: i32, %arg1: i32) -> (i32, i32) {
    %c0_i32 = arith.constant 0 : i32
    return %arg1, %arg0 : i32, i32
  }
  func.func @transform_2(%arg0: i32, %arg1: i32) -> (i32, i32) {
    %c0_i32 = arith.constant 0 : i32
    %c0_i32_0 = arith.constant 0 : i32
    return %c0_i32, %arg0 : i32, i32
  }
  func.func @transform_3(%arg0: i32, %arg1: i32) -> (i32, i32) {
    %c0_i32 = arith.constant 0 : i32
    %c0_i32_0 = arith.constant 0 : i32
    return %c0_i32, %arg0 : i32, i32
  }
  func.func @transform_4(%arg0: i32, %arg1: i32) -> (i32, i32) {
    %c0_i32 = arith.constant 0 : i32
    %c0_i32_0 = arith.constant 0 : i32
    return %c0_i32, %arg0 : i32, i32
  }
}

module attributes {stable_mosaic.version = 11 : i64} {
  func.func @_conv_bn_act_kernel(%arg0: i32, %arg1: i32, %arg2: memref<8x128xbf16, #tpu.memory_space<vmem>>, %arg3: memref<128x128xbf16, #tpu.memory_space<vmem>>, %arg4: memref<1x128xf32, #tpu.memory_space<vmem>>, %arg5: memref<1x128xf32, #tpu.memory_space<vmem>>, %arg6: memref<8x128xf32, #tpu.memory_space<vmem>>, %arg7: memref<8x128xf32, #tpu.memory_space<vmem>>) attributes {dimension_semantics = [#tpu.dimension_semantics<parallel>, #tpu.dimension_semantics<arbitrary>], iteration_bounds = array<i64: 2, 1>, scalar_prefetch = 0 : i64, scratch_operands = 1 : i64, tpu.core_type = #tpu.core_type<tc>, window_params = [{transform_indices = @transform_0, window_bounds = array<i64: 8, 128>}, {transform_indices = @transform_1, window_bounds = array<i64: 128, 128>}, {transform_indices = @transform_2, window_bounds = array<i64: 1, 128>}, {transform_indices = @transform_3, window_bounds = array<i64: 1, 128>}, {transform_indices = @transform_4, window_bounds = array<i64: 8, 128>}]} {
    %c0_i32 = arith.constant 0 : i32
    %0 = arith.cmpi eq, %arg1, %c0_i32 : i32
    %1 = arith.extui %0 : i1 to i32
    %c0_i32_0 = arith.constant 0 : i32
    %2 = arith.cmpi ne, %1, %c0_i32_0 : i32
    scf.if %2 {
      %cst_10 = arith.constant 0.000000e+00 : f32
      %12 = vector.broadcast %cst_10 : f32 to vector<8x128xf32>
      %c0_11 = arith.constant 0 : index
      %c0_12 = arith.constant 0 : index
      %13 = vector.load %arg7[%c0_11, %c0_12] : memref<8x128xf32, #tpu.memory_space<vmem>>, vector<8x128xf32>
      tpu.vector_store %arg7[%c0_11, %c0_12], %12 {strides = array<i32>} : memref<8x128xf32, #tpu.memory_space<vmem>>, vector<8x128xf32>,
    } else {
    }
    %c0 = arith.constant 0 : index
    %c0_1 = arith.constant 0 : index
    %3 = vector.load %arg7[%c0, %c0_1] : memref<8x128xf32, #tpu.memory_space<vmem>>, vector<8x128xf32>
    %c0_2 = arith.constant 0 : index
    %c0_3 = arith.constant 0 : index
    %4 = vector.load %arg2[%c0_2, %c0_3] : memref<8x128xbf16, #tpu.memory_space<vmem>>, vector<8x128xbf16>
    %c0_4 = arith.constant 0 : index
    %c0_5 = arith.constant 0 : index
    %5 = vector.load %arg3[%c0_4, %c0_5] : memref<128x128xbf16, #tpu.memory_space<vmem>>, vector<128x128xbf16>
    %cst = arith.constant dense<0.000000e+00> : vector<8x128xf32>
    %6 = tpu.matmul %4, %5, %cst {dimension_numbers = #tpu.dot_dimension_numbers<[1], [0], [0], [1], [0, 0, 1, 1], [], []>} : vector<8x128xbf16>, vector<128x128xbf16>, vector<8x128xf32> -> vector<8x128xf32>
    %7 = arith.addf %3, %6 : vector<8x128xf32>
    %c0_6 = arith.constant 0 : index
    %c0_7 = arith.constant 0 : index
    %8 = vector.load %arg7[%c0_6, %c0_7] : memref<8x128xf32, #tpu.memory_space<vmem>>, vector<8x128xf32>
    tpu.vector_store %arg7[%c0_6, %c0_7], %7 {strides = array<i32>} : memref<8x128xf32, #tpu.memory_space<vmem>>, vector<8x128xf32>,
    %c0_i32_8 = arith.constant 0 : i32
    %9 = arith.cmpi eq, %arg1, %c0_i32_8 : i32
    %10 = arith.extui %9 : i1 to i32
    %c0_i32_9 = arith.constant 0 : i32
    %11 = arith.cmpi ne, %10, %c0_i32_9 : i32
    scf.if %11 {
      %c0_10 = arith.constant 0 : index
      %c0_11 = arith.constant 0 : index
      %12 = vector.load %arg7[%c0_10, %c0_11] : memref<8x128xf32, #tpu.memory_space<vmem>>, vector<8x128xf32>
      %cst_12 = arith.constant dense<0.000000e+00> : vector<128xf32>
      %13 = vector.multi_reduction <add>, %12, %cst_12 [0] : vector<8x128xf32> to vector<128xf32>
      %14 = vector.shape_cast %13 : vector<128xf32> to vector<1x128xf32>
      %15 = arith.mulf %12, %12 : vector<8x128xf32>
      %cst_13 = arith.constant dense<0.000000e+00> : vector<128xf32>
      %16 = vector.multi_reduction <add>, %15, %cst_13 [0] : vector<8x128xf32> to vector<128xf32>
      %17 = vector.shape_cast %16 : vector<128xf32> to vector<1x128xf32>
      %cst_14 = arith.constant 1.250000e-01 : f32
      %18 = vector.broadcast %cst_14 : f32 to vector<1x128xf32>
      %19 = arith.mulf %14, %18 : vector<1x128xf32>
      %cst_15 = arith.constant 1.250000e-01 : f32
      %20 = vector.broadcast %cst_15 : f32 to vector<1x128xf32>
      %21 = arith.mulf %17, %20 : vector<1x128xf32>
      %22 = arith.mulf %19, %19 : vector<1x128xf32>
      %23 = arith.subf %21, %22 : vector<1x128xf32>
      %cst_16 = arith.constant 9.99999974E-6 : f32
      %24 = vector.broadcast %cst_16 : f32 to vector<1x128xf32>
      %25 = arith.addf %23, %24 : vector<1x128xf32>
      %26 = math.rsqrt %25 : vector<1x128xf32>
      %c0_17 = arith.constant 0 : index
      %c0_18 = arith.constant 0 : index
      %27 = vector.load %arg4[%c0_17, %c0_18] : memref<1x128xf32, #tpu.memory_space<vmem>>, vector<1x128xf32>
      %28 = arith.mulf %26, %27 : vector<1x128xf32>
      %29 = vector.broadcast %19 : vector<1x128xf32> to vector<8x128xf32>
      %30 = arith.subf %12, %29 : vector<8x128xf32>
      %31 = vector.broadcast %28 : vector<1x128xf32> to vector<8x128xf32>
      %32 = arith.mulf %30, %31 : vector<8x128xf32>
      %c0_19 = arith.constant 0 : index
      %c0_20 = arith.constant 0 : index
      %33 = vector.load %arg5[%c0_19, %c0_20] : memref<1x128xf32, #tpu.memory_space<vmem>>, vector<1x128xf32>
      %34 = vector.broadcast %33 : vector<1x128xf32> to vector<8x128xf32>
      %35 = arith.addf %32, %34 : vector<8x128xf32>
      %c0_21 = arith.constant 0 : index
      %c0_22 = arith.constant 0 : index
      %36 = vector.load %arg6[%c0_21, %c0_22] : memref<8x128xf32, #tpu.memory_space<vmem>>, vector<8x128xf32>
      tpu.vector_store %arg6[%c0_21, %c0_22], %35 {strides = array<i32>} : memref<8x128xf32, #tpu.memory_space<vmem>>, vector<8x128xf32>,
    } else {
    }
    return
  }
  func.func @transform_0(%arg0: i32, %arg1: i32) -> (i32, i32) {
    %c0_i32 = arith.constant 0 : i32
    %c0_i32_0 = arith.constant 0 : i32
    return %c0_i32, %arg1 : i32, i32
  }
  func.func @transform_1(%arg0: i32, %arg1: i32) -> (i32, i32) {
    %c0_i32 = arith.constant 0 : i32
    return %arg1, %arg0 : i32, i32
  }
  func.func @transform_2(%arg0: i32, %arg1: i32) -> (i32, i32) {
    %c0_i32 = arith.constant 0 : i32
    %c0_i32_0 = arith.constant 0 : i32
    return %c0_i32, %arg0 : i32, i32
  }
  func.func @transform_3(%arg0: i32, %arg1: i32) -> (i32, i32) {
    %c0_i32 = arith.constant 0 : i32
    %c0_i32_0 = arith.constant 0 : i32
    return %c0_i32, %arg0 : i32, i32
  }
  func.func @transform_4(%arg0: i32, %arg1: i32) -> (i32, i32) {
    %c0_i32 = arith.constant 0 : i32
    %c0_i32_0 = arith.constant 0 : i32
    return %c0_i32, %arg0 : i32, i32
  }
}

module attributes {stable_mosaic.version = 11 : i64} {
  func.func @_conv_bn_act_kernel(%arg0: i32, %arg1: i32, %arg2: memref<8x384xbf16, #tpu.memory_space<vmem>>, %arg3: memref<384x128xbf16, #tpu.memory_space<vmem>>, %arg4: memref<1x128xf32, #tpu.memory_space<vmem>>, %arg5: memref<1x128xf32, #tpu.memory_space<vmem>>, %arg6: memref<8x128xf32, #tpu.memory_space<vmem>>, %arg7: memref<8x128xf32, #tpu.memory_space<vmem>>, %arg8: memref<8x128xf32, #tpu.memory_space<vmem>>) attributes {dimension_semantics = [#tpu.dimension_semantics<parallel>, #tpu.dimension_semantics<arbitrary>], iteration_bounds = array<i64: 2, 6>, scalar_prefetch = 0 : i64, scratch_operands = 1 : i64, tpu.core_type = #tpu.core_type<tc>, window_params = [{transform_indices = @transform_0, window_bounds = array<i64: 8, 384>}, {transform_indices = @transform_1, window_bounds = array<i64: 384, 128>}, {transform_indices = @transform_2, window_bounds = array<i64: 1, 128>}, {transform_indices = @transform_3, window_bounds = array<i64: 1, 128>}, {transform_indices = @transform_4, window_bounds = array<i64: 8, 128>}, {transform_indices = @transform_5, window_bounds = array<i64: 8, 128>}]} {
    %c0_i32 = arith.constant 0 : i32
    %0 = arith.cmpi eq, %arg1, %c0_i32 : i32
    %1 = arith.extui %0 : i1 to i32
    %c0_i32_0 = arith.constant 0 : i32
    %2 = arith.cmpi ne, %1, %c0_i32_0 : i32
    scf.if %2 {
      %cst_9 = arith.constant 0.000000e+00 : f32
      %12 = vector.broadcast %cst_9 : f32 to vector<8x128xf32>
      %c0_10 = arith.constant 0 : index
      %c0_11 = arith.constant 0 : index
      %13 = vector.load %arg8[%c0_10, %c0_11] : memref<8x128xf32, #tpu.memory_space<vmem>>, vector<8x128xf32>
      tpu.vector_store %arg8[%c0_10, %c0_11], %12 {strides = array<i32>} : memref<8x128xf32, #tpu.memory_space<vmem>>, vector<8x128xf32>,
    } else {
    }
    %c0 = arith.constant 0 : index
    %c0_1 = arith.constant 0 : index
    %3 = vector.load %arg8[%c0, %c0_1] : memref<8x128xf32, #tpu.memory_space<vmem>>, vector<8x128xf32>
    %c0_2 = arith.constant 0 : index
    %c0_3 = arith.constant 0 : index
    %4 = vector.load %arg2[%c0_2, %c0_3] : memref<8x384xbf16, #tpu.memory_space<vmem>>, vector<8x384xbf16>
    %c0_4 = arith.constant 0 : index
    %c0_5 = arith.constant 0 : index
    %5 = vector.load %arg3[%c0_4, %c0_5] : memref<384x128xbf16, #tpu.memory_space<vmem>>, vector<384x128xbf16>
    %cst = arith.constant dense<0.000000e+00> : vector<8x128xf32>
    %6 = tpu.matmul %4, %5, %cst {dimension_numbers = #tpu.dot_dimension_numbers<[1], [0], [0], [1], [0, 0, 1, 1], [], []>} : vector<8x384xbf16>, vector<384x128xbf16>, vector<8x128xf32> -> vector<8x128xf32>
    %7 = arith.addf %3, %6 : vector<8x128xf32>
    %c0_6 = arith.constant 0 : index
    %c0_7 = arith.constant 0 : index
    %8 = vector.load %arg8[%c0_6, %c0_7] : memref<8x128xf32, #tpu.memory_space<vmem>>, vector<8x128xf32>
    tpu.vector_store %arg8[%c0_6, %c0_7], %7 {strides = array<i32>} : memref<8x128xf32, #tpu.memory_space<vmem>>, vector<8x128xf32>,
    %c5_i32 = arith.constant 5 : i32
    %9 = arith.cmpi eq, %arg1, %c5_i32 : i32
    %10 = arith.extui %9 : i1 to i32
    %c0_i32_8 = arith.constant 0 : i32
    %11 = arith.cmpi ne, %10, %c0_i32_8 : i32
    scf.if %11 {
      %c0_9 = arith.constant 0 : index
      %c0_10 = arith.constant 0 : index
      %12 = vector.load %arg8[%c0_9, %c0_10] : memref<8x128xf32, #tpu.memory_space<vmem>>, vector<8x128xf32>
      %cst_11 = arith.constant dense<0.000000e+00> : vector<128xf32>
      %13 = vector.multi_reduction <add>, %12, %cst_11 [0] : vector<8x128xf32> to vector<128xf32>
      %14 = vector.shape_cast %13 : vector<128xf32> to vector<1x128xf32>
      %15 = arith.mulf %12, %12 : vector<8x128xf32>
      %cst_12 = arith.constant dense<0.000000e+00> : vector<128xf32>
      %16 = vector.multi_reduction <add>, %15, %cst_12 [0] : vector<8x128xf32> to vector<128xf32>
      %17 = vector.shape_cast %16 : vector<128xf32> to vector<1x128xf32>
      %cst_13 = arith.constant 1.250000e-01 : f32
      %18 = vector.broadcast %cst_13 : f32 to vector<1x128xf32>
      %19 = arith.mulf %14, %18 : vector<1x128xf32>
      %cst_14 = arith.constant 1.250000e-01 : f32
      %20 = vector.broadcast %cst_14 : f32 to vector<1x128xf32>
      %21 = arith.mulf %17, %20 : vector<1x128xf32>
      %22 = arith.mulf %19, %19 : vector<1x128xf32>
      %23 = arith.subf %21, %22 : vector<1x128xf32>
      %cst_15 = arith.constant 9.99999974E-6 : f32
      %24 = vector.broadcast %cst_15 : f32 to vector<1x128xf32>
      %25 = arith.addf %23, %24 : vector<1x128xf32>
      %26 = math.rsqrt %25 : vector<1x128xf32>
      %c0_16 = arith.constant 0 : index
      %c0_17 = arith.constant 0 : index
      %27 = vector.load %arg4[%c0_16, %c0_17] : memref<1x128xf32, #tpu.memory_space<vmem>>, vector<1x128xf32>
      %28 = arith.mulf %26, %27 : vector<1x128xf32>
      %29 = vector.broadcast %19 : vector<1x128xf32> to vector<8x128xf32>
      %30 = arith.subf %12, %29 : vector<8x128xf32>
      %31 = vector.broadcast %28 : vector<1x128xf32> to vector<8x128xf32>
      %32 = arith.mulf %30, %31 : vector<8x128xf32>
      %c0_18 = arith.constant 0 : index
      %c0_19 = arith.constant 0 : index
      %33 = vector.load %arg5[%c0_18, %c0_19] : memref<1x128xf32, #tpu.memory_space<vmem>>, vector<1x128xf32>
      %34 = vector.broadcast %33 : vector<1x128xf32> to vector<8x128xf32>
      %35 = arith.addf %32, %34 : vector<8x128xf32>
      %c0_20 = arith.constant 0 : index
      %c0_21 = arith.constant 0 : index
      %36 = vector.load %arg6[%c0_20, %c0_21] : memref<8x128xf32, #tpu.memory_space<vmem>>, vector<8x128xf32>
      %37 = arith.addf %35, %36 : vector<8x128xf32>
      %cst_22 = arith.constant 0.000000e+00 : f32
      %38 = vector.broadcast %cst_22 : f32 to vector<8x128xf32>
      %39 = arith.maximumf %37, %38 : vector<8x128xf32>
      %c0_23 = arith.constant 0 : index
      %c0_24 = arith.constant 0 : index
      %40 = vector.load %arg7[%c0_23, %c0_24] : memref<8x128xf32, #tpu.memory_space<vmem>>, vector<8x128xf32>
      tpu.vector_store %arg7[%c0_23, %c0_24], %39 {strides = array<i32>} : memref<8x128xf32, #tpu.memory_space<vmem>>, vector<8x128xf32>,
    } else {
    }
    return
  }
  func.func @transform_0(%arg0: i32, %arg1: i32) -> (i32, i32) {
    %c0_i32 = arith.constant 0 : i32
    %c0_i32_0 = arith.constant 0 : i32
    return %c0_i32, %arg1 : i32, i32
  }
  func.func @transform_1(%arg0: i32, %arg1: i32) -> (i32, i32) {
    %c0_i32 = arith.constant 0 : i32
    return %arg1, %arg0 : i32, i32
  }
  func.func @transform_2(%arg0: i32, %arg1: i32) -> (i32, i32) {
    %c0_i32 = arith.constant 0 : i32
    %c0_i32_0 = arith.constant 0 : i32
    return %c0_i32, %arg0 : i32, i32
  }
  func.func @transform_3(%arg0: i32, %arg1: i32) -> (i32, i32) {
    %c0_i32 = arith.constant 0 : i32
    %c0_i32_0 = arith.constant 0 : i32
    return %c0_i32, %arg0 : i32, i32
  }
  func.func @transform_4(%arg0: i32, %arg1: i32) -> (i32, i32) {
    %c0_i32 = arith.constant 0 : i32
    %c0_i32_0 = arith.constant 0 : i32
    return %c0_i32, %arg0 : i32, i32
  }
  func.func @transform_5(%arg0: i32, %arg1: i32) -> (i32, i32) {
    %c0_i32 = arith.constant 0 : i32
    %c0_i32_0 = arith.constant 0 : i32
    return %c0_i32, %arg0 : i32, i32
  }
}

module attributes {stable_mosaic.version = 11 : i64} {
  func.func @_conv_bn_act_kernel(%arg0: i32, %arg1: i32, %arg2: memref<2x384xbf16, #tpu.memory_space<vmem>>, %arg3: memref<384x128xbf16, #tpu.memory_space<vmem>>, %arg4: memref<1x128xf32, #tpu.memory_space<vmem>>, %arg5: memref<1x128xf32, #tpu.memory_space<vmem>>, %arg6: memref<2x128xf32, #tpu.memory_space<vmem>>, %arg7: memref<2x128xf32, #tpu.memory_space<vmem>>) attributes {dimension_semantics = [#tpu.dimension_semantics<parallel>, #tpu.dimension_semantics<arbitrary>], iteration_bounds = array<i64: 4, 6>, scalar_prefetch = 0 : i64, scratch_operands = 1 : i64, tpu.core_type = #tpu.core_type<tc>, window_params = [{transform_indices = @transform_0, window_bounds = array<i64: 2, 384>}, {transform_indices = @transform_1, window_bounds = array<i64: 384, 128>}, {transform_indices = @transform_2, window_bounds = array<i64: 1, 128>}, {transform_indices = @transform_3, window_bounds = array<i64: 1, 128>}, {transform_indices = @transform_4, window_bounds = array<i64: 2, 128>}]} {
    %c0_i32 = arith.constant 0 : i32
    %0 = arith.cmpi eq, %arg1, %c0_i32 : i32
    %1 = arith.extui %0 : i1 to i32
    %c0_i32_0 = arith.constant 0 : i32
    %2 = arith.cmpi ne, %1, %c0_i32_0 : i32
    scf.if %2 {
      %cst_9 = arith.constant 0.000000e+00 : f32
      %12 = vector.broadcast %cst_9 : f32 to vector<2x128xf32>
      %c0_10 = arith.constant 0 : index
      %c0_11 = arith.constant 0 : index
      %13 = vector.load %arg7[%c0_10, %c0_11] : memref<2x128xf32, #tpu.memory_space<vmem>>, vector<2x128xf32>
      tpu.vector_store %arg7[%c0_10, %c0_11], %12 {strides = array<i32>} : memref<2x128xf32, #tpu.memory_space<vmem>>, vector<2x128xf32>,
    } else {
    }
    %c0 = arith.constant 0 : index
    %c0_1 = arith.constant 0 : index
    %3 = vector.load %arg7[%c0, %c0_1] : memref<2x128xf32, #tpu.memory_space<vmem>>, vector<2x128xf32>
    %c0_2 = arith.constant 0 : index
    %c0_3 = arith.constant 0 : index
    %4 = vector.load %arg2[%c0_2, %c0_3] : memref<2x384xbf16, #tpu.memory_space<vmem>>, vector<2x384xbf16>
    %c0_4 = arith.constant 0 : index
    %c0_5 = arith.constant 0 : index
    %5 = vector.load %arg3[%c0_4, %c0_5] : memref<384x128xbf16, #tpu.memory_space<vmem>>, vector<384x128xbf16>
    %cst = arith.constant dense<0.000000e+00> : vector<2x128xf32>
    %6 = tpu.matmul %4, %5, %cst {dimension_numbers = #tpu.dot_dimension_numbers<[1], [0], [0], [1], [0, 0, 1, 1], [], []>} : vector<2x384xbf16>, vector<384x128xbf16>, vector<2x128xf32> -> vector<2x128xf32>
    %7 = arith.addf %3, %6 : vector<2x128xf32>
    %c0_6 = arith.constant 0 : index
    %c0_7 = arith.constant 0 : index
    %8 = vector.load %arg7[%c0_6, %c0_7] : memref<2x128xf32, #tpu.memory_space<vmem>>, vector<2x128xf32>
    tpu.vector_store %arg7[%c0_6, %c0_7], %7 {strides = array<i32>} : memref<2x128xf32, #tpu.memory_space<vmem>>, vector<2x128xf32>,
    %c5_i32 = arith.constant 5 : i32
    %9 = arith.cmpi eq, %arg1, %c5_i32 : i32
    %10 = arith.extui %9 : i1 to i32
    %c0_i32_8 = arith.constant 0 : i32
    %11 = arith.cmpi ne, %10, %c0_i32_8 : i32
    scf.if %11 {
      %c0_9 = arith.constant 0 : index
      %c0_10 = arith.constant 0 : index
      %12 = vector.load %arg7[%c0_9, %c0_10] : memref<2x128xf32, #tpu.memory_space<vmem>>, vector<2x128xf32>
      %cst_11 = arith.constant dense<0.000000e+00> : vector<128xf32>
      %13 = vector.multi_reduction <add>, %12, %cst_11 [0] : vector<2x128xf32> to vector<128xf32>
      %14 = vector.shape_cast %13 : vector<128xf32> to vector<1x128xf32>
      %15 = arith.mulf %12, %12 : vector<2x128xf32>
      %cst_12 = arith.constant dense<0.000000e+00> : vector<128xf32>
      %16 = vector.multi_reduction <add>, %15, %cst_12 [0] : vector<2x128xf32> to vector<128xf32>
      %17 = vector.shape_cast %16 : vector<128xf32> to vector<1x128xf32>
      %cst_13 = arith.constant 5.000000e-01 : f32
      %18 = vector.broadcast %cst_13 : f32 to vector<1x128xf32>
      %19 = arith.mulf %14, %18 : vector<1x128xf32>
      %cst_14 = arith.constant 5.000000e-01 : f32
      %20 = vector.broadcast %cst_14 : f32 to vector<1x128xf32>
      %21 = arith.mulf %17, %20 : vector<1x128xf32>
      %22 = arith.mulf %19, %19 : vector<1x128xf32>
      %23 = arith.subf %21, %22 : vector<1x128xf32>
      %cst_15 = arith.constant 9.99999974E-6 : f32
      %24 = vector.broadcast %cst_15 : f32 to vector<1x128xf32>
      %25 = arith.addf %23, %24 : vector<1x128xf32>
      %26 = math.rsqrt %25 : vector<1x128xf32>
      %c0_16 = arith.constant 0 : index
      %c0_17 = arith.constant 0 : index
      %27 = vector.load %arg4[%c0_16, %c0_17] : memref<1x128xf32, #tpu.memory_space<vmem>>, vector<1x128xf32>
      %28 = arith.mulf %26, %27 : vector<1x128xf32>
      %29 = vector.broadcast %19 : vector<1x128xf32> to vector<2x128xf32>
      %30 = arith.subf %12, %29 : vector<2x128xf32>
      %31 = vector.broadcast %28 : vector<1x128xf32> to vector<2x128xf32>
      %32 = arith.mulf %30, %31 : vector<2x128xf32>
      %c0_18 = arith.constant 0 : index
      %c0_19 = arith.constant 0 : index
      %33 = vector.load %arg5[%c0_18, %c0_19] : memref<1x128xf32, #tpu.memory_space<vmem>>, vector<1x128xf32>
      %34 = vector.broadcast %33 : vector<1x128xf32> to vector<2x128xf32>
      %35 = arith.addf %32, %34 : vector<2x128xf32>
      %cst_20 = arith.constant 0.000000e+00 : f32
      %36 = vector.broadcast %cst_20 : f32 to vector<2x128xf32>
      %37 = arith.maximumf %35, %36 : vector<2x128xf32>
      %c0_21 = arith.constant 0 : index
      %c0_22 = arith.constant 0 : index
      %38 = vector.load %arg6[%c0_21, %c0_22] : memref<2x128xf32, #tpu.memory_space<vmem>>, vector<2x128xf32>
      tpu.vector_store %arg6[%c0_21, %c0_22], %37 {strides = array<i32>} : memref<2x128xf32, #tpu.memory_space<vmem>>, vector<2x128xf32>,
    } else {
    }
    return
  }
  func.func @transform_0(%arg0: i32, %arg1: i32) -> (i32, i32) {
    %c0_i32 = arith.constant 0 : i32
    %c0_i32_0 = arith.constant 0 : i32
    return %c0_i32, %arg1 : i32, i32
  }
  func.func @transform_1(%arg0: i32, %arg1: i32) -> (i32, i32) {
    %c0_i32 = arith.constant 0 : i32
    return %arg1, %arg0 : i32, i32
  }
  func.func @transform_2(%arg0: i32, %arg1: i32) -> (i32, i32) {
    %c0_i32 = arith.constant 0 : i32
    %c0_i32_0 = arith.constant 0 : i32
    return %c0_i32, %arg0 : i32, i32
  }
  func.func @transform_3(%arg0: i32, %arg1: i32) -> (i32, i32) {
    %c0_i32 = arith.constant 0 : i32
    %c0_i32_0 = arith.constant 0 : i32
    return %c0_i32, %arg0 : i32, i32
  }
  func.func @transform_4(%arg0: i32, %arg1: i32) -> (i32, i32) {
    %c0_i32 = arith.constant 0 : i32
    %c0_i32_0 = arith.constant 0 : i32
    return %c0_i32, %arg0 : i32, i32
  }
}

module attributes {stable_mosaic.version = 11 : i64} {
  func.func @_conv_bn_act_kernel(%arg0: i32, %arg1: i32, %arg2: memref<2x256xbf16, #tpu.memory_space<vmem>>, %arg3: memref<256x128xbf16, #tpu.memory_space<vmem>>, %arg4: memref<1x128xf32, #tpu.memory_space<vmem>>, %arg5: memref<1x128xf32, #tpu.memory_space<vmem>>, %arg6: memref<2x128xf32, #tpu.memory_space<vmem>>, %arg7: memref<2x128xf32, #tpu.memory_space<vmem>>) attributes {dimension_semantics = [#tpu.dimension_semantics<parallel>, #tpu.dimension_semantics<arbitrary>], iteration_bounds = array<i64: 4, 1>, scalar_prefetch = 0 : i64, scratch_operands = 1 : i64, tpu.core_type = #tpu.core_type<tc>, window_params = [{transform_indices = @transform_0, window_bounds = array<i64: 2, 256>}, {transform_indices = @transform_1, window_bounds = array<i64: 256, 128>}, {transform_indices = @transform_2, window_bounds = array<i64: 1, 128>}, {transform_indices = @transform_3, window_bounds = array<i64: 1, 128>}, {transform_indices = @transform_4, window_bounds = array<i64: 2, 128>}]} {
    %c0_i32 = arith.constant 0 : i32
    %0 = arith.cmpi eq, %arg1, %c0_i32 : i32
    %1 = arith.extui %0 : i1 to i32
    %c0_i32_0 = arith.constant 0 : i32
    %2 = arith.cmpi ne, %1, %c0_i32_0 : i32
    scf.if %2 {
      %cst_10 = arith.constant 0.000000e+00 : f32
      %12 = vector.broadcast %cst_10 : f32 to vector<2x128xf32>
      %c0_11 = arith.constant 0 : index
      %c0_12 = arith.constant 0 : index
      %13 = vector.load %arg7[%c0_11, %c0_12] : memref<2x128xf32, #tpu.memory_space<vmem>>, vector<2x128xf32>
      tpu.vector_store %arg7[%c0_11, %c0_12], %12 {strides = array<i32>} : memref<2x128xf32, #tpu.memory_space<vmem>>, vector<2x128xf32>,
    } else {
    }
    %c0 = arith.constant 0 : index
    %c0_1 = arith.constant 0 : index
    %3 = vector.load %arg7[%c0, %c0_1] : memref<2x128xf32, #tpu.memory_space<vmem>>, vector<2x128xf32>
    %c0_2 = arith.constant 0 : index
    %c0_3 = arith.constant 0 : index
    %4 = vector.load %arg2[%c0_2, %c0_3] : memref<2x256xbf16, #tpu.memory_space<vmem>>, vector<2x256xbf16>
    %c0_4 = arith.constant 0 : index
    %c0_5 = arith.constant 0 : index
    %5 = vector.load %arg3[%c0_4, %c0_5] : memref<256x128xbf16, #tpu.memory_space<vmem>>, vector<256x128xbf16>
    %cst = arith.constant dense<0.000000e+00> : vector<2x128xf32>
    %6 = tpu.matmul %4, %5, %cst {dimension_numbers = #tpu.dot_dimension_numbers<[1], [0], [0], [1], [0, 0, 1, 1], [], []>} : vector<2x256xbf16>, vector<256x128xbf16>, vector<2x128xf32> -> vector<2x128xf32>
    %7 = arith.addf %3, %6 : vector<2x128xf32>
    %c0_6 = arith.constant 0 : index
    %c0_7 = arith.constant 0 : index
    %8 = vector.load %arg7[%c0_6, %c0_7] : memref<2x128xf32, #tpu.memory_space<vmem>>, vector<2x128xf32>
    tpu.vector_store %arg7[%c0_6, %c0_7], %7 {strides = array<i32>} : memref<2x128xf32, #tpu.memory_space<vmem>>, vector<2x128xf32>,
    %c0_i32_8 = arith.constant 0 : i32
    %9 = arith.cmpi eq, %arg1, %c0_i32_8 : i32
    %10 = arith.extui %9 : i1 to i32
    %c0_i32_9 = arith.constant 0 : i32
    %11 = arith.cmpi ne, %10, %c0_i32_9 : i32
    scf.if %11 {
      %c0_10 = arith.constant 0 : index
      %c0_11 = arith.constant 0 : index
      %12 = vector.load %arg7[%c0_10, %c0_11] : memref<2x128xf32, #tpu.memory_space<vmem>>, vector<2x128xf32>
      %cst_12 = arith.constant dense<0.000000e+00> : vector<128xf32>
      %13 = vector.multi_reduction <add>, %12, %cst_12 [0] : vector<2x128xf32> to vector<128xf32>
      %14 = vector.shape_cast %13 : vector<128xf32> to vector<1x128xf32>
      %15 = arith.mulf %12, %12 : vector<2x128xf32>
      %cst_13 = arith.constant dense<0.000000e+00> : vector<128xf32>
      %16 = vector.multi_reduction <add>, %15, %cst_13 [0] : vector<2x128xf32> to vector<128xf32>
      %17 = vector.shape_cast %16 : vector<128xf32> to vector<1x128xf32>
      %cst_14 = arith.constant 5.000000e-01 : f32
      %18 = vector.broadcast %cst_14 : f32 to vector<1x128xf32>
      %19 = arith.mulf %14, %18 : vector<1x128xf32>
      %cst_15 = arith.constant 5.000000e-01 : f32
      %20 = vector.broadcast %cst_15 : f32 to vector<1x128xf32>
      %21 = arith.mulf %17, %20 : vector<1x128xf32>
      %22 = arith.mulf %19, %19 : vector<1x128xf32>
      %23 = arith.subf %21, %22 : vector<1x128xf32>
      %cst_16 = arith.constant 9.99999974E-6 : f32
      %24 = vector.broadcast %cst_16 : f32 to vector<1x128xf32>
      %25 = arith.addf %23, %24 : vector<1x128xf32>
      %26 = math.rsqrt %25 : vector<1x128xf32>
      %c0_17 = arith.constant 0 : index
      %c0_18 = arith.constant 0 : index
      %27 = vector.load %arg4[%c0_17, %c0_18] : memref<1x128xf32, #tpu.memory_space<vmem>>, vector<1x128xf32>
      %28 = arith.mulf %26, %27 : vector<1x128xf32>
      %29 = vector.broadcast %19 : vector<1x128xf32> to vector<2x128xf32>
      %30 = arith.subf %12, %29 : vector<2x128xf32>
      %31 = vector.broadcast %28 : vector<1x128xf32> to vector<2x128xf32>
      %32 = arith.mulf %30, %31 : vector<2x128xf32>
      %c0_19 = arith.constant 0 : index
      %c0_20 = arith.constant 0 : index
      %33 = vector.load %arg5[%c0_19, %c0_20] : memref<1x128xf32, #tpu.memory_space<vmem>>, vector<1x128xf32>
      %34 = vector.broadcast %33 : vector<1x128xf32> to vector<2x128xf32>
      %35 = arith.addf %32, %34 : vector<2x128xf32>
      %c0_21 = arith.constant 0 : index
      %c0_22 = arith.constant 0 : index
      %36 = vector.load %arg6[%c0_21, %c0_22] : memref<2x128xf32, #tpu.memory_space<vmem>>, vector<2x128xf32>
      tpu.vector_store %arg6[%c0_21, %c0_22], %35 {strides = array<i32>} : memref<2x128xf32, #tpu.memory_space<vmem>>, vector<2x128xf32>,
    } else {
    }
    return
  }
  func.func @transform_0(%arg0: i32, %arg1: i32) -> (i32, i32) {
    %c0_i32 = arith.constant 0 : i32
    %c0_i32_0 = arith.constant 0 : i32
    return %c0_i32, %arg1 : i32, i32
  }
  func.func @transform_1(%arg0: i32, %arg1: i32) -> (i32, i32) {
    %c0_i32 = arith.constant 0 : i32
    return %arg1, %arg0 : i32, i32
  }
  func.func @transform_2(%arg0: i32, %arg1: i32) -> (i32, i32) {
    %c0_i32 = arith.constant 0 : i32
    %c0_i32_0 = arith.constant 0 : i32
    return %c0_i32, %arg0 : i32, i32
  }
  func.func @transform_3(%arg0: i32, %arg1: i32) -> (i32, i32) {
    %c0_i32 = arith.constant 0 : i32
    %c0_i32_0 = arith.constant 0 : i32
    return %c0_i32, %arg0 : i32, i32
  }
  func.func @transform_4(%arg0: i32, %arg1: i32) -> (i32, i32) {
    %c0_i32 = arith.constant 0 : i32
    %c0_i32_0 = arith.constant 0 : i32
    return %c0_i32, %arg0 : i32, i32
  }
}

module attributes {stable_mosaic.version = 11 : i64} {
  func.func @_conv_bn_act_kernel(%arg0: i32, %arg1: i32, %arg2: memref<2x512xbf16, #tpu.memory_space<vmem>>, %arg3: memref<512x128xbf16, #tpu.memory_space<vmem>>, %arg4: memref<1x128xf32, #tpu.memory_space<vmem>>, %arg5: memref<1x128xf32, #tpu.memory_space<vmem>>, %arg6: memref<2x128xf32, #tpu.memory_space<vmem>>, %arg7: memref<2x128xf32, #tpu.memory_space<vmem>>, %arg8: memref<2x128xf32, #tpu.memory_space<vmem>>) attributes {dimension_semantics = [#tpu.dimension_semantics<parallel>, #tpu.dimension_semantics<arbitrary>], iteration_bounds = array<i64: 4, 9>, scalar_prefetch = 0 : i64, scratch_operands = 1 : i64, tpu.core_type = #tpu.core_type<tc>, window_params = [{transform_indices = @transform_0, window_bounds = array<i64: 2, 512>}, {transform_indices = @transform_1, window_bounds = array<i64: 512, 128>}, {transform_indices = @transform_2, window_bounds = array<i64: 1, 128>}, {transform_indices = @transform_3, window_bounds = array<i64: 1, 128>}, {transform_indices = @transform_4, window_bounds = array<i64: 2, 128>}, {transform_indices = @transform_5, window_bounds = array<i64: 2, 128>}]} {
    %c0_i32 = arith.constant 0 : i32
    %0 = arith.cmpi eq, %arg1, %c0_i32 : i32
    %1 = arith.extui %0 : i1 to i32
    %c0_i32_0 = arith.constant 0 : i32
    %2 = arith.cmpi ne, %1, %c0_i32_0 : i32
    scf.if %2 {
      %cst_9 = arith.constant 0.000000e+00 : f32
      %12 = vector.broadcast %cst_9 : f32 to vector<2x128xf32>
      %c0_10 = arith.constant 0 : index
      %c0_11 = arith.constant 0 : index
      %13 = vector.load %arg8[%c0_10, %c0_11] : memref<2x128xf32, #tpu.memory_space<vmem>>, vector<2x128xf32>
      tpu.vector_store %arg8[%c0_10, %c0_11], %12 {strides = array<i32>} : memref<2x128xf32, #tpu.memory_space<vmem>>, vector<2x128xf32>,
    } else {
    }
    %c0 = arith.constant 0 : index
    %c0_1 = arith.constant 0 : index
    %3 = vector.load %arg8[%c0, %c0_1] : memref<2x128xf32, #tpu.memory_space<vmem>>, vector<2x128xf32>
    %c0_2 = arith.constant 0 : index
    %c0_3 = arith.constant 0 : index
    %4 = vector.load %arg2[%c0_2, %c0_3] : memref<2x512xbf16, #tpu.memory_space<vmem>>, vector<2x512xbf16>
    %c0_4 = arith.constant 0 : index
    %c0_5 = arith.constant 0 : index
    %5 = vector.load %arg3[%c0_4, %c0_5] : memref<512x128xbf16, #tpu.memory_space<vmem>>, vector<512x128xbf16>
    %cst = arith.constant dense<0.000000e+00> : vector<2x128xf32>
    %6 = tpu.matmul %4, %5, %cst {dimension_numbers = #tpu.dot_dimension_numbers<[1], [0], [0], [1], [0, 0, 1, 1], [], []>} : vector<2x512xbf16>, vector<512x128xbf16>, vector<2x128xf32> -> vector<2x128xf32>
    %7 = arith.addf %3, %6 : vector<2x128xf32>
    %c0_6 = arith.constant 0 : index
    %c0_7 = arith.constant 0 : index
    %8 = vector.load %arg8[%c0_6, %c0_7] : memref<2x128xf32, #tpu.memory_space<vmem>>, vector<2x128xf32>
    tpu.vector_store %arg8[%c0_6, %c0_7], %7 {strides = array<i32>} : memref<2x128xf32, #tpu.memory_space<vmem>>, vector<2x128xf32>,
    %c8_i32 = arith.constant 8 : i32
    %9 = arith.cmpi eq, %arg1, %c8_i32 : i32
    %10 = arith.extui %9 : i1 to i32
    %c0_i32_8 = arith.constant 0 : i32
    %11 = arith.cmpi ne, %10, %c0_i32_8 : i32
    scf.if %11 {
      %c0_9 = arith.constant 0 : index
      %c0_10 = arith.constant 0 : index
      %12 = vector.load %arg8[%c0_9, %c0_10] : memref<2x128xf32, #tpu.memory_space<vmem>>, vector<2x128xf32>
      %cst_11 = arith.constant dense<0.000000e+00> : vector<128xf32>
      %13 = vector.multi_reduction <add>, %12, %cst_11 [0] : vector<2x128xf32> to vector<128xf32>
      %14 = vector.shape_cast %13 : vector<128xf32> to vector<1x128xf32>
      %15 = arith.mulf %12, %12 : vector<2x128xf32>
      %cst_12 = arith.constant dense<0.000000e+00> : vector<128xf32>
      %16 = vector.multi_reduction <add>, %15, %cst_12 [0] : vector<2x128xf32> to vector<128xf32>
      %17 = vector.shape_cast %16 : vector<128xf32> to vector<1x128xf32>
      %cst_13 = arith.constant 5.000000e-01 : f32
      %18 = vector.broadcast %cst_13 : f32 to vector<1x128xf32>
      %19 = arith.mulf %14, %18 : vector<1x128xf32>
      %cst_14 = arith.constant 5.000000e-01 : f32
      %20 = vector.broadcast %cst_14 : f32 to vector<1x128xf32>
      %21 = arith.mulf %17, %20 : vector<1x128xf32>
      %22 = arith.mulf %19, %19 : vector<1x128xf32>
      %23 = arith.subf %21, %22 : vector<1x128xf32>
      %cst_15 = arith.constant 9.99999974E-6 : f32
      %24 = vector.broadcast %cst_15 : f32 to vector<1x128xf32>
      %25 = arith.addf %23, %24 : vector<1x128xf32>
      %26 = math.rsqrt %25 : vector<1x128xf32>
      %c0_16 = arith.constant 0 : index
      %c0_17 = arith.constant 0 : index
      %27 = vector.load %arg4[%c0_16, %c0_17] : memref<1x128xf32, #tpu.memory_space<vmem>>, vector<1x128xf32>
      %28 = arith.mulf %26, %27 : vector<1x128xf32>
      %29 = vector.broadcast %19 : vector<1x128xf32> to vector<2x128xf32>
      %30 = arith.subf %12, %29 : vector<2x128xf32>
      %31 = vector.broadcast %28 : vector<1x128xf32> to vector<2x128xf32>
      %32 = arith.mulf %30, %31 : vector<2x128xf32>
      %c0_18 = arith.constant 0 : index
      %c0_19 = arith.constant 0 : index
      %33 = vector.load %arg5[%c0_18, %c0_19] : memref<1x128xf32, #tpu.memory_space<vmem>>, vector<1x128xf32>
      %34 = vector.broadcast %33 : vector<1x128xf32> to vector<2x128xf32>
      %35 = arith.addf %32, %34 : vector<2x128xf32>
      %c0_20 = arith.constant 0 : index
      %c0_21 = arith.constant 0 : index
      %36 = vector.load %arg6[%c0_20, %c0_21] : memref<2x128xf32, #tpu.memory_space<vmem>>, vector<2x128xf32>
      %37 = arith.addf %35, %36 : vector<2x128xf32>
      %cst_22 = arith.constant 0.000000e+00 : f32
      %38 = vector.broadcast %cst_22 : f32 to vector<2x128xf32>
      %39 = arith.maximumf %37, %38 : vector<2x128xf32>
      %c0_23 = arith.constant 0 : index
      %c0_24 = arith.constant 0 : index
      %40 = vector.load %arg7[%c0_23, %c0_24] : memref<2x128xf32, #tpu.memory_space<vmem>>, vector<2x128xf32>
      tpu.vector_store %arg7[%c0_23, %c0_24], %39 {strides = array<i32>} : memref<2x128xf32, #tpu.memory_space<vmem>>, vector<2x128xf32>,
    } else {
    }
    return
  }
  func.func @transform_0(%arg0: i32, %arg1: i32) -> (i32, i32) {
    %c0_i32 = arith.constant 0 : i32
    %c0_i32_0 = arith.constant 0 : i32
    return %c0_i32, %arg1 : i32, i32
  }
  func.func @transform_1(%arg0: i32, %arg1: i32) -> (i32, i32) {
    %c0_i32 = arith.constant 0 : i32
    return %arg1, %arg0 : i32, i32
  }
  func.func @transform_2(%arg0: i32, %arg1: i32) -> (i32, i32) {
    %c0_i32 = arith.constant 0 : i32
    %c0_i32_0 = arith.constant 0 : i32
    return %c0_i32, %arg0 : i32, i32
  }
  func.func @transform_3(%arg0: i32, %arg1: i32) -> (i32, i32) {
    %c0_i32 = arith.constant 0 : i32
    %c0_i32_0 = arith.constant 0 : i32
    return %c0_i32, %arg0 : i32, i32
  }
  func.func @transform_4(%arg0: i32, %arg1: i32) -> (i32, i32) {
    %c0_i32 = arith.constant 0 : i32
    %c0_i32_0 = arith.constant 0 : i32
    return %c0_i32, %arg0 : i32, i32
  }
  func.func @transform_5(%arg0: i32, %arg1: i32) -> (i32, i32) {
    %c0_i32 = arith.constant 0 : i32
    %c0_i32_0 = arith.constant 0 : i32
    return %c0_i32, %arg0 : i32, i32
  }
}

</mosaic_0001>

<bundles_post_ra>
// kernel: _lambda_.14
= control target key start
LH: loop header
LB: loop body
LE: loop exit
PB: predicated region body
PF: predicated region fallthrough
CT: control target
= control target key end

     0   :  { %vm304_vm0 = vcmask 523264   ;;  %s871_s0 = inlined_call_operand.vmem [shape: f32[128,64], index: 0, kind: input, shape index: {}]   ;;  %s872_s1 = inlined_call_operand.vmem [shape: f32[128,64], index: 1, kind: input, shape index: {}]   ;;  %s873_s2 = inlined_call_operand.vmem [shape: f32[128,64], index: 2, kind: input, shape index: {}]   ;;  %s874_s3 = inlined_call_operand.vmem [shape: f32[128,64], index: 3, kind: input, shape index: {}]   ;;  %s875_s4 = inlined_call_operand.vmem [shape: f32[128,64], index: 4, kind: input, shape index: {}]   ;;  %s876_s5 = inlined_call_operand.vmem [shape: f32[128,64], index: 5, kind: input, shape index: {}]   ;;  %s877_s6 = inlined_call_operand.vmem [shape: f32[128,64], index: 6, kind: input, shape index: {}]   ;;  %s878_s7 = inlined_call_operand.vmem [shape: f32[128,64], index: 7, kind: input, shape index: {}]   ;;  %s879_s8 = inlined_call_operand.vmem [shape: f32[128,64], index: 8, kind: input, shape index: {}]   ;;  %s880_s9 = inlined_call_operand.vmem [shape: f32[128,64], index: 9, kind: output, shape index: {}]  }
   0x1   :  { %v32_v0 = vld [vmem:[%s871_s0] sm:$0xff]  ;;  %v33_v6 = vld [vmem:[%s871_s0 + $0x8] sm:$0xff]  ;;  %v34_v15 = vld [vmem:[%s871_s0 + $0x10] sm:$0xff] }
   0x2   :  { %v48_v1 = vld [vmem:[%s872_s1] sm:$0xff]  ;;  %v49_v7 = vld [vmem:[%s872_s1 + $0x8] sm:$0xff]  ;;  %v50_v16 = vld [vmem:[%s872_s1 + $0x10] sm:$0xff] }
   0x3   :  { %v80_v2 = vld [vmem:[%s873_s2] sm:$0xff]  ;;  %v64_v3 = vmax.f32 %v32_v0, %v48_v1  ;;  %v81_v8 = vld [vmem:[%s873_s2 + $0x8] sm:$0xff]  ;;  %v65_v10 = vmax.f32 %v33_v6, %v49_v7  ;;  %v82_v17 = vld [vmem:[%s873_s2 + $0x10] sm:$0xff]  ;;  %v66_v20 = vmax.f32 %v34_v15, %v50_v16 }
   0x4   :  { %v112_v4 = vld [vmem:[%s874_s3] sm:$0xff]  ;;  %v113_v13 = vld [vmem:[%s874_s3 + $0x8] sm:$0xff]  ;;  %v114_v24 = vld [vmem:[%s874_s3 + $0x10] sm:$0xff] }
   0x5   :  { %v96_v5 = vmax.f32 %v64_v3, %v80_v2  ;;  %v144_v9 = vld [vmem:[%s875_s4] sm:$0xff]  ;;  %v97_v14 = vmax.f32 %v65_v10, %v81_v8  ;;  %v145_v19 = vld [vmem:[%s875_s4 + $0x8] sm:$0xff]  ;;  %v98_v26 = vmax.f32 %v66_v20, %v82_v17  ;;  %v35_v27 = vld [vmem:[%s871_s0 + $0x18] sm:$0xff] }
   0x6   :  { %v176_v12 = vld [vmem:[%s876_s5] sm:$0xff]  ;;  %v177_v23 = vld [vmem:[%s876_s5 + $0x8] sm:$0xff]  ;;  %v51_v28 = vld [vmem:[%s872_s1 + $0x18] sm:$0xff] }
   0x7   :  { %v128_v11 = vmax.f32 %v96_v5, %v112_v4  ;;  %v208_v21 = vld [vmem:[%s877_s6] sm:$0xff]  ;;  %v129_v22 = vmax.f32 %v97_v14, %v113_v13  ;;  %v83_v29 = vld [vmem:[%s873_s2 + $0x18] sm:$0xff]  ;;  %v146_v33 = vld [vmem:[%s875_s4 + $0x10] sm:$0xff]  ;;  %v67_v34 = vmax.f32 %v35_v27, %v51_v28  ;;  %v130_v37 = vmax.f32 %v98_v26, %v114_v24 }
   0x8   :  { %v240_v30 = vld [vmem:[%s878_s7] sm:$0xff]  ;;  %v209_v36 = vld [vmem:[%s877_s6 + $0x8] sm:$0xff]  ;;  %v178_v38 = vld [vmem:[%s876_s5 + $0x10] sm:$0xff] }
   0x9   :  { %v160_v18 = vmax.f32 %v128_v11, %v144_v9  ;;  %v272_v31 = vld [vmem:[%s879_s8] sm:$0xff]  ;;  %v161_v32 = vmax.f32 %v129_v22, %v145_v19  ;;  %v115_v39 = vld [vmem:[%s874_s3 + $0x18] sm:$0xff]  ;;  %v99_v41 = vmax.f32 %v67_v34, %v83_v29  ;;  %v241_v46 = vld [vmem:[%s878_s7 + $0x8] sm:$0xff]  ;;  %v162_v48 = vmax.f32 %v130_v37, %v146_v33 }
   0xa   :  { %v36_v42 = vld [vmem:[%s871_s0 + $0x20] sm:$0xff]  ;;  %v273_v47 = vld [vmem:[%s879_s8 + $0x8] sm:$0xff]  ;;  %v147_v49 = vld [vmem:[%s875_s4 + $0x18] sm:$0xff] }
   0xb   :  { %v192_v25 = vmax.f32 %v160_v18, %v176_v12  ;;  %v193_v40 = vmax.f32 %v161_v32, %v177_v23  ;;  %v52_v43 = vld [vmem:[%s872_s1 + $0x20] sm:$0xff]  ;;  %v210_v52 = vld [vmem:[%s877_s6 + $0x10] sm:$0xff]  ;;  %v131_v53 = vmax.f32 %v99_v41, %v115_v39  ;;  %v179_v54 = vld [vmem:[%s876_s5 + $0x18] sm:$0xff]  ;;  %v194_v57 = vmax.f32 %v162_v48, %v178_v38 }
   0xc   :  { %v84_v44 = vld [vmem:[%s873_s2 + $0x20] sm:$0xff]  ;;  %v68_v50 = vmax.f32 %v36_v42, %v52_v43  ;;  %v37_v59 = vld [vmem:[%s871_s0 + $0x28] sm:$0xff]  ;;  %v242_v63 = vld [vmem:[%s878_s7 + $0x10] sm:$0xff] }
   0xd   :  { %v224_v35 = vmax.f32 %v192_v25, %v208_v21  ;;  %v225_v51 = vmax.f32 %v193_v40, %v209_v36  ;;  %v116_v55 = vld [vmem:[%s874_s3 + $0x20] sm:$0xff]  ;;  %v53_v60 = vld [vmem:[%s872_s1 + $0x28] sm:$0xff]  ;;  %v274_v0 = vld [vmem:[%s879_s8 + $0x10] sm:$0xff]  ;;  %v163_v1 = vmax.f32 %v131_v53, %v147_v49  ;;  %v226_v4 = vmax.f32 %v194_v57, %v210_v52 }
   0xe   :  { %v100_v58 = vmax.f32 %v68_v50, %v84_v44  ;;  %v85_v61 = vld [vmem:[%s873_s2 + $0x28] sm:$0xff]  ;;  %v148_v2 = vld [vmem:[%s875_s4 + $0x20] sm:$0xff]  ;;  %v69_v3 = vmax.f32 %v37_v59, %v53_v60  ;;  %v211_v5 = vld [vmem:[%s877_s6 + $0x18] sm:$0xff] }
   0xf   :  { %v256_v45 = vmax.f32 %v224_v35, %v240_v30  ;;  %v257_v62 = vmax.f32 %v225_v51, %v241_v46  ;;  %v180_v7 = vld [vmem:[%s876_s5 + $0x20] sm:$0xff]  ;;  %v117_v8 = vld [vmem:[%s874_s3 + $0x28] sm:$0xff]  ;;  %v195_v10 = vmax.f32 %v163_v1, %v179_v54  ;;  %v38_v12 = vld [vmem:[%s871_s0 + $0x30] sm:$0xff]  ;;  %v258_v15 = vmax.f32 %v226_v4, %v242_v63 }
  0x10   :  { %v132_v6 = vmax.f32 %v100_v58, %v116_v55  ;;  %v101_v11 = vmax.f32 %v69_v3, %v85_v61  ;;  %v54_v13 = vld [vmem:[%s872_s1 + $0x30] sm:$0xff]  ;;  %v243_v16 = vld [vmem:[%s878_s7 + $0x18] sm:$0xff]  ;;  %v149_v19 = vld [vmem:[%s875_s4 + $0x28] sm:$0xff] }
  0x11   :  { %v288_v56 = vmax.f32 %v256_v45, %v272_v31  ;;  %v289_v9 = vmax.f32 %v257_v62, %v273_v47  ;;  %v86_v14 = vld [vmem:[%s873_s2 + $0x30] sm:$0xff]  ;;  %v275_v17 = vld [vmem:[%s879_s8 + $0x18] sm:$0xff]  ;;  %v70_v20 = vmax.f32 %v38_v12, %v54_v13  ;;  %v227_v21 = vmax.f32 %v195_v10, %v211_v5  ;;  %v212_v22 = vld [vmem:[%s877_s6 + $0x20] sm:$0xff] }
  0x12   :  { %v164_v18 = vmax.f32 %v132_v6, %v148_v2  ;;  %v133_v23 = vmax.f32 %v101_v11, %v117_v8  ;;  %v181_v24 = vld [vmem:[%s876_s5 + $0x28] sm:$0xff]  ;;  %v118_v25 = vld [vmem:[%s874_s3 + $0x30] sm:$0xff]  ;;  %v290_v26 = vmax.f32 %v258_v15, %v274_v0  ;;  %v39_v29 = vld [vmem:[%s871_s0 + $0x38] sm:$0xff] }
  0x13   :  { %305 = vst.msk [vmem:[%s880_s9] sm:$0xff] %vm304_vm0, %v288_v56  ;;  %306 = vst.msk [vmem:[%s880_s9 + $0x8] sm:$0xff] %vm304_vm0, %v289_v9  ;;  %v102_v28 = vmax.f32 %v70_v20, %v86_v14  ;;  %v55_v30 = vld [vmem:[%s872_s1 + $0x38] sm:$0xff]  ;;  %v259_v32 = vmax.f32 %v227_v21, %v243_v16  ;;  %v244_v33 = vld [vmem:[%s878_s7 + $0x20] sm:$0xff] }
  0x14   :  { %v196_v27 = vmax.f32 %v164_v18, %v180_v7  ;;  %v87_v31 = vld [vmem:[%s873_s2 + $0x38] sm:$0xff]  ;;  %v276_v34 = vld [vmem:[%s879_s8 + $0x20] sm:$0xff]  ;;  %v165_v35 = vmax.f32 %v133_v23, %v149_v19  ;;  %v150_v36 = vld [vmem:[%s875_s4 + $0x30] sm:$0xff]  ;;  %v71_v37 = vmax.f32 %v39_v29, %v55_v30  ;;  %307 = vst.msk [vmem:[%s880_s9 + $0x10] sm:$0xff] %vm304_vm0, %v290_v26 }
  0x15   :  { %v213_v39 = vld [vmem:[%s877_s6 + $0x28] sm:$0xff]  ;;  %v134_v40 = vmax.f32 %v102_v28, %v118_v25  ;;  %v182_v41 = vld [vmem:[%s876_s5 + $0x30] sm:$0xff]  ;;  %v119_v42 = vld [vmem:[%s874_s3 + $0x38] sm:$0xff]  ;;  %v291_v43 = vmax.f32 %v259_v32, %v275_v17 }
  0x16   :  { %v228_v38 = vmax.f32 %v196_v27, %v212_v22  ;;  %v197_v44 = vmax.f32 %v165_v35, %v181_v24  ;;  %v103_v45 = vmax.f32 %v71_v37, %v87_v31  ;;  %v40_v46 = vld [vmem:[%s871_s0 + $0x40] sm:$0xff]  ;;  %v245_v50 = vld [vmem:[%s878_s7 + $0x28] sm:$0xff]  ;;  %v151_v53 = vld [vmem:[%s875_s4 + $0x38] sm:$0xff] }
  0x17   :  { %v56_v47 = vld [vmem:[%s872_s1 + $0x40] sm:$0xff]  ;;  %v277_v51 = vld [vmem:[%s879_s8 + $0x28] sm:$0xff]  ;;  %v166_v52 = vmax.f32 %v134_v40, %v150_v36  ;;  %308 = vst.msk [vmem:[%s880_s9 + $0x18] sm:$0xff] %vm304_vm0, %v291_v43  ;;  %v214_v56 = vld [vmem:[%s877_s6 + $0x30] sm:$0xff] }
  0x18   :  { %v88_v48 = vld [vmem:[%s873_s2 + $0x40] sm:$0xff]  ;;  %v260_v49 = vmax.f32 %v228_v38, %v244_v33  ;;  %v72_v54 = vmax.f32 %v40_v46, %v56_v47  ;;  %v229_v55 = vmax.f32 %v197_v44, %v213_v39  ;;  %v135_v57 = vmax.f32 %v103_v45, %v119_v42  ;;  %v183_v58 = vld [vmem:[%s876_s5 + $0x38] sm:$0xff]  ;;  %v41_v63 = vld [vmem:[%s871_s0 + $0x48] sm:$0xff] }
  0x19   :  { %v120_v59 = vld [vmem:[%s874_s3 + $0x40] sm:$0xff]  ;;  %v198_v61 = vmax.f32 %v166_v52, %v182_v41  ;;  %v57_v0 = vld [vmem:[%s872_s1 + $0x48] sm:$0xff]  ;;  %v246_v3 = vld [vmem:[%s878_s7 + $0x30] sm:$0xff] }
  0x1a   :  { %v292_v60 = vmax.f32 %v260_v49, %v276_v34  ;;  %v104_v62 = vmax.f32 %v72_v54, %v88_v48  ;;  %v89_v1 = vld [vmem:[%s873_s2 + $0x48] sm:$0xff]  ;;  %v261_v2 = vmax.f32 %v229_v55, %v245_v50  ;;  %v278_v4 = vld [vmem:[%s879_s8 + $0x30] sm:$0xff]  ;;  %v167_v5 = vmax.f32 %v135_v57, %v151_v53  ;;  %v152_v6 = vld [vmem:[%s875_s4 + $0x40] sm:$0xff] }
  0x1b   :  { %v73_v7 = vmax.f32 %v41_v63, %v57_v0  ;;  %v230_v8 = vmax.f32 %v198_v61, %v214_v56  ;;  %v215_v9 = vld [vmem:[%s877_s6 + $0x38] sm:$0xff]  ;;  %v184_v11 = vld [vmem:[%s876_s5 + $0x40] sm:$0xff]  ;;  %v121_v12 = vld [vmem:[%s874_s3 + $0x48] sm:$0xff] }
  0x1c   :  { %309 = vst.msk [vmem:[%s880_s9 + $0x20] sm:$0xff] %vm304_vm0, %v292_v60  ;;  %v136_v10 = vmax.f32 %v104_v62, %v120_v59  ;;  %v293_v13 = vmax.f32 %v261_v2, %v277_v51  ;;  %v199_v14 = vmax.f32 %v167_v5, %v183_v58  ;;  %v42_v16 = vld [vmem:[%s871_s0 + $0x50] sm:$0xff]  ;;  %v247_v20 = vld [vmem:[%s878_s7 + $0x38] sm:$0xff]  ;;  %v153_v23 = vld [vmem:[%s875_s4 + $0x48] sm:$0xff] }
  0x1d   :  { %v105_v15 = vmax.f32 %v73_v7, %v89_v1  ;;  %v58_v17 = vld [vmem:[%s872_s1 + $0x50] sm:$0xff]  ;;  %v262_v19 = vmax.f32 %v230_v8, %v246_v3  ;;  %v279_v21 = vld [vmem:[%s879_s8 + $0x38] sm:$0xff]  ;;  %v216_v26 = vld [vmem:[%s877_s6 + $0x40] sm:$0xff] }
  0x1e   :  { %v90_v18 = vld [vmem:[%s873_s2 + $0x50] sm:$0xff]  ;;  %v168_v22 = vmax.f32 %v136_v10, %v152_v6  ;;  %v74_v24 = vmax.f32 %v42_v16, %v58_v17  ;;  %310 = vst.msk [vmem:[%s880_s9 + $0x28] sm:$0xff] %vm304_vm0, %v293_v13  ;;  %v231_v25 = vmax.f32 %v199_v14, %v215_v9  ;;  %v185_v28 = vld [vmem:[%s876_s5 + $0x48] sm:$0xff]  ;;  %v43_v33 = vld [vmem:[%s871_s0 + $0x58] sm:$0xff] }
  0x1f   :  { %v137_v27 = vmax.f32 %v105_v15, %v121_v12  ;;  %v122_v29 = vld [vmem:[%s874_s3 + $0x50] sm:$0xff]  ;;  %v294_v30 = vmax.f32 %v262_v19, %v278_v4  ;;  %v59_v34 = vld [vmem:[%s872_s1 + $0x58] sm:$0xff]  ;;  %v248_v37 = vld [vmem:[%s878_s7 + $0x40] sm:$0xff] }
  0x20   :  { %v200_v31 = vmax.f32 %v168_v22, %v184_v11  ;;  %v106_v32 = vmax.f32 %v74_v24, %v90_v18  ;;  %v91_v35 = vld [vmem:[%s873_s2 + $0x58] sm:$0xff]  ;;  %v263_v36 = vmax.f32 %v231_v25, %v247_v20  ;;  %v280_v38 = vld [vmem:[%s879_s8 + $0x40] sm:$0xff]  ;;  %v154_v40 = vld [vmem:[%s875_s4 + $0x50] sm:$0xff]  ;;  %v75_v41 = vmax.f32 %v43_v33, %v59_v34 }
  0x21   :  { %v169_v39 = vmax.f32 %v137_v27, %v153_v23  ;;  %311 = vst.msk [vmem:[%s880_s9 + $0x30] sm:$0xff] %vm304_vm0, %v294_v30  ;;  %v217_v43 = vld [vmem:[%s877_s6 + $0x48] sm:$0xff]  ;;  %v186_v45 = vld [vmem:[%s876_s5 + $0x50] sm:$0xff]  ;;  %v123_v46 = vld [vmem:[%s874_s3 + $0x58] sm:$0xff] }
  0x22   :  { %v232_v42 = vmax.f32 %v200_v31, %v216_v26  ;;  %v138_v44 = vmax.f32 %v106_v32, %v122_v29  ;;  %v295_v47 = vmax.f32 %v263_v36, %v279_v21  ;;  %v107_v49 = vmax.f32 %v75_v41, %v91_v35  ;;  %v44_v50 = vld [vmem:[%s871_s0 + $0x60] sm:$0xff]  ;;  %v249_v54 = vld [vmem:[%s878_s7 + $0x48] sm:$0xff]  ;;  %v155_v57 = vld [vmem:[%s875_s4 + $0x58] sm:$0xff] }
  0x23   :  { %v201_v48 = vmax.f32 %v169_v39, %v185_v28  ;;  %v60_v51 = vld [vmem:[%s872_s1 + $0x60] sm:$0xff]  ;;  %v281_v55 = vld [vmem:[%s879_s8 + $0x48] sm:$0xff]  ;;  %v218_v60 = vld [vmem:[%s877_s6 + $0x50] sm:$0xff] }
  0x24   :  { %v92_v52 = vld [vmem:[%s873_s2 + $0x60] sm:$0xff]  ;;  %v264_v53 = vmax.f32 %v232_v42, %v248_v37  ;;  %v170_v56 = vmax.f32 %v138_v44, %v154_v40  ;;  %v76_v58 = vmax.f32 %v44_v50, %v60_v51  ;;  %312 = vst.msk [vmem:[%s880_s9 + $0x38] sm:$0xff] %vm304_vm0, %v295_v47  ;;  %v139_v61 = vmax.f32 %v107_v49, %v123_v46  ;;  %v187_v62 = vld [vmem:[%s876_s5 + $0x58] sm:$0xff]  ;;  %v45_v3 = vld [vmem:[%s871_s0 + $0x68] sm:$0xff] }
  0x25   :  { %v233_v59 = vmax.f32 %v201_v48, %v217_v43  ;;  %v124_v63 = vld [vmem:[%s874_s3 + $0x60] sm:$0xff]  ;;  %v61_v4 = vld [vmem:[%s872_s1 + $0x68] sm:$0xff]  ;;  %v250_v7 = vld [vmem:[%s878_s7 + $0x50] sm:$0xff] }
  0x26   :  { %v296_v0 = vmax.f32 %v264_v53, %v280_v38  ;;  %v202_v1 = vmax.f32 %v170_v56, %v186_v45  ;;  %v108_v2 = vmax.f32 %v76_v58, %v92_v52  ;;  %v93_v5 = vld [vmem:[%s873_s2 + $0x68] sm:$0xff]  ;;  %v282_v8 = vld [vmem:[%s879_s8 + $0x50] sm:$0xff]  ;;  %v171_v9 = vmax.f32 %v139_v61, %v155_v57  ;;  %v156_v10 = vld [vmem:[%s875_s4 + $0x60] sm:$0xff] }
  0x27   :  { %v265_v6 = vmax.f32 %v233_v59, %v249_v54  ;;  %v77_v11 = vmax.f32 %v45_v3, %v61_v4  ;;  %v219_v13 = vld [vmem:[%s877_s6 + $0x58] sm:$0xff]  ;;  %v188_v15 = vld [vmem:[%s876_s5 + $0x60] sm:$0xff]  ;;  %v125_v16 = vld [vmem:[%s874_s3 + $0x68] sm:$0xff] }
  0x28   :  { %313 = vst.msk [vmem:[%s880_s9 + $0x40] sm:$0xff] %vm304_vm0, %v296_v0  ;;  %v234_v12 = vmax.f32 %v202_v1, %v218_v60  ;;  %v140_v14 = vmax.f32 %v108_v2, %v124_v63  ;;  %v203_v18 = vmax.f32 %v171_v9, %v187_v62  ;;  %v46_v20 = vld [vmem:[%s871_s0 + $0x70] sm:$0xff]  ;;  %v251_v24 = vld [vmem:[%s878_s7 + $0x58] sm:$0xff]  ;;  %v157_v27 = vld [vmem:[%s875_s4 + $0x68] sm:$0xff] }
  0x29   :  { %v297_v17 = vmax.f32 %v265_v6, %v281_v55  ;;  %v109_v19 = vmax.f32 %v77_v11, %v93_v5  ;;  %v62_v21 = vld [vmem:[%s872_s1 + $0x70] sm:$0xff]  ;;  %v283_v25 = vld [vmem:[%s879_s8 + $0x58] sm:$0xff]  ;;  %v220_v30 = vld [vmem:[%s877_s6 + $0x60] sm:$0xff] }
  0x2a   :  { %v94_v22 = vld [vmem:[%s873_s2 + $0x70] sm:$0xff]  ;;  %v266_v23 = vmax.f32 %v234_v12, %v250_v7  ;;  %v172_v26 = vmax.f32 %v140_v14, %v156_v10  ;;  %v78_v28 = vmax.f32 %v46_v20, %v62_v21  ;;  %v235_v29 = vmax.f32 %v203_v18, %v219_v13  ;;  %v189_v32 = vld [vmem:[%s876_s5 + $0x68] sm:$0xff]  ;;  %v47_v37 = vld [vmem:[%s871_s0 + $0x78] sm:$0xff] }
  0x2b   :  { %314 = vst.msk [vmem:[%s880_s9 + $0x48] sm:$0xff] %vm304_vm0, %v297_v17  ;;  %v141_v31 = vmax.f32 %v109_v19, %v125_v16  ;;  %v126_v33 = vld [vmem:[%s874_s3 + $0x70] sm:$0xff]  ;;  %v63_v38 = vld [vmem:[%s872_s1 + $0x78] sm:$0xff]  ;;  %v252_v41 = vld [vmem:[%s878_s7 + $0x60] sm:$0xff] }
  0x2c   :  { %v298_v34 = vmax.f32 %v266_v23, %v282_v8  ;;  %v204_v35 = vmax.f32 %v172_v26, %v188_v15  ;;  %v110_v36 = vmax.f32 %v78_v28, %v94_v22  ;;  %v95_v39 = vld [vmem:[%s873_s2 + $0x78] sm:$0xff]  ;;  %v267_v40 = vmax.f32 %v235_v29, %v251_v24  ;;  %v158_v43 = vld [vmem:[%s875_s4 + $0x70] sm:$0xff]  ;;  %v221_v46 = vld [vmem:[%s877_s6 + $0x68] sm:$0xff] }
  0x2d   :  { %v173_v42 = vmax.f32 %v141_v31, %v157_v27  ;;  %v79_v44 = vmax.f32 %v47_v37, %v63_v38  ;;  %v127_v48 = vld [vmem:[%s874_s3 + $0x78] sm:$0xff]  ;;  %v284_v50 = vld [vmem:[%s879_s8 + $0x60] sm:$0xff]  ;;  %v190_v52 = vld [vmem:[%s876_s5 + $0x70] sm:$0xff] }
  0x2e   :  { %315 = vst.msk [vmem:[%s880_s9 + $0x50] sm:$0xff] %vm304_vm0, %v298_v34  ;;  %v236_v45 = vmax.f32 %v204_v35, %v220_v30  ;;  %v142_v47 = vmax.f32 %v110_v36, %v126_v33  ;;  %v299_v49 = vmax.f32 %v267_v40, %v283_v25  ;;  %v253_v55 = vld [vmem:[%s878_s7 + $0x68] sm:$0xff]  ;;  %v159_v57 = vld [vmem:[%s875_s4 + $0x78] sm:$0xff]  ;;  %v222_v59 = vld [vmem:[%s877_s6 + $0x70] sm:$0xff] }
  0x2f   :  { %v205_v51 = vmax.f32 %v173_v42, %v189_v32  ;;  %v111_v53 = vmax.f32 %v79_v44, %v95_v39  ;;  %v285_v62 = vld [vmem:[%s879_s8 + $0x68] sm:$0xff]  ;;  %v191_v0 = vld [vmem:[%s876_s5 + $0x78] sm:$0xff]  ;;  %v254_v2 = vld [vmem:[%s878_s7 + $0x70] sm:$0xff] }
  0x30   :  { %v268_v54 = vmax.f32 %v236_v45, %v252_v41  ;;  %v174_v56 = vmax.f32 %v142_v47, %v158_v43  ;;  %316 = vst.msk [vmem:[%s880_s9 + $0x58] sm:$0xff] %vm304_vm0, %v299_v49  ;;  %v223_v5 = vld [vmem:[%s877_s6 + $0x78] sm:$0xff]  ;;  %v286_v7 = vld [vmem:[%s879_s8 + $0x70] sm:$0xff] }
  0x31   :  { %v237_v58 = vmax.f32 %v205_v51, %v221_v46  ;;  %v143_v60 = vmax.f32 %v111_v53, %v127_v48  ;;  %v255_v10 = vld [vmem:[%s878_s7 + $0x78] sm:$0xff] }
  0x32   :  { %v300_v61 = vmax.f32 %v268_v54, %v284_v50  ;;  %v206_v63 = vmax.f32 %v174_v56, %v190_v52  ;;  %v287_v13 = vld [vmem:[%s879_s8 + $0x78] sm:$0xff] }
  0x33   :  { %v269_v1 = vmax.f32 %v237_v58, %v253_v55  ;;  %v175_v3 = vmax.f32 %v143_v60, %v159_v57 }
  0x34   :  { %317 = vst.msk [vmem:[%s880_s9 + $0x60] sm:$0xff] %vm304_vm0, %v300_v61  ;;  %v238_v4 = vmax.f32 %v206_v63, %v222_v59 }
  0x35   :  { %v301_v6 = vmax.f32 %v269_v1, %v285_v62  ;;  %v207_v8 = vmax.f32 %v175_v3, %v191_v0 }
  0x36   :  { %v270_v9 = vmax.f32 %v238_v4, %v254_v2 }
  0x37   :  { %318 = vst.msk [vmem:[%s880_s9 + $0x68] sm:$0xff] %vm304_vm0, %v301_v6  ;;  %v239_v11 = vmax.f32 %v207_v8, %v223_v5 }
  0x38   :  { %v302_v12 = vmax.f32 %v270_v9, %v286_v7 }
  0x39   :  { %v271_v14 = vmax.f32 %v239_v11, %v255_v10 }
  0x3a   :  { %319 = vst.msk [vmem:[%s880_s9 + $0x70] sm:$0xff] %vm304_vm0, %v302_v12 }
  0x3b   :  { %v303_v15 = vmax.f32 %v271_v14, %v287_v13 }
  0x3d   :  { %320 = vst.msk [vmem:[%s880_s9 + $0x78] sm:$0xff] %vm304_vm0, %v303_v15 }

// kernel: _lambda_.13
= control target key start
LH: loop header
LB: loop body
LE: loop exit
PB: predicated region body
PF: predicated region fallthrough
CT: control target
= control target key end

     0   :  { %v2057_v0 = vmov 0   ;;  %vm22_vm0 = vcmask 523264   ;;  %v2058_v23 = vmov 0.0   ;;  %s4094_s1 = inlined_call_operand.vmem [shape: bf16[256,64], index: 1, kind: input, shape index: {}]   ;;  %s4095_s0 = inlined_call_operand.vmem [shape: bf16[512,256], index: 0, kind: input, shape index: {}]   ;;  %s4096_s2 = inlined_call_operand.vmem [shape: f32[1,64], index: 2, kind: input, shape index: {}]   ;;  %s4097_s3 = inlined_call_operand.vmem [shape: f32[1,64], index: 3, kind: input, shape index: {}]   ;;  %s4098_s4 = inlined_call_operand.vmem [shape: f32[512,64], index: 4, kind: output, shape index: {}]  }
   0x1   :  { %663 = vmatprep.subr.bf16.mxu0 %v2057_v0  ;;  %v1936_v1 = vld [vmem:[%s4094_s1 + $0x38] sm:$0xff]   ;;  %1902 = vmatprep.subr.bf16.mxu1 %v2057_v0  ;;  %v1937_v2 = vld [vmem:[%s4094_s1 + $0x30] sm:$0xff]   ;;  %v1938_v3 = vld [vmem:[%s4094_s1 + $0x28] sm:$0xff]   ;;  %23 = vst.msk [vmem:[#allocation2] sm:$0xff] %vm22_vm0, %v2058_v23 }
   0x2   :  { %664 = vmatpush1.bf16.msra.mxu0 %v1936_v1  ;;  %1918 = vmatpush1.bf16.msra.mxu1 %v1936_v1  ;;  %v1939_v4 = vld [vmem:[%s4094_s1 + $0x20] sm:$0xff]   ;;  %v1940_v5 = vld [vmem:[%s4094_s1 + $0x18] sm:$0xff]   ;;  %v1941_v7 = vld [vmem:[%s4094_s1 + $0x10] sm:$0xff]   ;;  %24 = vst.msk [vmem:[#allocation2 + $0x8] sm:$0xff] %vm22_vm0, %v2058_v23 }
   0x3   :  { %665 = vmatprep.subr.bf16.mxu0 %v2057_v0  ;;  %1903 = vmatprep.subr.bf16.mxu1 %v2057_v0  ;;  %v1954_v6 = vld [vmem:[%s4095_s0 + $0x4] ss:$8 sps:$4 sm:$0xff]   ;;  %v1944_v11 = vld [vmem:[%s4094_s1 + $0x78] sm:$0xff]   ;;  %v1945_v12 = vld [vmem:[%s4094_s1 + $0x70] sm:$0xff]   ;;  %25 = vst.msk [vmem:[#allocation2 + $0x10] sm:$0xff] %vm22_vm0, %v2058_v23 }
   0x4   :  { %695 = vmatprep.mubr.bf16.mxu0 %v1954_v6  ;;  %v1942_v8 = vld [vmem:[%s4094_s1 + $0x8] sm:$0xff]   ;;  %v1943_v9 = vld [vmem:[%s4094_s1] sm:$0xff]   ;;  %v1948_v15 = vld [vmem:[%s4094_s1 + $0x58] sm:$0xff]   ;;  %26 = vst.msk [vmem:[#allocation2 + $0x18] sm:$0xff] %vm22_vm0, %v2058_v23 }
   0x5   :  { %v1978_v10 = vld [vmem:[%s4095_s0 + $0x104] ss:$8 sps:$4 sm:$0xff]   ;;  %v1949_v16 = vld [vmem:[%s4094_s1 + $0x50] sm:$0xff]   ;;  %v2173_v19 = vld [vmem:[%s4095_s0] ss:$8 sps:$4 sm:$0xff]   ;;  %27 = vst.msk [vmem:[#allocation2 + $0x20] sm:$0xff] %vm22_vm0, %v2058_v23 }
   0x6   :  { %666 = vmatpush1.bf16.msra.mxu0 %v1937_v2  ;;  %1919 = vmatpush1.bf16.msra.mxu1 %v1937_v2  ;;  %v1946_v13 = vld [vmem:[%s4094_s1 + $0x68] sm:$0xff]   ;;  %v1947_v14 = vld [vmem:[%s4094_s1 + $0x60] sm:$0xff]   ;;  %v2183_v21 = vld [vmem:[%s4095_s0 + $0x14] ss:$8 sps:$4 sm:$0xff]   ;;  %28 = vst.msk [vmem:[#allocation2 + $0x28] sm:$0xff] %vm22_vm0, %v2058_v23 }
   0x7   :  { %667 = vmatprep.subr.bf16.mxu0 %v2057_v0  ;;  %1904 = vmatprep.subr.bf16.mxu1 %v2057_v0  ;;  %v1950_v17 = vld [vmem:[%s4094_s1 + $0x48] sm:$0xff]   ;;  %v1951_v18 = vld [vmem:[%s4094_s1 + $0x40] sm:$0xff]   ;;  %v2188_v22 = vld [vmem:[%s4095_s0 + $0x114] ss:$8 sps:$4 sm:$0xff]   ;;  %29 = vst.msk [vmem:[#allocation2 + $0x30] sm:$0xff] %vm22_vm0, %v2058_v23 }
   0x8   :  { %823 = vmatprep.mubr.bf16.mxu1 %v1978_v10  ;;  %v2178_v20 = vld [vmem:[%s4095_s0 + $0x100] ss:$8 sps:$4 sm:$0xff]   ;;  %30 = vst.msk [vmem:[#allocation2 + $0x38] sm:$0xff] %vm22_vm0, %v2058_v23  ;;  %31 = vst.msk [vmem:[#allocation2 + $0x40] sm:$0xff] %vm22_vm0, %v2058_v23  ;;  %v1957_v24 = vld [vmem:[%s4095_s0 + $0x10] ss:$8 sps:$4 sm:$0xff]  }
   0x9   :  { %32 = vst.msk [vmem:[#allocation2 + $0x48] sm:$0xff] %vm22_vm0, %v2058_v23  ;;  %33 = vst.msk [vmem:[#allocation2 + $0x50] sm:$0xff] %vm22_vm0, %v2058_v23  ;;  %v1984_v25 = vld [vmem:[%s4095_s0 + $0x110] ss:$8 sps:$4 sm:$0xff]   ;;  %v1958_v26 = vld [vmem:[%s4095_s0 + $0x24] ss:$8 sps:$4 sm:$0xff]  }
   0xa   :  { %668 = vmatpush1.bf16.msra.mxu0 %v1938_v3  ;;  %1920 = vmatpush1.bf16.msra.mxu1 %v1938_v3  ;;  %34 = vst.msk [vmem:[#allocation2 + $0x58] sm:$0xff] %vm22_vm0, %v2058_v23  ;;  %35 = vst.msk [vmem:[#allocation2 + $0x60] sm:$0xff] %vm22_vm0, %v2058_v23  ;;  %v1988_v27 = vld [vmem:[%s4095_s0 + $0x124] ss:$8 sps:$4 sm:$0xff]   ;;  %v1960_v28 = vld [vmem:[%s4095_s0 + $0x20] ss:$8 sps:$4 sm:$0xff]  }
   0xb   :  { %669 = vmatprep.subr.bf16.mxu0 %v2057_v0  ;;  %1905 = vmatprep.subr.bf16.mxu1 %v2057_v0  ;;  %36 = vst.msk [vmem:[#allocation2 + $0x68] sm:$0xff] %vm22_vm0, %v2058_v23  ;;  %37 = vst.msk [vmem:[#allocation2 + $0x70] sm:$0xff] %vm22_vm0, %v2058_v23  ;;  %v1990_v29 = vld [vmem:[%s4095_s0 + $0x120] ss:$8 sps:$4 sm:$0xff]   ;;  %v1961_v30 = vld [vmem:[%s4095_s0 + $0x34] ss:$8 sps:$4 sm:$0xff]  }
   0xc   :  { %38 = vst.msk [vmem:[#allocation2 + $0x78] sm:$0xff] %vm22_vm0, %v2058_v23  ;;  %39 = vst.msk [vmem:[#allocation2 + $0x80] sm:$0xff] %vm22_vm0, %v2058_v23  ;;  %v1994_v31 = vld [vmem:[%s4095_s0 + $0x134] ss:$8 sps:$4 sm:$0xff]   ;;  %v1963_v32 = vld [vmem:[%s4095_s0 + $0x30] ss:$8 sps:$4 sm:$0xff]  }
   0xd   :  { %40 = vst.msk [vmem:[#allocation2 + $0x88] sm:$0xff] %vm22_vm0, %v2058_v23  ;;  %41 = vst.msk [vmem:[#allocation2 + $0x90] sm:$0xff] %vm22_vm0, %v2058_v23  ;;  %v1996_v33 = vld [vmem:[%s4095_s0 + $0x130] ss:$8 sps:$4 sm:$0xff]   ;;  %v1964_v34 = vld [vmem:[%s4095_s0 + $0x44] ss:$8 sps:$4 sm:$0xff]  }
   0xe   :  { %670 = vmatpush1.bf16.msra.mxu0 %v1939_v4  ;;  %1921 = vmatpush1.bf16.msra.mxu1 %v1939_v4  ;;  %42 = vst.msk [vmem:[#allocation2 + $0x98] sm:$0xff] %vm22_vm0, %v2058_v23  ;;  %43 = vst.msk [vmem:[#allocation2 + $0xa0] sm:$0xff] %vm22_vm0, %v2058_v23  ;;  %v2000_v35 = vld [vmem:[%s4095_s0 + $0x144] ss:$8 sps:$4 sm:$0xff]   ;;  %v1966_v36 = vld [vmem:[%s4095_s0 + $0x40] ss:$8 sps:$4 sm:$0xff]  }
   0xf   :  { %671 = vmatprep.subr.bf16.mxu0 %v2057_v0  ;;  %1906 = vmatprep.subr.bf16.mxu1 %v2057_v0  ;;  %44 = vst.msk [vmem:[#allocation2 + $0xa8] sm:$0xff] %vm22_vm0, %v2058_v23  ;;  %45 = vst.msk [vmem:[#allocation2 + $0xb0] sm:$0xff] %vm22_vm0, %v2058_v23  ;;  %v2002_v37 = vld [vmem:[%s4095_s0 + $0x140] ss:$8 sps:$4 sm:$0xff]   ;;  %v1967_v38 = vld [vmem:[%s4095_s0 + $0x54] ss:$8 sps:$4 sm:$0xff]  }
  0x10   :  { %46 = vst.msk [vmem:[#allocation2 + $0xb8] sm:$0xff] %vm22_vm0, %v2058_v23  ;;  %47 = vst.msk [vmem:[#allocation2 + $0xc0] sm:$0xff] %vm22_vm0, %v2058_v23  ;;  %v2006_v39 = vld [vmem:[%s4095_s0 + $0x154] ss:$8 sps:$4 sm:$0xff]   ;;  %v1969_v40 = vld [vmem:[%s4095_s0 + $0x50] ss:$8 sps:$4 sm:$0xff]  }
  0x11   :  { %48 = vst.msk [vmem:[#allocation2 + $0xc8] sm:$0xff] %vm22_vm0, %v2058_v23  ;;  %49 = vst.msk [vmem:[#allocation2 + $0xd0] sm:$0xff] %vm22_vm0, %v2058_v23  ;;  %v2008_v41 = vld [vmem:[%s4095_s0 + $0x150] ss:$8 sps:$4 sm:$0xff]   ;;  %v1970_v42 = vld [vmem:[%s4095_s0 + $0x64] ss:$8 sps:$4 sm:$0xff]  }
  0x12   :  { %672 = vmatpush1.bf16.msra.mxu0 %v1940_v5  ;;  %1922 = vmatpush1.bf16.msra.mxu1 %v1940_v5  ;;  %50 = vst.msk [vmem:[#allocation2 + $0xd8] sm:$0xff] %vm22_vm0, %v2058_v23  ;;  %51 = vst.msk [vmem:[#allocation2 + $0xe0] sm:$0xff] %vm22_vm0, %v2058_v23  ;;  %v2012_v43 = vld [vmem:[%s4095_s0 + $0x164] ss:$8 sps:$4 sm:$0xff]   ;;  %v1972_v44 = vld [vmem:[%s4095_s0 + $0x60] ss:$8 sps:$4 sm:$0xff]  }
  0x13   :  { %673 = vmatprep.subr.bf16.mxu0 %v2057_v0  ;;  %1907 = vmatprep.subr.bf16.mxu1 %v2057_v0  ;;  %52 = vst.msk [vmem:[#allocation2 + $0xe8] sm:$0xff] %vm22_vm0, %v2058_v23  ;;  %53 = vst.msk [vmem:[#allocation2 + $0xf0] sm:$0xff] %vm22_vm0, %v2058_v23  ;;  %v2014_v45 = vld [vmem:[%s4095_s0 + $0x160] ss:$8 sps:$4 sm:$0xff]   ;;  %v1973_v46 = vld [vmem:[%s4095_s0 + $0x74] ss:$8 sps:$4 sm:$0xff]  }
  0x14   :  { %54 = vst.msk [vmem:[#allocation2 + $0xf8] sm:$0xff] %vm22_vm0, %v2058_v23  ;;  %55 = vst.msk [vmem:[#allocation2 + $0x100] sm:$0xff] %vm22_vm0, %v2058_v23  ;;  %v2018_v47 = vld [vmem:[%s4095_s0 + $0x174] ss:$8 sps:$4 sm:$0xff]   ;;  %v1975_v48 = vld [vmem:[%s4095_s0 + $0x70] ss:$8 sps:$4 sm:$0xff]  }
  0x15   :  { %56 = vst.msk [vmem:[#allocation2 + $0x108] sm:$0xff] %vm22_vm0, %v2058_v23  ;;  %57 = vst.msk [vmem:[#allocation2 + $0x110] sm:$0xff] %vm22_vm0, %v2058_v23  ;;  %v2020_v49 = vld [vmem:[%s4095_s0 + $0x170] ss:$8 sps:$4 sm:$0xff]   ;;  %v1979_v50 = vld [vmem:[%s4095_s0 + $0x84] ss:$8 sps:$4 sm:$0xff]  }
  0x16   :  { %674 = vmatpush1.bf16.msra.mxu0 %v1941_v7  ;;  %1923 = vmatpush1.bf16.msra.mxu1 %v1941_v7  ;;  %58 = vst.msk [vmem:[#allocation2 + $0x118] sm:$0xff] %vm22_vm0, %v2058_v23  ;;  %59 = vst.msk [vmem:[#allocation2 + $0x120] sm:$0xff] %vm22_vm0, %v2058_v23  ;;  %v2024_v51 = vld [vmem:[%s4095_s0 + $0x184] ss:$8 sps:$4 sm:$0xff]   ;;  %v1981_v52 = vld [vmem:[%s4095_s0 + $0x80] ss:$8 sps:$4 sm:$0xff]  }
  0x17   :  { %675 = vmatprep.subr.bf16.mxu0 %v2057_v0  ;;  %1908 = vmatprep.subr.bf16.mxu1 %v2057_v0  ;;  %60 = vst.msk [vmem:[#allocation2 + $0x128] sm:$0xff] %vm22_vm0, %v2058_v23  ;;  %61 = vst.msk [vmem:[#allocation2 + $0x130] sm:$0xff] %vm22_vm0, %v2058_v23  ;;  %v2026_v53 = vld [vmem:[%s4095_s0 + $0x180] ss:$8 sps:$4 sm:$0xff]   ;;  %v1985_v54 = vld [vmem:[%s4095_s0 + $0x94] ss:$8 sps:$4 sm:$0xff]  }
  0x18   :  { %62 = vst.msk [vmem:[#allocation2 + $0x138] sm:$0xff] %vm22_vm0, %v2058_v23  ;;  %63 = vst.msk [vmem:[#allocation2 + $0x140] sm:$0xff] %vm22_vm0, %v2058_v23  ;;  %v2027_v55 = vld [vmem:[%s4095_s0 + $0x194] ss:$8 sps:$4 sm:$0xff]   ;;  %v1987_v56 = vld [vmem:[%s4095_s0 + $0x90] ss:$8 sps:$4 sm:$0xff]  }
  0x19   :  { %64 = vst.msk [vmem:[#allocation2 + $0x148] sm:$0xff] %vm22_vm0, %v2058_v23  ;;  %65 = vst.msk [vmem:[#allocation2 + $0x150] sm:$0xff] %vm22_vm0, %v2058_v23  ;;  %v2029_v57 = vld [vmem:[%s4095_s0 + $0x190] ss:$8 sps:$4 sm:$0xff]   ;;  %v1991_v58 = vld [vmem:[%s4095_s0 + $0xa4] ss:$8 sps:$4 sm:$0xff]  }
  0x1a   :  { %676 = vmatpush1.bf16.msra.mxu0 %v1942_v8  ;;  %1924 = vmatpush1.bf16.msra.mxu1 %v1942_v8  ;;  %66 = vst.msk [vmem:[#allocation2 + $0x158] sm:$0xff] %vm22_vm0, %v2058_v23  ;;  %67 = vst.msk [vmem:[#allocation2 + $0x160] sm:$0xff] %vm22_vm0, %v2058_v23  ;;  %v2030_v59 = vld [vmem:[%s4095_s0 + $0x1a4] ss:$8 sps:$4 sm:$0xff]   ;;  %v1993_v60 = vld [vmem:[%s4095_s0 + $0xa0] ss:$8 sps:$4 sm:$0xff]  }
  0x1b   :  { %677 = vmatprep.subr.bf16.mxu0 %v2057_v0  ;;  %1909 = vmatprep.subr.bf16.mxu1 %v2057_v0  ;;  %68 = vst.msk [vmem:[#allocation2 + $0x168] sm:$0xff] %vm22_vm0, %v2058_v23  ;;  %69 = vst.msk [vmem:[#allocation2 + $0x170] sm:$0xff] %vm22_vm0, %v2058_v23  ;;  %v2032_v61 = vld [vmem:[%s4095_s0 + $0x1a0] ss:$8 sps:$4 sm:$0xff]   ;;  %v1997_v62 = vld [vmem:[%s4095_s0 + $0xb4] ss:$8 sps:$4 sm:$0xff]  }
  0x1c   :  { %70 = vst.msk [vmem:[#allocation2 + $0x178] sm:$0xff] %vm22_vm0, %v2058_v23  ;;  %71 = vst.msk [vmem:[#allocation2 + $0x180] sm:$0xff] %vm22_vm0, %v2058_v23  ;;  %v2033_v63 = vld [vmem:[%s4095_s0 + $0x1b4] ss:$8 sps:$4 sm:$0xff]   ;;  %v2035_v1 = vld [vmem:[%s4095_s0 + $0x1b0] ss:$8 sps:$4 sm:$0xff]  }
  0x1d   :  { %72 = vst.msk [vmem:[#allocation2 + $0x188] sm:$0xff] %vm22_vm0, %v2058_v23  ;;  %73 = vst.msk [vmem:[#allocation2 + $0x190] sm:$0xff] %vm22_vm0, %v2058_v23  ;;  %v2003_v2 = vld [vmem:[%s4095_s0 + $0xc4] ss:$8 sps:$4 sm:$0xff]   ;;  %v2005_v4 = vld [vmem:[%s4095_s0 + $0xc0] ss:$8 sps:$4 sm:$0xff]  }
  0x1e   :  { %678 = vmatpush1.bf16.msra.mxu0 %v1943_v9  ;;  %1925 = vmatpush1.bf16.msra.mxu1 %v1943_v9  ;;  %74 = vst.msk [vmem:[#allocation2 + $0x198] sm:$0xff] %vm22_vm0, %v2058_v23  ;;  %75 = vst.msk [vmem:[#allocation2 + $0x1a0] sm:$0xff] %vm22_vm0, %v2058_v23  ;;  %v2036_v3 = vld [vmem:[%s4095_s0 + $0x1c4] ss:$8 sps:$4 sm:$0xff]   ;;  %v2038_v5 = vld [vmem:[%s4095_s0 + $0x1c0] ss:$8 sps:$4 sm:$0xff]  }
  0x1f   :  { %679 = vmatprep.subr.bf16.mxu0 %v2057_v0  ;;  %1910 = vmatprep.subr.bf16.mxu1 %v2057_v0  ;;  %76 = vst.msk [vmem:[#allocation2 + $0x1a8] sm:$0xff] %vm22_vm0, %v2058_v23  ;;  %77 = vst.msk [vmem:[#allocation2 + $0x1b0] sm:$0xff] %vm22_vm0, %v2058_v23  ;;  %v2009_v6 = vld [vmem:[%s4095_s0 + $0xd4] ss:$8 sps:$4 sm:$0xff]   ;;  %v2011_v8 = vld [vmem:[%s4095_s0 + $0xd0] ss:$8 sps:$4 sm:$0xff]  }
  0x20   :  { %78 = vst.msk [vmem:[#allocation2 + $0x1b8] sm:$0xff] %vm22_vm0, %v2058_v23  ;;  %79 = vst.msk [vmem:[#allocation2 + $0x1c0] sm:$0xff] %vm22_vm0, %v2058_v23  ;;  %v2039_v7 = vld [vmem:[%s4095_s0 + $0x1d4] ss:$8 sps:$4 sm:$0xff]   ;;  %v2041_v9 = vld [vmem:[%s4095_s0 + $0x1d0] ss:$8 sps:$4 sm:$0xff]  }
  0x21   :  { %80 = vst.msk [vmem:[#allocation2 + $0x1c8] sm:$0xff] %vm22_vm0, %v2058_v23  ;;  %81 = vst.msk [vmem:[#allocation2 + $0x1d0] sm:$0xff] %vm22_vm0, %v2058_v23  ;;  %v2015_v10 = vld [vmem:[%s4095_s0 + $0xe4] ss:$8 sps:$4 sm:$0xff]  }
  0x22   :  { %680 = vmatpush2.bf16.msra.mxu0 %v1944_v11  ;;  %1926 = vmatpush2.bf16.msra.mxu1 %v1944_v11  ;;  %82 = vst.msk [vmem:[#allocation2 + $0x1d8] sm:$0xff] %vm22_vm0, %v2058_v23  ;;  %83 = vst.msk [vmem:[#allocation2 + $0x1e0] sm:$0xff] %vm22_vm0, %v2058_v23  ;;  %v2042_v11 = vld [vmem:[%s4095_s0 + $0x1e4] ss:$8 sps:$4 sm:$0xff]  }
  0x23   :  { %681 = vmatprep.subr.bf16.mxu0 %v2057_v0  ;;  %1911 = vmatprep.subr.bf16.mxu1 %v2057_v0  ;;  %84 = vst.msk [vmem:[#allocation2 + $0x1e8] sm:$0xff] %vm22_vm0, %v2058_v23  ;;  %85 = vst.msk [vmem:[#allocation2 + $0x1f0] sm:$0xff] %vm22_vm0, %v2058_v23 }
  0x24   :  { %86 = vst.msk [vmem:[#allocation2 + $0x1f8] sm:$0xff] %vm22_vm0, %v2058_v23 }
  0x26   :  { %682 = vmatpush2.bf16.msra.mxu0 %v1945_v12  ;;  %1927 = vmatpush2.bf16.msra.mxu1 %v1945_v12  ;;  %v2017_v12 = vld [vmem:[%s4095_s0 + $0xe0] ss:$8 sps:$4 sm:$0xff]  }
  0x27   :  { %683 = vmatprep.subr.bf16.mxu0 %v2057_v0  ;;  %1912 = vmatprep.subr.bf16.mxu1 %v2057_v0 }
  0x2a   :  { %684 = vmatpush2.bf16.msra.mxu0 %v1946_v13  ;;  %1928 = vmatpush2.bf16.msra.mxu1 %v1946_v13  ;;  %v2044_v13 = vld [vmem:[%s4095_s0 + $0x1e0] ss:$8 sps:$4 sm:$0xff]  }
  0x2b   :  { %685 = vmatprep.subr.bf16.mxu0 %v2057_v0  ;;  %1913 = vmatprep.subr.bf16.mxu1 %v2057_v0 }
  0x2e   :  { %686 = vmatpush2.bf16.msra.mxu0 %v1947_v14  ;;  %1929 = vmatpush2.bf16.msra.mxu1 %v1947_v14  ;;  %v2021_v14 = vld [vmem:[%s4095_s0 + $0xf4] ss:$8 sps:$4 sm:$0xff]  }
  0x2f   :  { %687 = vmatprep.subr.bf16.mxu0 %v2057_v0  ;;  %1914 = vmatprep.subr.bf16.mxu1 %v2057_v0 }
  0x32   :  { %688 = vmatpush2.bf16.msra.mxu0 %v1948_v15  ;;  %1930 = vmatpush2.bf16.msra.mxu1 %v1948_v15  ;;  %v2045_v15 = vld [vmem:[%s4095_s0 + $0x1f4] ss:$8 sps:$4 sm:$0xff]  }
  0x33   :  { %689 = vmatprep.subr.bf16.mxu0 %v2057_v0  ;;  %1915 = vmatprep.subr.bf16.mxu1 %v2057_v0 }
  0x36   :  { %690 = vmatpush2.bf16.msra.mxu0 %v1949_v16  ;;  %1931 = vmatpush2.bf16.msra.mxu1 %v1949_v16  ;;  %v2023_v16 = vld [vmem:[%s4095_s0 + $0xf0] ss:$8 sps:$4 sm:$0xff]  }
  0x37   :  { %691 = vmatprep.subr.bf16.mxu0 %v2057_v0  ;;  %1916 = vmatprep.subr.bf16.mxu1 %v2057_v0 }
  0x3a   :  { %692 = vmatpush2.bf16.msra.mxu0 %v1950_v17  ;;  %1932 = vmatpush2.bf16.msra.mxu1 %v1950_v17  ;;  %v2047_v17 = vld [vmem:[%s4095_s0 + $0x1f0] ss:$8 sps:$4 sm:$0xff]  }
  0x3b   :  { %693 = vmatprep.subr.bf16.mxu0 %v2057_v0  ;;  %1917 = vmatprep.subr.bf16.mxu1 %v2057_v0  ;;  %v1999_v0 = vld [vmem:[%s4095_s0 + $0xb0] ss:$8 sps:$4 sm:$0xff]  }
  0x3e   :  { %694 = vmatpush2.bf16.msra.mxu0 %v1951_v18  ;;  %1933 = vmatpush2.bf16.msra.mxu1 %v1951_v18  ;;  %v87_v18 = vld [vmem:[#allocation2] sm:$0xff] }
  0x41   :  { %696 = vmatmul.mubr.bf16.vlgmr.msra.gmra.mxu0 %v2173_v19  ;;  %824 = vmatmul.mubr.bf16.vlgmr.msra.gmra.mxu1 %v2178_v20  ;;  %v119_v19 = vld [vmem:[#allocation2 + $0x100] sm:$0xff] }
  0x42   :  { %703 = vmatprep.mubr.bf16.mxu0 %v2183_v21  ;;  %831 = vmatprep.mubr.bf16.mxu1 %v2188_v22 }
  0x49   :  { %704 = vmatmul.mubr.bf16.gmra.mxu0 %v1957_v24  ;;  %832 = vmatmul.mubr.bf16.gmra.mxu1 %v1984_v25  ;;  %v88_v25 = vld [vmem:[#allocation2 + $0x8] sm:$0xff] }
  0x4a   :  { %711 = vmatprep.mubr.bf16.mxu0 %v1958_v26  ;;  %839 = vmatprep.mubr.bf16.mxu1 %v1988_v27  ;;  %v120_v27 = vld [vmem:[#allocation2 + $0x108] sm:$0xff] }
  0x51   :  { %712 = vmatmul.mubr.bf16.gmra.mxu0 %v1960_v28  ;;  %840 = vmatmul.mubr.bf16.gmra.mxu1 %v1990_v29 }
  0x52   :  { %719 = vmatprep.mubr.bf16.mxu0 %v1961_v30  ;;  %847 = vmatprep.mubr.bf16.mxu1 %v1994_v31 }
  0x59   :  { %720 = vmatmul.mubr.bf16.gmra.mxu0 %v1963_v32  ;;  %848 = vmatmul.mubr.bf16.gmra.mxu1 %v1996_v33  ;;  %v89_v33 = vld [vmem:[#allocation2 + $0x10] sm:$0xff] }
  0x5a   :  { %727 = vmatprep.mubr.bf16.mxu0 %v1964_v34  ;;  %855 = vmatprep.mubr.bf16.mxu1 %v2000_v35  ;;  %v121_v35 = vld [vmem:[#allocation2 + $0x110] sm:$0xff] }
  0x61   :  { %728 = vmatmul.mubr.bf16.gmra.mxu0 %v1966_v36  ;;  %856 = vmatmul.mubr.bf16.gmra.mxu1 %v2002_v37 }
  0x62   :  { %735 = vmatprep.mubr.bf16.mxu0 %v1967_v38  ;;  %863 = vmatprep.mubr.bf16.mxu1 %v2006_v39 }
  0x69   :  { %736 = vmatmul.mubr.bf16.gmra.mxu0 %v1969_v40  ;;  %864 = vmatmul.mubr.bf16.gmra.mxu1 %v2008_v41  ;;  %v90_v41 = vld [vmem:[#allocation2 + $0x18] sm:$0xff] }
  0x6a   :  { %743 = vmatprep.mubr.bf16.mxu0 %v1970_v42  ;;  %871 = vmatprep.mubr.bf16.mxu1 %v2012_v43  ;;  %v122_v43 = vld [vmem:[#allocation2 + $0x118] sm:$0xff] }
  0x71   :  { %744 = vmatmul.mubr.bf16.gmra.mxu0 %v1972_v44  ;;  %872 = vmatmul.mubr.bf16.gmra.mxu1 %v2014_v45 }
  0x72   :  { %751 = vmatprep.mubr.bf16.mxu0 %v1973_v46  ;;  %879 = vmatprep.mubr.bf16.mxu1 %v2018_v47 }
  0x79   :  { %752 = vmatmul.mubr.bf16.gmra.mxu0 %v1975_v48  ;;  %880 = vmatmul.mubr.bf16.gmra.mxu1 %v2020_v49  ;;  %v91_v49 = vld [vmem:[#allocation2 + $0x20] sm:$0xff] }
  0x7a   :  { %759 = vmatprep.mubr.bf16.mxu0 %v1979_v50  ;;  %887 = vmatprep.mubr.bf16.mxu1 %v2024_v51  ;;  %v123_v51 = vld [vmem:[#allocation2 + $0x120] sm:$0xff] }
  0x81   :  { %760 = vmatmul.mubr.bf16.gmra.mxu0 %v1981_v52  ;;  %888 = vmatmul.mubr.bf16.gmra.mxu1 %v2026_v53 }
  0x82   :  { %767 = vmatprep.mubr.bf16.mxu0 %v1985_v54  ;;  %895 = vmatprep.mubr.bf16.mxu1 %v2027_v55 }
  0x89   :  { %768 = vmatmul.mubr.bf16.gmra.mxu0 %v1987_v56  ;;  %896 = vmatmul.mubr.bf16.gmra.mxu1 %v2029_v57  ;;  %v92_v57 = vld [vmem:[#allocation2 + $0x28] sm:$0xff] }
  0x8a   :  { %775 = vmatprep.mubr.bf16.mxu0 %v1991_v58  ;;  %903 = vmatprep.mubr.bf16.mxu1 %v2030_v59  ;;  %v124_v59 = vld [vmem:[#allocation2 + $0x128] sm:$0xff] }
  0x91   :  { %776 = vmatmul.mubr.bf16.gmra.mxu0 %v1993_v60  ;;  %904 = vmatmul.mubr.bf16.gmra.mxu1 %v2032_v61 }
  0x92   :  { %783 = vmatprep.mubr.bf16.mxu0 %v1997_v62  ;;  %911 = vmatprep.mubr.bf16.mxu1 %v2033_v63 }
  0x99   :  { %784 = vmatmul.mubr.bf16.gmra.mxu0 %v1999_v0  ;;  %912 = vmatmul.mubr.bf16.gmra.mxu1 %v2035_v1  ;;  %v93_v1 = vld [vmem:[#allocation2 + $0x30] sm:$0xff] }
  0x9a   :  { %791 = vmatprep.mubr.bf16.mxu0 %v2003_v2  ;;  %919 = vmatprep.mubr.bf16.mxu1 %v2036_v3  ;;  %v125_v3 = vld [vmem:[#allocation2 + $0x130] sm:$0xff] }
  0xa1   :  { %792 = vmatmul.mubr.bf16.gmra.mxu0 %v2005_v4  ;;  %920 = vmatmul.mubr.bf16.gmra.mxu1 %v2038_v5 }
  0xa2   :  { %799 = vmatprep.mubr.bf16.mxu0 %v2009_v6  ;;  %927 = vmatprep.mubr.bf16.mxu1 %v2039_v7 }
  0xa9   :  { %800 = vmatmul.mubr.bf16.gmra.mxu0 %v2011_v8  ;;  %928 = vmatmul.mubr.bf16.gmra.mxu1 %v2041_v9  ;;  %v94_v9 = vld [vmem:[#allocation2 + $0x38] sm:$0xff] }
  0xaa   :  { %807 = vmatprep.mubr.bf16.mxu0 %v2015_v10  ;;  %935 = vmatprep.mubr.bf16.mxu1 %v2042_v11  ;;  %v126_v11 = vld [vmem:[#allocation2 + $0x138] sm:$0xff] }
  0xb1   :  { %808 = vmatmul.mubr.bf16.gmra.mxu0 %v2017_v12  ;;  %936 = vmatmul.mubr.bf16.gmra.mxu1 %v2044_v13 }
  0xb2   :  { %815 = vmatprep.mubr.bf16.mxu0 %v2021_v14  ;;  %943 = vmatprep.mubr.bf16.mxu1 %v2045_v15 }
  0xb9   :  { %816 = vmatmul.mubr.bf16.gmra.mxu0 %v2023_v16  ;;  %944 = vmatmul.mubr.bf16.gmra.mxu1 %v2047_v17  ;;  %v95_v17 = vld [vmem:[#allocation2 + $0x40] sm:$0xff] }
 0x101   :  { %v697_v20 = vpop.f32.mrf.mxu0  ;;  %v825_v21 = vpop.f32.mrf.mxu1 }
 0x102   :  { %v952_v22 = vadd.f32 %v697_v20, %v87_v18  ;;  %v984_v23 = vadd.f32 %v825_v21, %v119_v19  ;;  %v127_v19 = vld [vmem:[#allocation2 + $0x140] sm:$0xff] }
 0x103   :  { %v699_v24 = vpop.f32.mrf.mxu0  ;;  %v827_v26 = vpop.f32.mrf.mxu1 }
 0x104   :  { %1017 = vst.msk [vmem:[#allocation2] sm:$0xff] %vm22_vm0, %v952_v22  ;;  %1049 = vst.msk [vmem:[#allocation2 + $0x100] sm:$0xff] %vm22_vm0, %v984_v23 }
 0x105   :  { %v700_v28 = vpop.f32.mrf.mxu0  ;;  %v828_v29 = vpop.f32.mrf.mxu1 }
 0x106   :  { %v953_v30 = vadd.f32 %v700_v28, %v88_v25  ;;  %v985_v31 = vadd.f32 %v828_v29, %v120_v27  ;;  %v96_v25 = vld [vmem:[#allocation2 + $0x48] sm:$0xff] }
 0x107   :  { %v702_v32 = vpop.f32.mrf.mxu0  ;;  %v830_v34 = vpop.f32.mrf.mxu1  ;;  %v128_v27 = vld [vmem:[#allocation2 + $0x148] sm:$0xff] }
 0x108   :  { %1018 = vst.msk [vmem:[#allocation2 + $0x8] sm:$0xff] %vm22_vm0, %v953_v30  ;;  %1050 = vst.msk [vmem:[#allocation2 + $0x108] sm:$0xff] %vm22_vm0, %v985_v31 }
 0x109   :  { %v705_v36 = vpop.f32.mrf.mxu0  ;;  %v833_v37 = vpop.f32.mrf.mxu1 }
 0x10a   :  { %v954_v38 = vadd.f32 %v705_v36, %v89_v33  ;;  %v986_v39 = vadd.f32 %v833_v37, %v121_v35  ;;  %v97_v33 = vld [vmem:[#allocation2 + $0x50] sm:$0xff] }
 0x10b   :  { %v707_v40 = vpop.f32.mrf.mxu0  ;;  %v835_v42 = vpop.f32.mrf.mxu1  ;;  %v129_v35 = vld [vmem:[#allocation2 + $0x150] sm:$0xff] }
 0x10c   :  { %1019 = vst.msk [vmem:[#allocation2 + $0x10] sm:$0xff] %vm22_vm0, %v954_v38  ;;  %1051 = vst.msk [vmem:[#allocation2 + $0x110] sm:$0xff] %vm22_vm0, %v986_v39 }
 0x10d   :  { %v708_v44 = vpop.f32.mrf.mxu0  ;;  %v836_v45 = vpop.f32.mrf.mxu1 }
 0x10e   :  { %v955_v46 = vadd.f32 %v708_v44, %v90_v41  ;;  %v987_v47 = vadd.f32 %v836_v45, %v122_v43  ;;  %v98_v41 = vld [vmem:[#allocation2 + $0x58] sm:$0xff] }
 0x10f   :  { %v710_v48 = vpop.f32.mrf.mxu0  ;;  %v838_v50 = vpop.f32.mrf.mxu1  ;;  %v130_v43 = vld [vmem:[#allocation2 + $0x158] sm:$0xff] }
 0x110   :  { %1020 = vst.msk [vmem:[#allocation2 + $0x18] sm:$0xff] %vm22_vm0, %v955_v46  ;;  %1052 = vst.msk [vmem:[#allocation2 + $0x118] sm:$0xff] %vm22_vm0, %v987_v47 }
 0x111   :  { %v713_v52 = vpop.f32.mrf.mxu0  ;;  %v841_v53 = vpop.f32.mrf.mxu1 }
 0x112   :  { %v956_v54 = vadd.f32 %v713_v52, %v91_v49  ;;  %v988_v55 = vadd.f32 %v841_v53, %v123_v51  ;;  %v99_v49 = vld [vmem:[#allocation2 + $0x60] sm:$0xff] }
 0x113   :  { %v715_v56 = vpop.f32.mrf.mxu0  ;;  %v843_v58 = vpop.f32.mrf.mxu1  ;;  %v131_v51 = vld [vmem:[#allocation2 + $0x160] sm:$0xff] }
 0x114   :  { %1021 = vst.msk [vmem:[#allocation2 + $0x20] sm:$0xff] %vm22_vm0, %v956_v54  ;;  %1053 = vst.msk [vmem:[#allocation2 + $0x120] sm:$0xff] %vm22_vm0, %v988_v55 }
 0x115   :  { %v716_v60 = vpop.f32.mrf.mxu0  ;;  %v844_v61 = vpop.f32.mrf.mxu1 }
 0x116   :  { %v957_v62 = vadd.f32 %v716_v60, %v92_v57  ;;  %v989_v63 = vadd.f32 %v844_v61, %v124_v59  ;;  %v100_v57 = vld [vmem:[#allocation2 + $0x68] sm:$0xff] }
 0x117   :  { %v718_v0 = vpop.f32.mrf.mxu0  ;;  %v846_v2 = vpop.f32.mrf.mxu1  ;;  %v132_v59 = vld [vmem:[#allocation2 + $0x168] sm:$0xff] }
 0x118   :  { %1022 = vst.msk [vmem:[#allocation2 + $0x28] sm:$0xff] %vm22_vm0, %v957_v62  ;;  %1054 = vst.msk [vmem:[#allocation2 + $0x128] sm:$0xff] %vm22_vm0, %v989_v63 }
 0x119   :  { %v721_v4 = vpop.f32.mrf.mxu0  ;;  %v849_v5 = vpop.f32.mrf.mxu1 }
 0x11a   :  { %v958_v6 = vadd.f32 %v721_v4, %v93_v1  ;;  %v990_v7 = vadd.f32 %v849_v5, %v125_v3  ;;  %v101_v1 = vld [vmem:[#allocation2 + $0x70] sm:$0xff] }
 0x11b   :  { %v723_v8 = vpop.f32.mrf.mxu0  ;;  %v851_v10 = vpop.f32.mrf.mxu1  ;;  %v133_v3 = vld [vmem:[#allocation2 + $0x170] sm:$0xff] }
 0x11c   :  { %1023 = vst.msk [vmem:[#allocation2 + $0x30] sm:$0xff] %vm22_vm0, %v958_v6  ;;  %1055 = vst.msk [vmem:[#allocation2 + $0x130] sm:$0xff] %vm22_vm0, %v990_v7 }
 0x11d   :  { %v724_v12 = vpop.f32.mrf.mxu0  ;;  %v852_v13 = vpop.f32.mrf.mxu1 }
 0x11e   :  { %v959_v14 = vadd.f32 %v724_v12, %v94_v9  ;;  %v991_v15 = vadd.f32 %v852_v13, %v126_v11  ;;  %v102_v9 = vld [vmem:[#allocation2 + $0x78] sm:$0xff] }
 0x11f   :  { %v726_v16 = vpop.f32.mrf.mxu0  ;;  %v854_v18 = vpop.f32.mrf.mxu1  ;;  %v134_v11 = vld [vmem:[#allocation2 + $0x178] sm:$0xff] }
 0x120   :  { %1024 = vst.msk [vmem:[#allocation2 + $0x38] sm:$0xff] %vm22_vm0, %v959_v14  ;;  %1056 = vst.msk [vmem:[#allocation2 + $0x138] sm:$0xff] %vm22_vm0, %v991_v15 }
 0x121   :  { %v729_v20 = vpop.f32.mrf.mxu0  ;;  %v857_v21 = vpop.f32.mrf.mxu1 }
 0x122   :  { %v960_v22 = vadd.f32 %v729_v20, %v95_v17  ;;  %v992_v23 = vadd.f32 %v857_v21, %v127_v19  ;;  %v103_v17 = vld [vmem:[#allocation2 + $0x80] sm:$0xff] }
 0x123   :  { %v731_v24 = vpop.f32.mrf.mxu0  ;;  %v859_v26 = vpop.f32.mrf.mxu1  ;;  %v135_v19 = vld [vmem:[#allocation2 + $0x180] sm:$0xff] }
 0x124   :  { %1025 = vst.msk [vmem:[#allocation2 + $0x40] sm:$0xff] %vm22_vm0, %v960_v22  ;;  %1057 = vst.msk [vmem:[#allocation2 + $0x140] sm:$0xff] %vm22_vm0, %v992_v23 }
 0x125   :  { %v732_v28 = vpop.f32.mrf.mxu0  ;;  %v860_v29 = vpop.f32.mrf.mxu1 }
 0x126   :  { %v961_v30 = vadd.f32 %v732_v28, %v96_v25  ;;  %v993_v31 = vadd.f32 %v860_v29, %v128_v27  ;;  %v104_v25 = vld [vmem:[#allocation2 + $0x88] sm:$0xff] }
 0x127   :  { %v734_v32 = vpop.f32.mrf.mxu0  ;;  %v862_v34 = vpop.f32.mrf.mxu1  ;;  %v136_v27 = vld [vmem:[#allocation2 + $0x188] sm:$0xff] }
 0x128   :  { %1026 = vst.msk [vmem:[#allocation2 + $0x48] sm:$0xff] %vm22_vm0, %v961_v30  ;;  %1058 = vst.msk [vmem:[#allocation2 + $0x148] sm:$0xff] %vm22_vm0, %v993_v31  ;;  %v1085_v28 = vld [vmem:[#allocation2 + $0x8] sm:$0xff]  ;;  %v1084_v31 = vld [vmem:[#allocation2] sm:$0xff] }
 0x129   :  { %v737_v36 = vpop.f32.mrf.mxu0  ;;  %v865_v37 = vpop.f32.mrf.mxu1  ;;  %v1086_v32 = vld [vmem:[#allocation2 + $0x10] sm:$0xff] }
 0x12a   :  { %v962_v38 = vadd.f32 %v737_v36, %v97_v33  ;;  %v994_v39 = vadd.f32 %v865_v37, %v129_v35  ;;  %v105_v36 = vld [vmem:[#allocation2 + $0x90] sm:$0xff] }
 0x12b   :  { %v739_v40 = vpop.f32.mrf.mxu0  ;;  %v867_v42 = vpop.f32.mrf.mxu1 }
 0x12c   :  { %1027 = vst.msk [vmem:[#allocation2 + $0x50] sm:$0xff] %vm22_vm0, %v962_v38  ;;  %1059 = vst.msk [vmem:[#allocation2 + $0x150] sm:$0xff] %vm22_vm0, %v994_v39  ;;  %v137_v38 = vld [vmem:[#allocation2 + $0x190] sm:$0xff]  ;;  %v1282_v39 = vmul.f32 %v1085_v28, %v1085_v28  ;;  %v1281_v40 = vmul.f32 %v1084_v31, %v1084_v31  ;;  %v1087_v42 = vld [vmem:[#allocation2 + $0x18] sm:$0xff] }
 0x12d   :  { %v740_v44 = vpop.f32.mrf.mxu0  ;;  %v868_v45 = vpop.f32.mrf.mxu1 }
 0x12e   :  { %v963_v46 = vadd.f32 %v740_v44, %v98_v41  ;;  %v995_v47 = vadd.f32 %v868_v45, %v130_v43  ;;  %v1283_v41 = vmul.f32 %v1086_v32, %v1086_v32  ;;  %v1149_v45 = vsel %vm22_vm0, %v1085_v28, 0.0 }
 0x12f   :  { %v742_v48 = vpop.f32.mrf.mxu0  ;;  %v870_v50 = vpop.f32.mrf.mxu1 }
 0x130   :  { %1028 = vst.msk [vmem:[#allocation2 + $0x58] sm:$0xff] %vm22_vm0, %v963_v46  ;;  %1060 = vst.msk [vmem:[#allocation2 + $0x158] sm:$0xff] %vm22_vm0, %v995_v47  ;;  %v1088_v48 = vld [vmem:[#allocation2 + $0x20] sm:$0xff]  ;;  %v106_v50 = vld [vmem:[#allocation2 + $0x98] sm:$0xff] }
 0x131   :  { %v745_v52 = vpop.f32.mrf.mxu0  ;;  %v873_v53 = vpop.f32.mrf.mxu1 }
 0x132   :  { %v964_v54 = vadd.f32 %v745_v52, %v99_v49  ;;  %v996_v55 = vadd.f32 %v873_v53, %v131_v51  ;;  %v138_v52 = vld [vmem:[#allocation2 + $0x198] sm:$0xff]  ;;  %v1148_v53 = vsel %vm22_vm0, %v1084_v31, 0.0 }
 0x133   :  { %v747_v56 = vpop.f32.mrf.mxu0  ;;  %v875_v58 = vpop.f32.mrf.mxu1 }
 0x134   :  { %1029 = vst.msk [vmem:[#allocation2 + $0x60] sm:$0xff] %vm22_vm0, %v964_v54  ;;  %1061 = vst.msk [vmem:[#allocation2 + $0x160] sm:$0xff] %vm22_vm0, %v996_v55  ;;  %v1346_v54 = vsel %vm22_vm0, %v1282_v39, 0.0  ;;  %v1151_v55 = vsel %vm22_vm0, %v1086_v32, 0.0  ;;  %v1284_v56 = vmul.f32 %v1087_v42, %v1087_v42  ;;  %v1150_v58 = vadd.f32 %v1149_v45, %v1148_v53 }
 0x135   :  { %v748_v60 = vpop.f32.mrf.mxu0  ;;  %v876_v61 = vpop.f32.mrf.mxu1 }
 0x136   :  { %v965_v62 = vadd.f32 %v748_v60, %v100_v57  ;;  %v997_v63 = vadd.f32 %v876_v61, %v132_v59  ;;  %v1345_v57 = vsel %vm22_vm0, %v1281_v40, 0.0  ;;  %v1348_v59 = vsel %vm22_vm0, %v1283_v41, 0.0  ;;  %v1089_v60 = vld [vmem:[#allocation2 + $0x28] sm:$0xff]  ;;  %v2564_v41 = vld [vmem:[#allocation2 + $0x50] sm:$0xff] }
 0x137   :  { %v750_v0 = vpop.f32.mrf.mxu0  ;;  %v878_v2 = vpop.f32.mrf.mxu1 }
 0x138   :  { %1030 = vst.msk [vmem:[#allocation2 + $0x68] sm:$0xff] %vm22_vm0, %v965_v62  ;;  %1062 = vst.msk [vmem:[#allocation2 + $0x168] sm:$0xff] %vm22_vm0, %v997_v63  ;;  %v1153_v63 = vsel %vm22_vm0, %v1087_v42, 0.0  ;;  %v1285_v0 = vmul.f32 %v1088_v48, %v1088_v48 }
 0x139   :  { %v753_v4 = vpop.f32.mrf.mxu0  ;;  %v881_v5 = vpop.f32.mrf.mxu1 }
 0x13a   :  { %v966_v6 = vadd.f32 %v753_v4, %v101_v1  ;;  %v998_v7 = vadd.f32 %v881_v5, %v133_v3  ;;  %v1090_v1 = vld [vmem:[#allocation2 + $0x30] sm:$0xff]  ;;  %v1347_v4 = vadd.f32 %v1346_v54, %v1345_v57  ;;  %v1152_v5 = vadd.f32 %v1151_v55, %v1150_v58 }
 0x13b   :  { %v755_v8 = vpop.f32.mrf.mxu0  ;;  %v883_v10 = vpop.f32.mrf.mxu1  ;;  %v1159_v31 = vsel %vm22_vm0, %v1090_v1, 0.0  ;;  %v1291_v55 = vmul.f32 %v2564_v41, %v2564_v41 }
 0x13c   :  { %1031 = vst.msk [vmem:[#allocation2 + $0x70] sm:$0xff] %vm22_vm0, %v966_v6  ;;  %1063 = vst.msk [vmem:[#allocation2 + $0x170] sm:$0xff] %vm22_vm0, %v998_v7  ;;  %v107_v7 = vld [vmem:[#allocation2 + $0xa0] sm:$0xff]  ;;  %v1350_v10 = vsel %vm22_vm0, %v1284_v56, 0.0  ;;  %v2575_v56 = vld [vmem:[#allocation2 + $0x58] sm:$0xff] }
 0x13d   :  { %v756_v12 = vpop.f32.mrf.mxu0  ;;  %v884_v13 = vpop.f32.mrf.mxu1 }
 0x13e   :  { %v967_v14 = vadd.f32 %v756_v12, %v102_v9  ;;  %v999_v15 = vadd.f32 %v884_v13, %v134_v11  ;;  %v139_v9 = vld [vmem:[#allocation2 + $0x1a0] sm:$0xff]  ;;  %v1155_v11 = vsel %vm22_vm0, %v1088_v48, 0.0  ;;  %v1286_v12 = vmul.f32 %v1089_v60, %v1089_v60 }
 0x13f   :  { %v758_v16 = vpop.f32.mrf.mxu0  ;;  %v886_v18 = vpop.f32.mrf.mxu1  ;;  %v1349_v13 = vadd.f32 %v1348_v59, %v1347_v4 }
 0x140   :  { %1032 = vst.msk [vmem:[#allocation2 + $0x78] sm:$0xff] %vm22_vm0, %v967_v14  ;;  %1064 = vst.msk [vmem:[#allocation2 + $0x178] sm:$0xff] %vm22_vm0, %v999_v15  ;;  %v1154_v14 = vadd.f32 %v1153_v63, %v1152_v5  ;;  %v1287_v15 = vmul.f32 %v1090_v1, %v1090_v1  ;;  %v2545_v16 = vld [vmem:[#allocation2 + $0x38] sm:$0xff]  ;;  %v2580_v1 = vld [vmem:[#allocation2 + $0x60] sm:$0xff] }
 0x141   :  { %v761_v20 = vpop.f32.mrf.mxu0  ;;  %v889_v21 = vpop.f32.mrf.mxu1  ;;  %v1288_v32 = vmul.f32 %v2545_v16, %v2545_v16  ;;  %v1161_v39 = vsel %vm22_vm0, %v2545_v16, 0.0  ;;  %v142_v5 = vld [vmem:[#allocation2 + $0x1b8] sm:$0xff] }
 0x142   :  { %v968_v22 = vadd.f32 %v761_v20, %v103_v17  ;;  %v1000_v23 = vadd.f32 %v889_v21, %v135_v19  ;;  %v1352_v19 = vsel %vm22_vm0, %v1285_v0, 0.0  ;;  %v1157_v20 = vsel %vm22_vm0, %v1089_v60, 0.0 }
 0x143   :  { %v763_v24 = vpop.f32.mrf.mxu0  ;;  %v891_v26 = vpop.f32.mrf.mxu1 }
 0x144   :  { %1033 = vst.msk [vmem:[#allocation2 + $0x80] sm:$0xff] %vm22_vm0, %v968_v22  ;;  %1065 = vst.msk [vmem:[#allocation2 + $0x180] sm:$0xff] %vm22_vm0, %v1000_v23  ;;  %v1351_v23 = vadd.f32 %v1350_v10, %v1349_v13  ;;  %v1156_v24 = vadd.f32 %v1155_v11, %v1154_v14  ;;  %v1364_v11 = vsel %vm22_vm0, %v1291_v55, 0.0 }
 0x145   :  { %v764_v29 = vpop.f32.mrf.mxu0  ;;  %v892_v30 = vpop.f32.mrf.mxu1 }
 0x146   :  { %v969_v33 = vadd.f32 %v764_v29, %v104_v25  ;;  %v1001_v34 = vadd.f32 %v892_v30, %v136_v27  ;;  %v2549_v25 = vld [vmem:[#allocation2 + $0x40] sm:$0xff]  ;;  %v108_v27 = vld [vmem:[#allocation2 + $0xa8] sm:$0xff]  ;;  %v1354_v30 = vsel %vm22_vm0, %v1286_v12, 0.0 }
 0x147   :  { %v766_v35 = vpop.f32.mrf.mxu0  ;;  %v894_v37 = vpop.f32.mrf.mxu1  ;;  %v140_v29 = vld [vmem:[#allocation2 + $0x1a8] sm:$0xff]  ;;  %v1289_v40 = vmul.f32 %v2549_v25, %v2549_v25 }
 0x148   :  { %1034 = vst.msk [vmem:[#allocation2 + $0x88] sm:$0xff] %vm22_vm0, %v969_v33  ;;  %1066 = vst.msk [vmem:[#allocation2 + $0x188] sm:$0xff] %vm22_vm0, %v1001_v34  ;;  %v1353_v33 = vadd.f32 %v1352_v19, %v1351_v23  ;;  %v1158_v34 = vadd.f32 %v1157_v20, %v1156_v24  ;;  %v1356_v35 = vsel %vm22_vm0, %v1287_v15, 0.0  ;;  %v2590_v12 = vld [vmem:[#allocation2 + $0x68] sm:$0xff]  ;;  %v1169_v15 = vsel %vm22_vm0, %v2575_v56, 0.0  ;;  %v111_v24 = vld [vmem:[#allocation2 + $0xc0] sm:$0xff] }
 0x149   :  { %v769_v43 = vpop.f32.mrf.mxu0  ;;  %v897_v44 = vpop.f32.mrf.mxu1  ;;  %v1360_v59 = vsel %vm22_vm0, %v1289_v40, 0.0 }
 0x14a   :  { %v970_v46 = vadd.f32 %v769_v43, %v105_v36  ;;  %v1002_v47 = vadd.f32 %v897_v44, %v137_v38  ;;  %v2558_v36 = vld [vmem:[#allocation2 + $0x48] sm:$0xff]  ;;  %v1355_v44 = vadd.f32 %v1354_v30, %v1353_v33  ;;  %v1160_v45 = vadd.f32 %v1159_v31, %v1158_v34  ;;  %v2607_v34 = vld [vmem:[#allocation2 + $0x78] sm:$0xff] }
 0x14b   :  { %v771_v49 = vpop.f32.mrf.mxu0  ;;  %v899_v51 = vpop.f32.mrf.mxu1  ;;  %v1165_v60 = vsel %vm22_vm0, %v2558_v36, 0.0  ;;  %v1294_v30 = vmul.f32 %v2590_v12, %v2590_v12 }
 0x14c   :  { %1035 = vst.msk [vmem:[#allocation2 + $0x90] sm:$0xff] %vm22_vm0, %v970_v46  ;;  %1067 = vst.msk [vmem:[#allocation2 + $0x190] sm:$0xff] %vm22_vm0, %v1002_v47  ;;  %v109_v47 = vld [vmem:[#allocation2 + $0xb0] sm:$0xff]  ;;  %v1163_v51 = vsel %vm22_vm0, %v2549_v25, 0.0  ;;  %v1357_v53 = vadd.f32 %v1356_v35, %v1355_v44  ;;  %v1162_v54 = vadd.f32 %v1161_v39, %v1160_v45  ;;  %v1173_v39 = vsel %vm22_vm0, %v2590_v12, 0.0  ;;  %v2612_v45 = vld [vmem:[#allocation2 + $0x80] sm:$0xff] }
 0x14d   :  { %v772_v61 = vpop.f32.mrf.mxu0  ;;  %v900_v62 = vpop.f32.mrf.mxu1  ;;  %v141_v49 = vld [vmem:[#allocation2 + $0x1b0] sm:$0xff] }
 0x14e   :  { %v971_v2 = vadd.f32 %v772_v61, %v106_v50  ;;  %v1003_v3 = vadd.f32 %v900_v62, %v138_v52  ;;  %v1358_v50 = vsel %vm22_vm0, %v1288_v32, 0.0  ;;  %v1290_v52 = vmul.f32 %v2558_v36, %v2558_v36 }
 0x14f   :  { %v774_v6 = vpop.f32.mrf.mxu0  ;;  %v902_v8 = vpop.f32.mrf.mxu1  ;;  %v1359_v63 = vadd.f32 %v1358_v50, %v1357_v53  ;;  %v1164_v0 = vadd.f32 %v1163_v51, %v1162_v54  ;;  %v1370_v50 = vsel %vm22_vm0, %v1294_v30, 0.0 }
 0x150   :  { %1036 = vst.msk [vmem:[#allocation2 + $0x98] sm:$0xff] %vm22_vm0, %v971_v2  ;;  %1068 = vst.msk [vmem:[#allocation2 + $0x198] sm:$0xff] %vm22_vm0, %v1003_v3  ;;  %v110_v3 = vld [vmem:[#allocation2 + $0xb8] sm:$0xff]  ;;  %v1362_v6 = vsel %vm22_vm0, %v1290_v52, 0.0  ;;  %v1292_v8 = vmul.f32 %v2575_v56, %v2575_v56  ;;  %v1296_v52 = vmul.f32 %v2607_v34, %v2607_v34 }
 0x151   :  { %v777_v17 = vpop.f32.mrf.mxu0  ;;  %v905_v18 = vpop.f32.mrf.mxu1  ;;  %v1166_v10 = vadd.f32 %v1165_v60, %v1164_v0  ;;  %v1177_v60 = vsel %vm22_vm0, %v2607_v34, 0.0 }
 0x152   :  { %v972_v21 = vadd.f32 %v777_v17, %v107_v7  ;;  %v1004_v22 = vadd.f32 %v905_v18, %v139_v9  ;;  %v1167_v7 = vsel %vm22_vm0, %v2564_v41, 0.0  ;;  %v1361_v9 = vadd.f32 %v1360_v59, %v1359_v63  ;;  %v2596_v18 = vld [vmem:[#allocation2 + $0x70] sm:$0xff] }
 0x153   :  { %v779_v26 = vpop.f32.mrf.mxu0  ;;  %v907_v28 = vpop.f32.mrf.mxu1  ;;  %v1293_v17 = vmul.f32 %v2580_v1, %v2580_v1  ;;  %v1295_v33 = vmul.f32 %v2596_v18, %v2596_v18  ;;  %v1175_v51 = vsel %vm22_vm0, %v2596_v18, 0.0 }
 0x154   :  { %1037 = vst.msk [vmem:[#allocation2 + $0xa0] sm:$0xff] %vm22_vm0, %v972_v21  ;;  %1069 = vst.msk [vmem:[#allocation2 + $0x1a0] sm:$0xff] %vm22_vm0, %v1004_v22  ;;  %v1363_v21 = vadd.f32 %v1362_v6, %v1361_v9  ;;  %v1168_v22 = vadd.f32 %v1167_v7, %v1166_v10  ;;  %v1366_v28 = vsel %vm22_vm0, %v1292_v8, 0.0  ;;  %v145_v7 = vld [vmem:[#allocation2 + $0x1d0] sm:$0xff]  ;;  %v1374_v8 = vsel %vm22_vm0, %v1296_v52, 0.0 }
 0x155   :  { %v780_v37 = vpop.f32.mrf.mxu0  ;;  %v908_v38 = vpop.f32.mrf.mxu1  ;;  %v1372_v55 = vsel %vm22_vm0, %v1295_v33, 0.0  ;;  %v1179_v9 = vsel %vm22_vm0, %v2612_v45, 0.0 }
 0x156   :  { %v973_v42 = vadd.f32 %v780_v37, %v108_v27  ;;  %v1005_v43 = vadd.f32 %v908_v38, %v140_v29  ;;  %v143_v27 = vld [vmem:[#allocation2 + $0x1c0] sm:$0xff]  ;;  %v1171_v29 = vsel %vm22_vm0, %v2580_v1, 0.0  ;;  %v1365_v31 = vadd.f32 %v1364_v11, %v1363_v21 }
 0x157   :  { %v782_v46 = vpop.f32.mrf.mxu0  ;;  %v910_v48 = vpop.f32.mrf.mxu1  ;;  %v1170_v32 = vadd.f32 %v1169_v15, %v1168_v22  ;;  %v1368_v38 = vsel %vm22_vm0, %v1293_v17, 0.0  ;;  %v2639_v15 = vld [vmem:[#allocation2 + $0x98] sm:$0xff] }
 0x158   :  { %1038 = vst.msk [vmem:[#allocation2 + $0xa8] sm:$0xff] %vm22_vm0, %v973_v42  ;;  %1070 = vst.msk [vmem:[#allocation2 + $0x1a8] sm:$0xff] %vm22_vm0, %v1005_v43  ;;  %v1367_v43 = vadd.f32 %v1366_v28, %v1365_v31  ;;  %v146_v31 = vld [vmem:[#allocation2 + $0x1d8] sm:$0xff] }
 0x159   :  { %v785_v57 = vpop.f32.mrf.mxu0  ;;  %v913_v58 = vpop.f32.mrf.mxu1  ;;  %v1172_v44 = vadd.f32 %v1171_v29, %v1170_v32  ;;  %v114_v29 = vld [vmem:[#allocation2 + $0xd8] sm:$0xff] }
 0x15a   :  { %v974_v61 = vadd.f32 %v785_v57, %v109_v47  ;;  %v1006_v62 = vadd.f32 %v913_v58, %v141_v49  ;;  %v112_v47 = vld [vmem:[#allocation2 + $0xc8] sm:$0xff]  ;;  %v1369_v53 = vadd.f32 %v1368_v38, %v1367_v43 }
 0x15b   :  { %v787_v2 = vpop.f32.mrf.mxu0  ;;  %v915_v4 = vpop.f32.mrf.mxu1  ;;  %v144_v49 = vld [vmem:[#allocation2 + $0x1c8] sm:$0xff]  ;;  %v1174_v54 = vadd.f32 %v1173_v39, %v1172_v44  ;;  %v1185_v44 = vsel %vm22_vm0, %v2639_v15, 0.0 }
 0x15c   :  { %1039 = vst.msk [vmem:[#allocation2 + $0xb0] sm:$0xff] %vm22_vm0, %v974_v61  ;;  %1071 = vst.msk [vmem:[#allocation2 + $0x1b0] sm:$0xff] %vm22_vm0, %v1006_v62  ;;  %v2622_v57 = vld [vmem:[#allocation2 + $0x88] sm:$0xff]  ;;  %v1297_v61 = vmul.f32 %v2612_v45, %v2612_v45  ;;  %v2628_v62 = vld [vmem:[#allocation2 + $0x90] sm:$0xff]  ;;  %v1371_v2 = vadd.f32 %v1370_v50, %v1369_v53 }
 0x15d   :  { %v788_v13 = vpop.f32.mrf.mxu0  ;;  %v916_v14 = vpop.f32.mrf.mxu1  ;;  %v1298_v10 = vmul.f32 %v2622_v57, %v2622_v57  ;;  %v1181_v21 = vsel %vm22_vm0, %v2622_v57, 0.0  ;;  %v1183_v33 = vsel %vm22_vm0, %v2628_v62, 0.0  ;;  %v115_v53 = vld [vmem:[#allocation2 + $0xe0] sm:$0xff] }
 0x15e   :  { %v975_v19 = vadd.f32 %v788_v13, %v110_v3  ;;  %v1007_v20 = vadd.f32 %v916_v14, %v142_v5  ;;  %v1176_v3 = vadd.f32 %v1175_v51, %v1174_v54  ;;  %v113_v5 = vld [vmem:[#allocation2 + $0xd0] sm:$0xff]  ;;  %v1373_v11 = vadd.f32 %v1372_v55, %v1371_v2  ;;  %v147_v55 = vld [vmem:[#allocation2 + $0x1e0] sm:$0xff] }
 0x15f   :  { %v790_v23 = vpop.f32.mrf.mxu0  ;;  %v918_v26 = vpop.f32.mrf.mxu1  ;;  %v1299_v14 = vmul.f32 %v2628_v62, %v2628_v62  ;;  %v1378_v32 = vsel %vm22_vm0, %v1298_v10, 0.0 }
 0x160   :  { %1040 = vst.msk [vmem:[#allocation2 + $0xb8] sm:$0xff] %vm22_vm0, %v975_v19  ;;  %1072 = vst.msk [vmem:[#allocation2 + $0x1b8] sm:$0xff] %vm22_vm0, %v1007_v20  ;;  %v1178_v13 = vadd.f32 %v1177_v60, %v1176_v3  ;;  %v1376_v20 = vsel %vm22_vm0, %v1297_v61, 0.0 }
 0x161   :  { %v793_v35 = vpop.f32.mrf.mxu0  ;;  %v921_v37 = vpop.f32.mrf.mxu1  ;;  %v1380_v39 = vsel %vm22_vm0, %v1299_v14, 0.0  ;;  %v116_v14 = vld [vmem:[#allocation2 + $0xe8] sm:$0xff] }
 0x162   :  { %v976_v40 = vadd.f32 %v793_v35, %v111_v24  ;;  %v1008_v42 = vadd.f32 %v921_v37, %v143_v27  ;;  %v1375_v24 = vadd.f32 %v1374_v8, %v1373_v11  ;;  %v1180_v26 = vadd.f32 %v1179_v9, %v1178_v13  ;;  %v2644_v27 = vld [vmem:[#allocation2 + $0xa0] sm:$0xff] }
 0x163   :  { %v795_v46 = vpop.f32.mrf.mxu0  ;;  %v923_v48 = vpop.f32.mrf.mxu1  ;;  %v1300_v35 = vmul.f32 %v2639_v15, %v2639_v15 }
 0x164   :  { %1041 = vst.msk [vmem:[#allocation2 + $0xc0] sm:$0xff] %vm22_vm0, %v976_v40  ;;  %1073 = vst.msk [vmem:[#allocation2 + $0x1c0] sm:$0xff] %vm22_vm0, %v1008_v42  ;;  %v1377_v37 = vadd.f32 %v1376_v20, %v1375_v24  ;;  %v1182_v38 = vadd.f32 %v1181_v21, %v1180_v26  ;;  %v2654_v40 = vld [vmem:[#allocation2 + $0xa8] sm:$0xff]  ;;  %v1301_v46 = vmul.f32 %v2644_v27, %v2644_v27 }
 0x165   :  { %v796_v58 = vpop.f32.mrf.mxu0  ;;  %v924_v59 = vpop.f32.mrf.mxu1  ;;  %v1302_v60 = vmul.f32 %v2654_v40, %v2654_v40 }
 0x166   :  { %v977_v63 = vadd.f32 %v796_v58, %v112_v47  ;;  %v1009_v0 = vadd.f32 %v924_v59, %v144_v49  ;;  %v2660_v47 = vld [vmem:[#allocation2 + $0xb0] sm:$0xff]  ;;  %v1379_v50 = vadd.f32 %v1378_v32, %v1377_v37  ;;  %v1184_v51 = vadd.f32 %v1183_v33, %v1182_v38 }
 0x167   :  { %v798_v4 = vpop.f32.mrf.mxu0  ;;  %v926_v6 = vpop.f32.mrf.mxu1  ;;  %v1382_v58 = vsel %vm22_vm0, %v1300_v35, 0.0  ;;  %v1187_v59 = vsel %vm22_vm0, %v2644_v27, 0.0  ;;  %v2671_v2 = vld [vmem:[#allocation2 + $0xb8] sm:$0xff]  ;;  %v1386_v20 = vsel %vm22_vm0, %v1302_v60, 0.0  ;;  %v1191_v21 = vsel %vm22_vm0, %v2660_v47, 0.0 }
 0x168   :  { %1042 = vst.msk [vmem:[#allocation2 + $0xc8] sm:$0xff] %vm22_vm0, %v977_v63  ;;  %1074 = vst.msk [vmem:[#allocation2 + $0x1c8] sm:$0xff] %vm22_vm0, %v1009_v0  ;;  %v1381_v61 = vadd.f32 %v1380_v39, %v1379_v50  ;;  %v1186_v63 = vadd.f32 %v1185_v44, %v1184_v51  ;;  %v1303_v0 = vmul.f32 %v2660_v47, %v2660_v47  ;;  %v1189_v6 = vsel %vm22_vm0, %v2654_v40, 0.0 }
 0x169   :  { %v801_v17 = vpop.f32.mrf.mxu0  ;;  %v929_v19 = vpop.f32.mrf.mxu1 }
 0x16a   :  { %v978_v22 = vadd.f32 %v801_v17, %v113_v5  ;;  %v1010_v23 = vadd.f32 %v929_v19, %v145_v7  ;;  %v1384_v5 = vsel %vm22_vm0, %v1301_v46, 0.0  ;;  %v1383_v9 = vadd.f32 %v1382_v58, %v1381_v61  ;;  %v148_v19 = vld [vmem:[#allocation2 + $0x1e8] sm:$0xff]  ;;  %v149_v46 = vld [vmem:[#allocation2 + $0x1f0] sm:$0xff] }
 0x16b   :  { %v803_v28 = vpop.f32.mrf.mxu0  ;;  %v931_v30 = vpop.f32.mrf.mxu1  ;;  %v1188_v10 = vadd.f32 %v1187_v59, %v1186_v63  ;;  %v2676_v11 = vld [vmem:[#allocation2 + $0xc0] sm:$0xff]  ;;  %v1388_v26 = vsel %vm22_vm0, %v1303_v0, 0.0 }
 0x16c   :  { %1043 = vst.msk [vmem:[#allocation2 + $0xd0] sm:$0xff] %vm22_vm0, %v978_v22  ;;  %1075 = vst.msk [vmem:[#allocation2 + $0x1d0] sm:$0xff] %vm22_vm0, %v1010_v23  ;;  %v1304_v22 = vmul.f32 %v2671_v2, %v2671_v2  ;;  %v1385_v23 = vadd.f32 %v1384_v5, %v1383_v9  ;;  %v1305_v32 = vmul.f32 %v2676_v11, %v2676_v11 }
 0x16d   :  { %v804_v42 = vpop.f32.mrf.mxu0  ;;  %v932_v43 = vpop.f32.mrf.mxu1  ;;  %v1190_v24 = vadd.f32 %v1189_v6, %v1188_v10  ;;  %v118_v6 = vld [vmem:[#allocation2 + $0xf8] sm:$0xff] }
 0x16e   :  { %v979_v48 = vadd.f32 %v804_v42, %v114_v29  ;;  %v1011_v49 = vadd.f32 %v932_v43, %v146_v31  ;;  %v1193_v31 = vsel %vm22_vm0, %v2671_v2, 0.0  ;;  %v1387_v38 = vadd.f32 %v1386_v20, %v1385_v23  ;;  %v117_v43 = vld [vmem:[#allocation2 + $0xf0] sm:$0xff] }
 0x16f   :  { %v806_v52 = vpop.f32.mrf.mxu0  ;;  %v934_v54 = vpop.f32.mrf.mxu1  ;;  %v2686_v28 = vld [vmem:[#allocation2 + $0xc8] sm:$0xff]  ;;  %v1192_v39 = vadd.f32 %v1191_v21, %v1190_v24  ;;  %v1392_v59 = vsel %vm22_vm0, %v1305_v32, 0.0 }
 0x170   :  { %1044 = vst.msk [vmem:[#allocation2 + $0xd8] sm:$0xff] %vm22_vm0, %v979_v48  ;;  %1076 = vst.msk [vmem:[#allocation2 + $0x1d8] sm:$0xff] %vm22_vm0, %v1011_v49  ;;  %v1390_v48 = vsel %vm22_vm0, %v1304_v22, 0.0  ;;  %v1195_v49 = vsel %vm22_vm0, %v2676_v11, 0.0  ;;  %v1306_v50 = vmul.f32 %v2686_v28, %v2686_v28  ;;  %v1389_v51 = vadd.f32 %v1388_v26, %v1387_v38 }
 0x171   :  { %v809_v3 = vpop.f32.mrf.mxu0  ;;  %v937_v4 = vpop.f32.mrf.mxu1  ;;  %v1194_v52 = vadd.f32 %v1193_v31, %v1192_v39  ;;  %v1197_v60 = vsel %vm22_vm0, %v2686_v28, 0.0 }
 0x172   :  { %v980_v7 = vadd.f32 %v809_v3, %v115_v53  ;;  %v1012_v8 = vadd.f32 %v937_v4, %v147_v55  ;;  %v1391_v0 = vadd.f32 %v1390_v48, %v1389_v51  ;;  %v1394_v9 = vsel %vm22_vm0, %v1306_v50, 0.0 }
 0x173   :  { %v811_v13 = vpop.f32.mrf.mxu0  ;;  %v939_v17 = vpop.f32.mrf.mxu1  ;;  %v2692_v33 = vld [vmem:[#allocation2 + $0xd0] sm:$0xff]  ;;  %v1196_v3 = vadd.f32 %v1195_v49, %v1194_v52 }
 0x174   :  { %1045 = vst.msk [vmem:[#allocation2 + $0xe0] sm:$0xff] %vm22_vm0, %v980_v7  ;;  %1077 = vst.msk [vmem:[#allocation2 + $0x1e0] sm:$0xff] %vm22_vm0, %v1012_v8  ;;  %v1307_v53 = vmul.f32 %v2692_v33, %v2692_v33  ;;  %v150_v8 = vld [vmem:[#allocation2 + $0x1f8] sm:$0xff]  ;;  %v1199_v10 = vsel %vm22_vm0, %v2692_v33, 0.0 }
 0x175   :  { %v812_v29 = vpop.f32.mrf.mxu0  ;;  %v940_v30 = vpop.f32.mrf.mxu1  ;;  %v1198_v17 = vadd.f32 %v1197_v60, %v1196_v3 }
 0x176   :  { %v981_v35 = vadd.f32 %v812_v29, %v116_v14  ;;  %v1013_v37 = vadd.f32 %v940_v30, %v148_v19  ;;  %v1393_v14 = vadd.f32 %v1392_v59, %v1391_v0  ;;  %v1396_v19 = vsel %vm22_vm0, %v1307_v53, 0.0 }
 0x177   :  { %v814_v42 = vpop.f32.mrf.mxu0  ;;  %v942_v44 = vpop.f32.mrf.mxu1  ;;  %v2703_v54 = vld [vmem:[#allocation2 + $0xd8] sm:$0xff]  ;;  %v1200_v30 = vadd.f32 %v1199_v10, %v1198_v17 }
 0x178   :  { %1046 = vst.msk [vmem:[#allocation2 + $0xe8] sm:$0xff] %vm22_vm0, %v981_v35  ;;  %1078 = vst.msk [vmem:[#allocation2 + $0x1e8] sm:$0xff] %vm22_vm0, %v1013_v37  ;;  %v1308_v13 = vmul.f32 %v2703_v54, %v2703_v54  ;;  %v1201_v22 = vsel %vm22_vm0, %v2703_v54, 0.0  ;;  %v1395_v29 = vadd.f32 %v1394_v9, %v1393_v14 }
 0x179   :  { %v817_v55 = vpop.f32.mrf.mxu0  ;;  %v945_v58 = vpop.f32.mrf.mxu1 }
 0x17a   :  { %v982_v61 = vadd.f32 %v817_v55, %v117_v43  ;;  %v1014_v63 = vadd.f32 %v945_v58, %v149_v46  ;;  %v1398_v37 = vsel %vm22_vm0, %v1308_v13, 0.0  ;;  %v1397_v42 = vadd.f32 %v1396_v19, %v1395_v29  ;;  %v2741_v55 = vld [vmem:[#allocation2 + $0x100] sm:$0xff]  ;;  %v2761_v19 = vld [vmem:[#allocation2 + $0x118] sm:$0xff] }
 0x17b   :  { %v2708_v4 = vld [vmem:[#allocation2 + $0xe0] sm:$0xff]  ;;  %v819_v5 = vpop.f32.mrf.mxu0  ;;  %v947_v7 = vpop.f32.mrf.mxu1  ;;  %v1202_v43 = vadd.f32 %v1201_v22, %v1200_v30  ;;  %v1211_v13 = vsel %vm22_vm0, %v2741_v55, 0.0 }
 0x17c   :  { %1047 = vst.msk [vmem:[#allocation2 + $0xf0] sm:$0xff] %vm22_vm0, %v982_v61  ;;  %1079 = vst.msk [vmem:[#allocation2 + $0x1f0] sm:$0xff] %vm22_vm0, %v1014_v63  ;;  %v1309_v23 = vmul.f32 %v2708_v4, %v2708_v4  ;;  %v1203_v38 = vsel %vm22_vm0, %v2708_v4, 0.0  ;;  %v1399_v48 = vadd.f32 %v1398_v37, %v1397_v42  ;;  %v2744_v61 = vld [vmem:[#allocation2 + $0x108] sm:$0xff]  ;;  %v1313_v5 = vmul.f32 %v2741_v55, %v2741_v55 }
 0x17d   :  { %v820_v20 = vpop.f32.mrf.mxu0  ;;  %v948_v21 = vpop.f32.mrf.mxu1  ;;  %v1204_v49 = vadd.f32 %v1203_v38, %v1202_v43  ;;  %v1314_v14 = vmul.f32 %v2744_v61, %v2744_v61  ;;  %v1316_v37 = vmul.f32 %v2761_v19, %v2761_v19  ;;  %v2775_v38 = vld [vmem:[#allocation2 + $0x128] sm:$0xff] }
 0x17e   :  { %v983_v24 = vadd.f32 %v820_v20, %v118_v6  ;;  %v1015_v26 = vadd.f32 %v948_v21, %v150_v8  ;;  %v1400_v44 = vsel %vm22_vm0, %v1309_v23, 0.0  ;;  %v2754_v8 = vld [vmem:[#allocation2 + $0x110] sm:$0xff]  ;;  %v1408_v22 = vsel %vm22_vm0, %v1313_v5, 0.0 }
 0x17f   :  { %v2722_v31 = vld [vmem:[#allocation2 + $0xe8] sm:$0xff]  ;;  %v822_v32 = vpop.f32.mrf.mxu0  ;;  %v950_v35 = vpop.f32.mrf.mxu1  ;;  %v1401_v58 = vadd.f32 %v1400_v44, %v1399_v48  ;;  %v1213_v23 = vsel %vm22_vm0, %v2744_v61, 0.0  ;;  %v1217_v44 = vsel %vm22_vm0, %v2761_v19, 0.0  ;;  %v2782_v48 = vld [vmem:[#allocation2 + $0x130] sm:$0xff]  ;;  %v1221_v5 = vsel %vm22_vm0, %v2775_v38, 0.0 }
 0x180   :  { %v1310_v39 = vmul.f32 %v2722_v31, %v2722_v31  ;;  %1048 = vst.msk [vmem:[#allocation2 + $0xf8] sm:$0xff] %vm22_vm0, %v983_v24  ;;  %1080 = vst.msk [vmem:[#allocation2 + $0x1f8] sm:$0xff] %vm22_vm0, %v1015_v26  ;;  %v1205_v46 = vsel %vm22_vm0, %v2722_v31, 0.0  ;;  %v1315_v24 = vmul.f32 %v2754_v8, %v2754_v8  ;;  %v2768_v26 = vld [vmem:[#allocation2 + $0x120] sm:$0xff]  ;;  %v1410_v32 = vsel %vm22_vm0, %v1314_v14, 0.0 }
 0x181   :  { %v1206_v59 = vadd.f32 %v1205_v46, %v1204_v49  ;;  %v1215_v35 = vsel %vm22_vm0, %v2754_v8, 0.0  ;;  %v1317_v46 = vmul.f32 %v2768_v26, %v2768_v26  ;;  %v1223_v14 = vsel %vm22_vm0, %v2782_v48, 0.0 }
 0x182   :  { %v1402_v51 = vsel %vm22_vm0, %v1310_v39, 0.0  ;;  %v1412_v43 = vsel %vm22_vm0, %v1315_v24, 0.0 }
 0x183   :  { %v2734_v50 = vld [vmem:[#allocation2 + $0xf0] sm:$0xff]  ;;  %v1403_v63 = vadd.f32 %v1402_v51, %v1401_v58  ;;  %v1318_v58 = vmul.f32 %v2775_v38, %v2775_v38 }
 0x184   :  { %v1207_v52 = vsel %vm22_vm0, %v2734_v50, 0.0  ;;  %v1311_v53 = vmul.f32 %v2734_v50, %v2734_v50 }
 0x185   :  { %v1208_v0 = vadd.f32 %v1207_v52, %v1206_v59  ;;  %v1414_v52 = vsel %vm22_vm0, %v1316_v37, 0.0  ;;  %v2789_v59 = vld [vmem:[#allocation2 + $0x138] sm:$0xff] }
 0x186   :  { %v1404_v60 = vsel %vm22_vm0, %v1311_v53, 0.0  ;;  %v1219_v53 = vsel %vm22_vm0, %v2768_v26, 0.0  ;;  %v1225_v24 = vsel %vm22_vm0, %v2789_v59, 0.0 }
 0x187   :  { %v2746_v3 = vld [vmem:[#allocation2 + $0xf8] sm:$0xff]  ;;  %v1405_v9 = vadd.f32 %v1404_v60, %v1403_v63 }
 0x188   :  { %v1209_v6 = vsel %vm22_vm0, %v2746_v3, 0.0  ;;  %v1312_v7 = vmul.f32 %v2746_v3, %v2746_v3 }
 0x189   :  { %v1210_v10 = vadd.f32 %v1209_v6, %v1208_v0  ;;  %v1416_v0 = vsel %vm22_vm0, %v1317_v46, 0.0  ;;  %v1319_v6 = vmul.f32 %v2782_v48, %v2782_v48 }
 0x18a   :  { %v1406_v17 = vsel %vm22_vm0, %v1312_v7, 0.0  ;;  %v2796_v7 = vld [vmem:[#allocation2 + $0x140] sm:$0xff] }
 0x18b   :  { %v1212_v20 = vadd.f32 %v1211_v13, %v1210_v10  ;;  %v1407_v21 = vadd.f32 %v1406_v17, %v1405_v9  ;;  %v1418_v13 = vsel %vm22_vm0, %v1318_v58, 0.0  ;;  %v1320_v17 = vmul.f32 %v2789_v59, %v2789_v59 }
 0x18d   :  { %v1214_v29 = vadd.f32 %v1213_v23, %v1212_v20  ;;  %v1409_v30 = vadd.f32 %v1408_v22, %v1407_v21  ;;  %v2803_v20 = vld [vmem:[#allocation2 + $0x148] sm:$0xff]  ;;  %v1420_v23 = vsel %vm22_vm0, %v1319_v6, 0.0  ;;  %v1422_v37 = vsel %vm22_vm0, %v1320_v17, 0.0 }
 0x18e   :  { %v2831_v6 = vld [vmem:[#allocation2 + $0x168] sm:$0xff] }
 0x18f   :  { %v1216_v39 = vadd.f32 %v1215_v35, %v1214_v29  ;;  %v1411_v42 = vadd.f32 %v1410_v32, %v1409_v30  ;;  %v1321_v29 = vmul.f32 %v2796_v7, %v2796_v7  ;;  %v2810_v30 = vld [vmem:[#allocation2 + $0x150] sm:$0xff]  ;;  %4134 = vst [vmem:[#allocation3_spill] sm:$0xff] %v2831_v6 }
 0x191   :  { %v1218_v49 = vadd.f32 %v1217_v44, %v1216_v39  ;;  %v1413_v51 = vadd.f32 %v1412_v43, %v1411_v42  ;;  %v1227_v39 = vsel %vm22_vm0, %v2796_v7, 0.0  ;;  %v1322_v42 = vmul.f32 %v2803_v20, %v2803_v20  ;;  %v2817_v43 = vld [vmem:[#allocation2 + $0x158] sm:$0xff] }
 0x193   :  { %v1220_v60 = vadd.f32 %v1219_v53, %v1218_v49  ;;  %v1415_v63 = vadd.f32 %v1414_v52, %v1413_v51  ;;  %v1424_v49 = vsel %vm22_vm0, %v1321_v29, 0.0  ;;  %v1229_v51 = vsel %vm22_vm0, %v2803_v20, 0.0  ;;  %v2824_v53 = vld [vmem:[#allocation2 + $0x160] sm:$0xff] }
 0x194   :  { %v1323_v52 = vmul.f32 %v2810_v30, %v2810_v30  ;;  %v1325_v17 = vmul.f32 %v2824_v53, %v2824_v53  ;;  %v1235_v29 = vsel %vm22_vm0, %v2824_v53, 0.0 }
 0x195   :  { %v1222_v9 = vadd.f32 %v1221_v5, %v1220_v60  ;;  %v1417_v10 = vadd.f32 %v1416_v0, %v1415_v63  ;;  %v1426_v63 = vsel %vm22_vm0, %v1322_v42, 0.0  ;;  %v1231_v0 = vsel %vm22_vm0, %v2810_v30, 0.0 }
 0x196   :  { %v1324_v5 = vmul.f32 %v2817_v43, %v2817_v43  ;;  %v1432_v42 = vsel %vm22_vm0, %v1325_v17, 0.0 }
 0x197   :  { %v1224_v21 = vadd.f32 %v1223_v14, %v1222_v9  ;;  %v1419_v22 = vadd.f32 %v1418_v13, %v1417_v10  ;;  %v1428_v13 = vsel %vm22_vm0, %v1323_v52, 0.0  ;;  %v1233_v14 = vsel %vm22_vm0, %v2817_v43, 0.0 }
 0x199   :  { %v1226_v32 = vadd.f32 %v1225_v24, %v1224_v21  ;;  %v1421_v35 = vadd.f32 %v1420_v23, %v1419_v22  ;;  %v2838_v21 = vld [vmem:[#allocation2 + $0x170] sm:$0xff]  ;;  %v1430_v24 = vsel %vm22_vm0, %v1324_v5, 0.0 }
 0x19a   :  { %4135 = vst [vmem:[#allocation4_spill] sm:$0xff] %v2838_v21 }
 0x19b   :  { %v1423_v44 = vadd.f32 %v1422_v37, %v1421_v35  ;;  %v1228_v46 = vadd.f32 %v1227_v39, %v1226_v32  ;;  %v1326_v32 = vmul.f32 %v2831_v6, %v2831_v6  ;;  %v2845_v35 = vld [vmem:[#allocation2 + $0x178] sm:$0xff] }
 0x19c   :  { %4136 = vst [vmem:[#allocation5_spill] sm:$0xff] %v2845_v35 }
 0x19d   :  { %v1230_v58 = vadd.f32 %v1229_v51, %v1228_v46  ;;  %v1425_v60 = vadd.f32 %v1424_v49, %v1423_v44  ;;  %v1237_v44 = vsel %vm22_vm0, %v2831_v6, 0.0  ;;  %v1327_v46 = vmul.f32 %v2838_v21, %v2838_v21  ;;  %v2852_v49 = vld [vmem:[#allocation2 + $0x180] sm:$0xff] }
 0x19e   :  { %4137 = vst [vmem:[#allocation6_spill] sm:$0xff] %v2852_v49 }
 0x19f   :  { %v1232_v9 = vadd.f32 %v1231_v0, %v1230_v58  ;;  %v1427_v10 = vadd.f32 %v1426_v63, %v1425_v60  ;;  %v1434_v58 = vsel %vm22_vm0, %v1326_v32, 0.0  ;;  %v1239_v60 = vsel %vm22_vm0, %v2838_v21, 0.0  ;;  %v2859_v0 = vld [vmem:[#allocation2 + $0x188] sm:$0xff] }
 0x1a0   :  { %v1328_v63 = vmul.f32 %v2845_v35, %v2845_v35  ;;  %4138 = vst [vmem:[#allocation7_spill] sm:$0xff] %v2859_v0  ;;  %v1330_v32 = vmul.f32 %v2859_v0, %v2859_v0 }
 0x1a1   :  { %v1234_v22 = vadd.f32 %v1233_v14, %v1232_v9  ;;  %v1429_v23 = vadd.f32 %v1428_v13, %v1427_v10  ;;  %v1436_v10 = vsel %vm22_vm0, %v1327_v46, 0.0  ;;  %v1241_v13 = vsel %vm22_vm0, %v2845_v35, 0.0 }
 0x1a2   :  { %v1329_v14 = vmul.f32 %v2852_v49, %v2852_v49  ;;  %v1245_v46 = vsel %vm22_vm0, %v2859_v0, 0.0 }
 0x1a3   :  { %v1236_v37 = vadd.f32 %v1235_v29, %v1234_v22  ;;  %v1431_v39 = vadd.f32 %v1430_v24, %v1429_v23  ;;  %v2866_v23 = vld [vmem:[#allocation2 + $0x190] sm:$0xff]  ;;  %v1438_v24 = vsel %vm22_vm0, %v1328_v63, 0.0  ;;  %v1243_v29 = vsel %vm22_vm0, %v2852_v49, 0.0 }
 0x1a4   :  { %4139 = vst [vmem:[#allocation8_spill] sm:$0xff] %v2866_v23  ;;  %v1442_v63 = vsel %vm22_vm0, %v1330_v32, 0.0 }
 0x1a5   :  { %v1238_v51 = vadd.f32 %v1237_v44, %v1236_v37  ;;  %v1433_v52 = vadd.f32 %v1432_v42, %v1431_v39  ;;  %v2873_v42 = vld [vmem:[#allocation2 + $0x198] sm:$0xff]  ;;  %v1440_v44 = vsel %vm22_vm0, %v1329_v14, 0.0  ;;  %v2887_v14 = vld [vmem:[#allocation2 + $0x1a8] sm:$0xff] }
 0x1a6   :  { %4140 = vst [vmem:[#allocation9_spill] sm:$0xff] %v2873_v42  ;;  %4142 = vst [vmem:[#allocation11_spill] sm:$0xff] %v2887_v14 }
 0x1a7   :  { %v1240_v5 = vadd.f32 %v1239_v60, %v1238_v51  ;;  %v1435_v9 = vadd.f32 %v1434_v58, %v1433_v52  ;;  %v1331_v51 = vmul.f32 %v2866_v23, %v2866_v23  ;;  %v2880_v60 = vld [vmem:[#allocation2 + $0x1a0] sm:$0xff] }
 0x1a8   :  { %4141 = vst [vmem:[#allocation10_spill] sm:$0xff] %v2880_v60 }
 0x1a9   :  { %v1242_v17 = vadd.f32 %v1241_v13, %v1240_v5  ;;  %v1437_v22 = vadd.f32 %v1436_v10, %v1435_v9  ;;  %v1247_v5 = vsel %vm22_vm0, %v2866_v23, 0.0  ;;  %v1332_v9 = vmul.f32 %v2873_v42, %v2873_v42 }
 0x1ab   :  { %v1244_v37 = vadd.f32 %v1243_v29, %v1242_v17  ;;  %v1439_v39 = vadd.f32 %v1438_v24, %v1437_v22  ;;  %v1444_v17 = vsel %vm22_vm0, %v1331_v51, 0.0  ;;  %v1249_v22 = vsel %vm22_vm0, %v2873_v42, 0.0 }
 0x1ac   :  { %v1333_v24 = vmul.f32 %v2880_v60, %v2880_v60 }
 0x1ad   :  { %v1246_v52 = vadd.f32 %v1245_v46, %v1244_v37  ;;  %v1441_v58 = vadd.f32 %v1440_v44, %v1439_v39  ;;  %v2894_v37 = vld [vmem:[#allocation2 + $0x1b0] sm:$0xff]  ;;  %v1446_v39 = vsel %vm22_vm0, %v1332_v9, 0.0  ;;  %v1251_v44 = vsel %vm22_vm0, %v2880_v60, 0.0 }
 0x1ae   :  { %4143 = vst [vmem:[#allocation12_spill] sm:$0xff] %v2894_v37  ;;  %v1334_v46 = vmul.f32 %v2887_v14, %v2887_v14 }
 0x1af   :  { %v1443_v10 = vadd.f32 %v1442_v63, %v1441_v58  ;;  %v1248_v13 = vadd.f32 %v1247_v5, %v1246_v52  ;;  %v2901_v58 = vld [vmem:[#allocation2 + $0x1b8] sm:$0xff]  ;;  %v1448_v63 = vsel %vm22_vm0, %v1333_v24, 0.0  ;;  %v1253_v5 = vsel %vm22_vm0, %v2887_v14, 0.0 }
 0x1b0   :  { %4144 = vst [vmem:[#allocation13_spill] sm:$0xff] %v2901_v58 }
 0x1b1   :  { %v1445_v29 = vadd.f32 %v1444_v17, %v1443_v10  ;;  %v1250_v32 = vadd.f32 %v1249_v22, %v1248_v13  ;;  %v1335_v10 = vmul.f32 %v2894_v37, %v2894_v37  ;;  %v2908_v17 = vld [vmem:[#allocation2 + $0x1c0] sm:$0xff]  ;;  %v1450_v22 = vsel %vm22_vm0, %v1334_v46, 0.0 }
 0x1b2   :  { %4145 = vst [vmem:[#allocation14_spill] sm:$0xff] %v2908_v17 }
 0x1b3   :  { %v1447_v52 = vadd.f32 %v1446_v39, %v1445_v29  ;;  %v1252_v51 = vadd.f32 %v1251_v44, %v1250_v32  ;;  %v1255_v29 = vsel %vm22_vm0, %v2894_v37, 0.0  ;;  %v1336_v32 = vmul.f32 %v2901_v58, %v2901_v58  ;;  %v2915_v44 = vld [vmem:[#allocation2 + $0x1c8] sm:$0xff] }
 0x1b4   :  { %4146 = vst [vmem:[#allocation15_spill] sm:$0xff] %v2915_v44  ;;  %v1452_v14 = vsel %vm22_vm0, %v1335_v10, 0.0 }
 0x1b5   :  { %v1449_v13 = vadd.f32 %v1448_v63, %v1447_v52  ;;  %v1254_v9 = vadd.f32 %v1253_v5, %v1252_v51  ;;  %v1257_v52 = vsel %vm22_vm0, %v2901_v58, 0.0  ;;  %v1337_v51 = vmul.f32 %v2908_v17, %v2908_v17  ;;  %v2922_v5 = vld [vmem:[#allocation2 + $0x1d0] sm:$0xff] }
 0x1b6   :  { %4147 = vst [vmem:[#allocation16_spill] sm:$0xff] %v2922_v5  ;;  %v1454_v37 = vsel %vm22_vm0, %v1336_v32, 0.0 }
 0x1b7   :  { %v1451_v39 = vadd.f32 %v1450_v22, %v1449_v13  ;;  %v1256_v24 = vadd.f32 %v1255_v29, %v1254_v9  ;;  %v1259_v13 = vsel %vm22_vm0, %v2908_v17, 0.0  ;;  %v1338_v9 = vmul.f32 %v2915_v44, %v2915_v44  ;;  %v2929_v29 = vld [vmem:[#allocation2 + $0x1d8] sm:$0xff] }
 0x1b8   :  { %4148 = vst [vmem:[#allocation17_spill] sm:$0xff] %v2929_v29  ;;  %v1456_v58 = vsel %vm22_vm0, %v1337_v51, 0.0 }
 0x1b9   :  { %v1453_v63 = vadd.f32 %v1452_v14, %v1451_v39  ;;  %v1258_v46 = vadd.f32 %v1257_v52, %v1256_v24  ;;  %v1261_v14 = vsel %vm22_vm0, %v2915_v44, 0.0  ;;  %v1339_v39 = vmul.f32 %v2922_v5, %v2922_v5  ;;  %v2936_v52 = vld [vmem:[#allocation2 + $0x1e0] sm:$0xff] }
 0x1ba   :  { %4149 = vst [vmem:[#allocation18_spill] sm:$0xff] %v2936_v52  ;;  %v1458_v17 = vsel %vm22_vm0, %v1338_v9, 0.0 }
 0x1bb   :  { %v1455_v22 = vadd.f32 %v1454_v37, %v1453_v63  ;;  %v1260_v10 = vadd.f32 %v1259_v13, %v1258_v46  ;;  %v1263_v37 = vsel %vm22_vm0, %v2922_v5, 0.0  ;;  %v1340_v63 = vmul.f32 %v2929_v29, %v2929_v29  ;;  %v2943_v13 = vld [vmem:[#allocation2 + $0x1e8] sm:$0xff] }
 0x1bc   :  { %4150 = vst [vmem:[#allocation19_spill] sm:$0xff] %v2943_v13  ;;  %v1460_v44 = vsel %vm22_vm0, %v1339_v39, 0.0 }
 0x1bd   :  { %v1457_v24 = vadd.f32 %v1456_v58, %v1455_v22  ;;  %v1262_v32 = vadd.f32 %v1261_v14, %v1260_v10  ;;  %v1265_v58 = vsel %vm22_vm0, %v2929_v29, 0.0  ;;  %v1341_v22 = vmul.f32 %v2936_v52, %v2936_v52  ;;  %v2950_v14 = vld [vmem:[#allocation2 + $0x1f0] sm:$0xff] }
 0x1be   :  { %4151 = vst [vmem:[#allocation20_spill] sm:$0xff] %v2950_v14  ;;  %v1462_v5 = vsel %vm22_vm0, %v1340_v63, 0.0 }
 0x1bf   :  { %v1459_v46 = vadd.f32 %v1458_v17, %v1457_v24  ;;  %v1264_v51 = vadd.f32 %v1263_v37, %v1262_v32  ;;  %v1267_v17 = vsel %vm22_vm0, %v2936_v52, 0.0  ;;  %v1342_v24 = vmul.f32 %v2943_v13, %v2943_v13  ;;  %v2957_v37 = vld [vmem:[#allocation2 + $0x1f8] sm:$0xff]  ;;  %v4164_v6 = vld [vmem:[#allocation17_spill] sm:$0xff] }
 0x1c0   :  { %4152 = vst [vmem:[#allocation21_spill] sm:$0xff] %v2957_v37  ;;  %v1464_v29 = vsel %vm22_vm0, %v1341_v22, 0.0  ;;  %v1271_v52 = vsel %vm22_vm0, %v2950_v14, 0.0 }
 0x1c1   :  { %v1461_v10 = vadd.f32 %v1460_v44, %v1459_v46  ;;  %v1266_v9 = vadd.f32 %v1265_v58, %v1264_v51  ;;  %v1269_v44 = vsel %vm22_vm0, %v2943_v13, 0.0  ;;  %v1343_v46 = vmul.f32 %v2950_v14, %v2950_v14  ;;  %v4166_v35 = vld [vmem:[#allocation18_spill] sm:$0xff] }
 0x1c2   :  { %v1466_v58 = vsel %vm22_vm0, %v1342_v24, 0.0 }
 0x1c3   :  { %v1463_v32 = vadd.f32 %v1462_v5, %v1461_v10  ;;  %v1268_v39 = vadd.f32 %v1267_v17, %v1266_v9  ;;  %v1344_v5 = vmul.f32 %v2957_v37, %v2957_v37  ;;  %v1468_v22 = vsel %vm22_vm0, %v1343_v46, 0.0 }
 0x1c4   :  { %v1273_v17 = vsel %vm22_vm0, %v2957_v37, 0.0  ;;  %v1550_v37 = vlaneseq }
 0x1c5   :  { %v1465_v51 = vadd.f32 %v1464_v29, %v1463_v32  ;;  %v1270_v63 = vadd.f32 %v1269_v44, %v1268_v39  ;;  %v1470_v29 = vsel %vm22_vm0, %v1344_v5, 0.0 }
 0x1c7   :  { %v1467_v10 = vadd.f32 %v1466_v58, %v1465_v51  ;;  %v1272_v9 = vadd.f32 %v1271_v52, %v1270_v63 }
 0x1c9   :  { %v1469_v13 = vadd.f32 %v1468_v22, %v1467_v10  ;;  %v1274_v60 = vadd.f32 %v1273_v17, %v1272_v9  ;;  %v2979_v22 = vld [vmem:[#allocation2] sm:$0xff]  ;;  %v2992_v17 = vld [vmem:[#allocation2 + $0x18] sm:$0xff] }
 0x1cb   :  { %v1275_v32 = vrot.slane %v1274_v60, 4  ;;  %v1471_v39 = vadd.f32 %v1470_v29, %v1469_v13  ;;  %v2977_v13 = vshrl.u32 %v1550_v37, 7  ;;  %v4169_v37 = vld [vmem:[#allocation21_spill] sm:$0xff] }
 0x1cd   :  { %v1276_v24 = vadd.f32 %v1275_v32, %v1274_v60  ;;  %v1472_v44 = vrot.slane %v1471_v39, 4  ;;  %v2996_v32 = vld [vmem:[#allocation2 + $0x20] sm:$0xff]  ;;  %v4165_v21 = vsub.s32 0, %v2977_v13 }
 0x1cf   :  { %v1277_v42 = vrot.slane %v1276_v24, 2  ;;  %v1473_v14 = vadd.f32 %v1472_v44, %v1471_v39 }
 0x1d1   :  { %v1278_v23 = vadd.f32 %v1277_v42, %v1276_v24  ;;  %v1474_v0 = vrot.slane %v1473_v14, 2  ;;  %v3000_v24 = vld [vmem:[#allocation2 + $0x28] sm:$0xff] }
 0x1d3   :  { %v1279_v49 = vrot.slane %v1278_v23, 1  ;;  %v1475_v51 = vadd.f32 %v1474_v0, %v1473_v14  ;;  %v2988_v14 = vld [vmem:[#allocation2 + $0x10] sm:$0xff] }
 0x1d5   :  { %v1280_v52 = vadd.f32 %v1279_v49, %v1278_v23  ;;  %v1476_v63 = vrot.slane %v1475_v51, 1  ;;  %v2983_v49 = vld [vmem:[#allocation2 + $0x8] sm:$0xff] }
 0x1d6   :  { %v4155_v23 = vld [vmem:[#allocation8_spill] sm:$0xff] }
 0x1d7   :  { %v1477_v46 = vadd.f32 %v1476_v63, %v1475_v51  ;;  %v2973_v58 = vmul.f32 0.001953125, %v1280_v52  ;;  %v3004_v51 = vld [vmem:[#allocation2 + $0x30] sm:$0xff]  ;;  %v4167_v63 = vld [vmem:[#allocation19_spill] sm:$0xff] }
 0x1d9   :  { %v1479_v10 = vmul.f32 0.001953125, %v1477_v46  ;;  %v1480_v5 = vmul.f32 %v2973_v58, %v2973_v58  ;;  %v4154_v46 = vld [vmem:[#allocation7_spill] sm:$0xff]  ;;  %v4170_v0 = vsub.f32 %v2979_v22, %v2973_v58  ;;  %v4173_v44 = vsub.f32 %v2992_v17, %v2973_v58 }
 0x1db   :  { %v1481_v9 = vsub.f32 %v1479_v10, %v1480_v5  ;;  %v1484_v5 = vld [vmem:[%s4096_s2] sm:$0x1] }
 0x1dd   :  { %v1482_v60 = vadd.f32 1e-05, %v1481_v9  ;;  %v4163_v9 = vld [vmem:[#allocation16_spill] sm:$0xff] }
 0x1df   :  { %2048 = vrsqrt.f32 %v1482_v60 }
 0x1ec   :  { %v2049_v39 = vpop.eup %2048 }
 0x1ed   :  { %v1485_v10 = vmul.f32 %v2049_v39, %v1484_v5  ;;  %v4168_v5 = vld [vmem:[#allocation20_spill] sm:$0xff] }
 0x1ef   :  { %v3119_v60 = vrot.slane %v1485_v10, %v4165_v21  ;;  %v4171_v21 = vsub.f32 %v2983_v49, %v2973_v58  ;;  %v4172_v10 = vsub.f32 %v2988_v14, %v2973_v58 }
 0x1f1   :  { %v3133_v42 = vmul.f32 %v3119_v60, %v4170_v0  ;;  %v3139_v13 = vmul.f32 %v3119_v60, %v4171_v21  ;;  %v3145_v39 = vmul.f32 %v3119_v60, %v4172_v10  ;;  %v3151_v22 = vmul.f32 %v3119_v60, %v4173_v44 }
 0x1f2   :  { %v4174_v0 = vsub.f32 %v2996_v32, %v2973_v58  ;;  %v4175_v21 = vsub.f32 %v3000_v24, %v2973_v58  ;;  %v4176_v10 = vsub.f32 %v3004_v51, %v2973_v58  ;;  %v4177_v44 = vsub.f32 %v2545_v16, %v2973_v58 }
 0x1f4   :  { %v3157_v49 = vmul.f32 %v3119_v60, %v4174_v0  ;;  %v3163_v14 = vmul.f32 %v3119_v60, %v4175_v21  ;;  %v3169_v17 = vmul.f32 %v3119_v60, %v4176_v10  ;;  %v3175_v32 = vmul.f32 %v3119_v60, %v4177_v44 }
 0x1f5   :  { %v4178_v0 = vsub.f32 %v2549_v25, %v2973_v58  ;;  %v4179_v21 = vsub.f32 %v2558_v36, %v2973_v58  ;;  %v4180_v10 = vsub.f32 %v2564_v41, %v2973_v58  ;;  %v4181_v44 = vsub.f32 %v2575_v56, %v2973_v58 }
 0x1f7   :  { %v3181_v24 = vmul.f32 %v3119_v60, %v4178_v0  ;;  %v3187_v51 = vmul.f32 %v3119_v60, %v4179_v21  ;;  %v3193_v16 = vmul.f32 %v3119_v60, %v4180_v10  ;;  %v3199_v25 = vmul.f32 %v3119_v60, %v4181_v44 }
 0x1f8   :  { %v4182_v0 = vsub.f32 %v2580_v1, %v2973_v58  ;;  %v4183_v21 = vsub.f32 %v2590_v12, %v2973_v58  ;;  %v4184_v10 = vsub.f32 %v2596_v18, %v2973_v58  ;;  %v4185_v44 = vsub.f32 %v2607_v34, %v2973_v58 }
 0x1fa   :  { %v3205_v36 = vmul.f32 %v3119_v60, %v4182_v0  ;;  %v3211_v41 = vmul.f32 %v3119_v60, %v4183_v21  ;;  %v3217_v56 = vmul.f32 %v3119_v60, %v4184_v10  ;;  %v3223_v1 = vmul.f32 %v3119_v60, %v4185_v44 }
 0x1fb   :  { %v4186_v0 = vsub.f32 %v2612_v45, %v2973_v58  ;;  %v4187_v21 = vsub.f32 %v2622_v57, %v2973_v58  ;;  %v4188_v10 = vsub.f32 %v2628_v62, %v2973_v58  ;;  %v4189_v44 = vsub.f32 %v2639_v15, %v2973_v58 }
 0x1fd   :  { %v3229_v12 = vmul.f32 %v3119_v60, %v4186_v0  ;;  %v3235_v18 = vmul.f32 %v3119_v60, %v4187_v21  ;;  %v3241_v34 = vmul.f32 %v3119_v60, %v4188_v10  ;;  %v3247_v45 = vmul.f32 %v3119_v60, %v4189_v44 }
 0x1fe   :  { %v4190_v0 = vsub.f32 %v2644_v27, %v2973_v58  ;;  %v4191_v21 = vsub.f32 %v2654_v40, %v2973_v58  ;;  %v4192_v10 = vsub.f32 %v2660_v47, %v2973_v58  ;;  %v4193_v44 = vsub.f32 %v2671_v2, %v2973_v58 }
 0x200   :  { %v3253_v57 = vmul.f32 %v3119_v60, %v4190_v0  ;;  %v3259_v62 = vmul.f32 %v3119_v60, %v4191_v21  ;;  %v3265_v15 = vmul.f32 %v3119_v60, %v4192_v10  ;;  %v3271_v27 = vmul.f32 %v3119_v60, %v4193_v44 }
 0x201   :  { %v4194_v0 = vsub.f32 %v2676_v11, %v2973_v58  ;;  %v4195_v21 = vsub.f32 %v2686_v28, %v2973_v58  ;;  %v4196_v10 = vsub.f32 %v2692_v33, %v2973_v58  ;;  %v4197_v44 = vsub.f32 %v2703_v54, %v2973_v58 }
 0x203   :  { %v3277_v40 = vmul.f32 %v3119_v60, %v4194_v0  ;;  %v3283_v47 = vmul.f32 %v3119_v60, %v4195_v21  ;;  %v3289_v2 = vmul.f32 %v3119_v60, %v4196_v10  ;;  %v3295_v11 = vmul.f32 %v3119_v60, %v4197_v44 }
 0x204   :  { %v4198_v0 = vsub.f32 %v2708_v4, %v2973_v58  ;;  %v4199_v21 = vsub.f32 %v2722_v31, %v2973_v58  ;;  %v4200_v10 = vsub.f32 %v2734_v50, %v2973_v58  ;;  %v4201_v44 = vsub.f32 %v2746_v3, %v2973_v58 }
 0x206   :  { %v3301_v28 = vmul.f32 %v3119_v60, %v4198_v0  ;;  %v3307_v33 = vmul.f32 %v3119_v60, %v4199_v21  ;;  %v3313_v54 = vmul.f32 %v3119_v60, %v4200_v10  ;;  %v3319_v4 = vmul.f32 %v3119_v60, %v4201_v44 }
 0x207   :  { %v4202_v0 = vsub.f32 %v2741_v55, %v2973_v58  ;;  %v4203_v21 = vsub.f32 %v2744_v61, %v2973_v58  ;;  %v4204_v10 = vsub.f32 %v2754_v8, %v2973_v58  ;;  %v4205_v44 = vsub.f32 %v2761_v19, %v2973_v58 }
 0x209   :  { %v3325_v31 = vmul.f32 %v3119_v60, %v4202_v0  ;;  %v3331_v50 = vmul.f32 %v3119_v60, %v4203_v21  ;;  %v3337_v3 = vmul.f32 %v3119_v60, %v4204_v10  ;;  %v3343_v55 = vmul.f32 %v3119_v60, %v4205_v44 }
 0x20a   :  { %v4206_v0 = vsub.f32 %v2768_v26, %v2973_v58  ;;  %v4207_v21 = vsub.f32 %v2775_v38, %v2973_v58  ;;  %v4208_v10 = vsub.f32 %v2782_v48, %v2973_v58  ;;  %v4209_v44 = vsub.f32 %v2789_v59, %v2973_v58 }
 0x20c   :  { %v3349_v61 = vmul.f32 %v3119_v60, %v4206_v0  ;;  %v3355_v8 = vmul.f32 %v3119_v60, %v4207_v21  ;;  %v3361_v19 = vmul.f32 %v3119_v60, %v4208_v10  ;;  %v3367_v26 = vmul.f32 %v3119_v60, %v4209_v44 }
 0x20d   :  { %v4210_v0 = vsub.f32 %v2796_v7, %v2973_v58  ;;  %v4211_v21 = vsub.f32 %v2803_v20, %v2973_v58  ;;  %v4212_v10 = vsub.f32 %v2810_v30, %v2973_v58  ;;  %v4213_v44 = vsub.f32 %v2817_v43, %v2973_v58 }
 0x20f   :  { %v3373_v38 = vmul.f32 %v3119_v60, %v4210_v0  ;;  %v3379_v48 = vmul.f32 %v3119_v60, %v4211_v21  ;;  %v3385_v59 = vmul.f32 %v3119_v60, %v4212_v10  ;;  %v3391_v7 = vmul.f32 %v3119_v60, %v4213_v44  ;;  %v4217_v21 = vld [vmem:[#allocation3_spill] sm:$0xff]  ;;  %v4219_v10 = vld [vmem:[#allocation4_spill] sm:$0xff]  ;;  %v4221_v44 = vld [vmem:[#allocation5_spill] sm:$0xff] }
 0x210   :  { %v4215_v0 = vsub.f32 %v2824_v53, %v2973_v58  ;;  %v4218_v29 = vsub.f32 %v4217_v21, %v2973_v58  ;;  %v4220_v52 = vsub.f32 %v4219_v10, %v2973_v58 }
 0x211   :  { %4214 = vst [vmem:[#allocation7_spill] sm:$0xff] %v3391_v7  ;;  %v4222_v7 = vsub.f32 %v4221_v44, %v2973_v58 }
 0x212   :  { %v3397_v20 = vmul.f32 %v3119_v60, %v4215_v0  ;;  %v3403_v30 = vmul.f32 %v3119_v60, %v4218_v29  ;;  %v3409_v43 = vmul.f32 %v3119_v60, %v4220_v52  ;;  %v4224_v0 = vld [vmem:[#allocation6_spill] sm:$0xff]  ;;  %v4227_v29 = vsub.f32 %v4154_v46, %v2973_v58 }
 0x213   :  { %v3415_v53 = vmul.f32 %v3119_v60, %v4222_v7  ;;  %v4229_v52 = vsub.f32 %v4155_v23, %v2973_v58  ;;  %v4231_v7 = vld [vmem:[#allocation9_spill] sm:$0xff] }
 0x214   :  { %4216 = vst [vmem:[#allocation8_spill] sm:$0xff] %v3397_v20  ;;  %v4225_v20 = vsub.f32 %v4224_v0, %v2973_v58  ;;  %v3427_v10 = vmul.f32 %v3119_v60, %v4227_v29  ;;  %v4236_v29 = vld [vmem:[#allocation11_spill] sm:$0xff] }
 0x215   :  { %4223 = vst [vmem:[#allocation16_spill] sm:$0xff] %v3415_v53  ;;  %v3433_v44 = vmul.f32 %v3119_v60, %v4229_v52  ;;  %v4232_v53 = vsub.f32 %v4231_v7, %v2973_v58  ;;  %v4239_v52 = vld [vmem:[#allocation12_spill] sm:$0xff] }
 0x216   :  { %v3421_v21 = vmul.f32 %v3119_v60, %v4225_v20  ;;  %4228 = vst [vmem:[#allocation18_spill] sm:$0xff] %v3427_v10  ;;  %v4234_v20 = vld [vmem:[#allocation10_spill] sm:$0xff]  ;;  %v4237_v10 = vsub.f32 %v4236_v29, %v2973_v58 }
 0x217   :  { %4230 = vst [vmem:[#allocation19_spill] sm:$0xff] %v3433_v44  ;;  %v3439_v0 = vmul.f32 %v3119_v60, %v4232_v53  ;;  %v4240_v44 = vsub.f32 %v4239_v52, %v2973_v58  ;;  %v4242_v53 = vld [vmem:[#allocation13_spill] sm:$0xff]  ;;  %v4245_v29 = vld [vmem:[#allocation14_spill] sm:$0xff]  ;;  %v4247_v52 = vld [vmem:[#allocation15_spill] sm:$0xff] }
 0x218   :  { %4226 = vst [vmem:[#allocation17_spill] sm:$0xff] %v3421_v21  ;;  %v4235_v21 = vsub.f32 %v4234_v20, %v2973_v58  ;;  %v3451_v23 = vmul.f32 %v3119_v60, %v4237_v10  ;;  %v4246_v10 = vsub.f32 %v4245_v29, %v2973_v58 }
 0x219   :  { %4233 = vst [vmem:[#allocation20_spill] sm:$0xff] %v3439_v0  ;;  %v3457_v7 = vmul.f32 %v3119_v60, %v4240_v44  ;;  %v4243_v0 = vsub.f32 %v4242_v53, %v2973_v58  ;;  %v4248_v44 = vsub.f32 %v4247_v52, %v2973_v58 }
 0x21a   :  { %v3445_v46 = vmul.f32 %v3119_v60, %v4235_v21  ;;  %4238 = vst [vmem:[#allocation21_spill] sm:$0xff] %v3451_v23  ;;  %v3468_v21 = vld [vmem:[%s4097_s3] ss:$0 sm:$0xff]  ;;  %v3474_v23 = vmul.f32 %v3119_v60, %v4246_v10  ;;  %v4251_v10 = vsub.f32 %v4166_v35, %v2973_v58 }
 0x21b   :  { %4241 = vst [vmem:[#allocation3_spill] sm:$0xff] %v3457_v7  ;;  %v3463_v20 = vmul.f32 %v3119_v60, %v4243_v0  ;;  %v3480_v7 = vmul.f32 %v3119_v60, %v4248_v44  ;;  %v4249_v0 = vsub.f32 %v4163_v9, %v2973_v58  ;;  %v4252_v44 = vsub.f32 %v4167_v63, %v2973_v58 }
 0x21c   :  { %v3498_v52 = vmul.f32 %v3119_v60, %v4251_v10  ;;  %v3520_v10 = vadd.f32 %v3468_v21, %v3133_v42  ;;  %v3524_v63 = vadd.f32 %v3468_v21, %v3139_v13  ;;  %v3540_v42 = vadd.f32 %v3468_v21, %v3163_v14 }
 0x21d   :  { %4244 = vst [vmem:[#allocation4_spill] sm:$0xff] %v3463_v20  ;;  %v3486_v53 = vmul.f32 %v3119_v60, %v4249_v0  ;;  %v4250_v20 = vsub.f32 %v4164_v6, %v2973_v58  ;;  %v3504_v9 = vmul.f32 %v3119_v60, %v4252_v44  ;;  %v4253_v0 = vsub.f32 %v4168_v5, %v2973_v58 }
 0x21e   :  { %v3528_v5 = vadd.f32 %v3468_v21, %v3145_v39  ;;  %v3532_v44 = vadd.f32 %v3468_v21, %v3151_v22  ;;  %v3552_v39 = vadd.f32 %v3468_v21, %v3181_v24  ;;  %v3556_v13 = vadd.f32 %v3468_v21, %v3187_v51 }
 0x21f   :  { %v3492_v29 = vmul.f32 %v3119_v60, %v4250_v20  ;;  %v3510_v6 = vmul.f32 %v3119_v60, %v4253_v0  ;;  %v4254_v20 = vsub.f32 %v4169_v37, %v2973_v58  ;;  %v3536_v58 = vadd.f32 %v3468_v21, %v3157_v49  ;;  %v4260_v0 = vld [vmem:[#allocation16_spill] sm:$0xff] }
 0x220   :  { %v3544_v37 = vadd.f32 %v3468_v21, %v3169_v17  ;;  %v3560_v22 = vadd.f32 %v3468_v21, %v3193_v16  ;;  %v3564_v49 = vadd.f32 %v3468_v21, %v3199_v25  ;;  %v3568_v14 = vadd.f32 %v3468_v21, %v3205_v36 }
 0x221   :  { %v3516_v35 = vmul.f32 %v3119_v60, %v4254_v20  ;;  %v3548_v60 = vadd.f32 %v3468_v21, %v3175_v32  ;;  %v3572_v17 = vadd.f32 %v3468_v21, %v3211_v41  ;;  %v3576_v32 = vadd.f32 %v3468_v21, %v3217_v56  ;;  %v4262_v20 = vld [vmem:[#allocation17_spill] sm:$0xff] }
 0x222   :  { %v3580_v24 = vadd.f32 %v3468_v21, %v3223_v1  ;;  %v3584_v51 = vadd.f32 %v3468_v21, %v3229_v12  ;;  %v3588_v16 = vadd.f32 %v3468_v21, %v3235_v18  ;;  %v3592_v25 = vadd.f32 %v3468_v21, %v3241_v34 }
 0x223   :  { %v3596_v36 = vadd.f32 %v3468_v21, %v3247_v45  ;;  %v3600_v41 = vadd.f32 %v3468_v21, %v3253_v57  ;;  %v3604_v56 = vadd.f32 %v3468_v21, %v3259_v62  ;;  %v3608_v1 = vadd.f32 %v3468_v21, %v3265_v15 }
 0x224   :  { %v3612_v12 = vadd.f32 %v3468_v21, %v3271_v27  ;;  %v3616_v18 = vadd.f32 %v3468_v21, %v3277_v40  ;;  %v3620_v34 = vadd.f32 %v3468_v21, %v3283_v47  ;;  %v3624_v45 = vadd.f32 %v3468_v21, %v3289_v2 }
 0x225   :  { %v3628_v57 = vadd.f32 %v3468_v21, %v3295_v11  ;;  %v3632_v62 = vadd.f32 %v3468_v21, %v3301_v28  ;;  %v3636_v15 = vadd.f32 %v3468_v21, %v3307_v33  ;;  %v3640_v27 = vadd.f32 %v3468_v21, %v3313_v54 }
 0x226   :  { %v3644_v40 = vadd.f32 %v3468_v21, %v3319_v4  ;;  %v3648_v47 = vadd.f32 %v3468_v21, %v3325_v31  ;;  %v3652_v2 = vadd.f32 %v3468_v21, %v3331_v50  ;;  %v3656_v11 = vadd.f32 %v3468_v21, %v3337_v3 }
 0x227   :  { %v3660_v28 = vadd.f32 %v3468_v21, %v3343_v55  ;;  %v3664_v33 = vadd.f32 %v3468_v21, %v3349_v61  ;;  %v3668_v54 = vadd.f32 %v3468_v21, %v3355_v8  ;;  %v3672_v4 = vadd.f32 %v3468_v21, %v3361_v19  ;;  %v4255_v61 = vld [vmem:[#allocation7_spill] sm:$0xff]  ;;  %v4257_v19 = vld [vmem:[#allocation8_spill] sm:$0xff] }
 0x228   :  { %v3676_v31 = vadd.f32 %v3468_v21, %v3367_v26  ;;  %v3680_v50 = vadd.f32 %v3468_v21, %v3373_v38  ;;  %v3684_v3 = vadd.f32 %v3468_v21, %v3379_v48  ;;  %v3688_v55 = vadd.f32 %v3468_v21, %v3385_v59 }
 0x229   :  { %v3692_v8 = vadd.f32 %v3468_v21, %v4255_v61  ;;  %v3696_v26 = vadd.f32 %v3468_v21, %v4257_v19  ;;  %v3700_v38 = vadd.f32 %v3468_v21, %v3403_v30  ;;  %v3704_v48 = vadd.f32 %v3468_v21, %v3409_v43 }
 0x22a   :  { %v3708_v59 = vadd.f32 %v3468_v21, %v4260_v0  ;;  %v3712_v61 = vadd.f32 %v3468_v21, %v4262_v20  ;;  %v3728_v0 = vadd.f32 %v3468_v21, %v3445_v46  ;;  %v3748_v46 = vadd.f32 %v3468_v21, %v3480_v7 }
 0x22b   :  { %4256 = vst [vmem:[#allocation5_spill] sm:$0xff] %v3692_v8  ;;  %4258 = vst [vmem:[#allocation6_spill] sm:$0xff] %v3696_v26  ;;  %v4264_v8 = vld [vmem:[#allocation18_spill] sm:$0xff]  ;;  %v4266_v26 = vld [vmem:[#allocation19_spill] sm:$0xff]  ;;  %v3768_v7 = vadd.f32 %v3468_v21, %v3510_v6  ;;  %v1696_v6 = vmax.f32 %v3548_v60, 0.0  ;;  %v1707_v60 = vmax.f32 %v3592_v25, 0.0 }
 0x22c   :  { %4259 = vst [vmem:[#allocation9_spill] sm:$0xff] %v3700_v38  ;;  %4261 = vst [vmem:[#allocation10_spill] sm:$0xff] %v3708_v59  ;;  %v3716_v19 = vadd.f32 %v3468_v21, %v4264_v8  ;;  %v3720_v30 = vadd.f32 %v3468_v21, %v4266_v26  ;;  %v4267_v38 = vld [vmem:[#allocation20_spill] sm:$0xff]  ;;  %v4268_v59 = vld [vmem:[#allocation21_spill] sm:$0xff]  ;;  %v1718_v25 = vmax.f32 %v3636_v15, 0.0  ;;  %v1729_v15 = vmax.f32 %v3680_v50, 0.0 }
 0x22d   :  { %4263 = vst [vmem:[#allocation11_spill] sm:$0xff] %v3712_v61  ;;  %v3724_v43 = vadd.f32 %v3468_v21, %v4267_v38  ;;  %v3732_v20 = vadd.f32 %v3468_v21, %v4268_v59  ;;  %v4269_v61 = vld [vmem:[#allocation3_spill] sm:$0xff]  ;;  %v3744_v38 = vadd.f32 %v3468_v21, %v3474_v23  ;;  %v3752_v59 = vadd.f32 %v3468_v21, %v3486_v53 }
 0x22e   :  { %4265 = vst [vmem:[#allocation12_spill] sm:$0xff] %v3716_v19  ;;  %v3736_v8 = vadd.f32 %v3468_v21, %v4269_v61  ;;  %v4270_v19 = vld [vmem:[#allocation4_spill] sm:$0xff]  ;;  %v3756_v61 = vadd.f32 %v3468_v21, %v3492_v29  ;;  %v3764_v23 = vadd.f32 %v3468_v21, %v3504_v9  ;;  %4275 = vst [vmem:[#allocation8_spill] sm:$0xff] %v3768_v7  ;;  %v1690_v29 = vmax.f32 %v3524_v63, 0.0 }
 0x22f   :  { %v3740_v26 = vadd.f32 %v3468_v21, %v4270_v19  ;;  %4271 = vst [vmem:[#allocation13_spill] sm:$0xff] %v3752_v59  ;;  %v3760_v19 = vadd.f32 %v3468_v21, %v3498_v52  ;;  %v3772_v53 = vadd.f32 %v3468_v21, %v3516_v35  ;;  %v1689_v59 = vmax.f32 %v3520_v10, 0.0  ;;  %1760 = vst.msk [vmem:[%s4098_s4 + $0x38] sm:$0xff] %vm22_vm0, %v1696_v6 }
 0x230   :  { %4272 = vst [vmem:[#allocation14_spill] sm:$0xff] %v3756_v61  ;;  %4274 = vst [vmem:[#allocation7_spill] sm:$0xff] %v3764_v23  ;;  %v1691_v61 = vmax.f32 %v3528_v5, 0.0  ;;  %v1692_v52 = vmax.f32 %v3532_v44, 0.0  ;;  %v1694_v9 = vmax.f32 %v3540_v42, 0.0  ;;  %v1695_v23 = vmax.f32 %v3544_v37, 0.0 }
 0x231   :  { %4273 = vst [vmem:[#allocation15_spill] sm:$0xff] %v3760_v19  ;;  %v1693_v19 = vmax.f32 %v3536_v58, 0.0  ;;  %v1697_v7 = vmax.f32 %v3552_v39, 0.0  ;;  %v1698_v21 = vmax.f32 %v3556_v13, 0.0  ;;  %v1699_v35 = vmax.f32 %v3560_v22, 0.0  ;;  %1753 = vst.msk [vmem:[%s4098_s4] sm:$0xff] %vm22_vm0, %v1689_v59 }
 0x232   :  { %v1700_v10 = vmax.f32 %v3564_v49, 0.0  ;;  %1754 = vst.msk [vmem:[%s4098_s4 + $0x8] sm:$0xff] %vm22_vm0, %v1690_v29  ;;  %1755 = vst.msk [vmem:[%s4098_s4 + $0x10] sm:$0xff] %vm22_vm0, %v1691_v61  ;;  %v1701_v63 = vmax.f32 %v3568_v14, 0.0  ;;  %v1702_v5 = vmax.f32 %v3572_v17, 0.0  ;;  %v1703_v44 = vmax.f32 %v3576_v32, 0.0 }
 0x233   :  { %1756 = vst.msk [vmem:[%s4098_s4 + $0x18] sm:$0xff] %vm22_vm0, %v1692_v52  ;;  %v1704_v58 = vmax.f32 %v3580_v24, 0.0  ;;  %1757 = vst.msk [vmem:[%s4098_s4 + $0x20] sm:$0xff] %vm22_vm0, %v1693_v19  ;;  %v1705_v42 = vmax.f32 %v3584_v51, 0.0  ;;  %v1706_v37 = vmax.f32 %v3588_v16, 0.0  ;;  %v1708_v39 = vmax.f32 %v3596_v36, 0.0 }
 0x234   :  { %1758 = vst.msk [vmem:[%s4098_s4 + $0x28] sm:$0xff] %vm22_vm0, %v1694_v9  ;;  %1759 = vst.msk [vmem:[%s4098_s4 + $0x30] sm:$0xff] %vm22_vm0, %v1695_v23  ;;  %v1709_v13 = vmax.f32 %v3600_v41, 0.0  ;;  %v1710_v22 = vmax.f32 %v3604_v56, 0.0  ;;  %v1711_v49 = vmax.f32 %v3608_v1, 0.0  ;;  %v1712_v14 = vmax.f32 %v3612_v12, 0.0 }
 0x235   :  { %1761 = vst.msk [vmem:[%s4098_s4 + $0x40] sm:$0xff] %vm22_vm0, %v1697_v7  ;;  %1762 = vst.msk [vmem:[%s4098_s4 + $0x48] sm:$0xff] %vm22_vm0, %v1698_v21  ;;  %v1713_v17 = vmax.f32 %v3616_v18, 0.0  ;;  %v1714_v32 = vmax.f32 %v3620_v34, 0.0  ;;  %v1715_v24 = vmax.f32 %v3624_v45, 0.0  ;;  %v1716_v51 = vmax.f32 %v3628_v57, 0.0 }
 0x236   :  { %1763 = vst.msk [vmem:[%s4098_s4 + $0x50] sm:$0xff] %vm22_vm0, %v1699_v35  ;;  %1764 = vst.msk [vmem:[%s4098_s4 + $0x58] sm:$0xff] %vm22_vm0, %v1700_v10  ;;  %v1717_v16 = vmax.f32 %v3632_v62, 0.0  ;;  %v1719_v36 = vmax.f32 %v3640_v27, 0.0  ;;  %v1720_v41 = vmax.f32 %v3644_v40, 0.0  ;;  %v1721_v56 = vmax.f32 %v3648_v47, 0.0 }
 0x237   :  { %1765 = vst.msk [vmem:[%s4098_s4 + $0x60] sm:$0xff] %vm22_vm0, %v1701_v63  ;;  %1766 = vst.msk [vmem:[%s4098_s4 + $0x68] sm:$0xff] %vm22_vm0, %v1702_v5  ;;  %v1722_v1 = vmax.f32 %v3652_v2, 0.0  ;;  %v1723_v12 = vmax.f32 %v3656_v11, 0.0  ;;  %v1724_v18 = vmax.f32 %v3660_v28, 0.0  ;;  %v1725_v34 = vmax.f32 %v3664_v33, 0.0 }
 0x238   :  { %1767 = vst.msk [vmem:[%s4098_s4 + $0x70] sm:$0xff] %vm22_vm0, %v1703_v44  ;;  %1768 = vst.msk [vmem:[%s4098_s4 + $0x78] sm:$0xff] %vm22_vm0, %v1704_v58  ;;  %v1726_v45 = vmax.f32 %v3668_v54, 0.0  ;;  %v1727_v57 = vmax.f32 %v3672_v4, 0.0  ;;  %v1728_v62 = vmax.f32 %v3676_v31, 0.0  ;;  %v1730_v27 = vmax.f32 %v3684_v3, 0.0 }
 0x239   :  { %1769 = vst.msk [vmem:[%s4098_s4 + $0x80] sm:$0xff] %vm22_vm0, %v1705_v42  ;;  %1770 = vst.msk [vmem:[%s4098_s4 + $0x88] sm:$0xff] %vm22_vm0, %v1706_v37  ;;  %v1731_v40 = vmax.f32 %v3688_v55, 0.0  ;;  %v4276_v47 = vld [vmem:[#allocation5_spill] sm:$0xff]  ;;  %v4277_v11 = vld [vmem:[#allocation6_spill] sm:$0xff]  ;;  %v1735_v4 = vmax.f32 %v3704_v48, 0.0 }
 0x23a   :  { %1771 = vst.msk [vmem:[%s4098_s4 + $0x90] sm:$0xff] %vm22_vm0, %v1707_v60  ;;  %1772 = vst.msk [vmem:[%s4098_s4 + $0x98] sm:$0xff] %vm22_vm0, %v1708_v39  ;;  %v1732_v2 = vmax.f32 %v4276_v47, 0.0  ;;  %v1733_v28 = vmax.f32 %v4277_v11, 0.0  ;;  %v4278_v33 = vld [vmem:[#allocation9_spill] sm:$0xff]  ;;  %v4279_v31 = vld [vmem:[#allocation10_spill] sm:$0xff] }
 0x23b   :  { %1773 = vst.msk [vmem:[%s4098_s4 + $0xa0] sm:$0xff] %vm22_vm0, %v1709_v13  ;;  %1774 = vst.msk [vmem:[%s4098_s4 + $0xa8] sm:$0xff] %vm22_vm0, %v1710_v22  ;;  %v1734_v54 = vmax.f32 %v4278_v33, 0.0  ;;  %v1736_v50 = vmax.f32 %v4279_v31, 0.0  ;;  %v4280_v3 = vld [vmem:[#allocation11_spill] sm:$0xff]  ;;  %v4281_v48 = vld [vmem:[#allocation12_spill] sm:$0xff] }
 0x23c   :  { %1775 = vst.msk [vmem:[%s4098_s4 + $0xb0] sm:$0xff] %vm22_vm0, %v1711_v49  ;;  %1776 = vst.msk [vmem:[%s4098_s4 + $0xb8] sm:$0xff] %vm22_vm0, %v1712_v14  ;;  %v1737_v55 = vmax.f32 %v4280_v3, 0.0  ;;  %v1738_v59 = vmax.f32 %v4281_v48, 0.0  ;;  %v1739_v61 = vmax.f32 %v3720_v30, 0.0  ;;  %v1740_v19 = vmax.f32 %v3724_v43, 0.0 }
 0x23d   :  { %1777 = vst.msk [vmem:[%s4098_s4 + $0xc0] sm:$0xff] %vm22_vm0, %v1713_v17  ;;  %1778 = vst.msk [vmem:[%s4098_s4 + $0xc8] sm:$0xff] %vm22_vm0, %v1714_v32  ;;  %v1741_v30 = vmax.f32 %v3728_v0, 0.0  ;;  %v1742_v43 = vmax.f32 %v3732_v20, 0.0  ;;  %v1743_v23 = vmax.f32 %v3736_v8, 0.0  ;;  %v1744_v7 = vmax.f32 %v3740_v26, 0.0 }
 0x23e   :  { %1779 = vst.msk [vmem:[%s4098_s4 + $0xd0] sm:$0xff] %vm22_vm0, %v1715_v24  ;;  %1780 = vst.msk [vmem:[%s4098_s4 + $0xd8] sm:$0xff] %vm22_vm0, %v1716_v51  ;;  %v1745_v0 = vmax.f32 %v3744_v38, 0.0  ;;  %v1746_v20 = vmax.f32 %v3748_v46, 0.0  ;;  %v4282_v8 = vld [vmem:[#allocation13_spill] sm:$0xff]  ;;  %v4283_v29 = vld [vmem:[#allocation14_spill] sm:$0xff] }
 0x23f   :  { %1781 = vst.msk [vmem:[%s4098_s4 + $0xe0] sm:$0xff] %vm22_vm0, %v1717_v16  ;;  %1782 = vst.msk [vmem:[%s4098_s4 + $0xe8] sm:$0xff] %vm22_vm0, %v1718_v25  ;;  %v1747_v26 = vmax.f32 %v4282_v8, 0.0  ;;  %v1748_v52 = vmax.f32 %v4283_v29, 0.0  ;;  %v4284_v38 = vld [vmem:[#allocation15_spill] sm:$0xff]  ;;  %v4286_v21 = vld [vmem:[#allocation8_spill] sm:$0xff] }
 0x240   :  { %1783 = vst.msk [vmem:[%s4098_s4 + $0xf0] sm:$0xff] %vm22_vm0, %v1719_v36  ;;  %1784 = vst.msk [vmem:[%s4098_s4 + $0xf8] sm:$0xff] %vm22_vm0, %v1720_v41  ;;  %v1749_v46 = vmax.f32 %v4284_v38, 0.0  ;;  %v4285_v9 = vld [vmem:[#allocation7_spill] sm:$0xff]  ;;  %v1751_v35 = vmax.f32 %v4286_v21, 0.0  ;;  %v1752_v10 = vmax.f32 %v3772_v53, 0.0 }
 0x241   :  { %1785 = vst.msk [vmem:[%s4098_s4 + $0x100] sm:$0xff] %vm22_vm0, %v1721_v56  ;;  %1786 = vst.msk [vmem:[%s4098_s4 + $0x108] sm:$0xff] %vm22_vm0, %v1722_v1  ;;  %v1750_v6 = vmax.f32 %v4285_v9, 0.0 }
 0x242   :  { %1787 = vst.msk [vmem:[%s4098_s4 + $0x110] sm:$0xff] %vm22_vm0, %v1723_v12  ;;  %1788 = vst.msk [vmem:[%s4098_s4 + $0x118] sm:$0xff] %vm22_vm0, %v1724_v18 }
 0x243   :  { %1789 = vst.msk [vmem:[%s4098_s4 + $0x120] sm:$0xff] %vm22_vm0, %v1725_v34  ;;  %1790 = vst.msk [vmem:[%s4098_s4 + $0x128] sm:$0xff] %vm22_vm0, %v1726_v45 }
 0x244   :  { %1791 = vst.msk [vmem:[%s4098_s4 + $0x130] sm:$0xff] %vm22_vm0, %v1727_v57  ;;  %1792 = vst.msk [vmem:[%s4098_s4 + $0x138] sm:$0xff] %vm22_vm0, %v1728_v62 }
 0x245   :  { %1793 = vst.msk [vmem:[%s4098_s4 + $0x140] sm:$0xff] %vm22_vm0, %v1729_v15  ;;  %1794 = vst.msk [vmem:[%s4098_s4 + $0x148] sm:$0xff] %vm22_vm0, %v1730_v27 }
 0x246   :  { %1795 = vst.msk [vmem:[%s4098_s4 + $0x150] sm:$0xff] %vm22_vm0, %v1731_v40  ;;  %1796 = vst.msk [vmem:[%s4098_s4 + $0x158] sm:$0xff] %vm22_vm0, %v1732_v2 }
 0x247   :  { %1797 = vst.msk [vmem:[%s4098_s4 + $0x160] sm:$0xff] %vm22_vm0, %v1733_v28  ;;  %1798 = vst.msk [vmem:[%s4098_s4 + $0x168] sm:$0xff] %vm22_vm0, %v1734_v54 }
 0x248   :  { %1799 = vst.msk [vmem:[%s4098_s4 + $0x170] sm:$0xff] %vm22_vm0, %v1735_v4  ;;  %1800 = vst.msk [vmem:[%s4098_s4 + $0x178] sm:$0xff] %vm22_vm0, %v1736_v50 }
 0x249   :  { %1801 = vst.msk [vmem:[%s4098_s4 + $0x180] sm:$0xff] %vm22_vm0, %v1737_v55  ;;  %1802 = vst.msk [vmem:[%s4098_s4 + $0x188] sm:$0xff] %vm22_vm0, %v1738_v59 }
 0x24a   :  { %1803 = vst.msk [vmem:[%s4098_s4 + $0x190] sm:$0xff] %vm22_vm0, %v1739_v61  ;;  %1804 = vst.msk [vmem:[%s4098_s4 + $0x198] sm:$0xff] %vm22_vm0, %v1740_v19 }
 0x24b   :  { %1805 = vst.msk [vmem:[%s4098_s4 + $0x1a0] sm:$0xff] %vm22_vm0, %v1741_v30  ;;  %1806 = vst.msk [vmem:[%s4098_s4 + $0x1a8] sm:$0xff] %vm22_vm0, %v1742_v43 }
 0x24c   :  { %1807 = vst.msk [vmem:[%s4098_s4 + $0x1b0] sm:$0xff] %vm22_vm0, %v1743_v23  ;;  %1808 = vst.msk [vmem:[%s4098_s4 + $0x1b8] sm:$0xff] %vm22_vm0, %v1744_v7 }
 0x24d   :  { %1809 = vst.msk [vmem:[%s4098_s4 + $0x1c0] sm:$0xff] %vm22_vm0, %v1745_v0  ;;  %1810 = vst.msk [vmem:[%s4098_s4 + $0x1c8] sm:$0xff] %vm22_vm0, %v1746_v20 }
 0x24e   :  { %1811 = vst.msk [vmem:[%s4098_s4 + $0x1d0] sm:$0xff] %vm22_vm0, %v1747_v26  ;;  %1812 = vst.msk [vmem:[%s4098_s4 + $0x1d8] sm:$0xff] %vm22_vm0, %v1748_v52 }
 0x24f   :  { %1813 = vst.msk [vmem:[%s4098_s4 + $0x1e0] sm:$0xff] %vm22_vm0, %v1749_v46  ;;  %1814 = vst.msk [vmem:[%s4098_s4 + $0x1e8] sm:$0xff] %vm22_vm0, %v1750_v6 }
 0x250   :  { %1815 = vst.msk [vmem:[%s4098_s4 + $0x1f0] sm:$0xff] %vm22_vm0, %v1751_v35  ;;  %1816 = vst.msk [vmem:[%s4098_s4 + $0x1f8] sm:$0xff] %vm22_vm0, %v1752_v10 }

// kernel: _lambda_.15
= control target key start
LH: loop header
LB: loop body
LE: loop exit
PB: predicated region body
PF: predicated region fallthrough
CT: control target
= control target key end

     0   :  { %s1203_s15 = smov 0   ;;  %s1205_s16 = smov 0   ;;  %s1558_s0 = inlined_call_operand.vmem [shape: bf16[128,640], index: 0, kind: input, shape index: {}]   ;;  %s1559_s1 = inlined_call_operand.vmem [shape: bf16[640,64], index: 1, kind: input, shape index: {}]   ;;  %s1560_s2 = inlined_call_operand.vmem [shape: f32[1,64], index: 2, kind: input, shape index: {}]   ;;  %s1561_s3 = inlined_call_operand.vmem [shape: f32[1,64], index: 3, kind: input, shape index: {}]   ;;  %s1562_s4 = inlined_call_operand.vmem [shape: f32[128,64], index: 4, kind: output, shape index: {}]  }
   0x1   :  { %s1207_s17 = smov 0   ;;  %s1209_s18 = smov 0  }
   0x2   :  { %s1211_s19 = smov 0  }
   0x3 LB: > { %s23_s20 = sadd.s32 1, %s1171_s18  ;;  %p40_p1 = scmp.ne.s32.totalorder %s1163_s16, %s1159_s15  ;;  %s1175_s19 = sphi %s1211_s19, %s14_s19   ;;  %s1171_s18 = sphi %s1209_s18, %s1566_s18   ;;  %s1167_s17 = sphi %s1207_s17, %s1565_s17   ;;  %s1163_s16 = sphi %s1205_s16, %s1564_s16   ;;  %s1159_s15 = sphi %s1203_s15, %s1563_s15  }
   0x4   : > { %p24_p0 = scmp.ge.s32.totalorder %s23_s20, 5  ;;  %p41_p2 = scmp.eq.s32.totalorder %s1175_s19, 0 }
   0x5   : > { %s33_s22 = sadd.s32 1, %s1163_s16  ;;  %p985_p5 = scmp.ge.s32.totalorder %s1175_s19, 5 }
   0x6   : > { %s1568_s20 = smov (%p24_p0, %s23_s20), 0  ;;  %p42_p3 = por %p41_p2, %p40_p1 }
   0x7   : > { %s30_s21 = ssub.s32 %s1171_s18, %s1568_s20  ;;  %184 = sbr.rel (%p985_p5) target bundleno = 26 (0x1a), region = 24 }
   0x8   : > { %p31_p4 = scmp.eq.s32.totalorder %s30_s21, 0 }
   0xa   : > { %s1238_s23 = scalar_select %p31_p4, %s1163_s16, %s33_s22  }
   0xc   : > { %187 = sbr.rel (!%p42_p3) target bundleno = 26 (0x1a), region = 28  ;;  %s189_s24 = sand.u32 (%p42_p3), 1, %s1163_s16  }
   0xd   : > { %s987_s25 = sshll.u32 (%p42_p3), %s1171_s18, 2  ;;  %s986_s26 = sshll.u32 (%p42_p3), %s189_s24, 6 }
   0xe   : > { %s1246_s29 = scalar_lea.vmem (%p42_p3), %s1558_s0, %s987_s25  ;;  %s191_s30 = scalar_lea.vmem (%p42_p3), [#allocation3], %s986_s26 }
   0xf   : > { %v210_v0 = vld [vmem:[%s1246_s29] sm:$0xf] (%p42_p3)  ;;  %v212_v1 = vld [vmem:[%s1246_s29 + $0x14] sm:$0xf] (%p42_p3)  ;;  %v214_v2 = vld [vmem:[%s1246_s29 + $0x28] sm:$0xf] (%p42_p3) }
  0x10   : > { %211 = vst [vmem:[%s191_s30] sm:$0xf] (%p42_p3), %v210_v0  ;;  %213 = vst [vmem:[%s191_s30 + $0x4] sm:$0xf] (%p42_p3), %v212_v1  ;;  %v216_v3 = vld [vmem:[%s1246_s29 + $0x3c] sm:$0xf] (%p42_p3) }
  0x11   : > { %v218_v4 = vld [vmem:[%s1246_s29 + $0x50] sm:$0xf]  ;;  %215 = vst [vmem:[%s191_s30 + $0x8] sm:$0xf] %v214_v2  ;;  %217 = vst [vmem:[%s191_s30 + $0xc] sm:$0xf] %v216_v3 }
  0x12   : > { %219 = vst [vmem:[%s191_s30 + $0x10] sm:$0xf] %v218_v4  ;;  %v220_v5 = vld [vmem:[%s1246_s29 + $0x64] sm:$0xf]  ;;  %v222_v6 = vld [vmem:[%s1246_s29 + $0x78] sm:$0xf] }
  0x13   : > { %v224_v7 = vld [vmem:[%s1246_s29 + $0x8c] sm:$0xf]  ;;  %221 = vst [vmem:[%s191_s30 + $0x14] sm:$0xf] %v220_v5  ;;  %223 = vst [vmem:[%s191_s30 + $0x18] sm:$0xf] %v222_v6 }
  0x14   : > { %225 = vst [vmem:[%s191_s30 + $0x1c] sm:$0xf] %v224_v7  ;;  %v226_v8 = vld [vmem:[%s1246_s29 + $0xa0] sm:$0xf]  ;;  %v228_v9 = vld [vmem:[%s1246_s29 + $0xb4] sm:$0xf] }
  0x15   : > { %v230_v10 = vld [vmem:[%s1246_s29 + $0xc8] sm:$0xf]  ;;  %227 = vst [vmem:[%s191_s30 + $0x20] sm:$0xf] %v226_v8  ;;  %229 = vst [vmem:[%s191_s30 + $0x24] sm:$0xf] %v228_v9 }
  0x16   : > { %231 = vst [vmem:[%s191_s30 + $0x28] sm:$0xf] %v230_v10  ;;  %v232_v11 = vld [vmem:[%s1246_s29 + $0xdc] sm:$0xf]  ;;  %v234_v12 = vld [vmem:[%s1246_s29 + $0xf0] sm:$0xf] }
  0x17   : > { %v236_v13 = vld [vmem:[%s1246_s29 + $0x104] sm:$0xf]  ;;  %233 = vst [vmem:[%s191_s30 + $0x2c] sm:$0xf] %v232_v11  ;;  %235 = vst [vmem:[%s191_s30 + $0x30] sm:$0xf] %v234_v12 }
  0x18   : > { %237 = vst [vmem:[%s191_s30 + $0x34] sm:$0xf] %v236_v13  ;;  %v238_v14 = vld [vmem:[%s1246_s29 + $0x118] sm:$0xf]  ;;  %v240_v15 = vld [vmem:[%s1246_s29 + $0x12c] sm:$0xf] }
  0x19   : > { %239 = vst [vmem:[%s191_s30 + $0x38] sm:$0xf] %v238_v14  ;;  %241 = vst [vmem:[%s191_s30 + $0x3c] sm:$0xf] %v240_v15 }
  0x1a PF: > { %p988_p6 = scmp.ge.s32.totalorder %s1175_s19, 1  ;;  %p308_p7 = scmp.lt.s32.totalorder %s1175_s19, 6 }
  0x1c   : > { %p309_p8 = pnand %p988_p6, %p308_p7 }
  0x1d   : > { %s315_s5 = sand.u32 (!%p309_p8), 1, %s1159_s15   ;;  %s990_s6 = sshll.u32 (!%p309_p8), %s1167_s17, 4 }
  0x1e   : > { %312 = sbr.rel (%p309_p8) target bundleno = 380 (0x17c), region = 73  ;;  %s989_s7 = sshll.u32 (!%p309_p8), %s315_s5, 6 }
  0x1f   : > { %p354_p9 = scmp.lt.s32.totalorder (!%p309_p8), %s990_s6, 79  ;;  %s1273_s12 = scalar_lea.vmem (!%p309_p8), [#allocation3], %s989_s7 }
  0x20   : > { %p992_p10 = scmp.ne.s32.totalorder (!%p309_p8), %s1167_s17, 0 }
  0x23   : > { %s1570_s6 = smov (!%p354_p9, %s990_s6), 79  ;;  %376 = sbr.rel (%p992_p10) target bundleno = 49 (0x31), region = 81 }
  0x24   : > { %s991_s8 = sshll.u32 %s1570_s6, 2 }
  0x25   : > { %s1271_s11 = scalar_lea.vmem %s1559_s1, %s991_s8 }
  0x28   : > { %vm377_vm0 = vcmask 523264   ;;  %v1177_v16 = vmov 0.0  }
  0x29   : > { %378 = vst.msk [vmem:[#allocation2] sm:$0xff] %vm377_vm0, %v1177_v16  ;;  %379 = vst.msk [vmem:[#allocation2 + $0x8] sm:$0xff] %vm377_vm0, %v1177_v16 }
  0x2a   : > { %380 = vst.msk [vmem:[#allocation2 + $0x10] sm:$0xff] %vm377_vm0, %v1177_v16  ;;  %381 = vst.msk [vmem:[#allocation2 + $0x18] sm:$0xff] %vm377_vm0, %v1177_v16 }
  0x2b   : > { %382 = vst.msk [vmem:[#allocation2 + $0x20] sm:$0xff] %vm377_vm0, %v1177_v16  ;;  %383 = vst.msk [vmem:[#allocation2 + $0x28] sm:$0xff] %vm377_vm0, %v1177_v16 }
  0x2c   : > { %384 = vst.msk [vmem:[#allocation2 + $0x30] sm:$0xff] %vm377_vm0, %v1177_v16  ;;  %385 = vst.msk [vmem:[#allocation2 + $0x38] sm:$0xff] %vm377_vm0, %v1177_v16 }
  0x2d   : > { %386 = vst.msk [vmem:[#allocation2 + $0x40] sm:$0xff] %vm377_vm0, %v1177_v16  ;;  %387 = vst.msk [vmem:[#allocation2 + $0x48] sm:$0xff] %vm377_vm0, %v1177_v16 }
  0x2e   : > { %388 = vst.msk [vmem:[#allocation2 + $0x50] sm:$0xff] %vm377_vm0, %v1177_v16  ;;  %389 = vst.msk [vmem:[#allocation2 + $0x58] sm:$0xff] %vm377_vm0, %v1177_v16 }
  0x2f   : > { %390 = vst.msk [vmem:[#allocation2 + $0x60] sm:$0xff] %vm377_vm0, %v1177_v16  ;;  %391 = vst.msk [vmem:[#allocation2 + $0x68] sm:$0xff] %vm377_vm0, %v1177_v16 }
  0x30   : > { %392 = vst.msk [vmem:[#allocation2 + $0x70] sm:$0xff] %vm377_vm0, %v1177_v16  ;;  %393 = vst.msk [vmem:[#allocation2 + $0x78] sm:$0xff] %vm377_vm0, %v1177_v16 }
  0x31 PF: > { %v1119_v17 = vld [vmem:[%s1271_s11 + $0x38] sm:$0xff]   ;;  %v1120_v18 = vld [vmem:[%s1271_s11 + $0x30] sm:$0xff]   ;;  %v1121_v19 = vld [vmem:[%s1271_s11 + $0x28] sm:$0xff]   ;;  %vm651_vm1 = vcmask 523264   ;;  %p1009_p11 = scmp.ne.s32.totalorder %s1167_s17, 4 }
  0x32   : > { %1030 = vmatprep.subr.bf16.mxu0 %v1119_v17  ;;  %1062 = vmatprep.subr.bf16.mxu1 %v1119_v17  ;;  %v1122_v20 = vld [vmem:[%s1271_s11 + $0x20] sm:$0xff]   ;;  %v1123_v23 = vld [vmem:[%s1271_s11 + $0x18] sm:$0xff]   ;;  %v1124_v24 = vld [vmem:[%s1271_s11 + $0x10] sm:$0xff]  }
  0x33   : > { %1031 = vmatpush3.bf16.msra.mxu0 %v1119_v17  ;;  %1070 = vmatpush3.bf16.msra.mxu1 %v1119_v17  ;;  %v1127_v21 = vld [vmem:[%s1273_s12] sm:$0xff]   ;;  %v1125_v25 = vld [vmem:[%s1271_s11 + $0x8] sm:$0xff]   ;;  %v1131_v29 = vld [vmem:[%s1273_s12 + $0x10] sm:$0xff]  }
  0x34   : > { %1032 = vmatprep.subr.bf16.mxu0 %v1120_v18  ;;  %1063 = vmatprep.subr.bf16.mxu1 %v1120_v18  ;;  %v1128_v22 = vld [vmem:[%s1273_s12 + $0x20] sm:$0xff]   ;;  %v1129_v27 = vld [vmem:[%s1273_s12 + $0x8] sm:$0xff]   ;;  %v1132_v30 = vld [vmem:[%s1273_s12 + $0x30] sm:$0xff]  }
  0x35   : > { %1046 = vmatprep.mubr.bf16.mxu0 %v1127_v21  ;;  %1054 = vmatprep.mubr.bf16.mxu1 %v1128_v22  ;;  %v1126_v26 = vld [vmem:[%s1271_s11] sm:$0xff]   ;;  %v1130_v28 = vld [vmem:[%s1273_s12 + $0x28] sm:$0xff]   ;;  %v1133_v31 = vld [vmem:[%s1273_s12 + $0x18] sm:$0xff]  }
  0x36   : > { %v1134_v32 = vld [vmem:[%s1273_s12 + $0x38] sm:$0xff]   ;;  %v396_v33 = vld [vmem:[#allocation2 + $0x10] sm:$0xff]  ;;  %v394_v37 = vld [vmem:[#allocation2] sm:$0xff] }
  0x37   : > { %1033 = vmatpush3.bf16.msra.mxu0 %v1120_v18  ;;  %1071 = vmatpush3.bf16.msra.mxu1 %v1120_v18  ;;  %v404_v34 = vld [vmem:[#allocation2 + $0x50] sm:$0xff]  ;;  %v402_v38 = vld [vmem:[#allocation2 + $0x40] sm:$0xff]  ;;  %v397_v43 = vld [vmem:[#allocation2 + $0x18] sm:$0xff] }
  0x38   : > { %1034 = vmatprep.subr.bf16.mxu0 %v1121_v19  ;;  %1064 = vmatprep.subr.bf16.mxu1 %v1121_v19  ;;  %v405_v44 = vld [vmem:[#allocation2 + $0x58] sm:$0xff]  ;;  %v395_v49 = vld [vmem:[#allocation2 + $0x8] sm:$0xff]  ;;  %v400_v55 = vld [vmem:[#allocation2 + $0x30] sm:$0xff] }
  0x39   : > { %v403_v50 = vld [vmem:[#allocation2 + $0x48] sm:$0xff]  ;;  %v408_v56 = vld [vmem:[#allocation2 + $0x70] sm:$0xff]  ;;  %v398_v61 = vld [vmem:[#allocation2 + $0x20] sm:$0xff] }
  0x3a   : > { %v406_v62 = vld [vmem:[#allocation2 + $0x60] sm:$0xff]  ;;  %v401_v3 = vld [vmem:[#allocation2 + $0x38] sm:$0xff]  ;;  %v399_v9 = vld [vmem:[#allocation2 + $0x28] sm:$0xff] }
  0x3b   : > { %1035 = vmatpush3.bf16.msra.mxu0 %v1121_v19  ;;  %1072 = vmatpush3.bf16.msra.mxu1 %v1121_v19  ;;  %v409_v4 = vld [vmem:[#allocation2 + $0x78] sm:$0xff]  ;;  %v407_v10 = vld [vmem:[#allocation2 + $0x68] sm:$0xff] }
  0x3c   : > { %1036 = vmatprep.subr.bf16.mxu0 %v1122_v20  ;;  %1065 = vmatprep.subr.bf16.mxu1 %v1122_v20 }
  0x3f   : > { %1037 = vmatpush3.bf16.msra.mxu0 %v1122_v20  ;;  %1073 = vmatpush3.bf16.msra.mxu1 %v1122_v20 }
  0x40   : > { %1038 = vmatprep.subr.bf16.mxu0 %v1123_v23  ;;  %1066 = vmatprep.subr.bf16.mxu1 %v1123_v23 }
  0x43   : > { %1039 = vmatpush3.bf16.msra.mxu0 %v1123_v23  ;;  %1074 = vmatpush3.bf16.msra.mxu1 %v1123_v23 }
  0x44   : > { %1040 = vmatprep.subr.bf16.mxu0 %v1124_v24  ;;  %1067 = vmatprep.subr.bf16.mxu1 %v1124_v24 }
  0x47   : > { %1041 = vmatpush3.bf16.msra.mxu0 %v1124_v24  ;;  %1075 = vmatpush3.bf16.msra.mxu1 %v1124_v24 }
  0x48   : > { %1042 = vmatprep.subr.bf16.mxu0 %v1125_v25  ;;  %1068 = vmatprep.subr.bf16.mxu1 %v1125_v25 }
  0x4b   : > { %1043 = vmatpush3.bf16.msra.mxu0 %v1125_v25  ;;  %1076 = vmatpush3.bf16.msra.mxu1 %v1125_v25 }
  0x4c   : > { %1044 = vmatprep.subr.bf16.mxu0 %v1126_v26  ;;  %1069 = vmatprep.subr.bf16.mxu1 %v1126_v26 }
  0x4f   : > { %1045 = vmatpush3.bf16.msra.mxu0 %v1126_v26  ;;  %1077 = vmatpush3.bf16.msra.mxu1 %v1126_v26 }
  0x52   : > { %1047 = vmatmul.mubr.bf16.vlgmr.msra.gmra.mxu0 %v1129_v27  ;;  %1055 = vmatmul.mubr.bf16.vlgmr.msra.gmra.mxu1 %v1130_v28 }
  0x53   : > { %1050 = vmatprep.mubr.bf16.mxu0 %v1131_v29  ;;  %1058 = vmatprep.mubr.bf16.mxu1 %v1132_v30 }
  0x5a   : > { %1051 = vmatmul.mubr.bf16.gmra.mxu0 %v1133_v31  ;;  %1059 = vmatmul.mubr.bf16.gmra.mxu1 %v1134_v32 }
 0x112   : > { %v1048_v35 = vpop.f32.mrf.mxu0  ;;  %v1056_v36 = vpop.f32.mrf.mxu1 }
 0x113   : > { %v637_v39 = vadd.f32 %v1048_v35, %v396_v33  ;;  %v645_v40 = vadd.f32 %v1056_v36, %v404_v34 }
 0x114   : > { %v572_v41 = vpop.f32.mrf.mxu0  ;;  %v604_v42 = vpop.f32.mrf.mxu1 }
 0x115   : > { %654 = vst.msk [vmem:[#allocation2 + $0x10] sm:$0xff] %vm651_vm1, %v637_v39  ;;  %662 = vst.msk [vmem:[#allocation2 + $0x50] sm:$0xff] %vm651_vm1, %v645_v40  ;;  %v635_v45 = vadd.f32 %v572_v41, %v394_v37  ;;  %v643_v46 = vadd.f32 %v604_v42, %v402_v38 }
 0x116   : > { %v1049_v47 = vpop.f32.mrf.mxu0  ;;  %v1057_v48 = vpop.f32.mrf.mxu1 }
 0x117   : > { %652 = vst.msk [vmem:[#allocation2] sm:$0xff] %vm651_vm1, %v635_v45  ;;  %660 = vst.msk [vmem:[#allocation2 + $0x40] sm:$0xff] %vm651_vm1, %v643_v46  ;;  %v638_v51 = vadd.f32 %v1049_v47, %v397_v43  ;;  %v646_v52 = vadd.f32 %v1057_v48, %v405_v44 }
 0x118   : > { %v575_v53 = vpop.f32.mrf.mxu0  ;;  %v607_v54 = vpop.f32.mrf.mxu1 }
 0x119   : > { %655 = vst.msk [vmem:[#allocation2 + $0x18] sm:$0xff] %vm651_vm1, %v638_v51  ;;  %663 = vst.msk [vmem:[#allocation2 + $0x58] sm:$0xff] %vm651_vm1, %v646_v52  ;;  %v636_v57 = vadd.f32 %v575_v53, %v395_v49  ;;  %v644_v58 = vadd.f32 %v607_v54, %v403_v50 }
 0x11a   : > { %v1052_v59 = vpop.f32.mrf.mxu0  ;;  %v1060_v60 = vpop.f32.mrf.mxu1 }
 0x11b   : > { %653 = vst.msk [vmem:[#allocation2 + $0x8] sm:$0xff] %vm651_vm1, %v636_v57  ;;  %661 = vst.msk [vmem:[#allocation2 + $0x48] sm:$0xff] %vm651_vm1, %v644_v58  ;;  %v641_v63 = vadd.f32 %v1052_v59, %v400_v55  ;;  %v649_v0 = vadd.f32 %v1060_v60, %v408_v56 }
 0x11c   : > { %v588_v1 = vpop.f32.mrf.mxu0  ;;  %v620_v2 = vpop.f32.mrf.mxu1 }
 0x11d   : > { %658 = vst.msk [vmem:[#allocation2 + $0x30] sm:$0xff] %vm651_vm1, %v641_v63  ;;  %666 = vst.msk [vmem:[#allocation2 + $0x70] sm:$0xff] %vm651_vm1, %v649_v0  ;;  %v639_v5 = vadd.f32 %v588_v1, %v398_v61  ;;  %v647_v6 = vadd.f32 %v620_v2, %v406_v62 }
 0x11e   : > { %v1053_v7 = vpop.f32.mrf.mxu0  ;;  %v1061_v8 = vpop.f32.mrf.mxu1 }
 0x11f   : > { %656 = vst.msk [vmem:[#allocation2 + $0x20] sm:$0xff] %vm651_vm1, %v639_v5  ;;  %664 = vst.msk [vmem:[#allocation2 + $0x60] sm:$0xff] %vm651_vm1, %v647_v6  ;;  %v642_v11 = vadd.f32 %v1053_v7, %v401_v3  ;;  %v650_v12 = vadd.f32 %v1061_v8, %v409_v4  ;;  %671 = sbr.rel (%p1009_p11) target bundleno = 380 (0x17c), region = 85 }
 0x120   : > { %v591_v13 = vpop.f32.mrf.mxu0  ;;  %v623_v14 = vpop.f32.mrf.mxu1 }
 0x121   : > { %659 = vst.msk [vmem:[#allocation2 + $0x38] sm:$0xff] %vm651_vm1, %v642_v11  ;;  %667 = vst.msk [vmem:[#allocation2 + $0x78] sm:$0xff] %vm651_vm1, %v650_v12  ;;  %v640_v15 = vadd.f32 %v591_v13, %v399_v9  ;;  %v648_v16 = vadd.f32 %v623_v14, %v407_v10 }
 0x123   : > { %657 = vst.msk [vmem:[#allocation2 + $0x28] sm:$0xff] %vm651_vm1, %v640_v15  ;;  %665 = vst.msk [vmem:[#allocation2 + $0x68] sm:$0xff] %vm651_vm1, %v648_v16 }
 0x124   : > { %v1325_v17 = vld [vmem:[#allocation2] sm:$0xff]  ;;  %v1327_v18 = vld [vmem:[#allocation2 + $0x8] sm:$0xff]  ;;  %v1329_v19 = vld [vmem:[#allocation2 + $0x10] sm:$0xff] }
 0x125   : > { %v1331_v20 = vld [vmem:[#allocation2 + $0x18] sm:$0xff]  ;;  %v688_v21 = vsel %vm651_vm1, %v1325_v17, 0.0  ;;  %v689_v22 = vsel %vm651_vm1, %v1327_v18, 0.0  ;;  %v691_v23 = vsel %vm651_vm1, %v1329_v19, 0.0  ;;  %v1347_v30 = vld [vmem:[#allocation2 + $0x30] sm:$0xff]  ;;  %v725_v32 = vmul.f32 %v1325_v17, %v1325_v17  ;;  %v1365_v41 = vld [vmem:[#allocation2 + $0x40] sm:$0xff] }
 0x126   : > { %v1339_v24 = vld [vmem:[#allocation2 + $0x20] sm:$0xff]  ;;  %v690_v25 = vadd.f32 %v689_v22, %v688_v21  ;;  %v693_v26 = vsel %vm651_vm1, %v1331_v20, 0.0  ;;  %v726_v33 = vmul.f32 %v1327_v18, %v1327_v18  ;;  %v727_v34 = vmul.f32 %v1329_v19, %v1329_v19  ;;  %v1372_v48 = vld [vmem:[#allocation2 + $0x48] sm:$0xff]  ;;  %v1379_v54 = vld [vmem:[#allocation2 + $0x50] sm:$0xff] }
 0x127   : > { %v695_v29 = vsel %vm651_vm1, %v1339_v24, 0.0  ;;  %v728_v38 = vmul.f32 %v1331_v20, %v1331_v20  ;;  %v699_v39 = vsel %vm651_vm1, %v1347_v30, 0.0  ;;  %v729_v40 = vmul.f32 %v1339_v24, %v1339_v24  ;;  %v1386_v60 = vld [vmem:[#allocation2 + $0x58] sm:$0xff]  ;;  %v1393_v2 = vld [vmem:[#allocation2 + $0x60] sm:$0xff]  ;;  %v1407_v14 = vld [vmem:[#allocation2 + $0x70] sm:$0xff] }
 0x128   : > { %v692_v28 = vadd.f32 %v691_v23, %v690_v25  ;;  %v1357_v36 = vld [vmem:[#allocation2 + $0x38] sm:$0xff]  ;;  %v741_v43 = vsel %vm651_vm1, %v725_v32, 0.0  ;;  %v742_v44 = vsel %vm651_vm1, %v726_v33, 0.0  ;;  %v744_v45 = vsel %vm651_vm1, %v727_v34, 0.0 }
 0x129   : > { %v701_v46 = vsel %vm651_vm1, %v1357_v36, 0.0  ;;  %v743_v47 = vadd.f32 %v742_v44, %v741_v43  ;;  %v746_v51 = vsel %vm651_vm1, %v728_v38, 0.0  ;;  %v703_v52 = vsel %vm651_vm1, %v1365_v41, 0.0  ;;  %v1414_v25 = vld [vmem:[#allocation2 + $0x78] sm:$0xff] }
 0x12a   : > { %v1343_v27 = vld [vmem:[#allocation2 + $0x28] sm:$0xff]  ;;  %v694_v31 = vadd.f32 %v693_v26, %v692_v28  ;;  %v731_v56 = vmul.f32 %v1347_v30, %v1347_v30  ;;  %v748_v57 = vsel %vm651_vm1, %v729_v40, 0.0  ;;  %v705_v58 = vsel %vm651_vm1, %v1372_v48, 0.0 }
 0x12b   : > { %v697_v35 = vsel %vm651_vm1, %v1343_v27, 0.0  ;;  %v730_v50 = vmul.f32 %v1343_v27, %v1343_v27  ;;  %v745_v53 = vadd.f32 %v744_v45, %v743_v47  ;;  %v732_v62 = vmul.f32 %v1357_v36, %v1357_v36  ;;  %v1400_v8 = vld [vmem:[#allocation2 + $0x68] sm:$0xff] }
 0x12c   : > { %v696_v37 = vadd.f32 %v695_v29, %v694_v31  ;;  %v707_v0 = vsel %vm651_vm1, %v1379_v54, 0.0  ;;  %v733_v4 = vmul.f32 %v1365_v41, %v1365_v41  ;;  %v752_v5 = vsel %vm651_vm1, %v731_v56, 0.0 }
 0x12d   : > { %v747_v59 = vadd.f32 %v746_v51, %v745_v53  ;;  %v750_v63 = vsel %vm651_vm1, %v730_v50, 0.0  ;;  %v709_v6 = vsel %vm651_vm1, %v1386_v60, 0.0  ;;  %v734_v10 = vmul.f32 %v1372_v48, %v1372_v48 }
 0x12e   : > { %v698_v42 = vadd.f32 %v697_v35, %v696_v37  ;;  %v754_v11 = vsel %vm651_vm1, %v732_v62, 0.0  ;;  %v711_v12 = vsel %vm651_vm1, %v1393_v2, 0.0  ;;  %v735_v16 = vmul.f32 %v1379_v54, %v1379_v54 }
 0x12f   : > { %v749_v1 = vadd.f32 %v748_v57, %v747_v59  ;;  %v756_v21 = vsel %vm651_vm1, %v733_v4, 0.0  ;;  %v713_v22 = vsel %vm651_vm1, %v1400_v8, 0.0  ;;  %v736_v28 = vmul.f32 %v1386_v60, %v1386_v60 }
 0x130   : > { %v700_v49 = vadd.f32 %v699_v39, %v698_v42  ;;  %v758_v29 = vsel %vm651_vm1, %v734_v10, 0.0  ;;  %v715_v31 = vsel %vm651_vm1, %v1407_v14, 0.0  ;;  %v737_v34 = vmul.f32 %v1393_v2, %v1393_v2 }
 0x131   : > { %v751_v7 = vadd.f32 %v750_v63, %v749_v1  ;;  %v760_v35 = vsel %vm651_vm1, %v735_v16, 0.0  ;;  %v717_v37 = vsel %vm651_vm1, %v1414_v25, 0.0  ;;  %v738_v40 = vmul.f32 %v1400_v8, %v1400_v8 }
 0x132   : > { %v702_v55 = vadd.f32 %v701_v46, %v700_v49  ;;  %v762_v42 = vsel %vm651_vm1, %v736_v28, 0.0  ;;  %v739_v45 = vmul.f32 %v1407_v14, %v1407_v14  ;;  %v764_v46 = vsel %vm651_vm1, %v737_v34, 0.0 }
 0x133   : > { %v753_v13 = vadd.f32 %v752_v5, %v751_v7  ;;  %v740_v50 = vmul.f32 %v1414_v25, %v1414_v25  ;;  %v766_v51 = vsel %vm651_vm1, %v738_v40, 0.0 }
 0x134   : > { %v704_v61 = vadd.f32 %v703_v52, %v702_v55  ;;  %v768_v55 = vsel %vm651_vm1, %v739_v45, 0.0 }
 0x135   : > { %v755_v23 = vadd.f32 %v754_v11, %v753_v13 }
 0x136   : > { %v706_v3 = vadd.f32 %v705_v58, %v704_v61  ;;  %v770_v58 = vsel %vm651_vm1, %v740_v50, 0.0 }
 0x137   : > { %v757_v32 = vadd.f32 %v756_v21, %v755_v23  ;;  %v784_v21 = vld [vmem:[%s1560_s2] sm:$0x1] }
 0x138   : > { %v708_v9 = vadd.f32 %v707_v0, %v706_v3 }
 0x139   : > { %v759_v38 = vadd.f32 %v758_v29, %v757_v32 }
 0x13a   : > { %v710_v15 = vadd.f32 %v709_v6, %v708_v9 }
 0x13b   : > { %v761_v43 = vadd.f32 %v760_v35, %v759_v38 }
 0x13c   : > { %v712_v26 = vadd.f32 %v711_v12, %v710_v15  ;;  %v802_v15 = vlaneseq }
 0x13d   : > { %v763_v47 = vadd.f32 %v762_v42, %v761_v43 }
 0x13e   : > { %v714_v33 = vadd.f32 %v713_v22, %v712_v26  ;;  %v803_v16 = vshrl.u32 %v802_v15, 7 }
 0x13f   : > { %v765_v52 = vadd.f32 %v764_v46, %v763_v47 }
 0x140   : > { %v716_v39 = vadd.f32 %v715_v31, %v714_v33  ;;  %v804_v22 = vsub.s32 0, %v803_v16 }
 0x141   : > { %v767_v56 = vadd.f32 %v766_v51, %v765_v52 }
 0x142   : > { %v718_v44 = vadd.f32 %v717_v37, %v716_v39 }
 0x143   : > { %v769_v59 = vadd.f32 %v768_v55, %v767_v56 }
 0x144   : > { %v719_v49 = vrot.slane %v718_v44, 4 }
 0x145   : > { %v771_v62 = vadd.f32 %v770_v58, %v769_v59 }
 0x146   : > { %v720_v53 = vadd.f32 %v719_v49, %v718_v44 }
 0x147   : > { %v772_v0 = vrot.slane %v771_v62, 4 }
 0x148   : > { %v721_v57 = vrot.slane %v720_v53, 2 }
 0x149   : > { %v773_v3 = vadd.f32 %v772_v0, %v771_v62 }
 0x14a   : > { %v722_v61 = vadd.f32 %v721_v57, %v720_v53 }
 0x14b   : > { %v774_v4 = vrot.slane %v773_v3, 2 }
 0x14c   : > { %v723_v63 = vrot.slane %v722_v61, 1 }
 0x14d   : > { %v775_v5 = vadd.f32 %v774_v4, %v773_v3 }
 0x14e   : > { %v724_v1 = vadd.f32 %v723_v63, %v722_v61 }
 0x14f   : > { %v776_v7 = vrot.slane %v775_v5, 1 }
 0x150   : > { %v1437_v6 = vmul.f32 0.0078125, %v724_v1 }
 0x151   : > { %v777_v9 = vadd.f32 %v776_v7, %v775_v5 }
 0x152   : > { %v780_v10 = vmul.f32 %v1437_v6, %v1437_v6  ;;  %v786_v26 = vsub.f32 %v1325_v17, %v1437_v6  ;;  %v787_v28 = vsub.f32 %v1327_v18, %v1437_v6  ;;  %v788_v31 = vsub.f32 %v1329_v19, %v1437_v6 }
 0x153   : > { %v779_v11 = vmul.f32 0.0078125, %v777_v9  ;;  %v789_v32 = vsub.f32 %v1331_v20, %v1437_v6  ;;  %v790_v33 = vsub.f32 %v1339_v24, %v1437_v6  ;;  %v791_v34 = vsub.f32 %v1343_v27, %v1437_v6  ;;  %v1010_v27 = vld [vmem:[%s1561_s3] ss:$0 sm:$0xff] }
 0x154   : > { %v792_v35 = vsub.f32 %v1347_v30, %v1437_v6  ;;  %v793_v17 = vsub.f32 %v1357_v36, %v1437_v6  ;;  %v794_v18 = vsub.f32 %v1365_v41, %v1437_v6  ;;  %v795_v19 = vsub.f32 %v1372_v48, %v1437_v6 }
 0x155   : > { %v781_v12 = vsub.f32 %v779_v11, %v780_v10  ;;  %v796_v20 = vsub.f32 %v1379_v54, %v1437_v6  ;;  %v797_v24 = vsub.f32 %v1386_v60, %v1437_v6  ;;  %v798_v30 = vsub.f32 %v1393_v2, %v1437_v6 }
 0x156   : > { %v799_v36 = vsub.f32 %v1400_v8, %v1437_v6  ;;  %v800_v41 = vsub.f32 %v1407_v14, %v1437_v6  ;;  %v801_v48 = vsub.f32 %v1414_v25, %v1437_v6 }
 0x157   : > { %v782_v13 = vadd.f32 1e-05, %v781_v12 }
 0x159   : > { %1135 = vrsqrt.f32 %v782_v13 }
 0x166   : > { %v1136_v23 = vpop.eup %1135 }
 0x167   : > { %v785_v29 = vmul.f32 %v1136_v23, %v784_v21 }
 0x169   : > { %v805_v37 = vrot.slane %v785_v29, %v804_v22 }
 0x16b   : > { %v806_v54 = vmul.f32 %v805_v37, %v786_v26  ;;  %v807_v38 = vmul.f32 %v805_v37, %v787_v28  ;;  %v808_v39 = vmul.f32 %v805_v37, %v788_v31  ;;  %v809_v60 = vmul.f32 %v805_v37, %v789_v32 }
 0x16c   : > { %v810_v40 = vmul.f32 %v805_v37, %v790_v33  ;;  %v811_v42 = vmul.f32 %v805_v37, %v791_v34  ;;  %v812_v43 = vmul.f32 %v805_v37, %v792_v35  ;;  %v813_v44 = vmul.f32 %v805_v37, %v793_v17 }
 0x16d   : > { %v829_v45 = vadd.f32 %v1010_v27, %v806_v54  ;;  %v830_v46 = vadd.f32 %v1010_v27, %v807_v38  ;;  %v831_v2 = vadd.f32 %v1010_v27, %v808_v39  ;;  %v832_v47 = vadd.f32 %v1010_v27, %v809_v60 }
 0x16e   : > { %v833_v49 = vadd.f32 %v1010_v27, %v810_v40  ;;  %v834_v8 = vadd.f32 %v1010_v27, %v811_v42  ;;  %v835_v50 = vadd.f32 %v1010_v27, %v812_v43  ;;  %v836_v51 = vadd.f32 %v1010_v27, %v813_v44 }
 0x16f   : > { %v845_v14 = vmax.f32 %v829_v45, 0.0  ;;  %v846_v52 = vmax.f32 %v830_v46, 0.0  ;;  %v847_v53 = vmax.f32 %v831_v2, 0.0  ;;  %v848_v25 = vmax.f32 %v832_v47, 0.0 }
 0x170   : > { %v849_v55 = vmax.f32 %v833_v49, 0.0  ;;  %v850_v56 = vmax.f32 %v834_v8, 0.0  ;;  %v851_v57 = vmax.f32 %v835_v50, 0.0  ;;  %v852_v58 = vmax.f32 %v836_v51, 0.0 }
 0x171   : > { %861 = vst.msk [vmem:[%s1562_s4] sm:$0xff] %vm651_vm1, %v845_v14  ;;  %862 = vst.msk [vmem:[%s1562_s4 + $0x8] sm:$0xff] %vm651_vm1, %v846_v52  ;;  %v814_v59 = vmul.f32 %v805_v37, %v794_v18  ;;  %v815_v61 = vmul.f32 %v805_v37, %v795_v19  ;;  %v816_v62 = vmul.f32 %v805_v37, %v796_v20 }
 0x172   : > { %863 = vst.msk [vmem:[%s1562_s4 + $0x10] sm:$0xff] %vm651_vm1, %v847_v53  ;;  %864 = vst.msk [vmem:[%s1562_s4 + $0x18] sm:$0xff] %vm651_vm1, %v848_v25  ;;  %v817_v63 = vmul.f32 %v805_v37, %v797_v24  ;;  %v818_v0 = vmul.f32 %v805_v37, %v798_v30  ;;  %v819_v1 = vmul.f32 %v805_v37, %v799_v36 }
 0x173   : > { %865 = vst.msk [vmem:[%s1562_s4 + $0x20] sm:$0xff] %vm651_vm1, %v849_v55  ;;  %866 = vst.msk [vmem:[%s1562_s4 + $0x28] sm:$0xff] %vm651_vm1, %v850_v56  ;;  %v820_v3 = vmul.f32 %v805_v37, %v800_v41  ;;  %v821_v4 = vmul.f32 %v805_v37, %v801_v48  ;;  %v837_v5 = vadd.f32 %v1010_v27, %v814_v59 }
 0x174   : > { %867 = vst.msk [vmem:[%s1562_s4 + $0x30] sm:$0xff] %vm651_vm1, %v851_v57  ;;  %868 = vst.msk [vmem:[%s1562_s4 + $0x38] sm:$0xff] %vm651_vm1, %v852_v58  ;;  %v838_v6 = vadd.f32 %v1010_v27, %v815_v61  ;;  %v839_v7 = vadd.f32 %v1010_v27, %v816_v62  ;;  %v840_v9 = vadd.f32 %v1010_v27, %v817_v63 }
 0x175   : > { %v841_v10 = vadd.f32 %v1010_v27, %v818_v0  ;;  %v842_v11 = vadd.f32 %v1010_v27, %v819_v1  ;;  %v843_v12 = vadd.f32 %v1010_v27, %v820_v3  ;;  %v844_v13 = vadd.f32 %v1010_v27, %v821_v4 }
 0x176   : > { %v853_v15 = vmax.f32 %v837_v5, 0.0  ;;  %v854_v16 = vmax.f32 %v838_v6, 0.0  ;;  %v855_v21 = vmax.f32 %v839_v7, 0.0  ;;  %v856_v22 = vmax.f32 %v840_v9, 0.0 }
 0x177   : > { %v857_v23 = vmax.f32 %v841_v10, 0.0  ;;  %v858_v26 = vmax.f32 %v842_v11, 0.0  ;;  %v859_v28 = vmax.f32 %v843_v12, 0.0  ;;  %v860_v29 = vmax.f32 %v844_v13, 0.0 }
 0x178   : > { %869 = vst.msk [vmem:[%s1562_s4 + $0x40] sm:$0xff] %vm651_vm1, %v853_v15  ;;  %870 = vst.msk [vmem:[%s1562_s4 + $0x48] sm:$0xff] %vm651_vm1, %v854_v16 }
 0x179   : > { %871 = vst.msk [vmem:[%s1562_s4 + $0x50] sm:$0xff] %vm651_vm1, %v855_v21  ;;  %872 = vst.msk [vmem:[%s1562_s4 + $0x58] sm:$0xff] %vm651_vm1, %v856_v22 }
 0x17a   : > { %873 = vst.msk [vmem:[%s1562_s4 + $0x60] sm:$0xff] %vm651_vm1, %v857_v23  ;;  %874 = vst.msk [vmem:[%s1562_s4 + $0x68] sm:$0xff] %vm651_vm1, %v858_v26 }
 0x17b   : > { %875 = vst.msk [vmem:[%s1562_s4 + $0x70] sm:$0xff] %vm651_vm1, %v859_v28  ;;  %876 = vst.msk [vmem:[%s1562_s4 + $0x78] sm:$0xff] %vm651_vm1, %v860_v29 }
 0x17c PF: > { %s14_s19 = sadd.s32 1, %s1175_s19   ;;  %s1563_s15 = smov %s1163_s16 }
 0x17d   : > { %p11_p12 = scmp.ge.s32.totalorder %s14_s19, 7   ;;  %s1564_s16 = smov %s1238_s23 }
 0x17e   : > { %s1565_s17 = smov %s1171_s18  ;;  %s1566_s18 = smov %s1568_s20 }
 0x17f   :  { %13 = sbr.rel (!%p11_p12) target bundleno = 3 (0x3), region = 129 }

// kernel: _lambda_.16
= control target key start
LH: loop header
LB: loop body
LE: loop exit
PB: predicated region body
PF: predicated region fallthrough
CT: control target
= control target key end

     0   :  { %s1300_s18 = smov 0   ;;  %s1302_s19 = smov 0   ;;  %s1739_s0 = inlined_call_operand.vmem [shape: bf16[128,640], index: 0, kind: input, shape index: {}]   ;;  %s1740_s1 = inlined_call_operand.vmem [shape: bf16[640,64], index: 1, kind: input, shape index: {}]   ;;  %s1741_s2 = inlined_call_operand.vmem [shape: f32[1,64], index: 2, kind: input, shape index: {}]   ;;  %s1742_s3 = inlined_call_operand.vmem [shape: f32[1,64], index: 3, kind: input, shape index: {}]   ;;  %s1743_s4 = inlined_call_operand.vmem [shape: f32[128,64], index: 4, kind: input, shape index: {}]   ;;  %s1744_s5 = inlined_call_operand.vmem [shape: f32[128,64], index: 5, kind: output, shape index: {}]  }
   0x1   :  { %s1304_s20 = smov 0   ;;  %s1306_s21 = smov 0  }
   0x2   :  { %s1308_s22 = smov 0  }
   0x3 LB: > { %s24_s23 = sadd.s32 1, %s1263_s21  ;;  %p41_p1 = scmp.ne.s32.totalorder %s1255_s19, %s1251_s18  ;;  %s1267_s22 = sphi %s1308_s22, %s15_s22   ;;  %s1263_s21 = sphi %s1306_s21, %s1748_s21   ;;  %s1259_s20 = sphi %s1304_s20, %s1747_s20   ;;  %s1255_s19 = sphi %s1302_s19, %s1746_s19   ;;  %s1251_s18 = sphi %s1300_s18, %s1745_s18  }
   0x4   : > { %p25_p0 = scmp.ge.s32.totalorder %s24_s23, 5  ;;  %p42_p2 = scmp.eq.s32.totalorder %s1267_s22, 0 }
   0x5   : > { %s34_s25 = sadd.s32 1, %s1255_s19  ;;  %p1077_p5 = scmp.ge.s32.totalorder %s1267_s22, 5 }
   0x6   : > { %s1750_s23 = smov (%p25_p0, %s24_s23), 0  ;;  %p43_p3 = por %p42_p2, %p41_p1 }
   0x7   : > { %s31_s24 = ssub.s32 %s1263_s21, %s1750_s23  ;;  %218 = sbr.rel (%p1077_p5) target bundleno = 26 (0x1a), region = 28 }
   0x8   : > { %p32_p4 = scmp.eq.s32.totalorder %s31_s24, 0 }
   0xa   : > { %s1335_s26 = scalar_select %p32_p4, %s1255_s19, %s34_s25  }
   0xc   : > { %221 = sbr.rel (!%p43_p3) target bundleno = 26 (0x1a), region = 32  ;;  %s223_s27 = sand.u32 (%p43_p3), 1, %s1255_s19  }
   0xd   : > { %s1079_s28 = sshll.u32 (%p43_p3), %s1263_s21, 2  ;;  %s1078_s29 = sshll.u32 (%p43_p3), %s223_s27, 6 }
   0xe   : > { %s1343_s7 = scalar_lea.vmem (%p43_p3), %s1739_s0, %s1079_s28  ;;  %s225_s8 = scalar_lea.vmem (%p43_p3), [#allocation3], %s1078_s29 }
   0xf   : > { %v244_v0 = vld [vmem:[%s1343_s7] sm:$0xf] (%p43_p3)  ;;  %v246_v1 = vld [vmem:[%s1343_s7 + $0x14] sm:$0xf] (%p43_p3)  ;;  %v248_v2 = vld [vmem:[%s1343_s7 + $0x28] sm:$0xf] (%p43_p3) }
  0x10   : > { %245 = vst [vmem:[%s225_s8] sm:$0xf] (%p43_p3), %v244_v0  ;;  %247 = vst [vmem:[%s225_s8 + $0x4] sm:$0xf] (%p43_p3), %v246_v1  ;;  %v250_v3 = vld [vmem:[%s1343_s7 + $0x3c] sm:$0xf] (%p43_p3) }
  0x11   : > { %v252_v4 = vld [vmem:[%s1343_s7 + $0x50] sm:$0xf]  ;;  %249 = vst [vmem:[%s225_s8 + $0x8] sm:$0xf] %v248_v2  ;;  %251 = vst [vmem:[%s225_s8 + $0xc] sm:$0xf] %v250_v3 }
  0x12   : > { %253 = vst [vmem:[%s225_s8 + $0x10] sm:$0xf] %v252_v4  ;;  %v254_v5 = vld [vmem:[%s1343_s7 + $0x64] sm:$0xf]  ;;  %v256_v6 = vld [vmem:[%s1343_s7 + $0x78] sm:$0xf] }
  0x13   : > { %v258_v7 = vld [vmem:[%s1343_s7 + $0x8c] sm:$0xf]  ;;  %255 = vst [vmem:[%s225_s8 + $0x14] sm:$0xf] %v254_v5  ;;  %257 = vst [vmem:[%s225_s8 + $0x18] sm:$0xf] %v256_v6 }
  0x14   : > { %259 = vst [vmem:[%s225_s8 + $0x1c] sm:$0xf] %v258_v7  ;;  %v260_v8 = vld [vmem:[%s1343_s7 + $0xa0] sm:$0xf]  ;;  %v262_v9 = vld [vmem:[%s1343_s7 + $0xb4] sm:$0xf] }
  0x15   : > { %v264_v10 = vld [vmem:[%s1343_s7 + $0xc8] sm:$0xf]  ;;  %261 = vst [vmem:[%s225_s8 + $0x20] sm:$0xf] %v260_v8  ;;  %263 = vst [vmem:[%s225_s8 + $0x24] sm:$0xf] %v262_v9 }
  0x16   : > { %265 = vst [vmem:[%s225_s8 + $0x28] sm:$0xf] %v264_v10  ;;  %v266_v11 = vld [vmem:[%s1343_s7 + $0xdc] sm:$0xf]  ;;  %v268_v12 = vld [vmem:[%s1343_s7 + $0xf0] sm:$0xf] }
  0x17   : > { %v270_v13 = vld [vmem:[%s1343_s7 + $0x104] sm:$0xf]  ;;  %267 = vst [vmem:[%s225_s8 + $0x2c] sm:$0xf] %v266_v11  ;;  %269 = vst [vmem:[%s225_s8 + $0x30] sm:$0xf] %v268_v12 }
  0x18   : > { %271 = vst [vmem:[%s225_s8 + $0x34] sm:$0xf] %v270_v13  ;;  %v272_v14 = vld [vmem:[%s1343_s7 + $0x118] sm:$0xf]  ;;  %v274_v15 = vld [vmem:[%s1343_s7 + $0x12c] sm:$0xf] }
  0x19   : > { %273 = vst [vmem:[%s225_s8 + $0x38] sm:$0xf] %v272_v14  ;;  %275 = vst [vmem:[%s225_s8 + $0x3c] sm:$0xf] %v274_v15 }
  0x1a PF: > { %p1080_p6 = scmp.ge.s32.totalorder %s1267_s22, 1  ;;  %p342_p7 = scmp.lt.s32.totalorder %s1267_s22, 6 }
  0x1c   : > { %p343_p8 = pnand %p1080_p6, %p342_p7 }
  0x1d   : > { %s349_s9 = sand.u32 (!%p343_p8), 1, %s1251_s18   ;;  %s1082_s10 = sshll.u32 (!%p343_p8), %s1259_s20, 4 }
  0x1e   : > { %346 = sbr.rel (%p343_p8) target bundleno = 384 (0x180), region = 77  ;;  %s1081_s11 = sshll.u32 (!%p343_p8), %s349_s9, 6 }
  0x1f   : > { %p394_p9 = scmp.lt.s32.totalorder (!%p343_p8), %s1082_s10, 79  ;;  %s1370_s16 = scalar_lea.vmem (!%p343_p8), [#allocation3], %s1081_s11 }
  0x20   : > { %p1084_p10 = scmp.ne.s32.totalorder (!%p343_p8), %s1259_s20, 0 }
  0x23   : > { %s1752_s10 = smov (!%p394_p9, %s1082_s10), 79  ;;  %420 = sbr.rel (%p1084_p10) target bundleno = 49 (0x31), region = 85 }
  0x24   : > { %s1083_s12 = sshll.u32 %s1752_s10, 2 }
  0x25   : > { %s1368_s15 = scalar_lea.vmem %s1740_s1, %s1083_s12 }
  0x28   : > { %vm421_vm0 = vcmask 523264   ;;  %v1269_v16 = vmov 0.0  }
  0x29   : > { %422 = vst.msk [vmem:[#allocation2] sm:$0xff] %vm421_vm0, %v1269_v16  ;;  %423 = vst.msk [vmem:[#allocation2 + $0x8] sm:$0xff] %vm421_vm0, %v1269_v16 }
  0x2a   : > { %424 = vst.msk [vmem:[#allocation2 + $0x10] sm:$0xff] %vm421_vm0, %v1269_v16  ;;  %425 = vst.msk [vmem:[#allocation2 + $0x18] sm:$0xff] %vm421_vm0, %v1269_v16 }
  0x2b   : > { %426 = vst.msk [vmem:[#allocation2 + $0x20] sm:$0xff] %vm421_vm0, %v1269_v16  ;;  %427 = vst.msk [vmem:[#allocation2 + $0x28] sm:$0xff] %vm421_vm0, %v1269_v16 }
  0x2c   : > { %428 = vst.msk [vmem:[#allocation2 + $0x30] sm:$0xff] %vm421_vm0, %v1269_v16  ;;  %429 = vst.msk [vmem:[#allocation2 + $0x38] sm:$0xff] %vm421_vm0, %v1269_v16 }
  0x2d   : > { %430 = vst.msk [vmem:[#allocation2 + $0x40] sm:$0xff] %vm421_vm0, %v1269_v16  ;;  %431 = vst.msk [vmem:[#allocation2 + $0x48] sm:$0xff] %vm421_vm0, %v1269_v16 }
  0x2e   : > { %432 = vst.msk [vmem:[#allocation2 + $0x50] sm:$0xff] %vm421_vm0, %v1269_v16  ;;  %433 = vst.msk [vmem:[#allocation2 + $0x58] sm:$0xff] %vm421_vm0, %v1269_v16 }
  0x2f   : > { %434 = vst.msk [vmem:[#allocation2 + $0x60] sm:$0xff] %vm421_vm0, %v1269_v16  ;;  %435 = vst.msk [vmem:[#allocation2 + $0x68] sm:$0xff] %vm421_vm0, %v1269_v16 }
  0x30   : > { %436 = vst.msk [vmem:[#allocation2 + $0x70] sm:$0xff] %vm421_vm0, %v1269_v16  ;;  %437 = vst.msk [vmem:[#allocation2 + $0x78] sm:$0xff] %vm421_vm0, %v1269_v16 }
  0x31 PF: > { %v1211_v17 = vld [vmem:[%s1368_s15 + $0x38] sm:$0xff]   ;;  %v1212_v18 = vld [vmem:[%s1368_s15 + $0x30] sm:$0xff]   ;;  %v1213_v19 = vld [vmem:[%s1368_s15 + $0x28] sm:$0xff]   ;;  %vm695_vm1 = vcmask 523264   ;;  %p1101_p11 = scmp.ne.s32.totalorder %s1259_s20, 4 }
  0x32   : > { %1122 = vmatprep.subr.bf16.mxu0 %v1211_v17  ;;  %1154 = vmatprep.subr.bf16.mxu1 %v1211_v17  ;;  %v1214_v20 = vld [vmem:[%s1368_s15 + $0x20] sm:$0xff]   ;;  %v1215_v23 = vld [vmem:[%s1368_s15 + $0x18] sm:$0xff]   ;;  %v1216_v24 = vld [vmem:[%s1368_s15 + $0x10] sm:$0xff]  }
  0x33   : > { %1123 = vmatpush3.bf16.msra.mxu0 %v1211_v17  ;;  %1162 = vmatpush3.bf16.msra.mxu1 %v1211_v17  ;;  %v1219_v21 = vld [vmem:[%s1370_s16] sm:$0xff]   ;;  %v1217_v25 = vld [vmem:[%s1368_s15 + $0x8] sm:$0xff]   ;;  %v1223_v29 = vld [vmem:[%s1370_s16 + $0x10] sm:$0xff]  }
  0x34   : > { %1124 = vmatprep.subr.bf16.mxu0 %v1212_v18  ;;  %1155 = vmatprep.subr.bf16.mxu1 %v1212_v18  ;;  %v1220_v22 = vld [vmem:[%s1370_s16 + $0x20] sm:$0xff]   ;;  %v1221_v27 = vld [vmem:[%s1370_s16 + $0x8] sm:$0xff]   ;;  %v1224_v30 = vld [vmem:[%s1370_s16 + $0x30] sm:$0xff]  }
  0x35   : > { %1138 = vmatprep.mubr.bf16.mxu0 %v1219_v21  ;;  %1146 = vmatprep.mubr.bf16.mxu1 %v1220_v22  ;;  %v1218_v26 = vld [vmem:[%s1368_s15] sm:$0xff]   ;;  %v1222_v28 = vld [vmem:[%s1370_s16 + $0x28] sm:$0xff]   ;;  %v1225_v31 = vld [vmem:[%s1370_s16 + $0x18] sm:$0xff]  }
  0x36   : > { %v1226_v32 = vld [vmem:[%s1370_s16 + $0x38] sm:$0xff]   ;;  %v440_v33 = vld [vmem:[#allocation2 + $0x10] sm:$0xff]  ;;  %v438_v37 = vld [vmem:[#allocation2] sm:$0xff] }
  0x37   : > { %1125 = vmatpush3.bf16.msra.mxu0 %v1212_v18  ;;  %1163 = vmatpush3.bf16.msra.mxu1 %v1212_v18  ;;  %v448_v34 = vld [vmem:[#allocation2 + $0x50] sm:$0xff]  ;;  %v446_v38 = vld [vmem:[#allocation2 + $0x40] sm:$0xff]  ;;  %v441_v43 = vld [vmem:[#allocation2 + $0x18] sm:$0xff] }
  0x38   : > { %1126 = vmatprep.subr.bf16.mxu0 %v1213_v19  ;;  %1156 = vmatprep.subr.bf16.mxu1 %v1213_v19  ;;  %v449_v44 = vld [vmem:[#allocation2 + $0x58] sm:$0xff]  ;;  %v439_v49 = vld [vmem:[#allocation2 + $0x8] sm:$0xff]  ;;  %v444_v55 = vld [vmem:[#allocation2 + $0x30] sm:$0xff] }
  0x39   : > { %v447_v50 = vld [vmem:[#allocation2 + $0x48] sm:$0xff]  ;;  %v452_v56 = vld [vmem:[#allocation2 + $0x70] sm:$0xff]  ;;  %v442_v61 = vld [vmem:[#allocation2 + $0x20] sm:$0xff] }
  0x3a   : > { %v450_v62 = vld [vmem:[#allocation2 + $0x60] sm:$0xff]  ;;  %v445_v3 = vld [vmem:[#allocation2 + $0x38] sm:$0xff]  ;;  %v443_v9 = vld [vmem:[#allocation2 + $0x28] sm:$0xff] }
  0x3b   : > { %1127 = vmatpush3.bf16.msra.mxu0 %v1213_v19  ;;  %1164 = vmatpush3.bf16.msra.mxu1 %v1213_v19  ;;  %v453_v4 = vld [vmem:[#allocation2 + $0x78] sm:$0xff]  ;;  %v451_v10 = vld [vmem:[#allocation2 + $0x68] sm:$0xff] }
  0x3c   : > { %1128 = vmatprep.subr.bf16.mxu0 %v1214_v20  ;;  %1157 = vmatprep.subr.bf16.mxu1 %v1214_v20 }
  0x3f   : > { %1129 = vmatpush3.bf16.msra.mxu0 %v1214_v20  ;;  %1165 = vmatpush3.bf16.msra.mxu1 %v1214_v20 }
  0x40   : > { %1130 = vmatprep.subr.bf16.mxu0 %v1215_v23  ;;  %1158 = vmatprep.subr.bf16.mxu1 %v1215_v23 }
  0x43   : > { %1131 = vmatpush3.bf16.msra.mxu0 %v1215_v23  ;;  %1166 = vmatpush3.bf16.msra.mxu1 %v1215_v23 }
  0x44   : > { %1132 = vmatprep.subr.bf16.mxu0 %v1216_v24  ;;  %1159 = vmatprep.subr.bf16.mxu1 %v1216_v24 }
  0x47   : > { %1133 = vmatpush3.bf16.msra.mxu0 %v1216_v24  ;;  %1167 = vmatpush3.bf16.msra.mxu1 %v1216_v24 }
  0x48   : > { %1134 = vmatprep.subr.bf16.mxu0 %v1217_v25  ;;  %1160 = vmatprep.subr.bf16.mxu1 %v1217_v25 }
  0x4b   : > { %1135 = vmatpush3.bf16.msra.mxu0 %v1217_v25  ;;  %1168 = vmatpush3.bf16.msra.mxu1 %v1217_v25 }
  0x4c   : > { %1136 = vmatprep.subr.bf16.mxu0 %v1218_v26  ;;  %1161 = vmatprep.subr.bf16.mxu1 %v1218_v26 }
  0x4f   : > { %1137 = vmatpush3.bf16.msra.mxu0 %v1218_v26  ;;  %1169 = vmatpush3.bf16.msra.mxu1 %v1218_v26 }
  0x52   : > { %1139 = vmatmul.mubr.bf16.vlgmr.msra.gmra.mxu0 %v1221_v27  ;;  %1147 = vmatmul.mubr.bf16.vlgmr.msra.gmra.mxu1 %v1222_v28 }
  0x53   : > { %1142 = vmatprep.mubr.bf16.mxu0 %v1223_v29  ;;  %1150 = vmatprep.mubr.bf16.mxu1 %v1224_v30 }
  0x5a   : > { %1143 = vmatmul.mubr.bf16.gmra.mxu0 %v1225_v31  ;;  %1151 = vmatmul.mubr.bf16.gmra.mxu1 %v1226_v32 }
 0x112   : > { %v1140_v35 = vpop.f32.mrf.mxu0  ;;  %v1148_v36 = vpop.f32.mrf.mxu1 }
 0x113   : > { %v681_v39 = vadd.f32 %v1140_v35, %v440_v33  ;;  %v689_v40 = vadd.f32 %v1148_v36, %v448_v34 }
 0x114   : > { %v616_v41 = vpop.f32.mrf.mxu0  ;;  %v648_v42 = vpop.f32.mrf.mxu1 }
 0x115   : > { %698 = vst.msk [vmem:[#allocation2 + $0x10] sm:$0xff] %vm695_vm1, %v681_v39  ;;  %706 = vst.msk [vmem:[#allocation2 + $0x50] sm:$0xff] %vm695_vm1, %v689_v40  ;;  %v679_v45 = vadd.f32 %v616_v41, %v438_v37  ;;  %v687_v46 = vadd.f32 %v648_v42, %v446_v38 }
 0x116   : > { %v1141_v47 = vpop.f32.mrf.mxu0  ;;  %v1149_v48 = vpop.f32.mrf.mxu1 }
 0x117   : > { %696 = vst.msk [vmem:[#allocation2] sm:$0xff] %vm695_vm1, %v679_v45  ;;  %704 = vst.msk [vmem:[#allocation2 + $0x40] sm:$0xff] %vm695_vm1, %v687_v46  ;;  %v682_v51 = vadd.f32 %v1141_v47, %v441_v43  ;;  %v690_v52 = vadd.f32 %v1149_v48, %v449_v44 }
 0x118   : > { %v619_v53 = vpop.f32.mrf.mxu0  ;;  %v651_v54 = vpop.f32.mrf.mxu1 }
 0x119   : > { %699 = vst.msk [vmem:[#allocation2 + $0x18] sm:$0xff] %vm695_vm1, %v682_v51  ;;  %707 = vst.msk [vmem:[#allocation2 + $0x58] sm:$0xff] %vm695_vm1, %v690_v52  ;;  %v680_v57 = vadd.f32 %v619_v53, %v439_v49  ;;  %v688_v58 = vadd.f32 %v651_v54, %v447_v50 }
 0x11a   : > { %v1144_v59 = vpop.f32.mrf.mxu0  ;;  %v1152_v60 = vpop.f32.mrf.mxu1 }
 0x11b   : > { %697 = vst.msk [vmem:[#allocation2 + $0x8] sm:$0xff] %vm695_vm1, %v680_v57  ;;  %705 = vst.msk [vmem:[#allocation2 + $0x48] sm:$0xff] %vm695_vm1, %v688_v58  ;;  %v685_v63 = vadd.f32 %v1144_v59, %v444_v55  ;;  %v693_v0 = vadd.f32 %v1152_v60, %v452_v56 }
 0x11c   : > { %v632_v1 = vpop.f32.mrf.mxu0  ;;  %v664_v2 = vpop.f32.mrf.mxu1 }
 0x11d   : > { %702 = vst.msk [vmem:[#allocation2 + $0x30] sm:$0xff] %vm695_vm1, %v685_v63  ;;  %710 = vst.msk [vmem:[#allocation2 + $0x70] sm:$0xff] %vm695_vm1, %v693_v0  ;;  %v683_v5 = vadd.f32 %v632_v1, %v442_v61  ;;  %v691_v6 = vadd.f32 %v664_v2, %v450_v62 }
 0x11e   : > { %v1145_v7 = vpop.f32.mrf.mxu0  ;;  %v1153_v8 = vpop.f32.mrf.mxu1 }
 0x11f   : > { %700 = vst.msk [vmem:[#allocation2 + $0x20] sm:$0xff] %vm695_vm1, %v683_v5  ;;  %708 = vst.msk [vmem:[#allocation2 + $0x60] sm:$0xff] %vm695_vm1, %v691_v6  ;;  %v686_v11 = vadd.f32 %v1145_v7, %v445_v3  ;;  %v694_v12 = vadd.f32 %v1153_v8, %v453_v4  ;;  %715 = sbr.rel (%p1101_p11) target bundleno = 384 (0x180), region = 89 }
 0x120   : > { %v635_v13 = vpop.f32.mrf.mxu0  ;;  %v667_v14 = vpop.f32.mrf.mxu1 }
 0x121   : > { %703 = vst.msk [vmem:[#allocation2 + $0x38] sm:$0xff] %vm695_vm1, %v686_v11  ;;  %711 = vst.msk [vmem:[#allocation2 + $0x78] sm:$0xff] %vm695_vm1, %v694_v12  ;;  %v684_v15 = vadd.f32 %v635_v13, %v443_v9  ;;  %v692_v16 = vadd.f32 %v667_v14, %v451_v10 }
 0x123   : > { %701 = vst.msk [vmem:[#allocation2 + $0x28] sm:$0xff] %vm695_vm1, %v684_v15  ;;  %709 = vst.msk [vmem:[#allocation2 + $0x68] sm:$0xff] %vm695_vm1, %v692_v16 }
 0x124   : > { %v1422_v17 = vld [vmem:[#allocation2] sm:$0xff]  ;;  %v1424_v18 = vld [vmem:[#allocation2 + $0x8] sm:$0xff]  ;;  %v1426_v19 = vld [vmem:[#allocation2 + $0x10] sm:$0xff] }
 0x125   : > { %v1428_v20 = vld [vmem:[#allocation2 + $0x18] sm:$0xff]  ;;  %v732_v21 = vsel %vm695_vm1, %v1422_v17, 0.0  ;;  %v733_v22 = vsel %vm695_vm1, %v1424_v18, 0.0  ;;  %v735_v23 = vsel %vm695_vm1, %v1426_v19, 0.0  ;;  %v1444_v30 = vld [vmem:[#allocation2 + $0x30] sm:$0xff]  ;;  %v769_v32 = vmul.f32 %v1422_v17, %v1422_v17  ;;  %v1462_v41 = vld [vmem:[#allocation2 + $0x40] sm:$0xff] }
 0x126   : > { %v1436_v24 = vld [vmem:[#allocation2 + $0x20] sm:$0xff]  ;;  %v734_v25 = vadd.f32 %v733_v22, %v732_v21  ;;  %v737_v26 = vsel %vm695_vm1, %v1428_v20, 0.0  ;;  %v770_v33 = vmul.f32 %v1424_v18, %v1424_v18  ;;  %v771_v34 = vmul.f32 %v1426_v19, %v1426_v19  ;;  %v1469_v48 = vld [vmem:[#allocation2 + $0x48] sm:$0xff]  ;;  %v1476_v54 = vld [vmem:[#allocation2 + $0x50] sm:$0xff] }
 0x127   : > { %v739_v29 = vsel %vm695_vm1, %v1436_v24, 0.0  ;;  %v772_v38 = vmul.f32 %v1428_v20, %v1428_v20  ;;  %v743_v39 = vsel %vm695_vm1, %v1444_v30, 0.0  ;;  %v773_v40 = vmul.f32 %v1436_v24, %v1436_v24  ;;  %v1483_v60 = vld [vmem:[#allocation2 + $0x58] sm:$0xff]  ;;  %v1490_v2 = vld [vmem:[#allocation2 + $0x60] sm:$0xff]  ;;  %v1504_v14 = vld [vmem:[#allocation2 + $0x70] sm:$0xff] }
 0x128   : > { %v736_v28 = vadd.f32 %v735_v23, %v734_v25  ;;  %v1454_v36 = vld [vmem:[#allocation2 + $0x38] sm:$0xff]  ;;  %v785_v43 = vsel %vm695_vm1, %v769_v32, 0.0  ;;  %v786_v44 = vsel %vm695_vm1, %v770_v33, 0.0  ;;  %v788_v45 = vsel %vm695_vm1, %v771_v34, 0.0 }
 0x129   : > { %v745_v46 = vsel %vm695_vm1, %v1454_v36, 0.0  ;;  %v787_v47 = vadd.f32 %v786_v44, %v785_v43  ;;  %v790_v51 = vsel %vm695_vm1, %v772_v38, 0.0  ;;  %v747_v52 = vsel %vm695_vm1, %v1462_v41, 0.0  ;;  %v1511_v25 = vld [vmem:[#allocation2 + $0x78] sm:$0xff] }
 0x12a   : > { %v1440_v27 = vld [vmem:[#allocation2 + $0x28] sm:$0xff]  ;;  %v738_v31 = vadd.f32 %v737_v26, %v736_v28  ;;  %v775_v56 = vmul.f32 %v1444_v30, %v1444_v30  ;;  %v792_v57 = vsel %vm695_vm1, %v773_v40, 0.0  ;;  %v749_v58 = vsel %vm695_vm1, %v1469_v48, 0.0 }
 0x12b   : > { %v741_v35 = vsel %vm695_vm1, %v1440_v27, 0.0  ;;  %v774_v50 = vmul.f32 %v1440_v27, %v1440_v27  ;;  %v789_v53 = vadd.f32 %v788_v45, %v787_v47  ;;  %v776_v62 = vmul.f32 %v1454_v36, %v1454_v36  ;;  %v1497_v8 = vld [vmem:[#allocation2 + $0x68] sm:$0xff] }
 0x12c   : > { %v740_v37 = vadd.f32 %v739_v29, %v738_v31  ;;  %v751_v0 = vsel %vm695_vm1, %v1476_v54, 0.0  ;;  %v777_v4 = vmul.f32 %v1462_v41, %v1462_v41  ;;  %v796_v5 = vsel %vm695_vm1, %v775_v56, 0.0 }
 0x12d   : > { %v791_v59 = vadd.f32 %v790_v51, %v789_v53  ;;  %v794_v63 = vsel %vm695_vm1, %v774_v50, 0.0  ;;  %v753_v6 = vsel %vm695_vm1, %v1483_v60, 0.0  ;;  %v778_v10 = vmul.f32 %v1469_v48, %v1469_v48 }
 0x12e   : > { %v742_v42 = vadd.f32 %v741_v35, %v740_v37  ;;  %v798_v11 = vsel %vm695_vm1, %v776_v62, 0.0  ;;  %v755_v12 = vsel %vm695_vm1, %v1490_v2, 0.0  ;;  %v779_v16 = vmul.f32 %v1476_v54, %v1476_v54 }
 0x12f   : > { %v793_v1 = vadd.f32 %v792_v57, %v791_v59  ;;  %v800_v21 = vsel %vm695_vm1, %v777_v4, 0.0  ;;  %v757_v22 = vsel %vm695_vm1, %v1497_v8, 0.0  ;;  %v780_v28 = vmul.f32 %v1483_v60, %v1483_v60 }
 0x130   : > { %v744_v49 = vadd.f32 %v743_v39, %v742_v42  ;;  %v802_v29 = vsel %vm695_vm1, %v778_v10, 0.0  ;;  %v759_v31 = vsel %vm695_vm1, %v1504_v14, 0.0  ;;  %v781_v34 = vmul.f32 %v1490_v2, %v1490_v2 }
 0x131   : > { %v795_v7 = vadd.f32 %v794_v63, %v793_v1  ;;  %v804_v35 = vsel %vm695_vm1, %v779_v16, 0.0  ;;  %v761_v37 = vsel %vm695_vm1, %v1511_v25, 0.0  ;;  %v782_v40 = vmul.f32 %v1497_v8, %v1497_v8 }
 0x132   : > { %v746_v55 = vadd.f32 %v745_v46, %v744_v49  ;;  %v806_v42 = vsel %vm695_vm1, %v780_v28, 0.0  ;;  %v783_v45 = vmul.f32 %v1504_v14, %v1504_v14  ;;  %v808_v46 = vsel %vm695_vm1, %v781_v34, 0.0 }
 0x133   : > { %v797_v13 = vadd.f32 %v796_v5, %v795_v7  ;;  %v784_v50 = vmul.f32 %v1511_v25, %v1511_v25  ;;  %v810_v51 = vsel %vm695_vm1, %v782_v40, 0.0 }
 0x134   : > { %v748_v61 = vadd.f32 %v747_v52, %v746_v55  ;;  %v812_v55 = vsel %vm695_vm1, %v783_v45, 0.0 }
 0x135   : > { %v799_v23 = vadd.f32 %v798_v11, %v797_v13 }
 0x136   : > { %v750_v3 = vadd.f32 %v749_v58, %v748_v61  ;;  %v814_v58 = vsel %vm695_vm1, %v784_v50, 0.0 }
 0x137   : > { %v801_v32 = vadd.f32 %v800_v21, %v799_v23  ;;  %v828_v21 = vld [vmem:[%s1741_s2] sm:$0x1] }
 0x138   : > { %v752_v9 = vadd.f32 %v751_v0, %v750_v3 }
 0x139   : > { %v803_v38 = vadd.f32 %v802_v29, %v801_v32 }
 0x13a   : > { %v754_v15 = vadd.f32 %v753_v6, %v752_v9 }
 0x13b   : > { %v805_v43 = vadd.f32 %v804_v35, %v803_v38 }
 0x13c   : > { %v756_v26 = vadd.f32 %v755_v12, %v754_v15  ;;  %v846_v15 = vlaneseq }
 0x13d   : > { %v807_v47 = vadd.f32 %v806_v42, %v805_v43  ;;  %v893_v42 = vld [vmem:[%s1743_s4 + $0x20] sm:$0xff] }
 0x13e   : > { %v758_v33 = vadd.f32 %v757_v22, %v756_v26  ;;  %v847_v16 = vshrl.u32 %v846_v15, 7 }
 0x13f   : > { %v809_v52 = vadd.f32 %v808_v46, %v807_v47 }
 0x140   : > { %v760_v39 = vadd.f32 %v759_v31, %v758_v33  ;;  %v848_v22 = vsub.s32 0, %v847_v16  ;;  %v897_v16 = vld [vmem:[%s1743_s4 + $0x40] sm:$0xff] }
 0x141   : > { %v811_v56 = vadd.f32 %v810_v51, %v809_v52  ;;  %v894_v51 = vld [vmem:[%s1743_s4 + $0x28] sm:$0xff]  ;;  %v895_v52 = vld [vmem:[%s1743_s4 + $0x30] sm:$0xff] }
 0x142   : > { %v762_v44 = vadd.f32 %v761_v37, %v760_v39 }
 0x143   : > { %v813_v59 = vadd.f32 %v812_v55, %v811_v56 }
 0x144   : > { %v763_v49 = vrot.slane %v762_v44, 4 }
 0x145   : > { %v815_v62 = vadd.f32 %v814_v58, %v813_v59 }
 0x146   : > { %v764_v53 = vadd.f32 %v763_v49, %v762_v44 }
 0x147   : > { %v816_v0 = vrot.slane %v815_v62, 4 }
 0x148   : > { %v765_v57 = vrot.slane %v764_v53, 2 }
 0x149   : > { %v817_v3 = vadd.f32 %v816_v0, %v815_v62 }
 0x14a   : > { %v766_v61 = vadd.f32 %v765_v57, %v764_v53  ;;  %v896_v53 = vld [vmem:[%s1743_s4 + $0x38] sm:$0xff] }
 0x14b   : > { %v818_v4 = vrot.slane %v817_v3, 2 }
 0x14c   : > { %v767_v63 = vrot.slane %v766_v61, 1 }
 0x14d   : > { %v819_v5 = vadd.f32 %v818_v4, %v817_v3 }
 0x14e   : > { %v768_v1 = vadd.f32 %v767_v63, %v766_v61 }
 0x14f   : > { %v820_v7 = vrot.slane %v819_v5, 1 }
 0x150   : > { %v1534_v6 = vmul.f32 0.0078125, %v768_v1 }
 0x151   : > { %v821_v9 = vadd.f32 %v820_v7, %v819_v5 }
 0x152   : > { %v824_v10 = vmul.f32 %v1534_v6, %v1534_v6  ;;  %v830_v26 = vsub.f32 %v1422_v17, %v1534_v6  ;;  %v831_v28 = vsub.f32 %v1424_v18, %v1534_v6  ;;  %v832_v31 = vsub.f32 %v1426_v19, %v1534_v6 }
 0x153   : > { %v823_v11 = vmul.f32 0.0078125, %v821_v9  ;;  %v833_v32 = vsub.f32 %v1428_v20, %v1534_v6  ;;  %v834_v33 = vsub.f32 %v1436_v24, %v1534_v6  ;;  %v835_v34 = vsub.f32 %v1440_v27, %v1534_v6  ;;  %v1570_v27 = vld [vmem:[%s1742_s3] ss:$0 sm:$0xff] }
 0x154   : > { %v836_v35 = vsub.f32 %v1444_v30, %v1534_v6  ;;  %v837_v17 = vsub.f32 %v1454_v36, %v1534_v6  ;;  %v838_v18 = vsub.f32 %v1462_v41, %v1534_v6  ;;  %v839_v19 = vsub.f32 %v1469_v48, %v1534_v6 }
 0x155   : > { %v825_v12 = vsub.f32 %v823_v11, %v824_v10  ;;  %v840_v20 = vsub.f32 %v1476_v54, %v1534_v6  ;;  %v841_v24 = vsub.f32 %v1483_v60, %v1534_v6  ;;  %v842_v30 = vsub.f32 %v1490_v2, %v1534_v6  ;;  %v889_v60 = vld [vmem:[%s1743_s4] sm:$0xff]  ;;  %v890_v2 = vld [vmem:[%s1743_s4 + $0x8] sm:$0xff] }
 0x156   : > { %v843_v36 = vsub.f32 %v1497_v8, %v1534_v6  ;;  %v844_v41 = vsub.f32 %v1504_v14, %v1534_v6  ;;  %v845_v48 = vsub.f32 %v1511_v25, %v1534_v6  ;;  %v891_v14 = vld [vmem:[%s1743_s4 + $0x10] sm:$0xff]  ;;  %v892_v25 = vld [vmem:[%s1743_s4 + $0x18] sm:$0xff] }
 0x157   : > { %v826_v13 = vadd.f32 1e-05, %v825_v12 }
 0x159   : > { %1227 = vrsqrt.f32 %v826_v13 }
 0x166   : > { %v1228_v23 = vpop.eup %1227 }
 0x167   : > { %v829_v29 = vmul.f32 %v1228_v23, %v828_v21 }
 0x169   : > { %v1559_v37 = vrot.slane %v829_v29, %v848_v22  ;;  %v898_v22 = vld [vmem:[%s1743_s4 + $0x48] sm:$0xff]  ;;  %v900_v29 = vld [vmem:[%s1743_s4 + $0x58] sm:$0xff] }
 0x16b   : > { %v850_v54 = vmul.f32 %v1559_v37, %v830_v26  ;;  %v851_v38 = vmul.f32 %v1559_v37, %v831_v28  ;;  %v852_v8 = vmul.f32 %v1559_v37, %v832_v31  ;;  %v853_v39 = vmul.f32 %v1559_v37, %v833_v32  ;;  %v899_v28 = vld [vmem:[%s1743_s4 + $0x50] sm:$0xff]  ;;  %v901_v32 = vld [vmem:[%s1743_s4 + $0x60] sm:$0xff] }
 0x16c   : > { %v854_v40 = vmul.f32 %v1559_v37, %v834_v33  ;;  %v855_v43 = vmul.f32 %v1559_v37, %v835_v34  ;;  %v856_v44 = vmul.f32 %v1559_v37, %v836_v35  ;;  %v857_v45 = vmul.f32 %v1559_v37, %v837_v17 }
 0x16d   : > { %v873_v46 = vadd.f32 %v1570_v27, %v850_v54  ;;  %v874_v47 = vadd.f32 %v1570_v27, %v851_v38  ;;  %v875_v49 = vadd.f32 %v1570_v27, %v852_v8  ;;  %v876_v50 = vadd.f32 %v1570_v27, %v853_v39 }
 0x16e   : > { %v877_v55 = vadd.f32 %v1570_v27, %v854_v40  ;;  %v878_v56 = vadd.f32 %v1570_v27, %v855_v43  ;;  %v879_v57 = vadd.f32 %v1570_v27, %v856_v44  ;;  %v880_v58 = vadd.f32 %v1570_v27, %v857_v45 }
 0x16f   : > { %v905_v59 = vadd.f32 %v889_v60, %v873_v46  ;;  %v906_v61 = vadd.f32 %v890_v2, %v874_v47  ;;  %v907_v62 = vadd.f32 %v891_v14, %v875_v49  ;;  %v908_v63 = vadd.f32 %v892_v25, %v876_v50 }
 0x170   : > { %v909_v0 = vadd.f32 %v893_v42, %v877_v55  ;;  %v910_v1 = vadd.f32 %v894_v51, %v878_v56  ;;  %v911_v3 = vadd.f32 %v895_v52, %v879_v57  ;;  %v912_v4 = vadd.f32 %v896_v53, %v880_v58 }
 0x171   : > { %v921_v5 = vmax.f32 %v905_v59, 0.0  ;;  %v922_v6 = vmax.f32 %v906_v61, 0.0  ;;  %v923_v7 = vmax.f32 %v907_v62, 0.0  ;;  %v924_v9 = vmax.f32 %v908_v63, 0.0 }
 0x172   : > { %v925_v10 = vmax.f32 %v909_v0, 0.0  ;;  %v926_v11 = vmax.f32 %v910_v1, 0.0  ;;  %v927_v12 = vmax.f32 %v911_v3, 0.0  ;;  %v928_v13 = vmax.f32 %v912_v4, 0.0 }
 0x173   : > { %937 = vst.msk [vmem:[%s1744_s5] sm:$0xff] %vm695_vm1, %v921_v5  ;;  %938 = vst.msk [vmem:[%s1744_s5 + $0x8] sm:$0xff] %vm695_vm1, %v922_v6  ;;  %v858_v15 = vmul.f32 %v1559_v37, %v838_v18  ;;  %v859_v21 = vmul.f32 %v1559_v37, %v839_v19  ;;  %v860_v23 = vmul.f32 %v1559_v37, %v840_v20 }
 0x174   : > { %939 = vst.msk [vmem:[%s1744_s5 + $0x10] sm:$0xff] %vm695_vm1, %v923_v7  ;;  %940 = vst.msk [vmem:[%s1744_s5 + $0x18] sm:$0xff] %vm695_vm1, %v924_v9  ;;  %v861_v26 = vmul.f32 %v1559_v37, %v841_v24  ;;  %v862_v31 = vmul.f32 %v1559_v37, %v842_v30  ;;  %v863_v33 = vmul.f32 %v1559_v37, %v843_v36  ;;  %v902_v24 = vld [vmem:[%s1743_s4 + $0x68] sm:$0xff]  ;;  %v903_v30 = vld [vmem:[%s1743_s4 + $0x70] sm:$0xff] }
 0x175   : > { %941 = vst.msk [vmem:[%s1744_s5 + $0x20] sm:$0xff] %vm695_vm1, %v925_v10  ;;  %942 = vst.msk [vmem:[%s1744_s5 + $0x28] sm:$0xff] %vm695_vm1, %v926_v11  ;;  %v864_v34 = vmul.f32 %v1559_v37, %v844_v41  ;;  %v865_v35 = vmul.f32 %v1559_v37, %v845_v48  ;;  %v881_v17 = vadd.f32 %v1570_v27, %v858_v15  ;;  %v904_v37 = vld [vmem:[%s1743_s4 + $0x78] sm:$0xff] }
 0x176   : > { %943 = vst.msk [vmem:[%s1744_s5 + $0x30] sm:$0xff] %vm695_vm1, %v927_v12  ;;  %944 = vst.msk [vmem:[%s1744_s5 + $0x38] sm:$0xff] %vm695_vm1, %v928_v13  ;;  %v882_v18 = vadd.f32 %v1570_v27, %v859_v21  ;;  %v883_v19 = vadd.f32 %v1570_v27, %v860_v23  ;;  %v884_v20 = vadd.f32 %v1570_v27, %v861_v26 }
 0x177   : > { %v885_v36 = vadd.f32 %v1570_v27, %v862_v31  ;;  %v886_v41 = vadd.f32 %v1570_v27, %v863_v33  ;;  %v887_v48 = vadd.f32 %v1570_v27, %v864_v34  ;;  %v888_v54 = vadd.f32 %v1570_v27, %v865_v35 }
 0x178   : > { %v913_v60 = vadd.f32 %v897_v16, %v881_v17  ;;  %v914_v38 = vadd.f32 %v898_v22, %v882_v18  ;;  %v915_v2 = vadd.f32 %v899_v28, %v883_v19  ;;  %v916_v8 = vadd.f32 %v900_v29, %v884_v20 }
 0x179   : > { %v917_v39 = vadd.f32 %v901_v32, %v885_v36  ;;  %v918_v14 = vadd.f32 %v902_v24, %v886_v41  ;;  %v919_v25 = vadd.f32 %v903_v30, %v887_v48  ;;  %v920_v40 = vadd.f32 %v904_v37, %v888_v54 }
 0x17a   : > { %v929_v42 = vmax.f32 %v913_v60, 0.0  ;;  %v930_v43 = vmax.f32 %v914_v38, 0.0  ;;  %v931_v44 = vmax.f32 %v915_v2, 0.0  ;;  %v932_v45 = vmax.f32 %v916_v8, 0.0 }
 0x17b   : > { %v933_v46 = vmax.f32 %v917_v39, 0.0  ;;  %v934_v47 = vmax.f32 %v918_v14, 0.0  ;;  %v935_v49 = vmax.f32 %v919_v25, 0.0  ;;  %v936_v50 = vmax.f32 %v920_v40, 0.0 }
 0x17c   : > { %945 = vst.msk [vmem:[%s1744_s5 + $0x40] sm:$0xff] %vm695_vm1, %v929_v42  ;;  %946 = vst.msk [vmem:[%s1744_s5 + $0x48] sm:$0xff] %vm695_vm1, %v930_v43 }
 0x17d   : > { %947 = vst.msk [vmem:[%s1744_s5 + $0x50] sm:$0xff] %vm695_vm1, %v931_v44  ;;  %948 = vst.msk [vmem:[%s1744_s5 + $0x58] sm:$0xff] %vm695_vm1, %v932_v45 }
 0x17e   : > { %949 = vst.msk [vmem:[%s1744_s5 + $0x60] sm:$0xff] %vm695_vm1, %v933_v46  ;;  %950 = vst.msk [vmem:[%s1744_s5 + $0x68] sm:$0xff] %vm695_vm1, %v934_v47 }
 0x17f   : > { %951 = vst.msk [vmem:[%s1744_s5 + $0x70] sm:$0xff] %vm695_vm1, %v935_v49  ;;  %952 = vst.msk [vmem:[%s1744_s5 + $0x78] sm:$0xff] %vm695_vm1, %v936_v50 }
 0x180 PF: > { %s15_s22 = sadd.s32 1, %s1267_s22   ;;  %s1745_s18 = smov %s1255_s19 }
 0x181   : > { %p12_p12 = scmp.ge.s32.totalorder %s15_s22, 7   ;;  %s1746_s19 = smov %s1335_s26 }
 0x182   : > { %s1747_s20 = smov %s1263_s21  ;;  %s1748_s21 = smov %s1750_s23 }
 0x183   :  { %14 = sbr.rel (!%p12_p12) target bundleno = 3 (0x3), region = 136 }

// kernel: _lambda_.17
= control target key start
LH: loop header
LB: loop body
LE: loop exit
PB: predicated region body
PF: predicated region fallthrough
CT: control target
= control target key end

     0   :  { %s823_s15 = smov 0   ;;  %s825_s16 = smov 0   ;;  %s925_s0 = inlined_call_operand.vmem [shape: bf16[32,640], index: 0, kind: input, shape index: {}]   ;;  %s926_s1 = inlined_call_operand.vmem [shape: bf16[640,128], index: 1, kind: input, shape index: {}]   ;;  %s927_s2 = inlined_call_operand.vmem [shape: f32[1,128], index: 2, kind: input, shape index: {}]   ;;  %s928_s3 = inlined_call_operand.vmem [shape: f32[1,128], index: 3, kind: input, shape index: {}]   ;;  %s929_s4 = inlined_call_operand.vmem [shape: f32[32,128], index: 4, kind: output, shape index: {}]  }
   0x1   :  { %s827_s17 = smov 0   ;;  %s829_s18 = smov 0  }
   0x2   :  { %s831_s19 = smov 0  }
   0x3 LB: > { %s23_s20 = sadd.s32 1, %s791_s18  ;;  %p40_p1 = scmp.ne.s32.totalorder %s783_s16, %s779_s15  ;;  %s795_s19 = sphi %s831_s19, %s14_s19   ;;  %s791_s18 = sphi %s829_s18, %s933_s18   ;;  %s787_s17 = sphi %s827_s17, %s932_s17   ;;  %s783_s16 = sphi %s825_s16, %s931_s16   ;;  %s779_s15 = sphi %s823_s15, %s930_s15  }
   0x4   : > { %p24_p0 = scmp.ge.s32.totalorder %s23_s20, 5  ;;  %p41_p2 = scmp.eq.s32.totalorder %s795_s19, 0 }
   0x5   : > { %s33_s22 = sadd.s32 1, %s783_s16  ;;  %p651_p5 = scmp.ge.s32.totalorder %s795_s19, 5 }
   0x6   : > { %s935_s20 = smov (%p24_p0, %s23_s20), 0  ;;  %p42_p3 = por %p41_p2, %p40_p1 }
   0x7   : > { %s30_s21 = ssub.s32 %s791_s18, %s935_s20  ;;  %184 = sbr.rel (%p651_p5) target bundleno = 18 (0x12), region = 24 }
   0x8   : > { %p31_p4 = scmp.eq.s32.totalorder %s30_s21, 0 }
   0xa   : > { %s858_s23 = scalar_select %p31_p4, %s783_s16, %s33_s22  }
   0xc   : > { %187 = sbr.rel (!%p42_p3) target bundleno = 18 (0x12), region = 28  ;;  %s189_s24 = sand.u32 (%p42_p3), 1, %s783_s16  }
   0xd   : > { %s653_s25 = sshll.u32 (%p42_p3), %s791_s18, 2  ;;  %s652_s26 = sshll.u32 (%p42_p3), %s189_s24, 4 }
   0xe   : > { %s193_s29 = scalar_lea.vmem (%p42_p3), %s925_s0, %s653_s25  ;;  %s191_s30 = scalar_lea.vmem (%p42_p3), [#allocation3], %s652_s26 }
   0xf   : > { %v210_v0 = vld [vmem:[%s193_s29] sm:$0xf] (%p42_p3)  ;;  %v212_v1 = vld [vmem:[%s193_s29 + $0x14] sm:$0xf] (%p42_p3)  ;;  %v214_v2 = vld [vmem:[%s193_s29 + $0x28] sm:$0xf] (%p42_p3) }
  0x10   : > { %211 = vst [vmem:[%s191_s30] sm:$0xf] (%p42_p3), %v210_v0  ;;  %213 = vst [vmem:[%s191_s30 + $0x4] sm:$0xf] (%p42_p3), %v212_v1  ;;  %v216_v3 = vld [vmem:[%s193_s29 + $0x3c] sm:$0xf] (%p42_p3) }
  0x11   : > { %215 = vst [vmem:[%s191_s30 + $0x8] sm:$0xf] %v214_v2  ;;  %217 = vst [vmem:[%s191_s30 + $0xc] sm:$0xf] %v216_v3 }
  0x12 PF: > { %p654_p6 = scmp.ge.s32.totalorder %s795_s19, 1  ;;  %p260_p7 = scmp.lt.s32.totalorder %s795_s19, 6 }
  0x14   : > { %p261_p8 = pnand %p654_p6, %p260_p7 }
  0x15   : > { %s267_s5 = sand.u32 (!%p261_p8), 1, %s779_s15   ;;  %s656_s6 = sshll.u32 (!%p261_p8), %s787_s17, 4 }
  0x16   : > { %264 = sbr.rel (%p261_p8) target bundleno = 329 (0x149), region = 73  ;;  %s870_s7 = sshll.u32 (!%p261_p8), %s267_s5, 4 }
  0x17   : > { %p306_p9 = scmp.lt.s32.totalorder (!%p261_p8), %s656_s6, 79  ;;  %s269_s12 = scalar_lea.vmem (!%p261_p8), [#allocation3], %s870_s7 }
  0x18   : > { %p658_p10 = scmp.ne.s32.totalorder (!%p261_p8), %s787_s17, 0 }
  0x1b   : > { %s937_s6 = smov (!%p306_p9, %s656_s6), 79  ;;  %328 = sbr.rel (%p658_p10) target bundleno = 35 (0x23), region = 81 }
  0x1c   : > { %s657_s8 = sshll.u32 %s937_s6, 2 }
  0x1d   : > { %s875_s11 = scalar_lea.vmem %s926_s1, %s657_s8 }
  0x20   : > { %v797_v4 = vmov 0.0  }
  0x21   : > { %329 = vst [vmem:[#allocation2 + $0x10] sm:$0xff] %v797_v4  ;;  %330 = vst [vmem:[#allocation2] sm:$0xff] %v797_v4 }
  0x22   : > { %331 = vst [vmem:[#allocation2 + $0x18] sm:$0xff] %v797_v4  ;;  %332 = vst [vmem:[#allocation2 + $0x8] sm:$0xff] %v797_v4 }
  0x23 PF: > { %v745_v5 = vld [vmem:[%s875_s11 + $0x38] sm:$0xff]   ;;  %v746_v6 = vld [vmem:[%s875_s11 + $0x30] sm:$0xff]   ;;  %v747_v7 = vld [vmem:[%s875_s11 + $0x28] sm:$0xff]   ;;  %p669_p11 = scmp.ne.s32.totalorder %s787_s17, 4 }
  0x24   : > { %684 = vmatprep.subr.bf16.mxu0 %v745_v5  ;;  %v748_v8 = vld [vmem:[%s875_s11 + $0x20] sm:$0xff]   ;;  %v749_v10 = vld [vmem:[%s875_s11 + $0x18] sm:$0xff]   ;;  %v750_v11 = vld [vmem:[%s875_s11 + $0x10] sm:$0xff]  }
  0x25   : > { %685 = vmatpush3.bf16.msra.mxu0 %v745_v5  ;;  %v753_v9 = vld [vmem:[%s269_s12] sm:$0xff]   ;;  %v751_v12 = vld [vmem:[%s875_s11 + $0x8] sm:$0xff]  }
  0x26   : > { %686 = vmatprep.subr.bf16.mxu0 %v746_v6  ;;  %700 = vmatprep.mubr.bf16.mxu0 %v753_v9  ;;  %v752_v13 = vld [vmem:[%s875_s11] sm:$0xff]   ;;  %v754_v14 = vld [vmem:[%s269_s12 + $0x8] sm:$0xff]  }
  0x28   : > { %v333_v17 = vld [vmem:[#allocation2 + $0x10] sm:$0xff]  ;;  %v334_v23 = vld [vmem:[#allocation2] sm:$0xff] }
  0x29   : > { %687 = vmatpush3.bf16.msra.mxu0 %v746_v6  ;;  %v335_v15 = vld [vmem:[#allocation2 + $0x18] sm:$0xff]  ;;  %v336_v20 = vld [vmem:[#allocation2 + $0x8] sm:$0xff] }
  0x2a   : > { %688 = vmatprep.subr.bf16.mxu0 %v747_v7 }
  0x2d   : > { %689 = vmatpush3.bf16.msra.mxu0 %v747_v7 }
  0x2e   : > { %690 = vmatprep.subr.bf16.mxu0 %v748_v8 }
  0x31   : > { %691 = vmatpush3.bf16.msra.mxu0 %v748_v8 }
  0x32   : > { %692 = vmatprep.subr.bf16.mxu0 %v749_v10 }
  0x35   : > { %693 = vmatpush3.bf16.msra.mxu0 %v749_v10 }
  0x36   : > { %694 = vmatprep.subr.bf16.mxu0 %v750_v11 }
  0x39   : > { %695 = vmatpush3.bf16.msra.mxu0 %v750_v11 }
  0x3a   : > { %696 = vmatprep.subr.bf16.mxu0 %v751_v12 }
  0x3d   : > { %697 = vmatpush3.bf16.msra.mxu0 %v751_v12 }
  0x3e   : > { %698 = vmatprep.subr.bf16.mxu0 %v752_v13 }
  0x41   : > { %699 = vmatpush3.bf16.msra.mxu0 %v752_v13 }
  0x44   : > { %701 = vmatmul.mubr.bf16.vlgmr.msra.gmra.mxu0 %v754_v14 }
 0x104   : > { %v702_v16 = vpop.f32.mrf.mxu0 }
 0x105   : > { %v468_v18 = vadd.f32 %v702_v16, %v335_v15 }
 0x106   : > { %v451_v19 = vpop.f32.mrf.mxu0 }
 0x107   : > { %472 = vst [vmem:[#allocation2 + $0x18] sm:$0xff] %v468_v18  ;;  %v466_v21 = vadd.f32 %v451_v19, %v333_v17 }
 0x108   : > { %v703_v22 = vpop.f32.mrf.mxu0 }
 0x109   : > { %470 = vst [vmem:[#allocation2 + $0x10] sm:$0xff] %v466_v21  ;;  %v469_v24 = vadd.f32 %v703_v22, %v336_v20  ;;  %477 = sbr.rel (%p669_p11) target bundleno = 329 (0x149), region = 85 }
 0x10a   : > { %v454_v25 = vpop.f32.mrf.mxu0 }
 0x10b   : > { %473 = vst [vmem:[#allocation2 + $0x8] sm:$0xff] %v469_v24  ;;  %v467_v26 = vadd.f32 %v454_v25, %v334_v23 }
 0x10d   : > { %471 = vst [vmem:[#allocation2] sm:$0xff] %v467_v26 }
 0x10e   : > { %v480_v29 = vld [vmem:[#allocation2 + $0x18] sm:$0xff]  ;;  %v516_v58 = vlaneseq  ;;  %v510_v60 = vld [vmem:[%s927_s2] sm:$0x1] }
 0x10f   : > { %v493_v34 = vmul.f32 %v480_v29, %v480_v29  ;;  %v670_v5 = vld [vmem:[%s928_s3] ss:$0 sm:$0xff] }
 0x110   : > { %v478_v27 = vld [vmem:[#allocation2 + $0x10] sm:$0xff]  ;;  %v517_v59 = vshrl.u32 %v516_v58, 7 }
 0x111   : > { %v491_v32 = vmul.f32 %v478_v27, %v478_v27 }
 0x112   : > { %v481_v30 = vld [vmem:[#allocation2 + $0x8] sm:$0xff]  ;;  %v518_v61 = vsub.s32 0, %v517_v59 }
 0x113   : > { %v494_v36 = vmul.f32 %v481_v30, %v481_v30 }
 0x114   : > { %v479_v28 = vld [vmem:[#allocation2] sm:$0xff] }
 0x115   : > { %v482_v31 = vadd.f32 %v479_v28, %v478_v27  ;;  %v492_v33 = vmul.f32 %v479_v28, %v479_v28 }
 0x117   : > { %v483_v35 = vadd.f32 %v482_v31, %v480_v29  ;;  %v495_v37 = vadd.f32 %v492_v33, %v491_v32 }
 0x119   : > { %v484_v38 = vadd.f32 %v483_v35, %v481_v30  ;;  %v496_v39 = vadd.f32 %v495_v37, %v493_v34 }
 0x11b   : > { %v485_v40 = vrot.slane %v484_v38, 4  ;;  %v497_v41 = vadd.f32 %v496_v39, %v494_v36 }
 0x11d   : > { %v486_v42 = vadd.f32 %v485_v40, %v484_v38  ;;  %v498_v43 = vrot.slane %v497_v41, 4 }
 0x11f   : > { %v487_v44 = vrot.slane %v486_v42, 2  ;;  %v499_v45 = vadd.f32 %v498_v43, %v497_v41 }
 0x121   : > { %v488_v46 = vadd.f32 %v487_v44, %v486_v42  ;;  %v500_v47 = vrot.slane %v499_v45, 2 }
 0x123   : > { %v489_v48 = vrot.slane %v488_v46, 1  ;;  %v501_v49 = vadd.f32 %v500_v47, %v499_v45 }
 0x125   : > { %v490_v50 = vadd.f32 %v489_v48, %v488_v46  ;;  %v502_v51 = vrot.slane %v501_v49, 1 }
 0x127   : > { %v503_v52 = vadd.f32 %v502_v51, %v501_v49  ;;  %v504_v53 = vmul.f32 0.03125, %v490_v50 }
 0x129   : > { %v505_v54 = vmul.f32 0.03125, %v503_v52  ;;  %v506_v55 = vmul.f32 %v504_v53, %v504_v53  ;;  %v512_v63 = vsub.f32 %v478_v27, %v504_v53  ;;  %v513_v1 = vsub.f32 %v479_v28, %v504_v53 }
 0x12a   : > { %v514_v2 = vsub.f32 %v480_v29, %v504_v53  ;;  %v515_v3 = vsub.f32 %v481_v30, %v504_v53 }
 0x12b   : > { %v507_v56 = vsub.f32 %v505_v54, %v506_v55 }
 0x12d   : > { %v508_v57 = vadd.f32 1e-05, %v507_v56 }
 0x12f   : > { %755 = vrsqrt.f32 %v508_v57 }
 0x13c   : > { %v756_v62 = vpop.eup %755 }
 0x13d   : > { %v511_v0 = vmul.f32 %v756_v62, %v510_v60 }
 0x13f   : > { %v519_v4 = vrot.slane %v511_v0, %v518_v61 }
 0x141   : > { %v520_v6 = vmul.f32 %v519_v4, %v512_v63  ;;  %v521_v7 = vmul.f32 %v519_v4, %v513_v1  ;;  %v522_v8 = vmul.f32 %v519_v4, %v514_v2  ;;  %v523_v9 = vmul.f32 %v519_v4, %v515_v3 }
 0x143   : > { %v531_v10 = vadd.f32 %v670_v5, %v520_v6  ;;  %v532_v11 = vadd.f32 %v670_v5, %v521_v7  ;;  %v533_v12 = vadd.f32 %v670_v5, %v522_v8  ;;  %v534_v13 = vadd.f32 %v670_v5, %v523_v9 }
 0x145   : > { %v535_v14 = vmax.f32 %v531_v10, 0.0  ;;  %v536_v15 = vmax.f32 %v532_v11, 0.0  ;;  %v537_v16 = vmax.f32 %v533_v12, 0.0  ;;  %v538_v17 = vmax.f32 %v534_v13, 0.0 }
 0x147   : > { %539 = vst [vmem:[%s929_s4] sm:$0xff] %v535_v14  ;;  %540 = vst [vmem:[%s929_s4 + $0x8] sm:$0xff] %v536_v15 }
 0x148   : > { %541 = vst [vmem:[%s929_s4 + $0x10] sm:$0xff] %v537_v16  ;;  %542 = vst [vmem:[%s929_s4 + $0x18] sm:$0xff] %v538_v17 }
 0x149 PF: > { %s14_s19 = sadd.s32 1, %s795_s19   ;;  %s930_s15 = smov %s783_s16 }
 0x14a   : > { %p11_p12 = scmp.ge.s32.totalorder %s14_s19, 7   ;;  %s931_s16 = smov %s858_s23 }
 0x14b   : > { %s932_s17 = smov %s791_s18  ;;  %s933_s18 = smov %s935_s20 }
 0x14c   :  { %13 = sbr.rel (!%p11_p12) target bundleno = 3 (0x3), region = 129 }

// kernel: _lambda_.19
= control target key start
LH: loop header
LB: loop body
LE: loop exit
PB: predicated region body
PF: predicated region fallthrough
CT: control target
= control target key end

     0   :  { %s1169_s18 = smov 0   ;;  %s1171_s19 = smov 0   ;;  %s1300_s0 = inlined_call_operand.vmem [shape: bf16[32,1152], index: 0, kind: input, shape index: {}]   ;;  %s1301_s1 = inlined_call_operand.vmem [shape: bf16[1152,128], index: 1, kind: input, shape index: {}]   ;;  %s1302_s2 = inlined_call_operand.vmem [shape: f32[1,128], index: 2, kind: input, shape index: {}]   ;;  %s1303_s3 = inlined_call_operand.vmem [shape: f32[1,128], index: 3, kind: input, shape index: {}]   ;;  %s1304_s4 = inlined_call_operand.vmem [shape: f32[32,128], index: 4, kind: input, shape index: {}]   ;;  %s1305_s5 = inlined_call_operand.vmem [shape: f32[32,128], index: 5, kind: output, shape index: {}]  }
   0x1   :  { %s1173_s20 = smov 0   ;;  %s1175_s21 = smov 0  }
   0x2   :  { %s1177_s22 = smov 0  }
   0x3 LB: > { %s24_s23 = sadd.s32 1, %s1132_s21  ;;  %p41_p1 = scmp.ne.s32.totalorder %s1124_s19, %s1120_s18  ;;  %s1136_s22 = sphi %s1177_s22, %s15_s22   ;;  %s1132_s21 = sphi %s1175_s21, %s1309_s21   ;;  %s1128_s20 = sphi %s1173_s20, %s1308_s20   ;;  %s1124_s19 = sphi %s1171_s19, %s1307_s19   ;;  %s1120_s18 = sphi %s1169_s18, %s1306_s18  }
   0x4   : > { %p25_p0 = scmp.ge.s32.totalorder %s24_s23, 3  ;;  %p42_p2 = scmp.eq.s32.totalorder %s1136_s22, 0 }
   0x5   : > { %s34_s25 = sadd.s32 1, %s1124_s19  ;;  %p914_p5 = scmp.ge.s32.totalorder %s1136_s22, 3 }
   0x6   : > { %s1311_s23 = smov (%p25_p0, %s24_s23), 0  ;;  %p43_p3 = por %p42_p2, %p41_p1 }
   0x7   : > { %s31_s24 = ssub.s32 %s1132_s21, %s1311_s23  ;;  %218 = sbr.rel (%p914_p5) target bundleno = 21 (0x15), region = 28 }
   0x8   : > { %p32_p4 = scmp.eq.s32.totalorder %s31_s24, 0 }
   0xa   : > { %s1204_s26 = scalar_select %p32_p4, %s1124_s19, %s34_s25  }
   0xc   : > { %221 = sbr.rel (!%p43_p3) target bundleno = 21 (0x15), region = 32  ;;  %s223_s27 = sand.u32 (%p43_p3), 1, %s1124_s19  }
   0xd   : > { %s962_s28 = smul.u32 (%p43_p3), 12, %s1132_s21 }
   0xe   : > { %s1021_s29 = smul.u32 (%p43_p3), 48, %s223_s27 }
   0xf   : > { %s228_s7 = scalar_lea.vmem (%p43_p3), %s1300_s0, %s962_s28 }
  0x10   : > { %v243_v0 = vld [vmem:[%s228_s7] sm:$0xff] (%p43_p3)  ;;  %v247_v2 = vld [vmem:[%s228_s7 + $0x48] sm:$0xff] (%p43_p3)  ;;  %s225_s8 = scalar_lea.vmem (%p43_p3), [#allocation3], %s1021_s29  ;;  %v920_v6 = vld [vmem:[%s228_s7 + $0x50] sm:$0xf] (%p43_p3) }
  0x11   : > { %v245_v1 = vld [vmem:[%s228_s7 + $0x24] sm:$0xff]  ;;  %244 = vst [vmem:[%s225_s8] sm:$0xff] %v243_v0  ;;  %248 = vst [vmem:[%s225_s8 + $0x18] sm:$0xff] %v247_v2  ;;  %v249_v3 = vld [vmem:[%s228_s7 + $0x6c] sm:$0xff] }
  0x12   : > { %246 = vst [vmem:[%s225_s8 + $0xc] sm:$0xff] %v245_v1  ;;  %v916_v4 = vld [vmem:[%s228_s7 + $0x8] sm:$0xf]  ;;  %v918_v5 = vld [vmem:[%s228_s7 + $0x2c] sm:$0xf]  ;;  %250 = vst [vmem:[%s225_s8 + $0x24] sm:$0xff] %v249_v3 }
  0x13   : > { %917 = vst [vmem:[%s225_s8 + $0x8] sm:$0xf] %v916_v4  ;;  %919 = vst [vmem:[%s225_s8 + $0x14] sm:$0xf] %v918_v5  ;;  %v922_v7 = vld [vmem:[%s228_s7 + $0x74] sm:$0xf] }
  0x14   : > { %921 = vst [vmem:[%s225_s8 + $0x20] sm:$0xf] %v920_v6  ;;  %923 = vst [vmem:[%s225_s8 + $0x2c] sm:$0xf] %v922_v7 }
  0x15 PF: > { %p924_p6 = scmp.ge.s32.totalorder %s1136_s22, 1  ;;  %p283_p7 = scmp.lt.s32.totalorder %s1136_s22, 4 }
  0x17   : > { %p284_p8 = pnand %p924_p6, %p283_p7 }
  0x18   : > { %s290_s9 = sand.u32 (!%p284_p8), 1, %s1120_s18   ;;  %s335_s10 = smul.u32 (!%p284_p8), 48, %s1128_s20 }
  0x19   : > { %287 = sbr.rel (%p284_p8) target bundleno = 342 (0x156), region = 62  ;;  %p926_p10 = scmp.ne.s32.totalorder (!%p284_p8), %s1128_s20, 0 }
  0x1a   : > { %s1022_s11 = smul.u32 (!%p284_p8), 48, %s290_s9  ;;  %p336_p9 = scmp.lt.s32.totalorder (!%p284_p8), %s335_s10, 143 }
  0x1c   : > { %s1221_s16 = scalar_lea.vmem (!%p284_p8), [#allocation3], %s1022_s11 }
  0x1e   : > { %s1313_s10 = smov (!%p336_p9, %s335_s10), 143  ;;  %362 = sbr.rel (%p926_p10) target bundleno = 38 (0x26), region = 70 }
  0x1f   : > { %s925_s12 = sshll.u32 %s1313_s10, 2 }
  0x20   : > { %s1219_s15 = scalar_lea.vmem %s1301_s1, %s925_s12 }
  0x23   : > { %v1138_v8 = vmov 0.0  }
  0x24   : > { %363 = vst [vmem:[#allocation2 + $0x10] sm:$0xff] %v1138_v8  ;;  %364 = vst [vmem:[#allocation2] sm:$0xff] %v1138_v8 }
  0x25   : > { %365 = vst [vmem:[#allocation2 + $0x18] sm:$0xff] %v1138_v8  ;;  %366 = vst [vmem:[#allocation2 + $0x8] sm:$0xff] %v1138_v8 }
  0x26 PF: > { %v1064_v9 = vld [vmem:[%s1219_s15 + $0x78] sm:$0xff]   ;;  %v1067_v12 = vld [vmem:[%s1219_s15 + $0x70] sm:$0xff]   ;;  %v1070_v15 = vld [vmem:[%s1219_s15 + $0x68] sm:$0xff]   ;;  %p957_p11 = scmp.ne.s32.totalorder %s1128_s20, 2 }
  0x27   : > { %v1065_v10 = vld [vmem:[%s1219_s15 + $0x38] sm:$0xff]   ;;  %963 = vmatprep.subr.bf16.mxu0 %v1064_v9  ;;  %v1068_v13 = vld [vmem:[%s1219_s15 + $0x30] sm:$0xff]   ;;  %v1071_v16 = vld [vmem:[%s1219_s15 + $0x28] sm:$0xff]  }
  0x28   : > { %v1066_v11 = vld [vmem:[%s1219_s15 + $0xb8] sm:$0xff]   ;;  %964 = vmatpush3.bf16.msra.mxu0 %v1065_v10  ;;  %v1069_v14 = vld [vmem:[%s1219_s15 + $0xb0] sm:$0xff]   ;;  %v1072_v17 = vld [vmem:[%s1219_s15 + $0xa8] sm:$0xff]  }
  0x29   : > { %1001 = vmatprep.subr.bf16.mxu1 %v1066_v11  ;;  %965 = vmatprep.subr.bf16.mxu0 %v1067_v12  ;;  %v1073_v18 = vld [vmem:[%s1219_s15 + $0x60] sm:$0xff]   ;;  %v1076_v21 = vld [vmem:[%s1219_s15 + $0x58] sm:$0xff]   ;;  %v1079_v24 = vld [vmem:[%s1219_s15 + $0x50] sm:$0xff]  }
  0x2a   : > { %1002 = vmatpush3.bf16.msra.mxu1 %v1066_v11  ;;  %v1074_v19 = vld [vmem:[%s1219_s15 + $0x20] sm:$0xff]   ;;  %v1078_v22 = vld [vmem:[%s1219_s15 + $0x98] sm:$0xff]   ;;  %v1081_v25 = vld [vmem:[%s1219_s15 + $0x90] sm:$0xff]  }
  0x2b   : > { %1003 = vmatprep.subr.bf16.mxu1 %v1069_v14  ;;  %v1075_v20 = vld [vmem:[%s1219_s15 + $0xa0] sm:$0xff]   ;;  %v1077_v23 = vld [vmem:[%s1219_s15 + $0x18] sm:$0xff]   ;;  %v1080_v26 = vld [vmem:[%s1219_s15 + $0x10] sm:$0xff]  }
  0x2c   : > { %966 = vmatpush3.bf16.msra.mxu0 %v1068_v13  ;;  %v1082_v27 = vld [vmem:[%s1219_s15 + $0x48] sm:$0xff]   ;;  %v1085_v30 = vld [vmem:[%s1219_s15 + $0x40] sm:$0xff]   ;;  %v367_v44 = vld [vmem:[#allocation2 + $0x10] sm:$0xff] }
  0x2d   : > { %967 = vmatprep.subr.bf16.mxu0 %v1070_v15  ;;  %v1083_v28 = vld [vmem:[%s1219_s15 + $0x8] sm:$0xff]   ;;  %v1087_v31 = vld [vmem:[%s1219_s15 + $0x80] sm:$0xff]   ;;  %v369_v58 = vld [vmem:[#allocation2 + $0x18] sm:$0xff] }
  0x2e   : > { %1004 = vmatpush3.bf16.msra.mxu1 %v1069_v14  ;;  %v1084_v29 = vld [vmem:[%s1219_s15 + $0x88] sm:$0xff]   ;;  %v1090_v32 = vld [vmem:[%s1221_s16 + $0x4] ss:$12 sps:$4 sm:$0xff]  }
  0x2f   : > { %1005 = vmatprep.subr.bf16.mxu1 %v1072_v17  ;;  %v1091_v33 = vld [vmem:[%s1221_s16 + $0x8] ss:$12 sps:$4 sm:$0xff]   ;;  %635 = vmatprep.mubr.bf16.mxu0 %v1090_v32  ;;  %v1088_v35 = vld [vmem:[%s1221_s16] ss:$12 sps:$4 sm:$0xff]   ;;  %v1095_v38 = vld [vmem:[%s1221_s16 + $0x18] ss:$12 sps:$4 sm:$0xff]  }
  0x30   : > { %968 = vmatpush3.bf16.msra.mxu0 %v1071_v16  ;;  %v1086_v34 = vld [vmem:[%s1219_s15] sm:$0xff]   ;;  %1017 = vmatprep.mubr.bf16.mxu1 %v1091_v33  ;;  %v1093_v36 = vld [vmem:[%s1221_s16 + $0x1c] ss:$12 sps:$4 sm:$0xff]  }
  0x31   : > { %969 = vmatprep.subr.bf16.mxu0 %v1073_v18  ;;  %v1092_v37 = vld [vmem:[%s1221_s16 + $0x20] ss:$12 sps:$4 sm:$0xff]  }
  0x32   : > { %1006 = vmatpush3.bf16.msra.mxu1 %v1072_v17  ;;  %v368_v52 = vld [vmem:[#allocation2] sm:$0xff]  ;;  %v370_v0 = vld [vmem:[#allocation2 + $0x8] sm:$0xff] }
  0x33   : > { %1007 = vmatprep.subr.bf16.mxu1 %v1075_v20 }
  0x34   : > { %970 = vmatpush3.bf16.msra.mxu0 %v1074_v19 }
  0x35   : > { %971 = vmatprep.subr.bf16.mxu0 %v1076_v21 }
  0x36   : > { %1008 = vmatpush3.bf16.msra.mxu1 %v1075_v20 }
  0x37   : > { %1009 = vmatprep.subr.bf16.mxu1 %v1078_v22 }
  0x38   : > { %972 = vmatpush3.bf16.msra.mxu0 %v1077_v23 }
  0x39   : > { %973 = vmatprep.subr.bf16.mxu0 %v1079_v24 }
  0x3a   : > { %1010 = vmatpush3.bf16.msra.mxu1 %v1078_v22 }
  0x3b   : > { %1011 = vmatprep.subr.bf16.mxu1 %v1081_v25 }
  0x3c   : > { %974 = vmatpush3.bf16.msra.mxu0 %v1080_v26 }
  0x3d   : > { %975 = vmatprep.subr.bf16.mxu0 %v1082_v27 }
  0x3e   : > { %1012 = vmatpush3.bf16.msra.mxu1 %v1081_v25 }
  0x3f   : > { %1013 = vmatprep.subr.bf16.mxu1 %v1084_v29 }
  0x40   : > { %976 = vmatpush3.bf16.msra.mxu0 %v1083_v28 }
  0x41   : > { %977 = vmatprep.subr.bf16.mxu0 %v1085_v30 }
  0x42   : > { %1014 = vmatpush3.bf16.msra.mxu1 %v1084_v29 }
  0x43   : > { %1015 = vmatprep.subr.bf16.mxu1 %v1087_v31 }
  0x44   : > { %978 = vmatpush3.bf16.msra.mxu0 %v1086_v34 }
  0x46   : > { %1016 = vmatpush3.bf16.msra.mxu1 %v1087_v31 }
  0x47   : > { %636 = vmatmul.mubr.bf16.vlgmr.msra.gmra.mxu0 %v1088_v35 }
  0x48   : > { %643 = vmatprep.mubr.bf16.mxu0 %v1093_v36 }
  0x49   : > { %1018 = vmatmul.mubr.bf16.vlgmr.msra.gmra.mxu1 %v1092_v37 }
  0x4f   : > { %644 = vmatmul.mubr.bf16.gmra.mxu0 %v1095_v38 }
 0x107   : > { %v979_v39 = vpop.f32.mrf.mxu0 }
 0x109   : > { %v980_v40 = vpop.f32.mrf.mxu0  ;;  %v1019_v41 = vpop.f32.mrf.mxu1 }
 0x10a   : > { %v981_v42 = vadd.f32 %v980_v40, %v979_v39 }
 0x10b   : > { %v982_v43 = vpop.f32.mrf.mxu0  ;;  %v686_v45 = vpop.f32.mrf.mxu1 }
 0x10c   : > { %v687_v46 = vadd.f32 %v981_v42, %v686_v45 }
 0x10d   : > { %v983_v47 = vpop.f32.mrf.mxu0  ;;  %v1020_v48 = vpop.f32.mrf.mxu1 }
 0x10e   : > { %v701_v49 = vadd.f32 %v687_v46, %v367_v44  ;;  %v984_v50 = vadd.f32 %v983_v47, %v982_v43 }
 0x10f   : > { %v985_v51 = vpop.f32.mrf.mxu0  ;;  %v689_v53 = vpop.f32.mrf.mxu1 }
 0x110   : > { %705 = vst [vmem:[#allocation2 + $0x10] sm:$0xff] %v701_v49  ;;  %v690_v54 = vadd.f32 %v984_v50, %v689_v53 }
 0x111   : > { %v986_v55 = vpop.f32.mrf.mxu0 }
 0x112   : > { %v702_v56 = vadd.f32 %v690_v54, %v368_v52  ;;  %v987_v57 = vadd.f32 %v986_v55, %v985_v51 }
 0x113   : > { %v988_v59 = vpop.f32.mrf.mxu0 }
 0x114   : > { %706 = vst [vmem:[#allocation2] sm:$0xff] %v702_v56  ;;  %v695_v60 = vadd.f32 %v1019_v41, %v987_v57 }
 0x115   : > { %v989_v61 = vpop.f32.mrf.mxu0 }
 0x116   : > { %v703_v62 = vadd.f32 %v695_v60, %v369_v58  ;;  %v990_v63 = vadd.f32 %v989_v61, %v988_v59 }
 0x118   : > { %707 = vst [vmem:[#allocation2 + $0x18] sm:$0xff] %v703_v62  ;;  %v698_v1 = vadd.f32 %v1020_v48, %v990_v63  ;;  %712 = sbr.rel (%p957_p11) target bundleno = 342 (0x156), region = 74 }
 0x11a   : > { %v704_v2 = vadd.f32 %v698_v1, %v370_v0 }
 0x11c   : > { %708 = vst [vmem:[#allocation2 + $0x8] sm:$0xff] %v704_v2 }
 0x11d   : > { %v713_v3 = vld [vmem:[#allocation2 + $0x10] sm:$0xff]  ;;  %v714_v4 = vld [vmem:[#allocation2] sm:$0xff]  ;;  %v751_v34 = vlaneseq  ;;  %v771_v51 = vld [vmem:[%s1304_s4 + $0x8] sm:$0xff] }
 0x11e   : > { %v717_v7 = vadd.f32 %v714_v4, %v713_v3  ;;  %v726_v8 = vmul.f32 %v713_v3, %v713_v3  ;;  %v727_v9 = vmul.f32 %v714_v4, %v714_v4  ;;  %v745_v36 = vld [vmem:[%s1302_s2] sm:$0x1]  ;;  %v772_v52 = vld [vmem:[%s1304_s4 + $0x10] sm:$0xff]  ;;  %v773_v53 = vld [vmem:[%s1304_s4 + $0x18] sm:$0xff] }
 0x11f   : > { %v715_v5 = vld [vmem:[#allocation2 + $0x18] sm:$0xff]  ;;  %v752_v35 = vshrl.u32 %v751_v34, 7  ;;  %v958_v45 = vld [vmem:[%s1303_s3] ss:$0 sm:$0xff] }
 0x120   : > { %v728_v10 = vmul.f32 %v715_v5, %v715_v5  ;;  %v718_v11 = vadd.f32 %v717_v7, %v715_v5  ;;  %v730_v13 = vadd.f32 %v727_v9, %v726_v8  ;;  %v770_v47 = vld [vmem:[%s1304_s4] sm:$0xff] }
 0x121   : > { %v753_v37 = vsub.s32 0, %v752_v35 }
 0x122   : > { %v731_v15 = vadd.f32 %v730_v13, %v728_v10 }
 0x123   : > { %v716_v6 = vld [vmem:[#allocation2 + $0x8] sm:$0xff] }
 0x124   : > { %v729_v12 = vmul.f32 %v716_v6, %v716_v6  ;;  %v719_v14 = vadd.f32 %v718_v11, %v716_v6 }
 0x126   : > { %v720_v16 = vrot.slane %v719_v14, 4  ;;  %v732_v17 = vadd.f32 %v731_v15, %v729_v12 }
 0x128   : > { %v721_v18 = vadd.f32 %v720_v16, %v719_v14  ;;  %v733_v19 = vrot.slane %v732_v17, 4 }
 0x12a   : > { %v722_v20 = vrot.slane %v721_v18, 2  ;;  %v734_v21 = vadd.f32 %v733_v19, %v732_v17 }
 0x12c   : > { %v723_v22 = vadd.f32 %v722_v20, %v721_v18  ;;  %v735_v23 = vrot.slane %v734_v21, 2 }
 0x12e   : > { %v724_v24 = vrot.slane %v723_v22, 1  ;;  %v736_v25 = vadd.f32 %v735_v23, %v734_v21 }
 0x130   : > { %v725_v26 = vadd.f32 %v724_v24, %v723_v22  ;;  %v737_v27 = vrot.slane %v736_v25, 1 }
 0x132   : > { %v738_v28 = vadd.f32 %v737_v27, %v736_v25  ;;  %v739_v29 = vmul.f32 0.03125, %v725_v26 }
 0x134   : > { %v740_v30 = vmul.f32 0.03125, %v738_v28  ;;  %v741_v31 = vmul.f32 %v739_v29, %v739_v29  ;;  %v747_v39 = vsub.f32 %v713_v3, %v739_v29  ;;  %v748_v41 = vsub.f32 %v714_v4, %v739_v29 }
 0x135   : > { %v749_v42 = vsub.f32 %v715_v5, %v739_v29  ;;  %v750_v43 = vsub.f32 %v716_v6, %v739_v29 }
 0x136   : > { %v742_v32 = vsub.f32 %v740_v30, %v741_v31 }
 0x138   : > { %v743_v33 = vadd.f32 1e-05, %v742_v32 }
 0x13a   : > { %1096 = vrsqrt.f32 %v743_v33 }
 0x147   : > { %v1097_v38 = vpop.eup %1096 }
 0x148   : > { %v746_v40 = vmul.f32 %v1097_v38, %v745_v36 }
 0x14a   : > { %v754_v44 = vrot.slane %v746_v40, %v753_v37 }
 0x14c   : > { %v755_v46 = vmul.f32 %v754_v44, %v747_v39  ;;  %v756_v48 = vmul.f32 %v754_v44, %v748_v41  ;;  %v757_v49 = vmul.f32 %v754_v44, %v749_v42  ;;  %v758_v50 = vmul.f32 %v754_v44, %v750_v43 }
 0x14e   : > { %v766_v54 = vadd.f32 %v958_v45, %v755_v46  ;;  %v767_v55 = vadd.f32 %v958_v45, %v756_v48  ;;  %v768_v56 = vadd.f32 %v958_v45, %v757_v49  ;;  %v769_v57 = vadd.f32 %v958_v45, %v758_v50 }
 0x150   : > { %v774_v58 = vadd.f32 %v770_v47, %v766_v54  ;;  %v775_v59 = vadd.f32 %v771_v51, %v767_v55  ;;  %v776_v60 = vadd.f32 %v772_v52, %v768_v56  ;;  %v777_v61 = vadd.f32 %v773_v53, %v769_v57 }
 0x152   : > { %v778_v62 = vmax.f32 %v774_v58, 0.0  ;;  %v779_v63 = vmax.f32 %v775_v59, 0.0  ;;  %v780_v0 = vmax.f32 %v776_v60, 0.0  ;;  %v781_v1 = vmax.f32 %v777_v61, 0.0 }
 0x154   : > { %782 = vst [vmem:[%s1305_s5] sm:$0xff] %v778_v62  ;;  %783 = vst [vmem:[%s1305_s5 + $0x8] sm:$0xff] %v779_v63 }
 0x155   : > { %784 = vst [vmem:[%s1305_s5 + $0x10] sm:$0xff] %v780_v0  ;;  %785 = vst [vmem:[%s1305_s5 + $0x18] sm:$0xff] %v781_v1 }
 0x156 PF: > { %s15_s22 = sadd.s32 1, %s1136_s22   ;;  %s1306_s18 = smov %s1124_s19 }
 0x157   : > { %p12_p12 = scmp.ge.s32.totalorder %s15_s22, 5   ;;  %s1307_s19 = smov %s1204_s26 }
 0x158   : > { %s1308_s20 = smov %s1132_s21  ;;  %s1309_s21 = smov %s1311_s23 }
 0x159   :  { %14 = sbr.rel (!%p12_p12) target bundleno = 3 (0x3), region = 127 }

// kernel: _lambda_.18
= control target key start
LH: loop header
LB: loop body
LE: loop exit
PB: predicated region body
PF: predicated region fallthrough
CT: control target
= control target key end

     0   :  { %v208_v41 = vlaneseq  ;;  %s361_s1 = inlined_call_operand.vmem [shape: bf16[128,128], index: 1, kind: input, shape index: {}]   ;;  %s362_s0 = inlined_call_operand.vmem [shape: bf16[32,128], index: 0, kind: input, shape index: {}]   ;;  %s363_s2 = inlined_call_operand.vmem [shape: f32[1,128], index: 2, kind: input, shape index: {}]   ;;  %s364_s3 = inlined_call_operand.vmem [shape: f32[1,128], index: 3, kind: input, shape index: {}]   ;;  %s365_s4 = inlined_call_operand.vmem [shape: f32[32,128], index: 4, kind: output, shape index: {}]  }
   0x1   :  { %v276_v0 = vld [vmem:[%s361_s1 + $0x38] sm:$0xff]   ;;  %v277_v1 = vld [vmem:[%s361_s1 + $0x30] sm:$0xff]   ;;  %v278_v2 = vld [vmem:[%s361_s1 + $0x28] sm:$0xff]  }
   0x2   :  { %256 = vmatprep.subr.bf16.mxu0 %v276_v0  ;;  %v279_v3 = vld [vmem:[%s361_s1 + $0x20] sm:$0xff]   ;;  %v280_v5 = vld [vmem:[%s361_s1 + $0x18] sm:$0xff]   ;;  %v281_v6 = vld [vmem:[%s361_s1 + $0x10] sm:$0xff]   ;;  %v209_v42 = vshrl.u32 %v208_v41, 7 }
   0x3   :  { %257 = vmatpush3.bf16.msra.mxu0 %v276_v0  ;;  %v284_v4 = vld [vmem:[%s362_s0] sm:$0xff]   ;;  %v282_v7 = vld [vmem:[%s361_s1 + $0x8] sm:$0xff]  }
   0x4   :  { %258 = vmatprep.subr.bf16.mxu0 %v277_v1  ;;  %272 = vmatprep.mubr.bf16.mxu0 %v284_v4  ;;  %v283_v8 = vld [vmem:[%s361_s1] sm:$0xff]   ;;  %v285_v9 = vld [vmem:[%s362_s0 + $0x8] sm:$0xff]   ;;  %v210_v44 = vsub.s32 0, %v209_v42 }
   0x5   :  { %v202_v43 = vld [vmem:[%s363_s2] sm:$0x1] }
   0x6   :  { %v245_v52 = vld [vmem:[%s364_s3] ss:$0 sm:$0xff] }
   0x7   :  { %259 = vmatpush3.bf16.msra.mxu0 %v277_v1 }
   0x8   :  { %260 = vmatprep.subr.bf16.mxu0 %v278_v2 }
   0xb   :  { %261 = vmatpush3.bf16.msra.mxu0 %v278_v2 }
   0xc   :  { %262 = vmatprep.subr.bf16.mxu0 %v279_v3 }
   0xf   :  { %263 = vmatpush3.bf16.msra.mxu0 %v279_v3 }
  0x10   :  { %264 = vmatprep.subr.bf16.mxu0 %v280_v5 }
  0x13   :  { %265 = vmatpush3.bf16.msra.mxu0 %v280_v5 }
  0x14   :  { %266 = vmatprep.subr.bf16.mxu0 %v281_v6 }
  0x17   :  { %267 = vmatpush3.bf16.msra.mxu0 %v281_v6 }
  0x18   :  { %268 = vmatprep.subr.bf16.mxu0 %v282_v7 }
  0x1b   :  { %269 = vmatpush3.bf16.msra.mxu0 %v282_v7 }
  0x1c   :  { %270 = vmatprep.subr.bf16.mxu0 %v283_v8 }
  0x1f   :  { %271 = vmatpush3.bf16.msra.mxu0 %v283_v8 }
  0x22   :  { %273 = vmatmul.mubr.bf16.vlgmr.msra.gmra.mxu0 %v285_v9 }
  0xe2   :  { %v274_v10 = vpop.f32.mrf.mxu0 }
  0xe3   :  { %v185_v17 = vmul.f32 %v274_v10, %v274_v10 }
  0xe4   :  { %v144_v11 = vpop.f32.mrf.mxu0 }
  0xe5   :  { %v183_v14 = vmul.f32 %v144_v11, %v144_v11 }
  0xe6   :  { %v275_v12 = vpop.f32.mrf.mxu0 }
  0xe7   :  { %v186_v20 = vmul.f32 %v275_v12, %v275_v12 }
  0xe8   :  { %v147_v13 = vpop.f32.mrf.mxu0 }
  0xe9   :  { %v174_v15 = vadd.f32 %v147_v13, %v144_v11  ;;  %v184_v16 = vmul.f32 %v147_v13, %v147_v13 }
  0xeb   :  { %v175_v18 = vadd.f32 %v274_v10, %v174_v15  ;;  %v187_v19 = vadd.f32 %v184_v16, %v183_v14 }
  0xed   :  { %v176_v21 = vadd.f32 %v275_v12, %v175_v18  ;;  %v188_v22 = vadd.f32 %v187_v19, %v185_v17 }
  0xef   :  { %v177_v23 = vrot.slane %v176_v21, 4  ;;  %v189_v24 = vadd.f32 %v188_v22, %v186_v20 }
  0xf1   :  { %v178_v25 = vadd.f32 %v177_v23, %v176_v21  ;;  %v190_v26 = vrot.slane %v189_v24, 4 }
  0xf3   :  { %v179_v27 = vrot.slane %v178_v25, 2  ;;  %v191_v28 = vadd.f32 %v190_v26, %v189_v24 }
  0xf5   :  { %v180_v29 = vadd.f32 %v179_v27, %v178_v25  ;;  %v192_v30 = vrot.slane %v191_v28, 2 }
  0xf7   :  { %v181_v31 = vrot.slane %v180_v29, 1  ;;  %v193_v32 = vadd.f32 %v192_v30, %v191_v28 }
  0xf9   :  { %v182_v33 = vadd.f32 %v181_v31, %v180_v29  ;;  %v194_v34 = vrot.slane %v193_v32, 1 }
  0xfb   :  { %v195_v35 = vadd.f32 %v194_v34, %v193_v32  ;;  %v196_v36 = vmul.f32 0.03125, %v182_v33 }
  0xfd   :  { %v197_v37 = vmul.f32 0.03125, %v195_v35  ;;  %v198_v38 = vmul.f32 %v196_v36, %v196_v36  ;;  %v204_v47 = vsub.f32 %v144_v11, %v196_v36  ;;  %v205_v48 = vsub.f32 %v147_v13, %v196_v36 }
  0xfe   :  { %v206_v49 = vsub.f32 %v274_v10, %v196_v36  ;;  %v207_v50 = vsub.f32 %v275_v12, %v196_v36 }
  0xff   :  { %v199_v39 = vsub.f32 %v197_v37, %v198_v38 }
 0x101   :  { %v200_v40 = vadd.f32 1e-05, %v199_v39 }
 0x103   :  { %286 = vrsqrt.f32 %v200_v40 }
 0x110   :  { %v287_v45 = vpop.eup %286 }
 0x111   :  { %v203_v46 = vmul.f32 %v287_v45, %v202_v43 }
 0x113   :  { %v211_v51 = vrot.slane %v203_v46, %v210_v44 }
 0x115   :  { %v212_v53 = vmul.f32 %v211_v51, %v204_v47  ;;  %v213_v54 = vmul.f32 %v211_v51, %v205_v48  ;;  %v214_v55 = vmul.f32 %v211_v51, %v206_v49  ;;  %v215_v56 = vmul.f32 %v211_v51, %v207_v50 }
 0x117   :  { %v223_v57 = vadd.f32 %v245_v52, %v212_v53  ;;  %v224_v58 = vadd.f32 %v245_v52, %v213_v54  ;;  %v225_v59 = vadd.f32 %v245_v52, %v214_v55  ;;  %v226_v60 = vadd.f32 %v245_v52, %v215_v56 }
 0x119   :  { %227 = vst [vmem:[%s365_s4] sm:$0xff] %v223_v57  ;;  %228 = vst [vmem:[%s365_s4 + $0x8] sm:$0xff] %v224_v58 }
 0x11a   :  { %229 = vst [vmem:[%s365_s4 + $0x10] sm:$0xff] %v225_v59  ;;  %230 = vst [vmem:[%s365_s4 + $0x18] sm:$0xff] %v226_v60 }

// kernel: _lambda_.20
= control target key start
LH: loop header
LB: loop body
LE: loop exit
PB: predicated region body
PF: predicated region fallthrough
CT: control target
= control target key end

     0   :  { %s1200_s15 = smov 0   ;;  %s1202_s16 = smov 0   ;;  %s1449_s0 = inlined_call_operand.vmem [shape: bf16[8,1152], index: 0, kind: input, shape index: {}]   ;;  %s1450_s1 = inlined_call_operand.vmem [shape: bf16[1152,256], index: 1, kind: input, shape index: {}]   ;;  %s1451_s2 = inlined_call_operand.vmem [shape: f32[1,256], index: 2, kind: input, shape index: {}]   ;;  %s1452_s3 = inlined_call_operand.vmem [shape: f32[1,256], index: 3, kind: input, shape index: {}]   ;;  %s1453_s4 = inlined_call_operand.vmem [shape: f32[8,256], index: 4, kind: output, shape index: {}]  }
   0x1   :  { %s1204_s17 = smov 0   ;;  %s1206_s18 = smov 0  }
   0x2   :  { %s1208_s19 = smov 0   ;;  %s1210_s20 = smov 0  }
   0x3   :  { %s1212_s21 = smov 0  }
   0x4 LB: > { %s23_s22 = sadd.s32 1, %s1162_s19  ;;  %s26_s23 = sadd.s32 1, %s1166_s20  ;;  %s1170_s21 = sphi %s1212_s21, %s14_s21   ;;  %s1166_s20 = sphi %s1210_s20, %s1459_s20   ;;  %s1162_s19 = sphi %s1208_s19, %s1458_s19   ;;  %s1158_s18 = sphi %s1206_s18, %s1457_s18   ;;  %s1154_s17 = sphi %s1204_s17, %s1456_s17   ;;  %s1150_s16 = sphi %s1202_s16, %s1455_s16   ;;  %s1146_s15 = sphi %s1200_s15, %s1454_s15  }
   0x5   : > { %p24_p0 = scmp.ge.s32.totalorder %s23_s22, 3  ;;  %p68_p1 = scmp.ne.s32.totalorder %s1150_s16, %s1146_s15 }
   0x6   : > { %p69_p2 = scmp.eq.s32.totalorder %s1170_s21, 0  ;;  %s61_s27 = sadd.s32 1, %s1150_s16 }
   0x7   : > { %s1461_s22 = smov (%p24_p0, %s23_s22), 0  ;;  %s1463_s23 = smov (!%p24_p0, %s26_s23), %s1166_s20 }
   0x8   : > { %p70_p3 = por %p69_p2, %p68_p1  ;;  %p28_p4 = scmp.ge.s32.totalorder %s1463_s23, 2 }
   0x9   : > { %s56_s24 = ssub.s32 %s1162_s19, %s1461_s22  ;;  %p936_p6 = scmp.ge.s32.totalorder %s1170_s21, 6 }
   0xa   : > { %s1465_s23 = smov (%p28_p4, %s1463_s23), 0 }
   0xb   : > { %s57_s25 = ssub.s32 %s1166_s20, %s1465_s23  ;;  %172 = sbr.rel (%p936_p6) target bundleno = 55 (0x37), region = 16 }
   0xc   : > { %s58_s26 = sor.u32 %s57_s25, %s56_s24 }
   0xd   : > { %p59_p5 = scmp.eq.s32.totalorder %s58_s26, 0 }
   0xf   : > { %s1251_s28 = scalar_select %p59_p5, %s1150_s16, %s61_s27  }
  0x10   : > { %184 = sbr.rel (!%p70_p3) target bundleno = 55 (0x37), region = 24  ;;  %s186_s29 = sand.u32 (%p70_p3), 1, %s1150_s16  }
  0x11   : > { %s974_s30 = smul.u32 (%p70_p3), 96, %s1162_s19 }
  0x12   : > { %s1026_s5 = smul.u32 (%p70_p3), 192, %s186_s29 }
  0x13   : > { %s191_s6 = sadd.s32 (%p70_p3), %s1166_s20, %s974_s30 }
  0x14   : > { %s938_s7 = sshll.u32 (%p70_p3), %s191_s6, 2  ;;  %s1265_s11 = scalar_lea.vmem (%p70_p3), [#allocation3], %s1026_s5 }
  0x15   : > { %s1260_s10 = scalar_lea.vmem %s1450_s1, %s938_s7 }
  0x16   : > { %v210_v0 = vld [vmem:[%s1260_s10] sm:$0xf]  ;;  %v212_v1 = vld [vmem:[%s1260_s10 + $0x8] sm:$0xf]  ;;  %v214_v2 = vld [vmem:[%s1260_s10 + $0x10] sm:$0xf] }
  0x17   : > { %211 = vst [vmem:[%s1265_s11] sm:$0xf] %v210_v0  ;;  %213 = vst [vmem:[%s1265_s11 + $0x4] sm:$0xf] %v212_v1  ;;  %v216_v3 = vld [vmem:[%s1260_s10 + $0x18] sm:$0xf] }
  0x18   : > { %215 = vst [vmem:[%s1265_s11 + $0x8] sm:$0xf] %v214_v2  ;;  %v218_v4 = vld [vmem:[%s1260_s10 + $0x20] sm:$0xf]  ;;  %v220_v5 = vld [vmem:[%s1260_s10 + $0x28] sm:$0xf] }
  0x19   : > { %217 = vst [vmem:[%s1265_s11 + $0xc] sm:$0xf] %v216_v3  ;;  %219 = vst [vmem:[%s1265_s11 + $0x10] sm:$0xf] %v218_v4  ;;  %v222_v6 = vld [vmem:[%s1260_s10 + $0x30] sm:$0xf] }
  0x1a   : > { %221 = vst [vmem:[%s1265_s11 + $0x14] sm:$0xf] %v220_v5  ;;  %v224_v7 = vld [vmem:[%s1260_s10 + $0x38] sm:$0xf]  ;;  %v226_v8 = vld [vmem:[%s1260_s10 + $0x40] sm:$0xf] }
  0x1b   : > { %223 = vst [vmem:[%s1265_s11 + $0x18] sm:$0xf] %v222_v6  ;;  %225 = vst [vmem:[%s1265_s11 + $0x1c] sm:$0xf] %v224_v7  ;;  %v228_v9 = vld [vmem:[%s1260_s10 + $0x48] sm:$0xf] }
  0x1c   : > { %227 = vst [vmem:[%s1265_s11 + $0x20] sm:$0xf] %v226_v8  ;;  %v230_v10 = vld [vmem:[%s1260_s10 + $0x50] sm:$0xf]  ;;  %v232_v11 = vld [vmem:[%s1260_s10 + $0x58] sm:$0xf] }
  0x1d   : > { %229 = vst [vmem:[%s1265_s11 + $0x24] sm:$0xf] %v228_v9  ;;  %231 = vst [vmem:[%s1265_s11 + $0x28] sm:$0xf] %v230_v10  ;;  %v234_v12 = vld [vmem:[%s1260_s10 + $0x60] sm:$0xf] }
  0x1e   : > { %233 = vst [vmem:[%s1265_s11 + $0x2c] sm:$0xf] %v232_v11  ;;  %v236_v13 = vld [vmem:[%s1260_s10 + $0x68] sm:$0xf]  ;;  %v238_v14 = vld [vmem:[%s1260_s10 + $0x70] sm:$0xf] }
  0x1f   : > { %235 = vst [vmem:[%s1265_s11 + $0x30] sm:$0xf] %v234_v12  ;;  %237 = vst [vmem:[%s1265_s11 + $0x34] sm:$0xf] %v236_v13  ;;  %v240_v15 = vld [vmem:[%s1260_s10 + $0x78] sm:$0xf] }
  0x20   : > { %239 = vst [vmem:[%s1265_s11 + $0x38] sm:$0xf] %v238_v14  ;;  %v242_v16 = vld [vmem:[%s1260_s10 + $0x80] sm:$0xf]  ;;  %v244_v17 = vld [vmem:[%s1260_s10 + $0x88] sm:$0xf] }
  0x21   : > { %241 = vst [vmem:[%s1265_s11 + $0x3c] sm:$0xf] %v240_v15  ;;  %243 = vst [vmem:[%s1265_s11 + $0x40] sm:$0xf] %v242_v16  ;;  %v246_v18 = vld [vmem:[%s1260_s10 + $0x90] sm:$0xf] }
  0x22   : > { %245 = vst [vmem:[%s1265_s11 + $0x44] sm:$0xf] %v244_v17  ;;  %v248_v19 = vld [vmem:[%s1260_s10 + $0x98] sm:$0xf]  ;;  %v250_v20 = vld [vmem:[%s1260_s10 + $0xa0] sm:$0xf] }
  0x23   : > { %247 = vst [vmem:[%s1265_s11 + $0x48] sm:$0xf] %v246_v18  ;;  %249 = vst [vmem:[%s1265_s11 + $0x4c] sm:$0xf] %v248_v19  ;;  %v252_v21 = vld [vmem:[%s1260_s10 + $0xa8] sm:$0xf] }
  0x24   : > { %251 = vst [vmem:[%s1265_s11 + $0x50] sm:$0xf] %v250_v20  ;;  %v254_v22 = vld [vmem:[%s1260_s10 + $0xb0] sm:$0xf]  ;;  %v256_v23 = vld [vmem:[%s1260_s10 + $0xb8] sm:$0xf] }
  0x25   : > { %253 = vst [vmem:[%s1265_s11 + $0x54] sm:$0xf] %v252_v21  ;;  %255 = vst [vmem:[%s1265_s11 + $0x58] sm:$0xf] %v254_v22  ;;  %v258_v24 = vld [vmem:[%s1260_s10 + $0xc0] sm:$0xf] }
  0x26   : > { %257 = vst [vmem:[%s1265_s11 + $0x5c] sm:$0xf] %v256_v23  ;;  %v260_v25 = vld [vmem:[%s1260_s10 + $0xc8] sm:$0xf]  ;;  %v262_v26 = vld [vmem:[%s1260_s10 + $0xd0] sm:$0xf] }
  0x27   : > { %259 = vst [vmem:[%s1265_s11 + $0x60] sm:$0xf] %v258_v24  ;;  %261 = vst [vmem:[%s1265_s11 + $0x64] sm:$0xf] %v260_v25  ;;  %v264_v27 = vld [vmem:[%s1260_s10 + $0xd8] sm:$0xf] }
  0x28   : > { %263 = vst [vmem:[%s1265_s11 + $0x68] sm:$0xf] %v262_v26  ;;  %v266_v28 = vld [vmem:[%s1260_s10 + $0xe0] sm:$0xf]  ;;  %v268_v29 = vld [vmem:[%s1260_s10 + $0xe8] sm:$0xf] }
  0x29   : > { %265 = vst [vmem:[%s1265_s11 + $0x6c] sm:$0xf] %v264_v27  ;;  %267 = vst [vmem:[%s1265_s11 + $0x70] sm:$0xf] %v266_v28  ;;  %v270_v30 = vld [vmem:[%s1260_s10 + $0xf0] sm:$0xf] }
  0x2a   : > { %269 = vst [vmem:[%s1265_s11 + $0x74] sm:$0xf] %v268_v29  ;;  %v272_v31 = vld [vmem:[%s1260_s10 + $0xf8] sm:$0xf]  ;;  %v274_v32 = vld [vmem:[%s1260_s10 + $0x100] sm:$0xf] }
  0x2b   : > { %271 = vst [vmem:[%s1265_s11 + $0x78] sm:$0xf] %v270_v30  ;;  %273 = vst [vmem:[%s1265_s11 + $0x7c] sm:$0xf] %v272_v31  ;;  %v276_v33 = vld [vmem:[%s1260_s10 + $0x108] sm:$0xf] }
  0x2c   : > { %275 = vst [vmem:[%s1265_s11 + $0x80] sm:$0xf] %v274_v32  ;;  %v278_v34 = vld [vmem:[%s1260_s10 + $0x110] sm:$0xf]  ;;  %v280_v35 = vld [vmem:[%s1260_s10 + $0x118] sm:$0xf] }
  0x2d   : > { %277 = vst [vmem:[%s1265_s11 + $0x84] sm:$0xf] %v276_v33  ;;  %279 = vst [vmem:[%s1265_s11 + $0x88] sm:$0xf] %v278_v34  ;;  %v282_v36 = vld [vmem:[%s1260_s10 + $0x120] sm:$0xf] }
  0x2e   : > { %281 = vst [vmem:[%s1265_s11 + $0x8c] sm:$0xf] %v280_v35  ;;  %v284_v37 = vld [vmem:[%s1260_s10 + $0x128] sm:$0xf]  ;;  %v286_v38 = vld [vmem:[%s1260_s10 + $0x130] sm:$0xf] }
  0x2f   : > { %283 = vst [vmem:[%s1265_s11 + $0x90] sm:$0xf] %v282_v36  ;;  %285 = vst [vmem:[%s1265_s11 + $0x94] sm:$0xf] %v284_v37  ;;  %v288_v39 = vld [vmem:[%s1260_s10 + $0x138] sm:$0xf] }
  0x30   : > { %287 = vst [vmem:[%s1265_s11 + $0x98] sm:$0xf] %v286_v38  ;;  %v290_v40 = vld [vmem:[%s1260_s10 + $0x140] sm:$0xf]  ;;  %v292_v41 = vld [vmem:[%s1260_s10 + $0x148] sm:$0xf] }
  0x31   : > { %289 = vst [vmem:[%s1265_s11 + $0x9c] sm:$0xf] %v288_v39  ;;  %291 = vst [vmem:[%s1265_s11 + $0xa0] sm:$0xf] %v290_v40  ;;  %v294_v42 = vld [vmem:[%s1260_s10 + $0x150] sm:$0xf] }
  0x32   : > { %293 = vst [vmem:[%s1265_s11 + $0xa4] sm:$0xf] %v292_v41  ;;  %v296_v43 = vld [vmem:[%s1260_s10 + $0x158] sm:$0xf]  ;;  %v298_v44 = vld [vmem:[%s1260_s10 + $0x160] sm:$0xf] }
  0x33   : > { %295 = vst [vmem:[%s1265_s11 + $0xa8] sm:$0xf] %v294_v42  ;;  %297 = vst [vmem:[%s1265_s11 + $0xac] sm:$0xf] %v296_v43  ;;  %v300_v45 = vld [vmem:[%s1260_s10 + $0x168] sm:$0xf] }
  0x34   : > { %299 = vst [vmem:[%s1265_s11 + $0xb0] sm:$0xf] %v298_v44  ;;  %v302_v46 = vld [vmem:[%s1260_s10 + $0x170] sm:$0xf]  ;;  %v304_v47 = vld [vmem:[%s1260_s10 + $0x178] sm:$0xf] }
  0x35   : > { %301 = vst [vmem:[%s1265_s11 + $0xb4] sm:$0xf] %v300_v45  ;;  %303 = vst [vmem:[%s1265_s11 + $0xb8] sm:$0xf] %v302_v46 }
  0x36   : > { %305 = vst [vmem:[%s1265_s11 + $0xbc] sm:$0xf] %v304_v47 }
  0x37 PF: > { %p939_p7 = scmp.ge.s32.totalorder %s1170_s21, 1  ;;  %p436_p8 = scmp.lt.s32.totalorder %s1170_s21, 7 }
  0x39   : > { %p437_p9 = pnand %p939_p7, %p436_p8 }
  0x3a   : > { %s443_s12 = sand.u32 (!%p437_p9), 1, %s1146_s15   ;;  %s478_s13 = smul.u32 (!%p437_p9), 3, %s1154_s17 }
  0x3b   : > { %440 = sbr.rel (%p437_p9) target bundleno = 362 (0x16a), region = 73  ;;  %p485_p10 = scmp.lt.s32.totalorder (!%p437_p9), %s1158_s18, 1 }
  0x3c   : > { %s1027_s14 = smul.u32 (!%p437_p9), 192, %s443_s12  ;;  %p479_p11 = scmp.lt.s32.totalorder (!%p437_p9), %s478_s13, 8 }
  0x3d   : > { %p942_p12 = scmp.ne.s32.totalorder (!%p437_p9), %s1154_s17, 0 }
  0x3e   : > { %s1387_s12 = scalar_lea.vmem (!%p437_p9), [#allocation3], %s1027_s14 }
  0x40   : > { %s1467_s13 = smov (!%p479_p11, %s478_s13), 8  ;;  %s1469_s18 = smov (!%p485_p10, %s1158_s18), 1 }
  0x41   : > { %s940_s24 = sshll.u32 %s1467_s13, 2  ;;  %s487_s15 = scalar_lea.vmem %s1451_s2, %s1469_s18 }
  0x42   : > { %s1371_s27 = scalar_lea.vmem %s1449_s0, %s940_s24  ;;  %s490_s7 = scalar_lea.vmem %s1452_s3, %s1469_s18 }
  0x43   : > { %s941_s8 = sshll.u32 %s1469_s18, 3  ;;  %499 = sbr.rel (%p942_p12) target bundleno = 74 (0x4a), region = 81 }
  0x44   : > { %s1385_s11 = scalar_lea.vmem %s1453_s4, %s941_s8 }
  0x48   : > { %v1172_v48 = vmov 0.0  }
  0x49   : > { %500 = vst [vmem:[#allocation2] sm:$0xff] %v1172_v48 }
  0x4a PF: > { %v1087_v49 = vld [vmem:[%s1387_s12 + $0x78] sm:$0xff]   ;;  %v1173_v50 = vmov 0.0   ;;  %vm1174_vm0 = vmmov 0   ;;  %v1090_v53 = vld [vmem:[%s1387_s12 + $0x70] sm:$0xff]   ;;  %v1093_v56 = vld [vmem:[%s1387_s12 + $0x68] sm:$0xff]   ;;  %p970_p13 = scmp.ne.s32.totalorder %s1154_s17, 2 }
  0x4b   : > { %1006 = vmatprep.subr.bf16.mxu1 %v1173_v50  ;;  %v1088_v51 = vld [vmem:[%s1387_s12 + $0xb8] sm:$0xff]   ;;  %975 = vmatprep.subr.bf16.mxu0 %v1087_v49  ;;  %v1091_v54 = vld [vmem:[%s1387_s12 + $0xb0] sm:$0xff]   ;;  %v1094_v57 = vld [vmem:[%s1387_s12 + $0xa8] sm:$0xff]  }
  0x4c   : > { %v1089_v52 = vld [vmem:[%s1387_s12 + $0x38] sm:$0xff]   ;;  %1022 = vmatprep.mubr.msk.bf16.mxu1 %vm1174_vm0, %v1173_v50  ;;  %1007 = vmatpush3.bf16.msra.mxu1 %v1088_v51  ;;  %v1092_v55 = vld [vmem:[%s1387_s12 + $0x30] sm:$0xff]   ;;  %v1095_v58 = vld [vmem:[%s1387_s12 + $0x28] sm:$0xff]  }
  0x4d   : > { %976 = vmatpush3.bf16.msra.mxu0 %v1089_v52  ;;  %1008 = vmatprep.subr.bf16.mxu1 %v1173_v50  ;;  %v1096_v59 = vld [vmem:[%s1387_s12 + $0x60] sm:$0xff]   ;;  %v1099_v62 = vld [vmem:[%s1387_s12 + $0x58] sm:$0xff]   ;;  %v1102_v1 = vld [vmem:[%s1387_s12 + $0x50] sm:$0xff]  }
  0x4e   : > { %977 = vmatprep.subr.bf16.mxu0 %v1090_v53  ;;  %v1097_v60 = vld [vmem:[%s1387_s12 + $0xa0] sm:$0xff]   ;;  %v1100_v63 = vld [vmem:[%s1387_s12 + $0x98] sm:$0xff]   ;;  %v1103_v2 = vld [vmem:[%s1387_s12 + $0x90] sm:$0xff]  }
  0x4f   : > { %v1098_v61 = vld [vmem:[%s1387_s12 + $0x20] sm:$0xff]   ;;  %v1101_v0 = vld [vmem:[%s1387_s12 + $0x18] sm:$0xff]   ;;  %v1104_v3 = vld [vmem:[%s1387_s12 + $0x10] sm:$0xff]  }
  0x50   : > { %1009 = vmatpush3.bf16.msra.mxu1 %v1091_v54  ;;  %v1105_v4 = vld [vmem:[%s1387_s12 + $0x48] sm:$0xff]   ;;  %v502_v7 = vld [vmem:[%s1371_s27] sm:$0xff]  ;;  %v1108_v8 = vld [vmem:[%s1387_s12 + $0x40] sm:$0xff]  }
  0x51   : > { %978 = vmatpush3.bf16.msra.mxu0 %v1092_v55  ;;  %1010 = vmatprep.subr.bf16.mxu1 %v1173_v50  ;;  %v1106_v5 = vld [vmem:[%s1387_s12 + $0x88] sm:$0xff]   ;;  %v944_v9 = vcombine.high %v502_v7, %v502_v7  ;;  %v1109_v10 = vld [vmem:[%s1387_s12 + $0x80] sm:$0xff]   ;;  %v943_v13 = vcombine.low %v502_v7, %v502_v7  ;;  %v501_v20 = vld [vmem:[#allocation2] sm:$0xff] }
  0x52   : > { %979 = vmatprep.subr.bf16.mxu0 %v1093_v56  ;;  %v1107_v6 = vld [vmem:[%s1387_s12 + $0x8] sm:$0xff]   ;;  %v1110_v11 = vld [vmem:[%s1387_s12] sm:$0xff]  }
  0x53   : > { %739 = vmatprep.mubr.bf16.mxu0 %v944_v9  ;;  %v1113_v12 = vld [vmem:[%s1371_s27 + $0x8] ss:$0 sps:$4 sm:$0xff]  }
  0x54   : > { %1011 = vmatpush3.bf16.msra.mxu1 %v1094_v57 }
  0x55   : > { %980 = vmatpush3.bf16.msra.mxu0 %v1095_v58  ;;  %1012 = vmatprep.subr.bf16.mxu1 %v1173_v50 }
  0x56   : > { %981 = vmatprep.subr.bf16.mxu0 %v1096_v59 }
  0x58   : > { %1013 = vmatpush3.bf16.msra.mxu1 %v1097_v60 }
  0x59   : > { %982 = vmatpush3.bf16.msra.mxu0 %v1098_v61  ;;  %1014 = vmatprep.subr.bf16.mxu1 %v1173_v50 }
  0x5a   : > { %983 = vmatprep.subr.bf16.mxu0 %v1099_v62 }
  0x5c   : > { %1015 = vmatpush3.bf16.msra.mxu1 %v1100_v63 }
  0x5d   : > { %984 = vmatpush3.bf16.msra.mxu0 %v1101_v0  ;;  %1016 = vmatprep.subr.bf16.mxu1 %v1173_v50 }
  0x5e   : > { %985 = vmatprep.subr.bf16.mxu0 %v1102_v1 }
  0x60   : > { %1017 = vmatpush3.bf16.msra.mxu1 %v1103_v2 }
  0x61   : > { %986 = vmatpush3.bf16.msra.mxu0 %v1104_v3  ;;  %1018 = vmatprep.subr.bf16.mxu1 %v1173_v50 }
  0x62   : > { %987 = vmatprep.subr.bf16.mxu0 %v1105_v4 }
  0x64   : > { %1019 = vmatpush3.bf16.msra.mxu1 %v1106_v5 }
  0x65   : > { %988 = vmatpush3.bf16.msra.mxu0 %v1107_v6  ;;  %1020 = vmatprep.subr.bf16.mxu1 %v1173_v50 }
  0x66   : > { %989 = vmatprep.subr.bf16.mxu0 %v1108_v8 }
  0x68   : > { %1021 = vmatpush3.bf16.msra.mxu1 %v1109_v10 }
  0x69   : > { %990 = vmatpush3.bf16.msra.mxu0 %v1110_v11 }
  0x6b   : > { %1023 = vmatmul.mubr.bf16.vlgmr.msra.gmra.mxu1 %v1113_v12 }
  0x6c   : > { %740 = vmatmul.mubr.bf16.vlgmr.msra.gmra.mxu0 %v943_v13 }
 0x12b   : > { %v781_v14 = vpop.f32.mrf.mxu1 }
 0x12c   : > { %v991_v15 = vpop.f32.mrf.mxu0 }
 0x12d   : > { %v1024_v16 = vpop.f32.mrf.mxu1 }
 0x12e   : > { %v992_v17 = vpop.f32.mrf.mxu0 }
 0x12f   : > { %v993_v18 = vadd.f32 %v992_v17, %v991_v15  ;;  %v784_v19 = vpop.f32.mrf.mxu1 }
 0x130   : > { %v994_v21 = vpop.f32.mrf.mxu0 }
 0x131   : > { %v782_v22 = vadd.f32 %v993_v18, %v781_v14  ;;  %v1025_v23 = vpop.f32.mrf.mxu1  ;;  %792 = sbr.rel (%p970_p13) target bundleno = 362 (0x16a), region = 85 }
 0x132   : > { %v995_v24 = vpop.f32.mrf.mxu0 }
 0x133   : > { %v787_v25 = vadd.f32 %v782_v22, %v501_v20 }
 0x135   : > { %788 = vst [vmem:[#allocation2] sm:$0xff] %v787_v25 }
 0x136   : > { %v816_v45 = vlaneseq  ;;  %v813_v47 = vld [vmem:[%s487_s15] sm:$0x1] }
 0x137   : > { %v971_v53 = vld [vmem:[%s490_s7] ss:$0 sm:$0xff] }
 0x138   : > { %v817_v46 = vshrl.u32 %v816_v45, 7 }
 0x13a   : > { %v818_v48 = vsub.s32 0, %v817_v46 }
 0x13c   : > { %v793_v26 = vld [vmem:[#allocation2] sm:$0xff] }
 0x13d   : > { %v794_v27 = vrot.slane %v793_v26, 4  ;;  %v800_v28 = vmul.f32 %v793_v26, %v793_v26 }
 0x13f   : > { %v795_v29 = vadd.f32 %v794_v27, %v793_v26  ;;  %v801_v30 = vrot.slane %v800_v28, 4 }
 0x141   : > { %v796_v31 = vrot.slane %v795_v29, 2  ;;  %v802_v32 = vadd.f32 %v801_v30, %v800_v28 }
 0x143   : > { %v797_v33 = vadd.f32 %v796_v31, %v795_v29  ;;  %v803_v34 = vrot.slane %v802_v32, 2 }
 0x145   : > { %v798_v35 = vrot.slane %v797_v33, 1  ;;  %v804_v36 = vadd.f32 %v803_v34, %v802_v32 }
 0x147   : > { %v799_v37 = vadd.f32 %v798_v35, %v797_v33  ;;  %v805_v38 = vrot.slane %v804_v36, 1 }
 0x149   : > { %v806_v39 = vadd.f32 %v805_v38, %v804_v36  ;;  %v807_v40 = vmul.f32 0.125, %v799_v37 }
 0x14b   : > { %v808_v41 = vmul.f32 0.125, %v806_v39  ;;  %v809_v42 = vmul.f32 %v807_v40, %v807_v40  ;;  %v815_v51 = vsub.f32 %v793_v26, %v807_v40 }
 0x14d   : > { %v810_v43 = vsub.f32 %v808_v41, %v809_v42 }
 0x14f   : > { %v811_v44 = vadd.f32 1e-05, %v810_v43 }
 0x151   : > { %1114 = vrsqrt.f32 %v811_v44 }
 0x15e   : > { %v1115_v49 = vpop.eup %1114 }
 0x15f   : > { %v814_v50 = vmul.f32 %v1115_v49, %v813_v47 }
 0x161   : > { %v819_v52 = vrot.slane %v814_v50, %v818_v48 }
 0x163   : > { %v820_v54 = vmul.f32 %v819_v52, %v815_v51 }
 0x165   : > { %v828_v55 = vadd.f32 %v971_v53, %v820_v54 }
 0x167   : > { %v829_v56 = vmax.f32 %v828_v55, 0.0 }
 0x169   : > { %830 = vst [vmem:[%s1385_s11] sm:$0xff] %v829_v56 }
 0x16a PF: > { %s14_s21 = sadd.s32 1, %s1170_s21   ;;  %s1454_s15 = smov %s1150_s16 }
 0x16b   : > { %p11_p0 = scmp.ge.s32.totalorder %s14_s21, 8   ;;  %s1455_s16 = smov %s1251_s28 }
 0x16c   : > { %s1456_s17 = smov %s1162_s19  ;;  %s1457_s18 = smov %s1166_s20 }
 0x16d   : > { %s1458_s19 = smov %s1461_s22  ;;  %s1459_s20 = smov %s1465_s23 }
 0x16e   :  { %13 = sbr.rel (!%p11_p0) target bundleno = 4 (0x4), region = 129 }

// kernel: _lambda_.21
= control target key start
LH: loop header
LB: loop body
LE: loop exit
PB: predicated region body
PF: predicated region fallthrough
CT: control target
= control target key end

     0   :  { %s788_s15 = smov 0   ;;  %s790_s16 = smov 0   ;;  %s881_s0 = inlined_call_operand.vmem [shape: bf16[8,128], index: 0, kind: input, shape index: {}]   ;;  %s882_s1 = inlined_call_operand.vmem [shape: bf16[128,256], index: 1, kind: input, shape index: {}]   ;;  %s883_s2 = inlined_call_operand.vmem [shape: f32[1,256], index: 2, kind: input, shape index: {}]   ;;  %s884_s3 = inlined_call_operand.vmem [shape: f32[1,256], index: 3, kind: input, shape index: {}]   ;;  %s885_s4 = inlined_call_operand.vmem [shape: f32[8,256], index: 4, kind: output, shape index: {}]  }
   0x1   :  { %s792_s17 = smov 0   ;;  %s794_s18 = smov 0  }
   0x2   :  { %s796_s19 = smov 0  }
   0x3 LB: > { %s26_s20 = sadd.s32 1, %s755_s18  ;;  %p68_p1 = scmp.ne.s32.totalorder %s747_s16, %s743_s15  ;;  %s759_s19 = sphi %s796_s19, %s14_s19   ;;  %s755_s18 = sphi %s794_s18, %s889_s18   ;;  %s751_s17 = sphi %s792_s17, %s888_s17   ;;  %s747_s16 = sphi %s790_s16, %s887_s16   ;;  %s743_s15 = sphi %s788_s15, %s886_s15  }
   0x4   : > { %p28_p0 = scmp.ge.s32.totalorder %s26_s20, 2  ;;  %p69_p2 = scmp.eq.s32.totalorder %s759_s19, 0 }
   0x5   : > { %s61_s22 = sadd.s32 1, %s747_s16  ;;  %p623_p5 = scmp.ge.s32.totalorder %s759_s19, 2 }
   0x6   : > { %s891_s20 = smov (%p28_p0, %s26_s20), 0  ;;  %p70_p3 = por %p69_p2, %p68_p1 }
   0x7   : > { %s57_s21 = ssub.s32 %s755_s18, %s891_s20  ;;  %179 = sbr.rel (%p623_p5) target bundleno = 26 (0x1a), region = 20 }
   0x8   : > { %p59_p4 = scmp.eq.s32.totalorder %s57_s21, 0 }
   0xa   : > { %s823_s23 = scalar_select %p59_p4, %s747_s16, %s61_s22  }
   0xc   : > { %182 = sbr.rel (!%p70_p3) target bundleno = 26 (0x1a), region = 24  ;;  %s184_s24 = sand.u32 (%p70_p3), 1, %s747_s16  }
   0xd   : > { %s625_s25 = sshll.u32 (%p70_p3), %s755_s18, 2  ;;  %s624_s26 = sshll.u32 (%p70_p3), %s184_s24, 6 }
   0xe   : > { %s831_s29 = scalar_lea.vmem (%p70_p3), %s882_s1, %s625_s25  ;;  %s186_s30 = scalar_lea.vmem (%p70_p3), [#allocation3], %s624_s26 }
   0xf   : > { %v208_v0 = vld [vmem:[%s831_s29] sm:$0xf] (%p70_p3)  ;;  %v210_v1 = vld [vmem:[%s831_s29 + $0x8] sm:$0xf] (%p70_p3)  ;;  %v212_v2 = vld [vmem:[%s831_s29 + $0x10] sm:$0xf] (%p70_p3) }
  0x10   : > { %209 = vst [vmem:[%s186_s30] sm:$0xf] (%p70_p3), %v208_v0  ;;  %211 = vst [vmem:[%s186_s30 + $0x4] sm:$0xf] (%p70_p3), %v210_v1  ;;  %v214_v3 = vld [vmem:[%s831_s29 + $0x18] sm:$0xf] (%p70_p3) }
  0x11   : > { %v216_v4 = vld [vmem:[%s831_s29 + $0x20] sm:$0xf]  ;;  %213 = vst [vmem:[%s186_s30 + $0x8] sm:$0xf] %v212_v2  ;;  %215 = vst [vmem:[%s186_s30 + $0xc] sm:$0xf] %v214_v3 }
  0x12   : > { %217 = vst [vmem:[%s186_s30 + $0x10] sm:$0xf] %v216_v4  ;;  %v218_v5 = vld [vmem:[%s831_s29 + $0x28] sm:$0xf]  ;;  %v220_v6 = vld [vmem:[%s831_s29 + $0x30] sm:$0xf] }
  0x13   : > { %v222_v7 = vld [vmem:[%s831_s29 + $0x38] sm:$0xf]  ;;  %219 = vst [vmem:[%s186_s30 + $0x14] sm:$0xf] %v218_v5  ;;  %221 = vst [vmem:[%s186_s30 + $0x18] sm:$0xf] %v220_v6 }
  0x14   : > { %223 = vst [vmem:[%s186_s30 + $0x1c] sm:$0xf] %v222_v7  ;;  %v224_v8 = vld [vmem:[%s831_s29 + $0x40] sm:$0xf]  ;;  %v226_v9 = vld [vmem:[%s831_s29 + $0x48] sm:$0xf] }
  0x15   : > { %v228_v10 = vld [vmem:[%s831_s29 + $0x50] sm:$0xf]  ;;  %225 = vst [vmem:[%s186_s30 + $0x20] sm:$0xf] %v224_v8  ;;  %227 = vst [vmem:[%s186_s30 + $0x24] sm:$0xf] %v226_v9 }
  0x16   : > { %229 = vst [vmem:[%s186_s30 + $0x28] sm:$0xf] %v228_v10  ;;  %v230_v11 = vld [vmem:[%s831_s29 + $0x58] sm:$0xf]  ;;  %v232_v12 = vld [vmem:[%s831_s29 + $0x60] sm:$0xf] }
  0x17   : > { %v234_v13 = vld [vmem:[%s831_s29 + $0x68] sm:$0xf]  ;;  %231 = vst [vmem:[%s186_s30 + $0x2c] sm:$0xf] %v230_v11  ;;  %233 = vst [vmem:[%s186_s30 + $0x30] sm:$0xf] %v232_v12 }
  0x18   : > { %235 = vst [vmem:[%s186_s30 + $0x34] sm:$0xf] %v234_v13  ;;  %v236_v14 = vld [vmem:[%s831_s29 + $0x70] sm:$0xf]  ;;  %v238_v15 = vld [vmem:[%s831_s29 + $0x78] sm:$0xf] }
  0x19   : > { %237 = vst [vmem:[%s186_s30 + $0x38] sm:$0xf] %v236_v14  ;;  %239 = vst [vmem:[%s186_s30 + $0x3c] sm:$0xf] %v238_v15 }
  0x1a PF: > { %p626_p6 = scmp.ge.s32.totalorder %s759_s19, 1  ;;  %p306_p7 = scmp.lt.s32.totalorder %s759_s19, 3 }
  0x1c   : > { %p307_p8 = pnand %p626_p6, %p306_p7 }
  0x1d   : > { %s313_s5 = sand.u32 (!%p307_p8), 1, %s743_s15   ;;  %p352_p9 = scmp.lt.s32.totalorder (!%p307_p8), %s751_s17, 1 }
  0x1e   : > { %310 = sbr.rel (%p307_p8) target bundleno = 304 (0x130), region = 73  ;;  %s627_s6 = sshll.u32 (!%p307_p8), %s313_s5, 6 }
  0x1f   : > { %s315_s7 = scalar_lea.vmem (!%p307_p8), [#allocation3], %s627_s6 }
  0x23   : > { %v761_v16 = vmov 0.0   ;;  %vm762_vm0 = vmmov 0   ;;  %v711_v17 = vld [vmem:[%s315_s7 + $0x38] sm:$0xff]   ;;  %v712_v18 = vld [vmem:[%s315_s7 + $0x30] sm:$0xff]   ;;  %v713_v19 = vld [vmem:[%s315_s7 + $0x28] sm:$0xff]   ;;  %s893_s17 = smov (!%p352_p9, %s751_s17), 1  ;;  %v502_v48 = vlaneseq }
  0x24   : > { %649 = vmatprep.subr.bf16.mxu0 %v761_v16  ;;  %665 = vmatprep.mubr.msk.bf16.mxu0 %vm762_vm0, %v761_v16  ;;  %v714_v20 = vld [vmem:[%s315_s7 + $0x20] sm:$0xff]   ;;  %v715_v21 = vld [vmem:[%s315_s7 + $0x18] sm:$0xff]   ;;  %v716_v22 = vld [vmem:[%s315_s7 + $0x10] sm:$0xff]   ;;  %s354_s12 = scalar_lea.vmem %s883_s2, %s893_s17  ;;  %s357_s15 = scalar_lea.vmem %s884_s3, %s893_s17 }
  0x25   : > { %650 = vmatpush3.bf16.msra.mxu0 %v711_v17  ;;  %v717_v23 = vld [vmem:[%s315_s7 + $0x8] sm:$0xff]   ;;  %v718_v24 = vld [vmem:[%s315_s7] sm:$0xff]   ;;  %v503_v49 = vshrl.u32 %v502_v48, 7  ;;  %s628_s21 = sshll.u32 %s893_s17, 3 }
  0x26   : > { %651 = vmatprep.subr.bf16.mxu0 %v761_v16  ;;  %v369_v25 = vld [vmem:[%s881_s0] sm:$0xf]  ;;  %s361_s25 = scalar_lea.vmem %s885_s4, %s628_s21 }
  0x27   : > { %v499_v50 = vld [vmem:[%s354_s12] sm:$0x1]  ;;  %v504_v51 = vsub.s32 0, %v503_v49 }
  0x28   : > { %v637_v56 = vld [vmem:[%s357_s15] ss:$0 sm:$0xff] }
  0x29   : > { %652 = vmatpush3.bf16.msra.mxu0 %v712_v18 }
  0x2a   : > { %653 = vmatprep.subr.bf16.mxu0 %v761_v16 }
  0x2d   : > { %654 = vmatpush3.bf16.msra.mxu0 %v713_v19 }
  0x2e   : > { %655 = vmatprep.subr.bf16.mxu0 %v761_v16 }
  0x31   : > { %656 = vmatpush3.bf16.msra.mxu0 %v714_v20 }
  0x32   : > { %657 = vmatprep.subr.bf16.mxu0 %v761_v16 }
  0x35   : > { %658 = vmatpush3.bf16.msra.mxu0 %v715_v21 }
  0x36   : > { %659 = vmatprep.subr.bf16.mxu0 %v761_v16 }
  0x39   : > { %660 = vmatpush3.bf16.msra.mxu0 %v716_v22 }
  0x3a   : > { %661 = vmatprep.subr.bf16.mxu0 %v761_v16 }
  0x3d   : > { %662 = vmatpush3.bf16.msra.mxu0 %v717_v23 }
  0x3e   : > { %663 = vmatprep.subr.bf16.mxu0 %v761_v16 }
  0x41   : > { %664 = vmatpush3.bf16.msra.mxu0 %v718_v24 }
  0x44   : > { %666 = vmatmul.mubr.bf16.vlgmr.msra.gmra.mxu0 %v369_v25 }
 0x104   : > { %v468_v26 = vpop.f32.mrf.mxu0 }
 0x105   : > { %v480_v27 = vrot.slane %v468_v26, 4  ;;  %v486_v28 = vmul.f32 %v468_v26, %v468_v26 }
 0x106   : > { %v667_v29 = vpop.f32.mrf.mxu0 }
 0x107   : > { %v481_v30 = vadd.f32 %v480_v27, %v468_v26  ;;  %v487_v31 = vrot.slane %v486_v28, 4 }
 0x108   : > { %v471_v32 = vpop.f32.mrf.mxu0 }
 0x109   : > { %v482_v33 = vrot.slane %v481_v30, 2  ;;  %v488_v34 = vadd.f32 %v487_v31, %v486_v28 }
 0x10a   : > { %v668_v35 = vpop.f32.mrf.mxu0 }
 0x10b   : > { %v483_v36 = vadd.f32 %v482_v33, %v481_v30  ;;  %v489_v37 = vrot.slane %v488_v34, 2 }
 0x10d   : > { %v484_v38 = vrot.slane %v483_v36, 1  ;;  %v490_v39 = vadd.f32 %v489_v37, %v488_v34 }
 0x10f   : > { %v485_v40 = vadd.f32 %v484_v38, %v483_v36  ;;  %v491_v41 = vrot.slane %v490_v39, 1 }
 0x111   : > { %v492_v42 = vadd.f32 %v491_v41, %v490_v39  ;;  %v493_v43 = vmul.f32 0.125, %v485_v40 }
 0x113   : > { %v494_v44 = vmul.f32 0.125, %v492_v42  ;;  %v495_v45 = vmul.f32 %v493_v43, %v493_v43  ;;  %v501_v54 = vsub.f32 %v468_v26, %v493_v43 }
 0x115   : > { %v496_v46 = vsub.f32 %v494_v44, %v495_v45 }
 0x117   : > { %v497_v47 = vadd.f32 1e-05, %v496_v46 }
 0x119   : > { %719 = vrsqrt.f32 %v497_v47 }
 0x126   : > { %v720_v52 = vpop.eup %719 }
 0x127   : > { %v500_v53 = vmul.f32 %v720_v52, %v499_v50 }
 0x129   : > { %v505_v55 = vrot.slane %v500_v53, %v504_v51 }
 0x12b   : > { %v506_v57 = vmul.f32 %v505_v55, %v501_v54 }
 0x12d   : > { %v514_v58 = vadd.f32 %v637_v56, %v506_v57 }
 0x12f   : > { %515 = vst [vmem:[%s361_s25] sm:$0xff] %v514_v58 }
 0x130 PF: > { %s14_s19 = sadd.s32 1, %s759_s19   ;;  %s886_s15 = smov %s747_s16 }
 0x131   : > { %p11_p10 = scmp.ge.s32.totalorder %s14_s19, 4   ;;  %s887_s16 = smov %s823_s23 }
 0x132   : > { %s888_s17 = smov %s755_s18  ;;  %s889_s18 = smov %s891_s20 }
 0x133   :  { %13 = sbr.rel (!%p11_p10) target bundleno = 3 (0x3), region = 129 }

// kernel: _lambda_.22
= control target key start
LH: loop header
LB: loop body
LE: loop exit
PB: predicated region body
PF: predicated region fallthrough
CT: control target
= control target key end

     0   :  { %s1519_s0 = inlined_call_operand.vmem [shape: bf16[8,2304], index: 0, kind: input, shape index: {}]   ;;  %s1520_s1 = inlined_call_operand.vmem [shape: bf16[2304,256], index: 1, kind: input, shape index: {}]   ;;  %s1521_s2 = inlined_call_operand.vmem [shape: f32[1,256], index: 2, kind: input, shape index: {}]   ;;  %s1522_s3 = inlined_call_operand.vmem [shape: f32[1,256], index: 3, kind: input, shape index: {}]   ;;  %s1523_s4 = inlined_call_operand.vmem [shape: f32[8,256], index: 4, kind: input, shape index: {}]   ;;  %s1524_s5 = inlined_call_operand.vmem [shape: f32[8,256], index: 5, kind: output, shape index: {}]  }
   0x1   :  { %1525 = sst [smem:[#allocation4_spill]] %s1520_s1 }
   0x2   :  { %s1264_s18 = smov 0   ;;  %s1266_s19 = smov 0  }
   0x3   :  { %s1268_s20 = smov 0   ;;  %s1270_s21 = smov 0  }
   0x4   :  { %s1272_s22 = smov 0   ;;  %s1274_s23 = smov 0  }
   0x5   :  { %s1276_s24 = smov 0  }
   0x6 LB: > { %s24_s25 = sadd.s32 1, %s1221_s22  ;;  %s27_s26 = sadd.s32 1, %s1225_s23  ;;  %s1229_s24 = sphi %s1276_s24, %s15_s24   ;;  %s1225_s23 = sphi %s1274_s23, %s1532_s23   ;;  %s1221_s22 = sphi %s1272_s22, %s1531_s22   ;;  %s1217_s21 = sphi %s1270_s21, %s1530_s21   ;;  %s1213_s20 = sphi %s1268_s20, %s1529_s20   ;;  %s1209_s19 = sphi %s1266_s19, %s1528_s19   ;;  %s1205_s18 = sphi %s1264_s18, %s1527_s18  }
   0x7   : > { %p25_p0 = scmp.ge.s32.totalorder %s24_s25, 6  ;;  %p69_p1 = scmp.ne.s32.totalorder %s1209_s19, %s1205_s18 }
   0x8   : > { %p70_p2 = scmp.eq.s32.totalorder %s1229_s24, 0  ;;  %s62_s30 = sadd.s32 1, %s1209_s19 }
   0x9   : > { %s1534_s25 = smov (%p25_p0, %s24_s25), 0  ;;  %s1536_s26 = smov (!%p25_p0, %s27_s26), %s1225_s23 }
   0xa   : > { %p71_p3 = por %p70_p2, %p69_p1  ;;  %p29_p4 = scmp.ge.s32.totalorder %s1536_s26, 2 }
   0xb   : > { %s57_s27 = ssub.s32 %s1221_s22, %s1534_s25  ;;  %p994_p6 = scmp.ge.s32.totalorder %s1229_s24, 12 }
   0xc   : > { %s1538_s26 = smov (%p29_p4, %s1536_s26), 0 }
   0xd   : > { %s58_s28 = ssub.s32 %s1225_s23, %s1538_s26  ;;  %199 = sbr.rel (%p994_p6) target bundleno = 59 (0x3b), region = 16 }
   0xe   : > { %s59_s29 = sor.u32 %s58_s28, %s57_s27 }
   0xf   : > { %p60_p5 = scmp.eq.s32.totalorder %s59_s29, 0 }
  0x11   : > { %s1315_s6 = scalar_select %p60_p5, %s1209_s19, %s62_s30  }
  0x12   : > { %211 = sbr.rel (!%p71_p3) target bundleno = 59 (0x3b), region = 24  ;;  %s213_s7 = sand.u32 (%p71_p3), 1, %s1209_s19  }
  0x13   : > { %s1033_s8 = smul.u32 (%p71_p3), 96, %s1221_s22  ;;  %s1526_s1 = sld [smem:[#allocation4_spill]] (%p71_p3) }
  0x14   : > { %s1085_s9 = smul.u32 (%p71_p3), 192, %s213_s7 }
  0x15   : > { %s218_s10 = sadd.s32 (%p71_p3), %s1225_s23, %s1033_s8 }
  0x16   : > { %s996_s11 = sshll.u32 (%p71_p3), %s218_s10, 2  ;;  %s1329_s15 = scalar_lea.vmem (%p71_p3), [#allocation3], %s1085_s9 }
  0x19   : > { %s1324_s14 = scalar_lea.vmem %s1526_s1, %s996_s11 }
  0x1a   : > { %v237_v0 = vld [vmem:[%s1324_s14] sm:$0xf]  ;;  %v239_v1 = vld [vmem:[%s1324_s14 + $0x8] sm:$0xf]  ;;  %v241_v2 = vld [vmem:[%s1324_s14 + $0x10] sm:$0xf] }
  0x1b   : > { %238 = vst [vmem:[%s1329_s15] sm:$0xf] %v237_v0  ;;  %240 = vst [vmem:[%s1329_s15 + $0x4] sm:$0xf] %v239_v1  ;;  %v243_v3 = vld [vmem:[%s1324_s14 + $0x18] sm:$0xf] }
  0x1c   : > { %242 = vst [vmem:[%s1329_s15 + $0x8] sm:$0xf] %v241_v2  ;;  %v245_v4 = vld [vmem:[%s1324_s14 + $0x20] sm:$0xf]  ;;  %v247_v5 = vld [vmem:[%s1324_s14 + $0x28] sm:$0xf] }
  0x1d   : > { %244 = vst [vmem:[%s1329_s15 + $0xc] sm:$0xf] %v243_v3  ;;  %246 = vst [vmem:[%s1329_s15 + $0x10] sm:$0xf] %v245_v4  ;;  %v249_v6 = vld [vmem:[%s1324_s14 + $0x30] sm:$0xf] }
  0x1e   : > { %248 = vst [vmem:[%s1329_s15 + $0x14] sm:$0xf] %v247_v5  ;;  %v251_v7 = vld [vmem:[%s1324_s14 + $0x38] sm:$0xf]  ;;  %v253_v8 = vld [vmem:[%s1324_s14 + $0x40] sm:$0xf] }
  0x1f   : > { %250 = vst [vmem:[%s1329_s15 + $0x18] sm:$0xf] %v249_v6  ;;  %252 = vst [vmem:[%s1329_s15 + $0x1c] sm:$0xf] %v251_v7  ;;  %v255_v9 = vld [vmem:[%s1324_s14 + $0x48] sm:$0xf] }
  0x20   : > { %254 = vst [vmem:[%s1329_s15 + $0x20] sm:$0xf] %v253_v8  ;;  %v257_v10 = vld [vmem:[%s1324_s14 + $0x50] sm:$0xf]  ;;  %v259_v11 = vld [vmem:[%s1324_s14 + $0x58] sm:$0xf] }
  0x21   : > { %256 = vst [vmem:[%s1329_s15 + $0x24] sm:$0xf] %v255_v9  ;;  %258 = vst [vmem:[%s1329_s15 + $0x28] sm:$0xf] %v257_v10  ;;  %v261_v12 = vld [vmem:[%s1324_s14 + $0x60] sm:$0xf] }
  0x22   : > { %260 = vst [vmem:[%s1329_s15 + $0x2c] sm:$0xf] %v259_v11  ;;  %v263_v13 = vld [vmem:[%s1324_s14 + $0x68] sm:$0xf]  ;;  %v265_v14 = vld [vmem:[%s1324_s14 + $0x70] sm:$0xf] }
  0x23   : > { %262 = vst [vmem:[%s1329_s15 + $0x30] sm:$0xf] %v261_v12  ;;  %264 = vst [vmem:[%s1329_s15 + $0x34] sm:$0xf] %v263_v13  ;;  %v267_v15 = vld [vmem:[%s1324_s14 + $0x78] sm:$0xf] }
  0x24   : > { %266 = vst [vmem:[%s1329_s15 + $0x38] sm:$0xf] %v265_v14  ;;  %v269_v16 = vld [vmem:[%s1324_s14 + $0x80] sm:$0xf]  ;;  %v271_v17 = vld [vmem:[%s1324_s14 + $0x88] sm:$0xf] }
  0x25   : > { %268 = vst [vmem:[%s1329_s15 + $0x3c] sm:$0xf] %v267_v15  ;;  %270 = vst [vmem:[%s1329_s15 + $0x40] sm:$0xf] %v269_v16  ;;  %v273_v18 = vld [vmem:[%s1324_s14 + $0x90] sm:$0xf] }
  0x26   : > { %272 = vst [vmem:[%s1329_s15 + $0x44] sm:$0xf] %v271_v17  ;;  %v275_v19 = vld [vmem:[%s1324_s14 + $0x98] sm:$0xf]  ;;  %v277_v20 = vld [vmem:[%s1324_s14 + $0xa0] sm:$0xf] }
  0x27   : > { %274 = vst [vmem:[%s1329_s15 + $0x48] sm:$0xf] %v273_v18  ;;  %276 = vst [vmem:[%s1329_s15 + $0x4c] sm:$0xf] %v275_v19  ;;  %v279_v21 = vld [vmem:[%s1324_s14 + $0xa8] sm:$0xf] }
  0x28   : > { %278 = vst [vmem:[%s1329_s15 + $0x50] sm:$0xf] %v277_v20  ;;  %v281_v22 = vld [vmem:[%s1324_s14 + $0xb0] sm:$0xf]  ;;  %v283_v23 = vld [vmem:[%s1324_s14 + $0xb8] sm:$0xf] }
  0x29   : > { %280 = vst [vmem:[%s1329_s15 + $0x54] sm:$0xf] %v279_v21  ;;  %282 = vst [vmem:[%s1329_s15 + $0x58] sm:$0xf] %v281_v22  ;;  %v285_v24 = vld [vmem:[%s1324_s14 + $0xc0] sm:$0xf] }
  0x2a   : > { %284 = vst [vmem:[%s1329_s15 + $0x5c] sm:$0xf] %v283_v23  ;;  %v287_v25 = vld [vmem:[%s1324_s14 + $0xc8] sm:$0xf]  ;;  %v289_v26 = vld [vmem:[%s1324_s14 + $0xd0] sm:$0xf] }
  0x2b   : > { %286 = vst [vmem:[%s1329_s15 + $0x60] sm:$0xf] %v285_v24  ;;  %288 = vst [vmem:[%s1329_s15 + $0x64] sm:$0xf] %v287_v25  ;;  %v291_v27 = vld [vmem:[%s1324_s14 + $0xd8] sm:$0xf] }
  0x2c   : > { %290 = vst [vmem:[%s1329_s15 + $0x68] sm:$0xf] %v289_v26  ;;  %v293_v28 = vld [vmem:[%s1324_s14 + $0xe0] sm:$0xf]  ;;  %v295_v29 = vld [vmem:[%s1324_s14 + $0xe8] sm:$0xf] }
  0x2d   : > { %292 = vst [vmem:[%s1329_s15 + $0x6c] sm:$0xf] %v291_v27  ;;  %294 = vst [vmem:[%s1329_s15 + $0x70] sm:$0xf] %v293_v28  ;;  %v297_v30 = vld [vmem:[%s1324_s14 + $0xf0] sm:$0xf] }
  0x2e   : > { %296 = vst [vmem:[%s1329_s15 + $0x74] sm:$0xf] %v295_v29  ;;  %v299_v31 = vld [vmem:[%s1324_s14 + $0xf8] sm:$0xf]  ;;  %v301_v32 = vld [vmem:[%s1324_s14 + $0x100] sm:$0xf] }
  0x2f   : > { %298 = vst [vmem:[%s1329_s15 + $0x78] sm:$0xf] %v297_v30  ;;  %300 = vst [vmem:[%s1329_s15 + $0x7c] sm:$0xf] %v299_v31  ;;  %v303_v33 = vld [vmem:[%s1324_s14 + $0x108] sm:$0xf] }
  0x30   : > { %302 = vst [vmem:[%s1329_s15 + $0x80] sm:$0xf] %v301_v32  ;;  %v305_v34 = vld [vmem:[%s1324_s14 + $0x110] sm:$0xf]  ;;  %v307_v35 = vld [vmem:[%s1324_s14 + $0x118] sm:$0xf] }
  0x31   : > { %304 = vst [vmem:[%s1329_s15 + $0x84] sm:$0xf] %v303_v33  ;;  %306 = vst [vmem:[%s1329_s15 + $0x88] sm:$0xf] %v305_v34  ;;  %v309_v36 = vld [vmem:[%s1324_s14 + $0x120] sm:$0xf] }
  0x32   : > { %308 = vst [vmem:[%s1329_s15 + $0x8c] sm:$0xf] %v307_v35  ;;  %v311_v37 = vld [vmem:[%s1324_s14 + $0x128] sm:$0xf]  ;;  %v313_v38 = vld [vmem:[%s1324_s14 + $0x130] sm:$0xf] }
  0x33   : > { %310 = vst [vmem:[%s1329_s15 + $0x90] sm:$0xf] %v309_v36  ;;  %312 = vst [vmem:[%s1329_s15 + $0x94] sm:$0xf] %v311_v37  ;;  %v315_v39 = vld [vmem:[%s1324_s14 + $0x138] sm:$0xf] }
  0x34   : > { %314 = vst [vmem:[%s1329_s15 + $0x98] sm:$0xf] %v313_v38  ;;  %v317_v40 = vld [vmem:[%s1324_s14 + $0x140] sm:$0xf]  ;;  %v319_v41 = vld [vmem:[%s1324_s14 + $0x148] sm:$0xf] }
  0x35   : > { %316 = vst [vmem:[%s1329_s15 + $0x9c] sm:$0xf] %v315_v39  ;;  %318 = vst [vmem:[%s1329_s15 + $0xa0] sm:$0xf] %v317_v40  ;;  %v321_v42 = vld [vmem:[%s1324_s14 + $0x150] sm:$0xf] }
  0x36   : > { %320 = vst [vmem:[%s1329_s15 + $0xa4] sm:$0xf] %v319_v41  ;;  %v323_v43 = vld [vmem:[%s1324_s14 + $0x158] sm:$0xf]  ;;  %v325_v44 = vld [vmem:[%s1324_s14 + $0x160] sm:$0xf] }
  0x37   : > { %322 = vst [vmem:[%s1329_s15 + $0xa8] sm:$0xf] %v321_v42  ;;  %324 = vst [vmem:[%s1329_s15 + $0xac] sm:$0xf] %v323_v43  ;;  %v327_v45 = vld [vmem:[%s1324_s14 + $0x168] sm:$0xf] }
  0x38   : > { %326 = vst [vmem:[%s1329_s15 + $0xb0] sm:$0xf] %v325_v44  ;;  %v329_v46 = vld [vmem:[%s1324_s14 + $0x170] sm:$0xf]  ;;  %v331_v47 = vld [vmem:[%s1324_s14 + $0x178] sm:$0xf] }
  0x39   : > { %328 = vst [vmem:[%s1329_s15 + $0xb4] sm:$0xf] %v327_v45  ;;  %330 = vst [vmem:[%s1329_s15 + $0xb8] sm:$0xf] %v329_v46 }
  0x3a   : > { %332 = vst [vmem:[%s1329_s15 + $0xbc] sm:$0xf] %v331_v47 }
  0x3b PF: > { %p997_p7 = scmp.ge.s32.totalorder %s1229_s24, 1  ;;  %p470_p8 = scmp.lt.s32.totalorder %s1229_s24, 13 }
  0x3d   : > { %p471_p9 = pnand %p997_p7, %p470_p8 }
  0x3e   : > { %s477_s16 = sand.u32 (!%p471_p9), 1, %s1205_s18   ;;  %s518_s17 = smul.u32 (!%p471_p9), 3, %s1213_s20 }
  0x3f   : > { %474 = sbr.rel (%p471_p9) target bundleno = 370 (0x172), region = 77  ;;  %p525_p10 = scmp.lt.s32.totalorder (!%p471_p9), %s1217_s21, 1 }
  0x40   : > { %s1086_s27 = smul.u32 (!%p471_p9), 192, %s477_s16  ;;  %p519_p11 = scmp.lt.s32.totalorder (!%p471_p9), %s518_s17, 17 }
  0x41   : > { %p1001_p12 = scmp.ne.s32.totalorder (!%p471_p9), %s1213_s20, 0 }
  0x44   : > { %s1540_s17 = smov (!%p519_p11, %s518_s17), 17  ;;  %s1542_s21 = smov (!%p525_p10, %s1217_s21), 1 }
  0x45   : > { %s998_s28 = sshll.u32 %s1540_s17, 2  ;;  %s527_s18 = scalar_lea.vmem %s1521_s2, %s1542_s21 }
  0x46   : > { %s1435_s7 = scalar_lea.vmem %s1519_s0, %s998_s28  ;;  %s530_s12 = scalar_lea.vmem %s1522_s3, %s1542_s21 }
  0x47   : > { %s999_s13 = sshll.u32 %s1542_s21, 3  ;;  %s1456_s28 = scalar_lea.vmem [#allocation3], %s1086_s27 }
  0x48   : > { %s1449_s16 = scalar_lea.vmem %s1523_s4, %s999_s13  ;;  %s1454_s29 = scalar_lea.vmem %s1524_s5, %s999_s13 }
  0x49   : > { %543 = sbr.rel (%p1001_p12) target bundleno = 80 (0x50), region = 85 }
  0x4e   : > { %v1231_v48 = vmov 0.0  }
  0x4f   : > { %544 = vst [vmem:[#allocation2] sm:$0xff] %v1231_v48 }
  0x50 PF: > { %v1146_v49 = vld [vmem:[%s1456_s28 + $0x78] sm:$0xff]   ;;  %v1232_v50 = vmov 0.0   ;;  %vm1233_vm0 = vmmov 0   ;;  %v1149_v53 = vld [vmem:[%s1456_s28 + $0x70] sm:$0xff]   ;;  %v1152_v56 = vld [vmem:[%s1456_s28 + $0x68] sm:$0xff]   ;;  %p1029_p13 = scmp.ne.s32.totalorder %s1213_s20, 5 }
  0x51   : > { %1065 = vmatprep.subr.bf16.mxu1 %v1232_v50  ;;  %v1147_v51 = vld [vmem:[%s1456_s28 + $0xb8] sm:$0xff]   ;;  %1034 = vmatprep.subr.bf16.mxu0 %v1146_v49  ;;  %v1150_v54 = vld [vmem:[%s1456_s28 + $0xb0] sm:$0xff]   ;;  %v1153_v57 = vld [vmem:[%s1456_s28 + $0xa8] sm:$0xff]  }
  0x52   : > { %v1148_v52 = vld [vmem:[%s1456_s28 + $0x38] sm:$0xff]   ;;  %1081 = vmatprep.mubr.msk.bf16.mxu1 %vm1233_vm0, %v1232_v50  ;;  %1066 = vmatpush3.bf16.msra.mxu1 %v1147_v51  ;;  %v1151_v55 = vld [vmem:[%s1456_s28 + $0x30] sm:$0xff]   ;;  %v1154_v58 = vld [vmem:[%s1456_s28 + $0x28] sm:$0xff]  }
  0x53   : > { %1035 = vmatpush3.bf16.msra.mxu0 %v1148_v52  ;;  %1067 = vmatprep.subr.bf16.mxu1 %v1232_v50  ;;  %v1155_v59 = vld [vmem:[%s1456_s28 + $0x60] sm:$0xff]   ;;  %v1158_v62 = vld [vmem:[%s1456_s28 + $0x58] sm:$0xff]   ;;  %v1161_v1 = vld [vmem:[%s1456_s28 + $0x50] sm:$0xff]  }
  0x54   : > { %1036 = vmatprep.subr.bf16.mxu0 %v1149_v53  ;;  %v1156_v60 = vld [vmem:[%s1456_s28 + $0xa0] sm:$0xff]   ;;  %v1159_v63 = vld [vmem:[%s1456_s28 + $0x98] sm:$0xff]   ;;  %v1162_v2 = vld [vmem:[%s1456_s28 + $0x90] sm:$0xff]  }
  0x55   : > { %v1157_v61 = vld [vmem:[%s1456_s28 + $0x20] sm:$0xff]   ;;  %v1160_v0 = vld [vmem:[%s1456_s28 + $0x18] sm:$0xff]   ;;  %v1163_v3 = vld [vmem:[%s1456_s28 + $0x10] sm:$0xff]  }
  0x56   : > { %1068 = vmatpush3.bf16.msra.mxu1 %v1150_v54  ;;  %v1164_v4 = vld [vmem:[%s1456_s28 + $0x48] sm:$0xff]   ;;  %v546_v7 = vld [vmem:[%s1435_s7] sm:$0xff]  ;;  %v1167_v8 = vld [vmem:[%s1456_s28 + $0x40] sm:$0xff]  }
  0x57   : > { %1037 = vmatpush3.bf16.msra.mxu0 %v1151_v55  ;;  %1069 = vmatprep.subr.bf16.mxu1 %v1232_v50  ;;  %v1165_v5 = vld [vmem:[%s1456_s28 + $0x88] sm:$0xff]   ;;  %v1003_v9 = vcombine.high %v546_v7, %v546_v7  ;;  %v1168_v10 = vld [vmem:[%s1456_s28 + $0x80] sm:$0xff]   ;;  %v1002_v13 = vcombine.low %v546_v7, %v546_v7  ;;  %v545_v20 = vld [vmem:[#allocation2] sm:$0xff] }
  0x58   : > { %1038 = vmatprep.subr.bf16.mxu0 %v1152_v56  ;;  %v1166_v6 = vld [vmem:[%s1456_s28 + $0x8] sm:$0xff]   ;;  %v1169_v11 = vld [vmem:[%s1456_s28] sm:$0xff]  }
  0x59   : > { %783 = vmatprep.mubr.bf16.mxu0 %v1003_v9  ;;  %v1172_v12 = vld [vmem:[%s1435_s7 + $0x8] ss:$0 sps:$4 sm:$0xff]  }
  0x5a   : > { %1070 = vmatpush3.bf16.msra.mxu1 %v1153_v57 }
  0x5b   : > { %1039 = vmatpush3.bf16.msra.mxu0 %v1154_v58  ;;  %1071 = vmatprep.subr.bf16.mxu1 %v1232_v50 }
  0x5c   : > { %1040 = vmatprep.subr.bf16.mxu0 %v1155_v59 }
  0x5e   : > { %1072 = vmatpush3.bf16.msra.mxu1 %v1156_v60 }
  0x5f   : > { %1041 = vmatpush3.bf16.msra.mxu0 %v1157_v61  ;;  %1073 = vmatprep.subr.bf16.mxu1 %v1232_v50 }
  0x60   : > { %1042 = vmatprep.subr.bf16.mxu0 %v1158_v62 }
  0x62   : > { %1074 = vmatpush3.bf16.msra.mxu1 %v1159_v63 }
  0x63   : > { %1043 = vmatpush3.bf16.msra.mxu0 %v1160_v0  ;;  %1075 = vmatprep.subr.bf16.mxu1 %v1232_v50 }
  0x64   : > { %1044 = vmatprep.subr.bf16.mxu0 %v1161_v1 }
  0x66   : > { %1076 = vmatpush3.bf16.msra.mxu1 %v1162_v2 }
  0x67   : > { %1045 = vmatpush3.bf16.msra.mxu0 %v1163_v3  ;;  %1077 = vmatprep.subr.bf16.mxu1 %v1232_v50 }
  0x68   : > { %1046 = vmatprep.subr.bf16.mxu0 %v1164_v4 }
  0x6a   : > { %1078 = vmatpush3.bf16.msra.mxu1 %v1165_v5 }
  0x6b   : > { %1047 = vmatpush3.bf16.msra.mxu0 %v1166_v6  ;;  %1079 = vmatprep.subr.bf16.mxu1 %v1232_v50 }
  0x6c   : > { %1048 = vmatprep.subr.bf16.mxu0 %v1167_v8 }
  0x6e   : > { %1080 = vmatpush3.bf16.msra.mxu1 %v1168_v10 }
  0x6f   : > { %1049 = vmatpush3.bf16.msra.mxu0 %v1169_v11 }
  0x71   : > { %1082 = vmatmul.mubr.bf16.vlgmr.msra.gmra.mxu1 %v1172_v12 }
  0x72   : > { %784 = vmatmul.mubr.bf16.vlgmr.msra.gmra.mxu0 %v1002_v13 }
 0x131   : > { %v825_v14 = vpop.f32.mrf.mxu1 }
 0x132   : > { %v1050_v15 = vpop.f32.mrf.mxu0 }
 0x133   : > { %v1083_v16 = vpop.f32.mrf.mxu1 }
 0x134   : > { %v1051_v17 = vpop.f32.mrf.mxu0 }
 0x135   : > { %v1052_v18 = vadd.f32 %v1051_v17, %v1050_v15  ;;  %v828_v19 = vpop.f32.mrf.mxu1 }
 0x136   : > { %v1053_v21 = vpop.f32.mrf.mxu0 }
 0x137   : > { %v826_v22 = vadd.f32 %v1052_v18, %v825_v14  ;;  %v1084_v23 = vpop.f32.mrf.mxu1  ;;  %836 = sbr.rel (%p1029_p13) target bundleno = 370 (0x172), region = 89 }
 0x138   : > { %v1054_v24 = vpop.f32.mrf.mxu0 }
 0x139   : > { %v831_v25 = vadd.f32 %v826_v22, %v545_v20 }
 0x13b   : > { %832 = vst [vmem:[#allocation2] sm:$0xff] %v831_v25 }
 0x13c   : > { %v860_v45 = vlaneseq  ;;  %v857_v47 = vld [vmem:[%s527_s18] sm:$0x1] }
 0x13d   : > { %v1030_v53 = vld [vmem:[%s530_s12] ss:$0 sm:$0xff] }
 0x13e   : > { %v861_v46 = vshrl.u32 %v860_v45, 7  ;;  %v873_v55 = vld [vmem:[%s1449_s16] sm:$0xff] }
 0x140   : > { %v862_v48 = vsub.s32 0, %v861_v46 }
 0x142   : > { %v837_v26 = vld [vmem:[#allocation2] sm:$0xff] }
 0x143   : > { %v838_v27 = vrot.slane %v837_v26, 4  ;;  %v844_v28 = vmul.f32 %v837_v26, %v837_v26 }
 0x145   : > { %v839_v29 = vadd.f32 %v838_v27, %v837_v26  ;;  %v845_v30 = vrot.slane %v844_v28, 4 }
 0x147   : > { %v840_v31 = vrot.slane %v839_v29, 2  ;;  %v846_v32 = vadd.f32 %v845_v30, %v844_v28 }
 0x149   : > { %v841_v33 = vadd.f32 %v840_v31, %v839_v29  ;;  %v847_v34 = vrot.slane %v846_v32, 2 }
 0x14b   : > { %v842_v35 = vrot.slane %v841_v33, 1  ;;  %v848_v36 = vadd.f32 %v847_v34, %v846_v32 }
 0x14d   : > { %v843_v37 = vadd.f32 %v842_v35, %v841_v33  ;;  %v849_v38 = vrot.slane %v848_v36, 1 }
 0x14f   : > { %v850_v39 = vadd.f32 %v849_v38, %v848_v36  ;;  %v851_v40 = vmul.f32 0.125, %v843_v37 }
 0x151   : > { %v852_v41 = vmul.f32 0.125, %v850_v39  ;;  %v853_v42 = vmul.f32 %v851_v40, %v851_v40  ;;  %v859_v51 = vsub.f32 %v837_v26, %v851_v40 }
 0x153   : > { %v854_v43 = vsub.f32 %v852_v41, %v853_v42 }
 0x155   : > { %v855_v44 = vadd.f32 1e-05, %v854_v43 }
 0x157   : > { %1173 = vrsqrt.f32 %v855_v44 }
 0x164   : > { %v1174_v49 = vpop.eup %1173 }
 0x165   : > { %v858_v50 = vmul.f32 %v1174_v49, %v857_v47 }
 0x167   : > { %v863_v52 = vrot.slane %v858_v50, %v862_v48 }
 0x169   : > { %v864_v54 = vmul.f32 %v863_v52, %v859_v51 }
 0x16b   : > { %v872_v56 = vadd.f32 %v1030_v53, %v864_v54 }
 0x16d   : > { %v874_v57 = vadd.f32 %v873_v55, %v872_v56 }
 0x16f   : > { %v875_v58 = vmax.f32 %v874_v57, 0.0 }
 0x171   : > { %876 = vst [vmem:[%s1454_s29] sm:$0xff] %v875_v58 }
 0x172 PF: > { %s15_s24 = sadd.s32 1, %s1229_s24   ;;  %s1527_s18 = smov %s1209_s19 }
 0x173   : > { %p12_p0 = scmp.ge.s32.totalorder %s15_s24, 14   ;;  %s1528_s19 = smov %s1315_s6 }
 0x174   : > { %s1529_s20 = smov %s1221_s22  ;;  %s1530_s21 = smov %s1225_s23 }
 0x175   : > { %s1531_s22 = smov %s1534_s25  ;;  %s1532_s23 = smov %s1538_s26 }
 0x176   :  { %14 = sbr.rel (!%p12_p0) target bundleno = 6 (0x6), region = 136 }

// kernel: _lambda_.23
= control target key start
LH: loop header
LB: loop body
LE: loop exit
PB: predicated region body
PF: predicated region fallthrough
CT: control target
= control target key end

     0   :  { %s1208_s15 = smov 0   ;;  %s1210_s16 = smov 0   ;;  %s1461_s0 = inlined_call_operand.vmem [shape: bf16[2,2304], index: 0, kind: input, shape index: {}]   ;;  %s1462_s1 = inlined_call_operand.vmem [shape: bf16[2304,512], index: 1, kind: input, shape index: {}]   ;;  %s1463_s2 = inlined_call_operand.vmem [shape: f32[1,512], index: 2, kind: input, shape index: {}]   ;;  %s1464_s3 = inlined_call_operand.vmem [shape: f32[1,512], index: 3, kind: input, shape index: {}]   ;;  %s1465_s4 = inlined_call_operand.vmem [shape: f32[2,512], index: 4, kind: output, shape index: {}]  }
   0x1   :  { %s1212_s17 = smov 0   ;;  %s1214_s18 = smov 0  }
   0x2   :  { %s1216_s19 = smov 0   ;;  %s1218_s20 = smov 0  }
   0x3   :  { %s1220_s21 = smov 0  }
   0x4 LB: > { %s23_s22 = sadd.s32 1, %s1169_s19  ;;  %s26_s23 = sadd.s32 1, %s1173_s20  ;;  %s1177_s21 = sphi %s1220_s21, %s14_s21   ;;  %s1173_s20 = sphi %s1218_s20, %s1471_s20   ;;  %s1169_s19 = sphi %s1216_s19, %s1470_s19   ;;  %s1165_s18 = sphi %s1214_s18, %s1469_s18   ;;  %s1161_s17 = sphi %s1212_s17, %s1468_s17   ;;  %s1157_s16 = sphi %s1210_s16, %s1467_s16   ;;  %s1153_s15 = sphi %s1208_s15, %s1466_s15  }
   0x5   : > { %p24_p0 = scmp.ge.s32.totalorder %s23_s22, 6  ;;  %p68_p1 = scmp.ne.s32.totalorder %s1157_s16, %s1153_s15 }
   0x6   : > { %p69_p2 = scmp.eq.s32.totalorder %s1177_s21, 0  ;;  %s61_s27 = sadd.s32 1, %s1157_s16 }
   0x7   : > { %s1473_s22 = smov (%p24_p0, %s23_s22), 0  ;;  %s1475_s23 = smov (!%p24_p0, %s26_s23), %s1173_s20 }
   0x8   : > { %p70_p3 = por %p69_p2, %p68_p1  ;;  %p28_p4 = scmp.ge.s32.totalorder %s1475_s23, 4 }
   0x9   : > { %s56_s24 = ssub.s32 %s1169_s19, %s1473_s22  ;;  %p948_p6 = scmp.ge.s32.totalorder %s1177_s21, 24 }
   0xa   : > { %s1477_s23 = smov (%p28_p4, %s1475_s23), 0 }
   0xb   : > { %s57_s25 = ssub.s32 %s1173_s20, %s1477_s23  ;;  %172 = sbr.rel (%p948_p6) target bundleno = 55 (0x37), region = 16 }
   0xc   : > { %s58_s26 = sor.u32 %s57_s25, %s56_s24 }
   0xd   : > { %p59_p5 = scmp.eq.s32.totalorder %s58_s26, 0 }
   0xf   : > { %s1259_s28 = scalar_select %p59_p5, %s1157_s16, %s61_s27  }
  0x10   : > { %183 = sbr.rel (!%p70_p3) target bundleno = 55 (0x37), region = 24  ;;  %s185_s29 = sand.u32 (%p70_p3), 1, %s1157_s16  }
  0x11   : > { %s983_s30 = smul.u32 (%p70_p3), 192, %s1169_s19 }
  0x12   : > { %s1035_s5 = smul.u32 (%p70_p3), 192, %s185_s29 }
  0x13   : > { %s190_s6 = sadd.s32 (%p70_p3), %s1173_s20, %s983_s30 }
  0x14   : > { %s950_s7 = sshll.u32 (%p70_p3), %s190_s6, 2  ;;  %s1273_s11 = scalar_lea.vmem (%p70_p3), [#allocation3], %s1035_s5 }
  0x15   : > { %s1268_s10 = scalar_lea.vmem %s1462_s1, %s950_s7 }
  0x16   : > { %v209_v0 = vld [vmem:[%s1268_s10] sm:$0xf]  ;;  %v211_v1 = vld [vmem:[%s1268_s10 + $0x10] sm:$0xf] }
  0x17   : > { %v213_v2 = vld [vmem:[%s1268_s10 + $0x20] sm:$0xf]  ;;  %210 = vst [vmem:[%s1273_s11] sm:$0xf] %v209_v0  ;;  %212 = vst [vmem:[%s1273_s11 + $0x4] sm:$0xf] %v211_v1 }
  0x18   : > { %214 = vst [vmem:[%s1273_s11 + $0x8] sm:$0xf] %v213_v2  ;;  %v215_v3 = vld [vmem:[%s1268_s10 + $0x30] sm:$0xf]  ;;  %v217_v4 = vld [vmem:[%s1268_s10 + $0x40] sm:$0xf] }
  0x19   : > { %v219_v5 = vld [vmem:[%s1268_s10 + $0x50] sm:$0xf]  ;;  %216 = vst [vmem:[%s1273_s11 + $0xc] sm:$0xf] %v215_v3  ;;  %218 = vst [vmem:[%s1273_s11 + $0x10] sm:$0xf] %v217_v4 }
  0x1a   : > { %220 = vst [vmem:[%s1273_s11 + $0x14] sm:$0xf] %v219_v5  ;;  %v221_v6 = vld [vmem:[%s1268_s10 + $0x60] sm:$0xf]  ;;  %v223_v7 = vld [vmem:[%s1268_s10 + $0x70] sm:$0xf] }
  0x1b   : > { %v225_v8 = vld [vmem:[%s1268_s10 + $0x80] sm:$0xf]  ;;  %222 = vst [vmem:[%s1273_s11 + $0x18] sm:$0xf] %v221_v6  ;;  %224 = vst [vmem:[%s1273_s11 + $0x1c] sm:$0xf] %v223_v7 }
  0x1c   : > { %226 = vst [vmem:[%s1273_s11 + $0x20] sm:$0xf] %v225_v8  ;;  %v227_v9 = vld [vmem:[%s1268_s10 + $0x90] sm:$0xf]  ;;  %v229_v10 = vld [vmem:[%s1268_s10 + $0xa0] sm:$0xf] }
  0x1d   : > { %v231_v11 = vld [vmem:[%s1268_s10 + $0xb0] sm:$0xf]  ;;  %228 = vst [vmem:[%s1273_s11 + $0x24] sm:$0xf] %v227_v9  ;;  %230 = vst [vmem:[%s1273_s11 + $0x28] sm:$0xf] %v229_v10 }
  0x1e   : > { %232 = vst [vmem:[%s1273_s11 + $0x2c] sm:$0xf] %v231_v11  ;;  %v233_v12 = vld [vmem:[%s1268_s10 + $0xc0] sm:$0xf]  ;;  %v235_v13 = vld [vmem:[%s1268_s10 + $0xd0] sm:$0xf] }
  0x1f   : > { %v237_v14 = vld [vmem:[%s1268_s10 + $0xe0] sm:$0xf]  ;;  %234 = vst [vmem:[%s1273_s11 + $0x30] sm:$0xf] %v233_v12  ;;  %236 = vst [vmem:[%s1273_s11 + $0x34] sm:$0xf] %v235_v13 }
  0x20   : > { %238 = vst [vmem:[%s1273_s11 + $0x38] sm:$0xf] %v237_v14  ;;  %v239_v15 = vld [vmem:[%s1268_s10 + $0xf0] sm:$0xf]  ;;  %v241_v16 = vld [vmem:[%s1268_s10 + $0x100] sm:$0xf] }
  0x21   : > { %v243_v17 = vld [vmem:[%s1268_s10 + $0x110] sm:$0xf]  ;;  %240 = vst [vmem:[%s1273_s11 + $0x3c] sm:$0xf] %v239_v15  ;;  %242 = vst [vmem:[%s1273_s11 + $0x40] sm:$0xf] %v241_v16 }
  0x22   : > { %244 = vst [vmem:[%s1273_s11 + $0x44] sm:$0xf] %v243_v17  ;;  %v245_v18 = vld [vmem:[%s1268_s10 + $0x120] sm:$0xf]  ;;  %v247_v19 = vld [vmem:[%s1268_s10 + $0x130] sm:$0xf] }
  0x23   : > { %v249_v20 = vld [vmem:[%s1268_s10 + $0x140] sm:$0xf]  ;;  %246 = vst [vmem:[%s1273_s11 + $0x48] sm:$0xf] %v245_v18  ;;  %248 = vst [vmem:[%s1273_s11 + $0x4c] sm:$0xf] %v247_v19 }
  0x24   : > { %250 = vst [vmem:[%s1273_s11 + $0x50] sm:$0xf] %v249_v20  ;;  %v251_v21 = vld [vmem:[%s1268_s10 + $0x150] sm:$0xf]  ;;  %v253_v22 = vld [vmem:[%s1268_s10 + $0x160] sm:$0xf] }
  0x25   : > { %v255_v23 = vld [vmem:[%s1268_s10 + $0x170] sm:$0xf]  ;;  %252 = vst [vmem:[%s1273_s11 + $0x54] sm:$0xf] %v251_v21  ;;  %254 = vst [vmem:[%s1273_s11 + $0x58] sm:$0xf] %v253_v22 }
  0x26   : > { %256 = vst [vmem:[%s1273_s11 + $0x5c] sm:$0xf] %v255_v23  ;;  %v257_v24 = vld [vmem:[%s1268_s10 + $0x180] sm:$0xf]  ;;  %v259_v25 = vld [vmem:[%s1268_s10 + $0x190] sm:$0xf] }
  0x27   : > { %v261_v26 = vld [vmem:[%s1268_s10 + $0x1a0] sm:$0xf]  ;;  %258 = vst [vmem:[%s1273_s11 + $0x60] sm:$0xf] %v257_v24  ;;  %260 = vst [vmem:[%s1273_s11 + $0x64] sm:$0xf] %v259_v25 }
  0x28   : > { %262 = vst [vmem:[%s1273_s11 + $0x68] sm:$0xf] %v261_v26  ;;  %v263_v27 = vld [vmem:[%s1268_s10 + $0x1b0] sm:$0xf]  ;;  %v265_v28 = vld [vmem:[%s1268_s10 + $0x1c0] sm:$0xf] }
  0x29   : > { %v267_v29 = vld [vmem:[%s1268_s10 + $0x1d0] sm:$0xf]  ;;  %264 = vst [vmem:[%s1273_s11 + $0x6c] sm:$0xf] %v263_v27  ;;  %266 = vst [vmem:[%s1273_s11 + $0x70] sm:$0xf] %v265_v28 }
  0x2a   : > { %268 = vst [vmem:[%s1273_s11 + $0x74] sm:$0xf] %v267_v29  ;;  %v269_v30 = vld [vmem:[%s1268_s10 + $0x1e0] sm:$0xf]  ;;  %v271_v31 = vld [vmem:[%s1268_s10 + $0x1f0] sm:$0xf] }
  0x2b   : > { %v273_v32 = vld [vmem:[%s1268_s10 + $0x200] sm:$0xf]  ;;  %270 = vst [vmem:[%s1273_s11 + $0x78] sm:$0xf] %v269_v30  ;;  %272 = vst [vmem:[%s1273_s11 + $0x7c] sm:$0xf] %v271_v31 }
  0x2c   : > { %274 = vst [vmem:[%s1273_s11 + $0x80] sm:$0xf] %v273_v32  ;;  %v275_v33 = vld [vmem:[%s1268_s10 + $0x210] sm:$0xf]  ;;  %v277_v34 = vld [vmem:[%s1268_s10 + $0x220] sm:$0xf] }
  0x2d   : > { %v279_v35 = vld [vmem:[%s1268_s10 + $0x230] sm:$0xf]  ;;  %276 = vst [vmem:[%s1273_s11 + $0x84] sm:$0xf] %v275_v33  ;;  %278 = vst [vmem:[%s1273_s11 + $0x88] sm:$0xf] %v277_v34 }
  0x2e   : > { %280 = vst [vmem:[%s1273_s11 + $0x8c] sm:$0xf] %v279_v35  ;;  %v281_v36 = vld [vmem:[%s1268_s10 + $0x240] sm:$0xf]  ;;  %v283_v37 = vld [vmem:[%s1268_s10 + $0x250] sm:$0xf] }
  0x2f   : > { %v285_v38 = vld [vmem:[%s1268_s10 + $0x260] sm:$0xf]  ;;  %282 = vst [vmem:[%s1273_s11 + $0x90] sm:$0xf] %v281_v36  ;;  %284 = vst [vmem:[%s1273_s11 + $0x94] sm:$0xf] %v283_v37 }
  0x30   : > { %286 = vst [vmem:[%s1273_s11 + $0x98] sm:$0xf] %v285_v38  ;;  %v287_v39 = vld [vmem:[%s1268_s10 + $0x270] sm:$0xf]  ;;  %v289_v40 = vld [vmem:[%s1268_s10 + $0x280] sm:$0xf] }
  0x31   : > { %v291_v41 = vld [vmem:[%s1268_s10 + $0x290] sm:$0xf]  ;;  %288 = vst [vmem:[%s1273_s11 + $0x9c] sm:$0xf] %v287_v39  ;;  %290 = vst [vmem:[%s1273_s11 + $0xa0] sm:$0xf] %v289_v40 }
  0x32   : > { %292 = vst [vmem:[%s1273_s11 + $0xa4] sm:$0xf] %v291_v41  ;;  %v293_v42 = vld [vmem:[%s1268_s10 + $0x2a0] sm:$0xf]  ;;  %v295_v43 = vld [vmem:[%s1268_s10 + $0x2b0] sm:$0xf] }
  0x33   : > { %v297_v44 = vld [vmem:[%s1268_s10 + $0x2c0] sm:$0xf]  ;;  %294 = vst [vmem:[%s1273_s11 + $0xa8] sm:$0xf] %v293_v42  ;;  %296 = vst [vmem:[%s1273_s11 + $0xac] sm:$0xf] %v295_v43 }
  0x34   : > { %298 = vst [vmem:[%s1273_s11 + $0xb0] sm:$0xf] %v297_v44  ;;  %v299_v45 = vld [vmem:[%s1268_s10 + $0x2d0] sm:$0xf]  ;;  %v301_v46 = vld [vmem:[%s1268_s10 + $0x2e0] sm:$0xf] }
  0x35   : > { %v303_v47 = vld [vmem:[%s1268_s10 + $0x2f0] sm:$0xf]  ;;  %300 = vst [vmem:[%s1273_s11 + $0xb4] sm:$0xf] %v299_v45  ;;  %302 = vst [vmem:[%s1273_s11 + $0xb8] sm:$0xf] %v301_v46 }
  0x36   : > { %304 = vst [vmem:[%s1273_s11 + $0xbc] sm:$0xf] %v303_v47 }
  0x37 PF: > { %p951_p7 = scmp.ge.s32.totalorder %s1177_s21, 1  ;;  %p435_p8 = scmp.lt.s32.totalorder %s1177_s21, 25 }
  0x39   : > { %p436_p9 = pnand %p951_p7, %p435_p8 }
  0x3a   : > { %s442_s12 = sand.u32 (!%p436_p9), 1, %s1153_s15   ;;  %s476_s13 = smul.u32 (!%p436_p9), 3, %s1161_s17 }
  0x3b   : > { %439 = sbr.rel (%p436_p9) target bundleno = 363 (0x16b), region = 73  ;;  %p482_p10 = scmp.lt.s32.totalorder (!%p436_p9), %s1165_s18, 3 }
  0x3c   : > { %s1036_s14 = smul.u32 (!%p436_p9), 192, %s442_s12  ;;  %p477_p11 = scmp.lt.s32.totalorder (!%p436_p9), %s476_s13, 17 }
  0x3d   : > { %p953_p12 = scmp.ne.s32.totalorder (!%p436_p9), %s1161_s17, 0 }
  0x3e   : > { %s1396_s11 = scalar_lea.vmem (!%p436_p9), [#allocation3], %s1036_s14 }
  0x40   : > { %s1479_s13 = smov (!%p477_p11, %s476_s13), 17  ;;  %s1481_s18 = smov (!%p482_p10, %s1165_s18), 3 }
  0x41   : > { %s479_s26 = scalar_lea.vmem %s1461_s0, %s1479_s13  ;;  %s484_s15 = scalar_lea.vmem %s1463_s2, %s1481_s18 }
  0x42   : > { %s487_s6 = scalar_lea.vmem %s1464_s3, %s1481_s18  ;;  %s952_s7 = sshll.u32 %s1481_s18, 1 }
  0x43   : > { %s1394_s10 = scalar_lea.vmem %s1465_s4, %s952_s7  ;;  %496 = sbr.rel (%p953_p12) target bundleno = 74 (0x4a), region = 81 }
  0x48   : > { %v1179_v48 = vmov 0.0  }
  0x49   : > { %497 = vst [vmem:[#allocation2] sm:$0x3] %v1179_v48 }
  0x4a PF: > { %v1097_v49 = vld [vmem:[%s1396_s11 + $0x78] sm:$0xff]   ;;  %v1180_v50 = vmov 0.0   ;;  %vm1181_vm0 = vmmov 0   ;;  %v1100_v53 = vld [vmem:[%s1396_s11 + $0x70] sm:$0xff]   ;;  %v1103_v56 = vld [vmem:[%s1396_s11 + $0x68] sm:$0xff]   ;;  %v560_v5 = vlaneseq  ;;  %p979_p13 = scmp.ne.s32.totalorder %s1161_s17, 5 }
  0x4b   : > { %1015 = vmatprep.subr.bf16.mxu1 %v1180_v50  ;;  %v1098_v51 = vld [vmem:[%s1396_s11 + $0xb8] sm:$0xff]   ;;  %984 = vmatprep.subr.bf16.mxu0 %v1097_v49  ;;  %v1101_v54 = vld [vmem:[%s1396_s11 + $0xb0] sm:$0xff]   ;;  %v1104_v57 = vld [vmem:[%s1396_s11 + $0xa8] sm:$0xff]   ;;  %v1182_v10 = vmov 1966171168  }
  0x4c   : > { %v1099_v52 = vld [vmem:[%s1396_s11 + $0x38] sm:$0xff]   ;;  %1031 = vmatprep.mubr.msk.bf16.mxu1 %vm1181_vm0, %v1180_v50  ;;  %1016 = vmatpush3.bf16.msra.mxu1 %v1098_v51  ;;  %v1102_v55 = vld [vmem:[%s1396_s11 + $0x30] sm:$0xff]   ;;  %v1105_v58 = vld [vmem:[%s1396_s11 + $0x28] sm:$0xff]   ;;  %v558_v11 = vunpack.c.l.s4 %v1182_v10  ;;  %v561_v12 = vshrl.u32 %v560_v5, 7 }
  0x4d   : > { %985 = vmatpush3.bf16.msra.mxu0 %v1099_v52  ;;  %1017 = vmatprep.subr.bf16.mxu1 %v1180_v50  ;;  %v1106_v59 = vld [vmem:[%s1396_s11 + $0x60] sm:$0xff]   ;;  %v1109_v62 = vld [vmem:[%s1396_s11 + $0x58] sm:$0xff]   ;;  %v1112_v1 = vld [vmem:[%s1396_s11 + $0x50] sm:$0xff]  }
  0x4e   : > { %986 = vmatprep.subr.bf16.mxu0 %v1100_v53  ;;  %v1107_v60 = vld [vmem:[%s1396_s11 + $0xa0] sm:$0xff]   ;;  %v1110_v63 = vld [vmem:[%s1396_s11 + $0x98] sm:$0xff]   ;;  %v1113_v2 = vld [vmem:[%s1396_s11 + $0x90] sm:$0xff]   ;;  %v559_v15 = vunpack.c.0.s8 %v558_v11 }
  0x4f   : > { %v1108_v61 = vld [vmem:[%s1396_s11 + $0x20] sm:$0xff]   ;;  %v1111_v0 = vld [vmem:[%s1396_s11 + $0x18] sm:$0xff]   ;;  %v1114_v3 = vld [vmem:[%s1396_s11 + $0x10] sm:$0xff]  }
  0x50   : > { %1018 = vmatpush3.bf16.msra.mxu1 %v1101_v54  ;;  %v1115_v4 = vld [vmem:[%s1396_s11 + $0x48] sm:$0xff]   ;;  %v954_v8 = vld.sshfl [vmem:[%s479_s26] sm:$0x13 pattern:$0x75316420]  ;;  %v562_v17 = vsub.s32 %v559_v15, %v561_v12 }
  0x51   : > { %987 = vmatpush3.bf16.msra.mxu0 %v1102_v55  ;;  %1019 = vmatprep.subr.bf16.mxu1 %v1180_v50  ;;  %v1116_v6 = vld [vmem:[%s1396_s11 + $0x88] sm:$0xff]   ;;  %v1118_v9 = vld [vmem:[%s1396_s11 + $0x40] sm:$0xff]   ;;  %v556_v14 = vcombine.high %v954_v8, %v954_v8  ;;  %v498_v26 = vld [vmem:[#allocation2] sm:$0x3] }
  0x52   : > { %988 = vmatprep.subr.bf16.mxu0 %v1103_v56  ;;  %v1117_v7 = vld [vmem:[%s1396_s11 + $0x8] sm:$0xff]   ;;  %v1119_v13 = vld [vmem:[%s1396_s11 + $0x80] sm:$0xff]   ;;  %v563_v18 = vrot.slane %v954_v8, %v562_v17 }
  0x53   : > { %v1120_v16 = vld [vmem:[%s1396_s11] sm:$0xff]   ;;  %v570_v19 = vrot.slane %v556_v14, %v562_v17 }
  0x54   : > { %1020 = vmatpush3.bf16.msra.mxu1 %v1104_v57  ;;  %v571_v20 = vcombine.high %v563_v18, %v563_v18 }
  0x55   : > { %989 = vmatpush3.bf16.msra.mxu0 %v1105_v58  ;;  %1021 = vmatprep.subr.bf16.mxu1 %v1180_v50 }
  0x56   : > { %990 = vmatprep.subr.bf16.mxu0 %v1106_v59  ;;  %751 = vmatprep.mubr.bf16.mxu0 %v570_v19 }
  0x58   : > { %1022 = vmatpush3.bf16.msra.mxu1 %v1107_v60 }
  0x59   : > { %991 = vmatpush3.bf16.msra.mxu0 %v1108_v61  ;;  %1023 = vmatprep.subr.bf16.mxu1 %v1180_v50 }
  0x5a   : > { %992 = vmatprep.subr.bf16.mxu0 %v1109_v62 }
  0x5c   : > { %1024 = vmatpush3.bf16.msra.mxu1 %v1110_v63 }
  0x5d   : > { %993 = vmatpush3.bf16.msra.mxu0 %v1111_v0  ;;  %1025 = vmatprep.subr.bf16.mxu1 %v1180_v50 }
  0x5e   : > { %994 = vmatprep.subr.bf16.mxu0 %v1112_v1 }
  0x60   : > { %1026 = vmatpush3.bf16.msra.mxu1 %v1113_v2 }
  0x61   : > { %995 = vmatpush3.bf16.msra.mxu0 %v1114_v3  ;;  %1027 = vmatprep.subr.bf16.mxu1 %v1180_v50 }
  0x62   : > { %996 = vmatprep.subr.bf16.mxu0 %v1115_v4 }
  0x64   : > { %1028 = vmatpush3.bf16.msra.mxu1 %v1116_v6 }
  0x65   : > { %997 = vmatpush3.bf16.msra.mxu0 %v1117_v7  ;;  %1029 = vmatprep.subr.bf16.mxu1 %v1180_v50 }
  0x66   : > { %998 = vmatprep.subr.bf16.mxu0 %v1118_v9 }
  0x68   : > { %1030 = vmatpush3.bf16.msra.mxu1 %v1119_v13 }
  0x69   : > { %999 = vmatpush3.bf16.msra.mxu0 %v1120_v16 }
  0x6b   : > { %1032 = vmatmul.mubr.bf16.vlgmr.msra.gmra.mxu1 %v571_v20 }
  0x6c   : > { %752 = vmatmul.mubr.bf16.vlgmr.msra.gmra.mxu0 %v563_v18 }
 0x12b   : > { %v793_v21 = vpop.f32.mrf.mxu1 }
 0x12c   : > { %v1000_v22 = vpop.f32.mrf.mxu0 }
 0x12d   : > { %v1033_v23 = vpop.f32.mrf.mxu1 }
 0x12e   : > { %v1001_v24 = vpop.f32.mrf.mxu0 }
 0x12f   : > { %v1002_v25 = vadd.f32 %v1001_v24, %v1000_v22  ;;  %v796_v27 = vpop.f32.mrf.mxu1 }
 0x130   : > { %v1003_v28 = vpop.f32.mrf.mxu0 }
 0x131   : > { %v794_v29 = vadd.f32 %v1002_v25, %v793_v21  ;;  %v1034_v30 = vpop.f32.mrf.mxu1  ;;  %804 = sbr.rel (%p979_p13) target bundleno = 363 (0x16b), region = 85 }
 0x132   : > { %v1004_v31 = vpop.f32.mrf.mxu0 }
 0x133   : > { %v799_v32 = vadd.f32 %v794_v29, %v498_v26 }
 0x135   : > { %800 = vst [vmem:[#allocation2] sm:$0x3] %v799_v32 }
 0x136   : > { %vm806_vm1 = vcmask 1041408   ;;  %v828_v54 = vld [vmem:[%s484_s15] sm:$0x1]  ;;  %v833_v55 = vsub.s32 0, %v561_v12 }
 0x137   : > { %v980_v60 = vld [vmem:[%s487_s6] ss:$0 sm:$0xff] }
 0x13c   : > { %v805_v33 = vld [vmem:[#allocation2] sm:$0x3] }
 0x13d   : > { %v807_v34 = vsel %vm806_vm1, %v805_v33, 0.0  ;;  %v814_v35 = vmul.f32 %v805_v33, %v805_v33 }
 0x13e   : > { %v808_v36 = vrot.slane %v807_v34, 4 }
 0x13f   : > { %v815_v37 = vsel %vm806_vm1, %v814_v35, 0.0 }
 0x140   : > { %v809_v38 = vadd.f32 %v808_v36, %v807_v34  ;;  %v816_v39 = vrot.slane %v815_v37, 4 }
 0x142   : > { %v810_v40 = vrot.slane %v809_v38, 2  ;;  %v817_v41 = vadd.f32 %v816_v39, %v815_v37 }
 0x144   : > { %v811_v42 = vadd.f32 %v810_v40, %v809_v38  ;;  %v818_v43 = vrot.slane %v817_v41, 2 }
 0x146   : > { %v812_v44 = vrot.slane %v811_v42, 1  ;;  %v819_v45 = vadd.f32 %v818_v43, %v817_v41 }
 0x148   : > { %v813_v46 = vadd.f32 %v812_v44, %v811_v42  ;;  %v820_v47 = vrot.slane %v819_v45, 1 }
 0x14a   : > { %v821_v48 = vadd.f32 %v820_v47, %v819_v45  ;;  %v822_v49 = vmul.f32 0.5, %v813_v46 }
 0x14c   : > { %v823_v50 = vmul.f32 0.5, %v821_v48  ;;  %v824_v51 = vmul.f32 %v822_v49, %v822_v49  ;;  %v830_v58 = vsub.f32 %v805_v33, %v822_v49 }
 0x14e   : > { %v825_v52 = vsub.f32 %v823_v50, %v824_v51 }
 0x150   : > { %v826_v53 = vadd.f32 1e-05, %v825_v52 }
 0x152   : > { %1121 = vrsqrt.f32 %v826_v53 }
 0x15f   : > { %v1122_v56 = vpop.eup %1121 }
 0x160   : > { %v829_v57 = vmul.f32 %v1122_v56, %v828_v54 }
 0x162   : > { %v834_v59 = vrot.slane %v829_v57, %v833_v55 }
 0x164   : > { %v835_v61 = vmul.f32 %v834_v59, %v830_v58 }
 0x166   : > { %v843_v62 = vadd.f32 %v980_v60, %v835_v61 }
 0x168   : > { %v844_v63 = vmax.f32 %v843_v62, 0.0 }
 0x16a   : > { %845 = vst [vmem:[%s1394_s10] sm:$0x3] %v844_v63 }
 0x16b PF: > { %s14_s21 = sadd.s32 1, %s1177_s21   ;;  %s1466_s15 = smov %s1157_s16 }
 0x16c   : > { %p11_p0 = scmp.ge.s32.totalorder %s14_s21, 26   ;;  %s1467_s16 = smov %s1259_s28 }
 0x16d   : > { %s1468_s17 = smov %s1169_s19  ;;  %s1469_s18 = smov %s1173_s20 }
 0x16e   : > { %s1470_s19 = smov %s1473_s22  ;;  %s1471_s20 = smov %s1477_s23 }
 0x16f   :  { %13 = sbr.rel (!%p11_p0) target bundleno = 4 (0x4), region = 129 }

// kernel: _lambda_.24
= control target key start
LH: loop header
LB: loop body
LE: loop exit
PB: predicated region body
PF: predicated region fallthrough
CT: control target
= control target key end

     0   :  { %s953_s15 = smov 0   ;;  %s955_s16 = smov 0   ;;  %s1118_s0 = inlined_call_operand.vmem [shape: bf16[2,256], index: 0, kind: input, shape index: {}]   ;;  %s1119_s1 = inlined_call_operand.vmem [shape: bf16[256,512], index: 1, kind: input, shape index: {}]   ;;  %s1120_s2 = inlined_call_operand.vmem [shape: f32[1,512], index: 2, kind: input, shape index: {}]   ;;  %s1121_s3 = inlined_call_operand.vmem [shape: f32[1,512], index: 3, kind: input, shape index: {}]   ;;  %s1122_s4 = inlined_call_operand.vmem [shape: f32[2,512], index: 4, kind: output, shape index: {}]  }
   0x1   :  { %s957_s17 = smov 0   ;;  %s959_s18 = smov 0  }
   0x2   :  { %s961_s19 = smov 0  }
   0x3 LB: > { %s26_s20 = sadd.s32 1, %s920_s18  ;;  %p68_p1 = scmp.ne.s32.totalorder %s912_s16, %s908_s15  ;;  %s924_s19 = sphi %s961_s19, %s14_s19   ;;  %s920_s18 = sphi %s959_s18, %s1126_s18   ;;  %s916_s17 = sphi %s957_s17, %s1125_s17   ;;  %s912_s16 = sphi %s955_s16, %s1124_s16   ;;  %s908_s15 = sphi %s953_s15, %s1123_s15  }
   0x4   : > { %p28_p0 = scmp.ge.s32.totalorder %s26_s20, 4  ;;  %p69_p2 = scmp.eq.s32.totalorder %s924_s19, 0 }
   0x5   : > { %s61_s22 = sadd.s32 1, %s912_s16  ;;  %p778_p5 = scmp.ge.s32.totalorder %s924_s19, 4 }
   0x6   : > { %s1128_s20 = smov (%p28_p0, %s26_s20), 0  ;;  %p70_p3 = por %p69_p2, %p68_p1 }
   0x7   : > { %s57_s21 = ssub.s32 %s920_s18, %s1128_s20  ;;  %180 = sbr.rel (%p778_p5) target bundleno = 37 (0x25), region = 20 }
   0x8   : > { %p59_p4 = scmp.eq.s32.totalorder %s57_s21, 0 }
   0xa   : > { %s988_s23 = scalar_select %p59_p4, %s912_s16, %s61_s22  }
   0xc   : > { %183 = sbr.rel (!%p70_p3) target bundleno = 37 (0x25), region = 24  ;;  %s185_s24 = sand.u32 (%p70_p3), 1, %s912_s16  }
   0xd   : > { %s780_s25 = sshll.u32 (%p70_p3), %s920_s18, 2  ;;  %s779_s26 = sshll.u32 (%p70_p3), %s185_s24, 7 }
   0xe   : > { %s996_s29 = scalar_lea.vmem (%p70_p3), %s1119_s1, %s780_s25  ;;  %s1000_s30 = scalar_lea.vmem (%p70_p3), [#allocation3], %s779_s26 }
   0xf   : > { %v209_v0 = vld [vmem:[%s996_s29] sm:$0xf] (%p70_p3)  ;;  %v211_v1 = vld [vmem:[%s996_s29 + $0x10] sm:$0xf] (%p70_p3) }
  0x10   : > { %210 = vst [vmem:[%s1000_s30] sm:$0xf] (%p70_p3), %v209_v0  ;;  %212 = vst [vmem:[%s1000_s30 + $0x4] sm:$0xf] (%p70_p3), %v211_v1  ;;  %v213_v2 = vld [vmem:[%s996_s29 + $0x20] sm:$0xf] (%p70_p3) }
  0x11   : > { %v215_v3 = vld [vmem:[%s996_s29 + $0x30] sm:$0xf]  ;;  %v217_v4 = vld [vmem:[%s996_s29 + $0x40] sm:$0xf]  ;;  %214 = vst [vmem:[%s1000_s30 + $0x8] sm:$0xf] %v213_v2 }
  0x12   : > { %216 = vst [vmem:[%s1000_s30 + $0xc] sm:$0xf] %v215_v3  ;;  %218 = vst [vmem:[%s1000_s30 + $0x10] sm:$0xf] %v217_v4  ;;  %v219_v5 = vld [vmem:[%s996_s29 + $0x50] sm:$0xf] }
  0x13   : > { %v221_v6 = vld [vmem:[%s996_s29 + $0x60] sm:$0xf]  ;;  %v223_v7 = vld [vmem:[%s996_s29 + $0x70] sm:$0xf]  ;;  %220 = vst [vmem:[%s1000_s30 + $0x14] sm:$0xf] %v219_v5 }
  0x14   : > { %222 = vst [vmem:[%s1000_s30 + $0x18] sm:$0xf] %v221_v6  ;;  %224 = vst [vmem:[%s1000_s30 + $0x1c] sm:$0xf] %v223_v7  ;;  %v225_v8 = vld [vmem:[%s996_s29 + $0x80] sm:$0xf] }
  0x15   : > { %v227_v9 = vld [vmem:[%s996_s29 + $0x90] sm:$0xf]  ;;  %v229_v10 = vld [vmem:[%s996_s29 + $0xa0] sm:$0xf]  ;;  %226 = vst [vmem:[%s1000_s30 + $0x20] sm:$0xf] %v225_v8 }
  0x16   : > { %228 = vst [vmem:[%s1000_s30 + $0x24] sm:$0xf] %v227_v9  ;;  %230 = vst [vmem:[%s1000_s30 + $0x28] sm:$0xf] %v229_v10  ;;  %v231_v11 = vld [vmem:[%s996_s29 + $0xb0] sm:$0xf] }
  0x17   : > { %v233_v12 = vld [vmem:[%s996_s29 + $0xc0] sm:$0xf]  ;;  %v235_v13 = vld [vmem:[%s996_s29 + $0xd0] sm:$0xf]  ;;  %232 = vst [vmem:[%s1000_s30 + $0x2c] sm:$0xf] %v231_v11 }
  0x18   : > { %234 = vst [vmem:[%s1000_s30 + $0x30] sm:$0xf] %v233_v12  ;;  %236 = vst [vmem:[%s1000_s30 + $0x34] sm:$0xf] %v235_v13  ;;  %v237_v14 = vld [vmem:[%s996_s29 + $0xe0] sm:$0xf] }
  0x19   : > { %v239_v15 = vld [vmem:[%s996_s29 + $0xf0] sm:$0xf]  ;;  %v241_v16 = vld [vmem:[%s996_s29 + $0x100] sm:$0xf]  ;;  %238 = vst [vmem:[%s1000_s30 + $0x38] sm:$0xf] %v237_v14 }
  0x1a   : > { %240 = vst [vmem:[%s1000_s30 + $0x3c] sm:$0xf] %v239_v15  ;;  %242 = vst [vmem:[%s1000_s30 + $0x40] sm:$0xf] %v241_v16  ;;  %v243_v17 = vld [vmem:[%s996_s29 + $0x110] sm:$0xf] }
  0x1b   : > { %v245_v18 = vld [vmem:[%s996_s29 + $0x120] sm:$0xf]  ;;  %v247_v19 = vld [vmem:[%s996_s29 + $0x130] sm:$0xf]  ;;  %244 = vst [vmem:[%s1000_s30 + $0x44] sm:$0xf] %v243_v17 }
  0x1c   : > { %246 = vst [vmem:[%s1000_s30 + $0x48] sm:$0xf] %v245_v18  ;;  %248 = vst [vmem:[%s1000_s30 + $0x4c] sm:$0xf] %v247_v19  ;;  %v249_v20 = vld [vmem:[%s996_s29 + $0x140] sm:$0xf] }
  0x1d   : > { %v251_v21 = vld [vmem:[%s996_s29 + $0x150] sm:$0xf]  ;;  %v253_v22 = vld [vmem:[%s996_s29 + $0x160] sm:$0xf]  ;;  %250 = vst [vmem:[%s1000_s30 + $0x50] sm:$0xf] %v249_v20 }
  0x1e   : > { %252 = vst [vmem:[%s1000_s30 + $0x54] sm:$0xf] %v251_v21  ;;  %254 = vst [vmem:[%s1000_s30 + $0x58] sm:$0xf] %v253_v22  ;;  %v255_v23 = vld [vmem:[%s996_s29 + $0x170] sm:$0xf] }
  0x1f   : > { %v257_v24 = vld [vmem:[%s996_s29 + $0x180] sm:$0xf]  ;;  %v259_v25 = vld [vmem:[%s996_s29 + $0x190] sm:$0xf]  ;;  %256 = vst [vmem:[%s1000_s30 + $0x5c] sm:$0xf] %v255_v23 }
  0x20   : > { %258 = vst [vmem:[%s1000_s30 + $0x60] sm:$0xf] %v257_v24  ;;  %260 = vst [vmem:[%s1000_s30 + $0x64] sm:$0xf] %v259_v25  ;;  %v261_v26 = vld [vmem:[%s996_s29 + $0x1a0] sm:$0xf] }
  0x21   : > { %v263_v27 = vld [vmem:[%s996_s29 + $0x1b0] sm:$0xf]  ;;  %v265_v28 = vld [vmem:[%s996_s29 + $0x1c0] sm:$0xf]  ;;  %262 = vst [vmem:[%s1000_s30 + $0x68] sm:$0xf] %v261_v26 }
  0x22   : > { %264 = vst [vmem:[%s1000_s30 + $0x6c] sm:$0xf] %v263_v27  ;;  %266 = vst [vmem:[%s1000_s30 + $0x70] sm:$0xf] %v265_v28  ;;  %v267_v29 = vld [vmem:[%s996_s29 + $0x1d0] sm:$0xf] }
  0x23   : > { %v269_v30 = vld [vmem:[%s996_s29 + $0x1e0] sm:$0xf]  ;;  %v271_v31 = vld [vmem:[%s996_s29 + $0x1f0] sm:$0xf]  ;;  %268 = vst [vmem:[%s1000_s30 + $0x74] sm:$0xf] %v267_v29 }
  0x24   : > { %270 = vst [vmem:[%s1000_s30 + $0x78] sm:$0xf] %v269_v30  ;;  %272 = vst [vmem:[%s1000_s30 + $0x7c] sm:$0xf] %v271_v31 }
  0x25 PF: > { %p781_p6 = scmp.ge.s32.totalorder %s924_s19, 1  ;;  %p371_p7 = scmp.lt.s32.totalorder %s924_s19, 5 }
  0x27   : > { %p372_p8 = pnand %p781_p6, %p371_p7 }
  0x28   : > { %s378_s5 = sand.u32 (!%p372_p8), 1, %s908_s15   ;;  %p418_p9 = scmp.lt.s32.totalorder (!%p372_p8), %s916_s17, 3 }
  0x29   : > { %375 = sbr.rel (%p372_p8) target bundleno = 331 (0x14b), region = 73  ;;  %s782_s8 = sshll.u32 (!%p372_p8), %s378_s5, 7 }
  0x2a   : > { %s1072_s9 = scalar_lea.vmem (!%p372_p8), [#allocation3], %s782_s8 }
  0x2e   : > { %v784_v32 = vld.sshfl [vmem:[%s1118_s0] sm:$0x11 pattern:$0x75316420]  ;;  %v480_v33 = vlaneseq  ;;  %v926_v34 = vmov 1966171168  }
  0x2f   : > { %v478_v35 = vunpack.c.l.s4 %v926_v34  ;;  %v868_v37 = vld [vmem:[%s1072_s9 + $0x78] sm:$0xff]   ;;  %v476_v39 = vcombine.high %v784_v32, %v784_v32  ;;  %v870_v41 = vld [vmem:[%s1072_s9 + $0x70] sm:$0xff]   ;;  %v872_v44 = vld [vmem:[%s1072_s9 + $0x68] sm:$0xff]   ;;  %v927_v58 = vmov 0.0   ;;  %vm635_vm0 = vcmask 1041408   ;;  %s1130_s17 = smov (!%p418_p9, %s916_s17), 3 }
  0x30   : > { %v1070_v36 = vshrl.u32 %v480_v33, 7  ;;  %v869_v38 = vld [vmem:[%s1072_s9 + $0x38] sm:$0xff]   ;;  %804 = vmatprep.subr.bf16.mxu0 %v868_v37  ;;  %v871_v42 = vld [vmem:[%s1072_s9 + $0x30] sm:$0xff]   ;;  %v873_v46 = vld [vmem:[%s1072_s9 + $0x28] sm:$0xff]   ;;  %433 = vst [vmem:[#allocation2] sm:$0x3] %v927_v58  ;;  %s420_s12 = scalar_lea.vmem %s1120_s2, %s1130_s17  ;;  %s423_s15 = scalar_lea.vmem %s1121_s3, %s1130_s17 }
  0x31   : > { %v479_v40 = vunpack.c.0.s8 %v478_v35  ;;  %805 = vmatpush3.bf16.msra.mxu0 %v869_v38  ;;  %v874_v47 = vld [vmem:[%s1072_s9 + $0x60] sm:$0xff]   ;;  %v876_v49 = vld [vmem:[%s1072_s9 + $0x58] sm:$0xff]   ;;  %v878_v51 = vld [vmem:[%s1072_s9 + $0x50] sm:$0xff]   ;;  %s783_s21 = sshll.u32 %s1130_s17, 1 }
  0x32   : > { %806 = vmatprep.subr.bf16.mxu0 %v870_v41  ;;  %v875_v48 = vld [vmem:[%s1072_s9 + $0x20] sm:$0xff]   ;;  %v877_v50 = vld [vmem:[%s1072_s9 + $0x18] sm:$0xff]   ;;  %v879_v52 = vld [vmem:[%s1072_s9 + $0x10] sm:$0xff]   ;;  %v662_v24 = vsub.s32 0, %v1070_v36  ;;  %s427_s25 = scalar_lea.vmem %s1122_s4, %s783_s21 }
  0x33   : > { %v482_v43 = vsub.s32 %v479_v40, %v1070_v36  ;;  %v880_v53 = vld [vmem:[%s1072_s9 + $0x48] sm:$0xff]   ;;  %v882_v55 = vld [vmem:[%s1072_s9 + $0x40] sm:$0xff]   ;;  %v657_v23 = vld [vmem:[%s420_s12] sm:$0x1] }
  0x34   : > { %v881_v54 = vld [vmem:[%s1072_s9 + $0x8] sm:$0xff]   ;;  %v883_v56 = vld [vmem:[%s1072_s9] sm:$0xff]   ;;  %v801_v29 = vld [vmem:[%s423_s15] ss:$0 sm:$0xff] }
  0x35   : > { %v490_v45 = vrot.slane %v476_v39, %v482_v43  ;;  %807 = vmatpush3.bf16.msra.mxu0 %v871_v42  ;;  %v483_v57 = vrot.slane %v784_v32, %v482_v43 }
  0x36   : > { %808 = vmatprep.subr.bf16.mxu0 %v872_v44 }
  0x37   : > { %621 = vmatprep.mubr.bf16.mxu0 %v490_v45  ;;  %v434_v60 = vld [vmem:[#allocation2] sm:$0x3] }
  0x39   : > { %809 = vmatpush3.bf16.msra.mxu0 %v873_v46 }
  0x3a   : > { %810 = vmatprep.subr.bf16.mxu0 %v874_v47 }
  0x3d   : > { %811 = vmatpush3.bf16.msra.mxu0 %v875_v48 }
  0x3e   : > { %812 = vmatprep.subr.bf16.mxu0 %v876_v49 }
  0x41   : > { %813 = vmatpush3.bf16.msra.mxu0 %v877_v50 }
  0x42   : > { %814 = vmatprep.subr.bf16.mxu0 %v878_v51 }
  0x45   : > { %815 = vmatpush3.bf16.msra.mxu0 %v879_v52 }
  0x46   : > { %816 = vmatprep.subr.bf16.mxu0 %v880_v53 }
  0x49   : > { %817 = vmatpush3.bf16.msra.mxu0 %v881_v54 }
  0x4a   : > { %818 = vmatprep.subr.bf16.mxu0 %v882_v55 }
  0x4d   : > { %819 = vmatpush3.bf16.msra.mxu0 %v883_v56 }
  0x50   : > { %622 = vmatmul.mubr.bf16.vlgmr.msra.gmra.mxu0 %v483_v57 }
 0x110   : > { %v820_v59 = vpop.f32.mrf.mxu0 }
 0x112   : > { %v821_v61 = vpop.f32.mrf.mxu0 }
 0x113   : > { %v822_v62 = vadd.f32 %v821_v61, %v820_v59 }
 0x114   : > { %v823_v63 = vpop.f32.mrf.mxu0 }
 0x115   : > { %v629_v0 = vadd.f32 %v822_v62, %v434_v60 }
 0x116   : > { %v824_v1 = vpop.f32.mrf.mxu0 }
 0x117   : > { %630 = vst [vmem:[#allocation2] sm:$0x3] %v629_v0 }
 0x11e   : > { %v634_v2 = vld [vmem:[#allocation2] sm:$0x3] }
 0x11f   : > { %v636_v3 = vsel %vm635_vm0, %v634_v2, 0.0  ;;  %v643_v4 = vmul.f32 %v634_v2, %v634_v2 }
 0x120   : > { %v637_v5 = vrot.slane %v636_v3, 4 }
 0x121   : > { %v644_v6 = vsel %vm635_vm0, %v643_v4, 0.0 }
 0x122   : > { %v638_v7 = vadd.f32 %v637_v5, %v636_v3  ;;  %v645_v8 = vrot.slane %v644_v6, 4 }
 0x124   : > { %v639_v9 = vrot.slane %v638_v7, 2  ;;  %v646_v10 = vadd.f32 %v645_v8, %v644_v6 }
 0x126   : > { %v640_v11 = vadd.f32 %v639_v9, %v638_v7  ;;  %v647_v12 = vrot.slane %v646_v10, 2 }
 0x128   : > { %v641_v13 = vrot.slane %v640_v11, 1  ;;  %v648_v14 = vadd.f32 %v647_v12, %v646_v10 }
 0x12a   : > { %v642_v15 = vadd.f32 %v641_v13, %v640_v11  ;;  %v649_v16 = vrot.slane %v648_v14, 1 }
 0x12c   : > { %v650_v17 = vadd.f32 %v649_v16, %v648_v14  ;;  %v651_v18 = vmul.f32 0.5, %v642_v15 }
 0x12e   : > { %v652_v19 = vmul.f32 0.5, %v650_v17  ;;  %v653_v20 = vmul.f32 %v651_v18, %v651_v18  ;;  %v659_v27 = vsub.f32 %v634_v2, %v651_v18 }
 0x130   : > { %v654_v21 = vsub.f32 %v652_v19, %v653_v20 }
 0x132   : > { %v655_v22 = vadd.f32 1e-05, %v654_v21 }
 0x134   : > { %884 = vrsqrt.f32 %v655_v22 }
 0x141   : > { %v885_v25 = vpop.eup %884 }
 0x142   : > { %v658_v26 = vmul.f32 %v885_v25, %v657_v23 }
 0x144   : > { %v663_v28 = vrot.slane %v658_v26, %v662_v24 }
 0x146   : > { %v664_v30 = vmul.f32 %v663_v28, %v659_v27 }
 0x148   : > { %v672_v31 = vadd.f32 %v801_v29, %v664_v30 }
 0x14a   : > { %673 = vst [vmem:[%s427_s25] sm:$0x3] %v672_v31 }
 0x14b PF: > { %s14_s19 = sadd.s32 1, %s924_s19   ;;  %s1123_s15 = smov %s912_s16 }
 0x14c   : > { %p11_p10 = scmp.ge.s32.totalorder %s14_s19, 6   ;;  %s1124_s16 = smov %s988_s23 }
 0x14d   : > { %s1125_s17 = smov %s920_s18  ;;  %s1126_s18 = smov %s1128_s20 }
 0x14e   :  { %13 = sbr.rel (!%p11_p10) target bundleno = 3 (0x3), region = 129 }

// kernel: _lambda_.25
= control target key start
LH: loop header
LB: loop body
LE: loop exit
PB: predicated region body
PF: predicated region fallthrough
CT: control target
= control target key end

     0   :  { %s1409_s18 = smov 0   ;;  %s1411_s19 = smov 0   ;;  %s1708_s0 = inlined_call_operand.vmem [shape: bf16[2,4608], index: 0, kind: input, shape index: {}]   ;;  %s1709_s1 = inlined_call_operand.vmem [shape: bf16[4608,512], index: 1, kind: input, shape index: {}]   ;;  %s1710_s2 = inlined_call_operand.vmem [shape: f32[1,512], index: 2, kind: input, shape index: {}]   ;;  %s1711_s3 = inlined_call_operand.vmem [shape: f32[1,512], index: 3, kind: input, shape index: {}]   ;;  %s1712_s4 = inlined_call_operand.vmem [shape: f32[2,512], index: 4, kind: input, shape index: {}]   ;;  %s1713_s5 = inlined_call_operand.vmem [shape: f32[2,512], index: 5, kind: output, shape index: {}]  }
   0x1   :  { %s1413_s20 = smov 0   ;;  %s1415_s21 = smov 0  }
   0x2   :  { %s1417_s22 = smov 0   ;;  %s1419_s23 = smov 0  }
   0x3   :  { %s1421_s24 = smov 0  }
   0x4 LB: > { %s24_s25 = sadd.s32 1, %s1367_s22  ;;  %s27_s26 = sadd.s32 1, %s1371_s23  ;;  %s1375_s24 = sphi %s1421_s24, %s15_s24   ;;  %s1371_s23 = sphi %s1419_s23, %s1720_s23   ;;  %s1367_s22 = sphi %s1417_s22, %s1719_s22   ;;  %s1363_s21 = sphi %s1415_s21, %s1718_s21   ;;  %s1359_s20 = sphi %s1413_s20, %s1717_s20   ;;  %s1355_s19 = sphi %s1411_s19, %s1716_s19   ;;  %s1351_s18 = sphi %s1409_s18, %s1715_s18  }
   0x5   : > { %p25_p0 = scmp.ge.s32.totalorder %s24_s25, 9  ;;  %p69_p1 = scmp.ne.s32.totalorder %s1355_s19, %s1351_s18 }
   0x6   : > { %p70_p2 = scmp.eq.s32.totalorder %s1375_s24, 0  ;;  %s62_s30 = sadd.s32 1, %s1355_s19 }
   0x7   : > { %s1722_s25 = smov (%p25_p0, %s24_s25), 0  ;;  %s1724_s26 = smov (!%p25_p0, %s27_s26), %s1371_s23 }
   0x8   : > { %p71_p3 = por %p70_p2, %p69_p1  ;;  %p29_p4 = scmp.ge.s32.totalorder %s1724_s26, 4 }
   0x9   : > { %s57_s27 = ssub.s32 %s1367_s22, %s1722_s25  ;;  %p1136_p6 = scmp.ge.s32.totalorder %s1375_s24, 36 }
   0xa   : > { %s1726_s26 = smov (%p29_p4, %s1724_s26), 0 }
   0xb   : > { %s58_s28 = ssub.s32 %s1371_s23, %s1726_s26  ;;  %199 = sbr.rel (%p1136_p6) target bundleno = 65 (0x41), region = 16 }
   0xc   : > { %s59_s29 = sor.u32 %s58_s28, %s57_s27 }
   0xd   : > { %p60_p5 = scmp.eq.s32.totalorder %s59_s29, 0 }
   0xf   : > { %s1460_s6 = scalar_select %p60_p5, %s1355_s19, %s62_s30  }
  0x10   : > { %210 = sbr.rel (!%p71_p3) target bundleno = 65 (0x41), region = 24  ;;  %s212_s7 = sand.u32 (%p71_p3), 1, %s1355_s19  }
  0x11   : > { %s1184_s8 = sshll.u32 (%p71_p3), %s1367_s22, 8  ;;  %s1137_s9 = sshll.u32 (%p71_p3), %s212_s7, 8 }
  0x12   : > { %s217_s10 = sadd.s32 (%p71_p3), %s1371_s23, %s1184_s8  ;;  %s1474_s15 = scalar_lea.vmem (%p71_p3), [#allocation3], %s1137_s9 }
  0x13   : > { %s1140_s11 = sshll.u32 (%p71_p3), %s217_s10, 2 }
  0x14   : > { %s1469_s14 = scalar_lea.vmem (%p71_p3), %s1709_s1, %s1140_s11 }
  0x15   : > { %v236_v0 = vld [vmem:[%s1469_s14] sm:$0xf]  ;;  %v238_v1 = vld [vmem:[%s1469_s14 + $0x10] sm:$0xf] }
  0x16   : > { %v240_v2 = vld [vmem:[%s1469_s14 + $0x20] sm:$0xf]  ;;  %237 = vst [vmem:[%s1474_s15] sm:$0xf] %v236_v0  ;;  %239 = vst [vmem:[%s1474_s15 + $0x4] sm:$0xf] %v238_v1 }
  0x17   : > { %241 = vst [vmem:[%s1474_s15 + $0x8] sm:$0xf] %v240_v2  ;;  %v242_v3 = vld [vmem:[%s1469_s14 + $0x30] sm:$0xf]  ;;  %v244_v4 = vld [vmem:[%s1469_s14 + $0x40] sm:$0xf] }
  0x18   : > { %v246_v5 = vld [vmem:[%s1469_s14 + $0x50] sm:$0xf]  ;;  %243 = vst [vmem:[%s1474_s15 + $0xc] sm:$0xf] %v242_v3  ;;  %245 = vst [vmem:[%s1474_s15 + $0x10] sm:$0xf] %v244_v4 }
  0x19   : > { %247 = vst [vmem:[%s1474_s15 + $0x14] sm:$0xf] %v246_v5  ;;  %v248_v6 = vld [vmem:[%s1469_s14 + $0x60] sm:$0xf]  ;;  %v250_v7 = vld [vmem:[%s1469_s14 + $0x70] sm:$0xf] }
  0x1a   : > { %v252_v8 = vld [vmem:[%s1469_s14 + $0x80] sm:$0xf]  ;;  %249 = vst [vmem:[%s1474_s15 + $0x18] sm:$0xf] %v248_v6  ;;  %251 = vst [vmem:[%s1474_s15 + $0x1c] sm:$0xf] %v250_v7 }
  0x1b   : > { %253 = vst [vmem:[%s1474_s15 + $0x20] sm:$0xf] %v252_v8  ;;  %v254_v9 = vld [vmem:[%s1469_s14 + $0x90] sm:$0xf]  ;;  %v256_v10 = vld [vmem:[%s1469_s14 + $0xa0] sm:$0xf] }
  0x1c   : > { %v258_v11 = vld [vmem:[%s1469_s14 + $0xb0] sm:$0xf]  ;;  %255 = vst [vmem:[%s1474_s15 + $0x24] sm:$0xf] %v254_v9  ;;  %257 = vst [vmem:[%s1474_s15 + $0x28] sm:$0xf] %v256_v10 }
  0x1d   : > { %259 = vst [vmem:[%s1474_s15 + $0x2c] sm:$0xf] %v258_v11  ;;  %v260_v12 = vld [vmem:[%s1469_s14 + $0xc0] sm:$0xf]  ;;  %v262_v13 = vld [vmem:[%s1469_s14 + $0xd0] sm:$0xf] }
  0x1e   : > { %v264_v14 = vld [vmem:[%s1469_s14 + $0xe0] sm:$0xf]  ;;  %261 = vst [vmem:[%s1474_s15 + $0x30] sm:$0xf] %v260_v12  ;;  %263 = vst [vmem:[%s1474_s15 + $0x34] sm:$0xf] %v262_v13 }
  0x1f   : > { %265 = vst [vmem:[%s1474_s15 + $0x38] sm:$0xf] %v264_v14  ;;  %v266_v15 = vld [vmem:[%s1469_s14 + $0xf0] sm:$0xf]  ;;  %v268_v16 = vld [vmem:[%s1469_s14 + $0x100] sm:$0xf] }
  0x20   : > { %v270_v17 = vld [vmem:[%s1469_s14 + $0x110] sm:$0xf]  ;;  %267 = vst [vmem:[%s1474_s15 + $0x3c] sm:$0xf] %v266_v15  ;;  %269 = vst [vmem:[%s1474_s15 + $0x40] sm:$0xf] %v268_v16 }
  0x21   : > { %271 = vst [vmem:[%s1474_s15 + $0x44] sm:$0xf] %v270_v17  ;;  %v272_v18 = vld [vmem:[%s1469_s14 + $0x120] sm:$0xf]  ;;  %v274_v19 = vld [vmem:[%s1469_s14 + $0x130] sm:$0xf] }
  0x22   : > { %v276_v20 = vld [vmem:[%s1469_s14 + $0x140] sm:$0xf]  ;;  %273 = vst [vmem:[%s1474_s15 + $0x48] sm:$0xf] %v272_v18  ;;  %275 = vst [vmem:[%s1474_s15 + $0x4c] sm:$0xf] %v274_v19 }
  0x23   : > { %277 = vst [vmem:[%s1474_s15 + $0x50] sm:$0xf] %v276_v20  ;;  %v278_v21 = vld [vmem:[%s1469_s14 + $0x150] sm:$0xf]  ;;  %v280_v22 = vld [vmem:[%s1469_s14 + $0x160] sm:$0xf] }
  0x24   : > { %v282_v23 = vld [vmem:[%s1469_s14 + $0x170] sm:$0xf]  ;;  %279 = vst [vmem:[%s1474_s15 + $0x54] sm:$0xf] %v278_v21  ;;  %281 = vst [vmem:[%s1474_s15 + $0x58] sm:$0xf] %v280_v22 }
  0x25   : > { %283 = vst [vmem:[%s1474_s15 + $0x5c] sm:$0xf] %v282_v23  ;;  %v284_v24 = vld [vmem:[%s1469_s14 + $0x180] sm:$0xf]  ;;  %v286_v25 = vld [vmem:[%s1469_s14 + $0x190] sm:$0xf] }
  0x26   : > { %v288_v26 = vld [vmem:[%s1469_s14 + $0x1a0] sm:$0xf]  ;;  %285 = vst [vmem:[%s1474_s15 + $0x60] sm:$0xf] %v284_v24  ;;  %287 = vst [vmem:[%s1474_s15 + $0x64] sm:$0xf] %v286_v25 }
  0x27   : > { %289 = vst [vmem:[%s1474_s15 + $0x68] sm:$0xf] %v288_v26  ;;  %v290_v27 = vld [vmem:[%s1469_s14 + $0x1b0] sm:$0xf]  ;;  %v292_v28 = vld [vmem:[%s1469_s14 + $0x1c0] sm:$0xf] }
  0x28   : > { %v294_v29 = vld [vmem:[%s1469_s14 + $0x1d0] sm:$0xf]  ;;  %291 = vst [vmem:[%s1474_s15 + $0x6c] sm:$0xf] %v290_v27  ;;  %293 = vst [vmem:[%s1474_s15 + $0x70] sm:$0xf] %v292_v28 }
  0x29   : > { %295 = vst [vmem:[%s1474_s15 + $0x74] sm:$0xf] %v294_v29  ;;  %v296_v30 = vld [vmem:[%s1469_s14 + $0x1e0] sm:$0xf]  ;;  %v298_v31 = vld [vmem:[%s1469_s14 + $0x1f0] sm:$0xf] }
  0x2a   : > { %v300_v32 = vld [vmem:[%s1469_s14 + $0x200] sm:$0xf]  ;;  %297 = vst [vmem:[%s1474_s15 + $0x78] sm:$0xf] %v296_v30  ;;  %299 = vst [vmem:[%s1474_s15 + $0x7c] sm:$0xf] %v298_v31 }
  0x2b   : > { %301 = vst [vmem:[%s1474_s15 + $0x80] sm:$0xf] %v300_v32  ;;  %v302_v33 = vld [vmem:[%s1469_s14 + $0x210] sm:$0xf]  ;;  %v304_v34 = vld [vmem:[%s1469_s14 + $0x220] sm:$0xf] }
  0x2c   : > { %v306_v35 = vld [vmem:[%s1469_s14 + $0x230] sm:$0xf]  ;;  %303 = vst [vmem:[%s1474_s15 + $0x84] sm:$0xf] %v302_v33  ;;  %305 = vst [vmem:[%s1474_s15 + $0x88] sm:$0xf] %v304_v34 }
  0x2d   : > { %307 = vst [vmem:[%s1474_s15 + $0x8c] sm:$0xf] %v306_v35  ;;  %v308_v36 = vld [vmem:[%s1469_s14 + $0x240] sm:$0xf]  ;;  %v310_v37 = vld [vmem:[%s1469_s14 + $0x250] sm:$0xf] }
  0x2e   : > { %v312_v38 = vld [vmem:[%s1469_s14 + $0x260] sm:$0xf]  ;;  %309 = vst [vmem:[%s1474_s15 + $0x90] sm:$0xf] %v308_v36  ;;  %311 = vst [vmem:[%s1474_s15 + $0x94] sm:$0xf] %v310_v37 }
  0x2f   : > { %313 = vst [vmem:[%s1474_s15 + $0x98] sm:$0xf] %v312_v38  ;;  %v314_v39 = vld [vmem:[%s1469_s14 + $0x270] sm:$0xf]  ;;  %v316_v40 = vld [vmem:[%s1469_s14 + $0x280] sm:$0xf] }
  0x30   : > { %v318_v41 = vld [vmem:[%s1469_s14 + $0x290] sm:$0xf]  ;;  %315 = vst [vmem:[%s1474_s15 + $0x9c] sm:$0xf] %v314_v39  ;;  %317 = vst [vmem:[%s1474_s15 + $0xa0] sm:$0xf] %v316_v40 }
  0x31   : > { %319 = vst [vmem:[%s1474_s15 + $0xa4] sm:$0xf] %v318_v41  ;;  %v320_v42 = vld [vmem:[%s1469_s14 + $0x2a0] sm:$0xf]  ;;  %v322_v43 = vld [vmem:[%s1469_s14 + $0x2b0] sm:$0xf] }
  0x32   : > { %v324_v44 = vld [vmem:[%s1469_s14 + $0x2c0] sm:$0xf]  ;;  %321 = vst [vmem:[%s1474_s15 + $0xa8] sm:$0xf] %v320_v42  ;;  %323 = vst [vmem:[%s1474_s15 + $0xac] sm:$0xf] %v322_v43 }
  0x33   : > { %325 = vst [vmem:[%s1474_s15 + $0xb0] sm:$0xf] %v324_v44  ;;  %v326_v45 = vld [vmem:[%s1469_s14 + $0x2d0] sm:$0xf]  ;;  %v328_v46 = vld [vmem:[%s1469_s14 + $0x2e0] sm:$0xf] }
  0x34   : > { %v330_v47 = vld [vmem:[%s1469_s14 + $0x2f0] sm:$0xf]  ;;  %327 = vst [vmem:[%s1474_s15 + $0xb4] sm:$0xf] %v326_v45  ;;  %329 = vst [vmem:[%s1474_s15 + $0xb8] sm:$0xf] %v328_v46 }
  0x35   : > { %331 = vst [vmem:[%s1474_s15 + $0xbc] sm:$0xf] %v330_v47  ;;  %v332_v48 = vld [vmem:[%s1469_s14 + $0x300] sm:$0xf]  ;;  %v334_v49 = vld [vmem:[%s1469_s14 + $0x310] sm:$0xf] }
  0x36   : > { %v336_v50 = vld [vmem:[%s1469_s14 + $0x320] sm:$0xf]  ;;  %333 = vst [vmem:[%s1474_s15 + $0xc0] sm:$0xf] %v332_v48  ;;  %335 = vst [vmem:[%s1474_s15 + $0xc4] sm:$0xf] %v334_v49 }
  0x37   : > { %337 = vst [vmem:[%s1474_s15 + $0xc8] sm:$0xf] %v336_v50  ;;  %v338_v51 = vld [vmem:[%s1469_s14 + $0x330] sm:$0xf]  ;;  %v340_v52 = vld [vmem:[%s1469_s14 + $0x340] sm:$0xf] }
  0x38   : > { %v342_v53 = vld [vmem:[%s1469_s14 + $0x350] sm:$0xf]  ;;  %339 = vst [vmem:[%s1474_s15 + $0xcc] sm:$0xf] %v338_v51  ;;  %341 = vst [vmem:[%s1474_s15 + $0xd0] sm:$0xf] %v340_v52 }
  0x39   : > { %343 = vst [vmem:[%s1474_s15 + $0xd4] sm:$0xf] %v342_v53  ;;  %v344_v54 = vld [vmem:[%s1469_s14 + $0x360] sm:$0xf]  ;;  %v346_v55 = vld [vmem:[%s1469_s14 + $0x370] sm:$0xf] }
  0x3a   : > { %v348_v56 = vld [vmem:[%s1469_s14 + $0x380] sm:$0xf]  ;;  %345 = vst [vmem:[%s1474_s15 + $0xd8] sm:$0xf] %v344_v54  ;;  %347 = vst [vmem:[%s1474_s15 + $0xdc] sm:$0xf] %v346_v55 }
  0x3b   : > { %349 = vst [vmem:[%s1474_s15 + $0xe0] sm:$0xf] %v348_v56  ;;  %v350_v57 = vld [vmem:[%s1469_s14 + $0x390] sm:$0xf]  ;;  %v352_v58 = vld [vmem:[%s1469_s14 + $0x3a0] sm:$0xf] }
  0x3c   : > { %v354_v59 = vld [vmem:[%s1469_s14 + $0x3b0] sm:$0xf]  ;;  %351 = vst [vmem:[%s1474_s15 + $0xe4] sm:$0xf] %v350_v57  ;;  %353 = vst [vmem:[%s1474_s15 + $0xe8] sm:$0xf] %v352_v58 }
  0x3d   : > { %355 = vst [vmem:[%s1474_s15 + $0xec] sm:$0xf] %v354_v59  ;;  %v356_v60 = vld [vmem:[%s1469_s14 + $0x3c0] sm:$0xf]  ;;  %v358_v61 = vld [vmem:[%s1469_s14 + $0x3d0] sm:$0xf] }
  0x3e   : > { %v360_v62 = vld [vmem:[%s1469_s14 + $0x3e0] sm:$0xf]  ;;  %357 = vst [vmem:[%s1474_s15 + $0xf0] sm:$0xf] %v356_v60  ;;  %359 = vst [vmem:[%s1474_s15 + $0xf4] sm:$0xf] %v358_v61 }
  0x3f   : > { %361 = vst [vmem:[%s1474_s15 + $0xf8] sm:$0xf] %v360_v62  ;;  %v362_v63 = vld [vmem:[%s1469_s14 + $0x3f0] sm:$0xf] }
  0x40   : > { %363 = vst [vmem:[%s1474_s15 + $0xfc] sm:$0xf] %v362_v63 }
  0x41 PF: > { %p1141_p7 = scmp.ge.s32.totalorder %s1375_s24, 1  ;;  %p533_p8 = scmp.lt.s32.totalorder %s1375_s24, 37 }
  0x43   : > { %p534_p9 = pnand %p1141_p7, %p533_p8 }
  0x44   : > { %s540_s16 = sand.u32 (!%p534_p9), 1, %s1351_s18   ;;  %s1143_s17 = sshll.u32 (!%p534_p9), %s1359_s20, 2 }
  0x45   : > { %537 = sbr.rel (%p534_p9) target bundleno = 375 (0x177), region = 77  ;;  %s1142_s27 = sshll.u32 (!%p534_p9), %s540_s16, 8 }
  0x46   : > { %p581_p10 = scmp.lt.s32.totalorder (!%p534_p9), %s1143_s17, 35  ;;  %p586_p11 = scmp.lt.s32.totalorder (!%p534_p9), %s1363_s21, 3 }
  0x47   : > { %s1634_s30 = scalar_lea.vmem (!%p534_p9), [#allocation3], %s1142_s27  ;;  %p1146_p12 = scmp.ne.s32.totalorder (!%p534_p9), %s1359_s20, 0 }
  0x4a   : > { %s1728_s17 = smov (!%p581_p10, %s1143_s17), 35  ;;  %s1730_s21 = smov (!%p586_p11, %s1363_s21), 3 }
  0x4b   : > { %s588_s18 = scalar_lea.vmem %s1710_s2, %s1730_s21  ;;  %s591_s11 = scalar_lea.vmem %s1711_s3, %s1730_s21 }
  0x4c   : > { %s1144_s12 = sshll.u32 %s1730_s21, 1  ;;  %604 = sbr.rel (%p1146_p12) target bundleno = 83 (0x53), region = 85 }
  0x4d   : > { %s1627_s15 = scalar_lea.vmem %s1712_s4, %s1144_s12  ;;  %s1632_s29 = scalar_lea.vmem %s1713_s5, %s1144_s12 }
  0x51   : > { %v1377_v0 = vmov 0.0  }
  0x52   : > { %605 = vst [vmem:[#allocation2] sm:$0x3] %v1377_v0 }
  0x53 PF: > { %v1287_v1 = vld [vmem:[%s1634_s30 + $0x78] sm:$0xff]   ;;  %v1291_v5 = vld [vmem:[%s1634_s30 + $0x70] sm:$0xff]   ;;  %v1295_v9 = vld [vmem:[%s1634_s30 + $0x68] sm:$0xff]   ;;  %v684_v31 = vlaneseq  ;;  %s1714_s8 = scalar_lea.vmem %s1708_s0, %s1728_s17  ;;  %v1378_v35 = vmov 1966171168   ;;  %p1180_p13 = scmp.ne.s32.totalorder %s1359_s20, 8 }
  0x54   : > { %v1288_v2 = vld [vmem:[%s1634_s30 + $0xf8] sm:$0xff]   ;;  %1185 = vmatprep.subr.bf16.mxu0 %v1287_v1  ;;  %v1292_v6 = vld [vmem:[%s1634_s30 + $0xf0] sm:$0xff]   ;;  %v1296_v10 = vld [vmem:[%s1634_s30 + $0xe8] sm:$0xff]   ;;  %v682_v36 = vunpack.c.l.s4 %v1378_v35 }
  0x55   : > { %v1289_v3 = vld [vmem:[%s1634_s30 + $0x38] sm:$0xff]   ;;  %1207 = vmatprep.subr.bf16.mxu1 %v1288_v2  ;;  %v1293_v7 = vld [vmem:[%s1634_s30 + $0x30] sm:$0xff]   ;;  %v1297_v11 = vld [vmem:[%s1634_s30 + $0x28] sm:$0xff]   ;;  %v685_v37 = vshrl.u32 %v684_v31, 7 }
  0x56   : > { %v1290_v4 = vld [vmem:[%s1634_s30 + $0xb8] sm:$0xff]   ;;  %1186 = vmatpush3.bf16.msra.mxu0 %v1289_v3  ;;  %v1294_v8 = vld [vmem:[%s1634_s30 + $0xb0] sm:$0xff]   ;;  %v1298_v12 = vld [vmem:[%s1634_s30 + $0xa8] sm:$0xff]   ;;  %v683_v39 = vunpack.c.0.s8 %v682_v36 }
  0x57   : > { %1208 = vmatpush3.bf16.msra.mxu1 %v1290_v4  ;;  %1187 = vmatprep.subr.bf16.mxu0 %v1291_v5  ;;  %v1299_v13 = vld [vmem:[%s1634_s30 + $0x60] sm:$0xff]   ;;  %v1303_v17 = vld [vmem:[%s1634_s30 + $0x58] sm:$0xff]   ;;  %v1307_v21 = vld [vmem:[%s1634_s30 + $0x50] sm:$0xff]  }
  0x58   : > { %1209 = vmatprep.subr.bf16.mxu1 %v1292_v6  ;;  %v1300_v14 = vld [vmem:[%s1634_s30 + $0xe0] sm:$0xff]   ;;  %v1304_v18 = vld [vmem:[%s1634_s30 + $0xd8] sm:$0xff]   ;;  %v1308_v22 = vld [vmem:[%s1634_s30 + $0xd0] sm:$0xff]   ;;  %v686_v40 = vsub.s32 %v683_v39, %v685_v37 }
  0x59   : > { %v1301_v15 = vld [vmem:[%s1634_s30 + $0x20] sm:$0xff]   ;;  %v1305_v19 = vld [vmem:[%s1634_s30 + $0x18] sm:$0xff]   ;;  %v1309_v23 = vld [vmem:[%s1634_s30 + $0x10] sm:$0xff]  }
  0x5a   : > { %1188 = vmatpush3.bf16.msra.mxu0 %v1293_v7  ;;  %v1302_v16 = vld [vmem:[%s1634_s30 + $0xa0] sm:$0xff]   ;;  %v1306_v20 = vld [vmem:[%s1634_s30 + $0x98] sm:$0xff]   ;;  %v1310_v24 = vld [vmem:[%s1634_s30 + $0x90] sm:$0xff]  }
  0x5b   : > { %1210 = vmatpush3.bf16.msra.mxu1 %v1294_v8  ;;  %1189 = vmatprep.subr.bf16.mxu0 %v1295_v9  ;;  %v1311_v25 = vld [vmem:[%s1634_s30 + $0x48] sm:$0xff]   ;;  %v1315_v29 = vld [vmem:[%s1634_s30 + $0x40] sm:$0xff]   ;;  %v606_v52 = vld [vmem:[#allocation2] sm:$0x3] }
  0x5c   : > { %1211 = vmatprep.subr.bf16.mxu1 %v1296_v10  ;;  %v1312_v26 = vld [vmem:[%s1634_s30 + $0xc8] sm:$0xff]   ;;  %v1316_v30 = vld [vmem:[%s1634_s30 + $0xc0] sm:$0xff]  }
  0x5d   : > { %v1313_v27 = vld [vmem:[%s1634_s30 + $0x8] sm:$0xff]   ;;  %v1317_v32 = vld [vmem:[%s1634_s30] sm:$0xff]  }
  0x5e   : > { %1190 = vmatpush3.bf16.msra.mxu0 %v1297_v11  ;;  %v1314_v28 = vld [vmem:[%s1634_s30 + $0x88] sm:$0xff]   ;;  %v1318_v33 = vld [vmem:[%s1634_s30 + $0x80] sm:$0xff]  }
  0x5f   : > { %1212 = vmatpush3.bf16.msra.mxu1 %v1298_v12  ;;  %1191 = vmatprep.subr.bf16.mxu0 %v1299_v13  ;;  %v1147_v34 = vld.sshfl [vmem:[%s1714_s8] sm:$0x33 pattern:$0x75316420] }
  0x60   : > { %1213 = vmatprep.subr.bf16.mxu1 %v1300_v14  ;;  %v680_v38 = vcombine.high %v1147_v34, %v1147_v34  ;;  %v687_v42 = vrot.slane %v1147_v34, %v686_v40 }
  0x62   : > { %1192 = vmatpush3.bf16.msra.mxu0 %v1301_v15  ;;  %v694_v41 = vrot.slane %v680_v38, %v686_v40  ;;  %v695_v44 = vcombine.high %v687_v42, %v687_v42 }
  0x63   : > { %1214 = vmatpush3.bf16.msra.mxu1 %v1302_v16  ;;  %1193 = vmatprep.subr.bf16.mxu0 %v1303_v17 }
  0x64   : > { %1215 = vmatprep.subr.bf16.mxu1 %v1304_v18  ;;  %925 = vmatprep.mubr.bf16.mxu0 %v694_v41  ;;  %v696_v43 = vcombine.high %v694_v41, %v694_v41 }
  0x66   : > { %1194 = vmatpush3.bf16.msra.mxu0 %v1305_v19  ;;  %965 = vmatprep.mubr.bf16.mxu1 %v696_v43 }
  0x67   : > { %1216 = vmatpush3.bf16.msra.mxu1 %v1306_v20  ;;  %1195 = vmatprep.subr.bf16.mxu0 %v1307_v21 }
  0x68   : > { %1217 = vmatprep.subr.bf16.mxu1 %v1308_v22 }
  0x6a   : > { %1196 = vmatpush3.bf16.msra.mxu0 %v1309_v23 }
  0x6b   : > { %1218 = vmatpush3.bf16.msra.mxu1 %v1310_v24  ;;  %1197 = vmatprep.subr.bf16.mxu0 %v1311_v25 }
  0x6c   : > { %1219 = vmatprep.subr.bf16.mxu1 %v1312_v26 }
  0x6e   : > { %1198 = vmatpush3.bf16.msra.mxu0 %v1313_v27 }
  0x6f   : > { %1220 = vmatpush3.bf16.msra.mxu1 %v1314_v28  ;;  %1199 = vmatprep.subr.bf16.mxu0 %v1315_v29 }
  0x70   : > { %1221 = vmatprep.subr.bf16.mxu1 %v1316_v30 }
  0x72   : > { %1200 = vmatpush3.bf16.msra.mxu0 %v1317_v32 }
  0x73   : > { %1222 = vmatpush3.bf16.msra.mxu1 %v1318_v33 }
  0x75   : > { %926 = vmatmul.mubr.bf16.vlgmr.msra.gmra.mxu0 %v687_v42 }
  0x76   : > { %966 = vmatmul.mubr.bf16.vlgmr.msra.gmra.mxu1 %v695_v44 }
 0x135   : > { %v1201_v45 = vpop.f32.mrf.mxu0 }
 0x136   : > { %v1223_v46 = vpop.f32.mrf.mxu1 }
 0x137   : > { %v1202_v47 = vpop.f32.mrf.mxu0 }
 0x138   : > { %v1203_v48 = vadd.f32 %v1202_v47, %v1201_v45  ;;  %v1224_v49 = vpop.f32.mrf.mxu1 }
 0x139   : > { %v1204_v50 = vpop.f32.mrf.mxu0  ;;  %v1225_v51 = vadd.f32 %v1224_v49, %v1223_v46 }
 0x13a   : > { %v1226_v53 = vpop.f32.mrf.mxu1 }
 0x13b   : > { %v1205_v54 = vpop.f32.mrf.mxu0  ;;  %v968_v55 = vadd.f32 %v1225_v51, %v1203_v48  ;;  %978 = sbr.rel (%p1180_p13) target bundleno = 375 (0x177), region = 89 }
 0x13c   : > { %v1227_v56 = vpop.f32.mrf.mxu1 }
 0x13d   : > { %v973_v57 = vadd.f32 %v968_v55, %v606_v52 }
 0x13f   : > { %974 = vst [vmem:[#allocation2] sm:$0x3] %v973_v57 }
 0x140   : > { %vm980_vm0 = vcmask 1041408   ;;  %v1002_v15 = vld [vmem:[%s588_s18] sm:$0x1]  ;;  %v1007_v16 = vsub.s32 0, %v685_v37 }
 0x141   : > { %v1181_v21 = vld [vmem:[%s591_s11] ss:$0 sm:$0xff] }
 0x142   : > { %v1018_v23 = vld [vmem:[%s1627_s15] sm:$0x3] }
 0x146   : > { %v979_v58 = vld [vmem:[#allocation2] sm:$0x3] }
 0x147   : > { %v981_v59 = vsel %vm980_vm0, %v979_v58, 0.0  ;;  %v988_v60 = vmul.f32 %v979_v58, %v979_v58 }
 0x148   : > { %v982_v61 = vrot.slane %v981_v59, 4 }
 0x149   : > { %v989_v62 = vsel %vm980_vm0, %v988_v60, 0.0 }
 0x14a   : > { %v983_v63 = vadd.f32 %v982_v61, %v981_v59  ;;  %v990_v0 = vrot.slane %v989_v62, 4 }
 0x14c   : > { %v984_v1 = vrot.slane %v983_v63, 2  ;;  %v991_v2 = vadd.f32 %v990_v0, %v989_v62 }
 0x14e   : > { %v985_v3 = vadd.f32 %v984_v1, %v983_v63  ;;  %v992_v4 = vrot.slane %v991_v2, 2 }
 0x150   : > { %v986_v5 = vrot.slane %v985_v3, 1  ;;  %v993_v6 = vadd.f32 %v992_v4, %v991_v2 }
 0x152   : > { %v987_v7 = vadd.f32 %v986_v5, %v985_v3  ;;  %v994_v8 = vrot.slane %v993_v6, 1 }
 0x154   : > { %v995_v9 = vadd.f32 %v994_v8, %v993_v6  ;;  %v996_v10 = vmul.f32 0.5, %v987_v7 }
 0x156   : > { %v997_v11 = vmul.f32 0.5, %v995_v9  ;;  %v998_v12 = vmul.f32 %v996_v10, %v996_v10  ;;  %v1004_v19 = vsub.f32 %v979_v58, %v996_v10 }
 0x158   : > { %v999_v13 = vsub.f32 %v997_v11, %v998_v12 }
 0x15a   : > { %v1000_v14 = vadd.f32 1e-05, %v999_v13 }
 0x15c   : > { %1319 = vrsqrt.f32 %v1000_v14 }
 0x169   : > { %v1320_v17 = vpop.eup %1319 }
 0x16a   : > { %v1003_v18 = vmul.f32 %v1320_v17, %v1002_v15 }
 0x16c   : > { %v1008_v20 = vrot.slane %v1003_v18, %v1007_v16 }
 0x16e   : > { %v1009_v22 = vmul.f32 %v1008_v20, %v1004_v19 }
 0x170   : > { %v1017_v24 = vadd.f32 %v1181_v21, %v1009_v22 }
 0x172   : > { %v1019_v25 = vadd.f32 %v1018_v23, %v1017_v24 }
 0x174   : > { %v1020_v26 = vmax.f32 %v1019_v25, 0.0 }
 0x176   : > { %1021 = vst [vmem:[%s1632_s29] sm:$0x3] %v1020_v26 }
 0x177 PF: > { %s15_s24 = sadd.s32 1, %s1375_s24   ;;  %s1715_s18 = smov %s1355_s19 }
 0x178   : > { %p12_p0 = scmp.ge.s32.totalorder %s15_s24, 38   ;;  %s1716_s19 = smov %s1460_s6 }
 0x179   : > { %s1717_s20 = smov %s1367_s22  ;;  %s1718_s21 = smov %s1371_s23 }
 0x17a   : > { %s1719_s22 = smov %s1722_s25  ;;  %s1720_s23 = smov %s1726_s26 }
 0x17b   :  { %14 = sbr.rel (!%p12_p0) target bundleno = 4 (0x4), region = 136 }

</bundles_post_ra>
